<compile_context>
chip_gen: v5e
topology: v5e:2x2
jax: 0.10.0
libtpu: 0.0.40
codegen_flags: <defaults>
</compile_context>

<pallas_src>
import jax
import jax.numpy as jnp
from jax import lax
from jax.experimental import pallas as pl
from jax.experimental.pallas import tpu as pltpu


# ------------------------------ small helpers ------------------------------ #

def _round_up(x, m):
    return (x + m - 1) // m * m


def _pick_tile(size, candidates):
    for c in candidates:
        if size % c == 0:
            return c
    return candidates[-1]


def _choose_cin_pad(cin, taps):
    """Pad Cin (lane dim) so K = taps*cin_pad admits a large tk that divides it."""
    best_key, best_cp = None, None
    for mult in (128, 256, 512, 1024):
        cp = _round_up(cin, mult)
        kp = taps * cp
        tk = _pick_tile(kp, (1024, 512, 256, 128))
        key = (kp // tk, kp)          # (k-grid steps, wasted K bytes)
        if best_key is None or key < best_key:
            best_key, best_cp = key, cp
    return best_cp


# --------------------------- static architecture --------------------------- #

ARCH = {
    "w1":  dict(cout=832, cin=1024, k=(1, 3, 3), st=1, pad=(1, 1)),
    "w2":  dict(cout=480, cin=832,  k=(3, 3, 3), st=3, pad=(1, 1)),
    "w3":  dict(cout=192, cin=480,  k=(5, 3, 3), st=5, pad=(1, 1)),
    "w4a": dict(cout=64,  cin=192,  k=(5, 3, 3), st=5, pad=(1, 1)),
    "w4b": dict(cout=32,  cin=64,   k=(2, 3, 3), st=2, pad=(1, 1)),
}
CONV_ORDER = ["w1", "w2", "w3", "w4a", "w4b"]
HEAD_C = dict(cout=32, cin=32, k=(2, 1, 1), st=2, pad=(0, 0))   # w4c (w4d is 1x1x1)


def _taps(k):
    return k[0] * k[1] * k[2]


CIN_PAD = {n: _choose_cin_pad(cfg["cin"], _taps(cfg["k"])) for n, cfg in ARCH.items()}
HEAD_CIN_PAD = _choose_cin_pad(HEAD_C["cin"], _taps(HEAD_C["k"]))        # 128
HEAD_OUT_PAD = 128
COUT_PAD = {"w1": CIN_PAD["w2"], "w2": CIN_PAD["w3"], "w3": CIN_PAD["w4a"],
            "w4a": CIN_PAD["w4b"], "w4b": HEAD_CIN_PAD}


# ------------------------------ Pallas kernels ------------------------------ #

def _matmul_relu_kernel(a_ref, b_ref, o_ref, acc_ref):
    """bf16 x bf16 matmul, f32 accumulation over the K grid axis, ReLU, bf16 store.

    The f32 VMEM scratch is kept (instead of accumulating in o_ref) because the
    output is stored as bf16; accumulation must stay f32.
    """
    k = pl.program_id(2)

    @pl.when(k == 0)
    def _():
        acc_ref[...] = jnp.zeros_like(acc_ref)

    acc_ref[...] += jnp.dot(a_ref[...], b_ref[...],
                            preferred_element_type=jnp.float32)

    @pl.when(k == pl.num_programs(2) - 1)
    def _():
        o_ref[...] = jnp.maximum(acc_ref[...], 0.0).astype(o_ref.dtype)


def matmul_relu(a, b):
    """relu((M,K) @ (K,N)) with bf16 MXU inputs.  K and N are pre-padded to 128."""
    m, k = a.shape
    k2, n = b.shape
    assert k == k2 and k % 128 == 0 and n % 128 == 0
    m_pad = _round_up(m, 16)
    tm = _pick_tile(m_pad, (256, 128, 64, 32, 16))
    tn = _pick_tile(n, (256, 128))
    tk = _pick_tile(k, (1024, 512, 256, 128))
    # Keep at least one parallel grid axis with extent >= 2 when possible (v7x megacore).
    if m_pad // tm < 2 and n // tn < 2 and tm >= 32:
        tm //= 2
    if m_pad != m:
        a = jnp.pad(a, ((0, m_pad - m), (0, 0)))

    flops = 2 * m_pad * k * n
    bytes_accessed = 2 * (m_pad * k * (n // tn) + k * n * (m_pad // tm) + m_pad * n)
    out = pl.pallas_call(
        _matmul_relu_kernel,
        out_shape=jax.ShapeDtypeStruct((m_pad, n), jnp.bfloat16),
        grid_spec=pltpu.PrefetchScalarGridSpec(
            num_scalar_prefetch=0,
            grid=(m_pad // tm, n // tn, k // tk),
            in_specs=[
                pl.BlockSpec((tm, tk), lambda i, j, kk: (i, kk)),
                pl.BlockSpec((tk, tn), lambda i, j, kk: (kk, j)),
            ],
            out_specs=pl.BlockSpec((tm, tn), lambda i, j, kk: (i, j)),
            scratch_shapes=[pltpu.VMEM((tm, tn), jnp.float32)],
        ),
        compiler_params=pltpu.CompilerParams(
            dimension_semantics=("parallel", "parallel", "arbitrary")),
        cost_estimate=pl.CostEstimate(flops=flops, transcendentals=0,
                                      bytes_accessed=bytes_accessed),
    )(a.astype(jnp.bfloat16), b)
    return out if m_pad == m else out[:m]


def _head_kernel(a_ref, wc_ref, wd_ref, bias_ref, o_ref):
    """Fused conv4c (K fits one block) + ReLU + conv4d (32->1, lane-padded) + bias + sigmoid."""
    h = jnp.dot(a_ref[...], wc_ref[...], preferred_element_type=jnp.float32)
    h = jnp.maximum(h, 0.0).astype(jnp.bfloat16)
    r = jnp.dot(h, wd_ref[...], preferred_element_type=jnp.float32) + bias_ref[...]
    o_ref[...] = jax.nn.sigmoid(r)


def head_matmul(a, wc, wd, bias_row):
    m, k = a.shape
    n = wd.shape[1]
    m_pad = _round_up(m, 16)
    tm = _pick_tile(m_pad, (256, 128, 64, 32, 16))
    if m_pad != m:
        a = jnp.pad(a, ((0, m_pad - m), (0, 0)))
    out = pl.pallas_call(
        _head_kernel,
        out_shape=jax.ShapeDtypeStruct((m_pad, n), jnp.float32),
        grid_spec=pltpu.PrefetchScalarGridSpec(
            num_scalar_prefetch=0,
            grid=(m_pad // tm,),
            in_specs=[
                pl.BlockSpec((tm, k), lambda i: (i, 0)),
                pl.BlockSpec(wc.shape, lambda i: (0, 0)),
                pl.BlockSpec(wd.shape, lambda i: (0, 0)),
                pl.BlockSpec((1, n), lambda i: (0, 0)),
            ],
            out_specs=pl.BlockSpec((tm, n), lambda i: (i, 0)),
        ),
        compiler_params=pltpu.CompilerParams(dimension_semantics=("parallel",)),
        cost_estimate=pl.CostEstimate(
            flops=2 * m_pad * k * n + 2 * m_pad * n * n,
            transcendentals=m_pad * n,
            bytes_accessed=2 * m_pad * k + 2 * (k * n + n * n) + 4 * m_pad * n),
    )(a.astype(jnp.bfloat16), wc, wd, bias_row)
    return out[:m, 0]


# ------------------------------ JAX glue (bf16) ----------------------------- #

def to_channels_last(x, c_pad):
    """NCDHW f32 -> NTHWC bf16, channels zero-padded to the lane-aligned width."""
    x = jnp.transpose(x, (0, 2, 3, 4, 1)).astype(jnp.bfloat16)
    c = x.shape[-1]
    if c_pad > c:
        x = jnp.pad(x, ((0, 0),) * 4 + ((0, c_pad - c),))
    return x


def im2col_channels_last(x, kt, kh, kw, stride_t, ph, pw):
    """x: (N, T, H, W, C) -> A: (N*T_out*H_out*W_out, kt*kh*kw*C) with C on the lane dim."""
    n, t, h, w, c = x.shape
    xp = jnp.pad(x, ((0, 0), (0, 0), (ph, ph), (pw, pw), (0, 0)))
    t_out = (t - kt) // stride_t + 1
    h_out = h + 2 * ph - kh + 1
    w_out = w + 2 * pw - kw + 1
    cols = []
    for dt in range(kt):
        t_stop = dt + (t_out - 1) * stride_t + 1
        for dh in range(kh):
            for dw in range(kw):
                cols.append(xp[:, dt:t_stop:stride_t,
                               dh:dh + h_out, dw:dw + w_out, :])
    patches = jnp.stack(cols, axis=4)            # (N, T_out, H_out, W_out, taps, C)
    a = patches.reshape(n * t_out * h_out * w_out, kt * kh * kw * c)
    return a, (n, t_out, h_out, w_out)


def conv3d_relu(x, w_mat, name):
    cfg = ARCH[name]
    kt, kh, kw = cfg["k"]
    ph, pw = cfg["pad"]
    assert x.shape[-1] == CIN_PAD[name]
    a, (n, t_out, h_out, w_out) = im2col_channels_last(x, kt, kh, kw, cfg["st"], ph, pw)
    out = matmul_relu(a, w_mat)                  # (M, cout_pad) bf16
    return out.reshape(n, t_out, h_out, w_out, COUT_PAD[name])


def upsample_1_2_2(x):
    """nn.Upsample(scale_factor=(1,2,2), mode='trilinear', align_corners=False) on NTHWC."""
    def up1d(v, axis):
        nsz = v.shape[axis]
        first = lax.slice_in_dim(v, 0, 1, axis=axis)
        last = lax.slice_in_dim(v, nsz - 1, nsz, axis=axis)
        left = jnp.concatenate(
            [first, lax.slice_in_dim(v, 0, nsz - 1, axis=axis)], axis=axis)
        right = jnp.concatenate(
            [lax.slice_in_dim(v, 1, nsz, axis=axis), last], axis=axis)
        even = 0.25 * left + 0.75 * v      # out[2i]   from coord i - 0.25 (clamped)
        odd = 0.75 * v + 0.25 * right      # out[2i+1] from coord i + 0.25 (clamped)
        stacked = jnp.stack([even, odd], axis=axis + 1)
        shp = list(v.shape)
        shp[axis] = 2 * nsz
        return stacked.reshape(shp)
    return up1d(up1d(x, 2), 3)                   # H then W (T scale = 1 -> identity)


# ------------------------------- parameters -------------------------------- #

def init_params(key):
    def conv_w(k, cout, cin, kt, kh, kw):
        fan_in = cin * kt * kh * kw
        return jax.random.normal(k, (cout, cin, kt, kh, kw),
                                 jnp.float32) * jnp.sqrt(2.0 / fan_in)

    ks = jax.random.split(key, 8)
    return {
        "w1":  conv_w(ks[0], 832, 1024, 1, 3, 3),
        "w2":  conv_w(ks[1], 480, 832, 3, 3, 3),
        "w3":  conv_w(ks[2], 192, 480, 5, 3, 3),
        "w4a": conv_w(ks[3], 64, 192, 5, 3, 3),
        "w4b": conv_w(ks[4], 32, 64, 2, 3, 3),
        "w4c": conv_w(ks[5], 32, 32, 2, 1, 1),
        "w4d": conv_w(ks[6], 1, 32, 1, 1, 1),
        "b4d": jax.random.normal(ks[7], (1,), jnp.float32) * 0.01,
    }


def _layout_conv_weight(w, cin_pad, cout_pad, dtype=jnp.bfloat16):
    """(Cout, Cin, kt, kh, kw) -> (kt*kh*kw*cin_pad, cout_pad), taps-major / Cin-minor rows."""
    cout, cin, kt, kh, kw = w.shape
    wt = jnp.transpose(w, (2, 3, 4, 1, 0))       # (kt, kh, kw, Cin, Cout)
    wt = jnp.pad(wt, ((0, 0), (0, 0), (0, 0),
                      (0, cin_pad - cin), (0, cout_pad - cout)))
    return wt.reshape(kt * kh * kw * cin_pad, cout_pad).astype(dtype)


def prepare_params(raw):
    """Hoist weight re-layout / padding / bf16 cast out of the per-forward path."""
    mats = {n: _layout_conv_weight(raw[n], CIN_PAD[n], COUT_PAD[n]) for n in CONV_ORDER}
    mats["w4c"] = _layout_conv_weight(raw["w4c"], HEAD_CIN_PAD, HEAD_OUT_PAD)
    mats["w4d"] = _layout_conv_weight(raw["w4d"], HEAD_OUT_PAD, HEAD_OUT_PAD)
    b = raw["b4d"].astype(jnp.float32)
    mats["b4d"] = jnp.pad(b, (0, HEAD_OUT_PAD - b.shape[0])).reshape(1, HEAD_OUT_PAD)
    return mats


# ------------------------------ DecoderConvUp ------------------------------ #

def _head(z, mats):
    # z: (N, T, H, W, 128) bf16 after conv4b + upsample.
    kt, kh, kw = HEAD_C["k"]
    a, (n, t_out, h_out, w_out) = im2col_channels_last(z, kt, kh, kw, HEAD_C["st"], 0, 0)
    col = head_matmul(a, mats["w4c"], mats["w4d"], mats["b4d"])
    assert t_out == 1          # required for PyTorch's final .view(N, H, W)
    return col.reshape(n, h_out, w_out)


def decoder_conv_up(mats, y0, y1, y2, y3):
    y0c = to_channels_last(y0, CIN_PAD["w1"])
    y1c = to_channels_last(y1, CIN_PAD["w2"])
    y2c = to_channels_last(y2, CIN_PAD["w3"])
    y3c = to_channels_last(y3, CIN_PAD["w4a"])

    # convtsp1
    z = conv3d_relu(y0c, mats["w1"], "w1")
    z = upsample_1_2_2(z)
    z = jnp.concatenate([z, y1c], axis=1)
    # convtsp2
    z = conv3d_relu(z, mats["w2"], "w2")
    z = upsample_1_2_2(z)
    z = jnp.concatenate([z, y2c], axis=1)
    # convtsp3
    z = conv3d_relu(z, mats["w3"], "w3")
    z = upsample_1_2_2(z)
    z = jnp.concatenate([z, y3c], axis=1)
    # convtsp4
    z = conv3d_relu(z, mats["w4a"], "w4a")
    z = upsample_1_2_2(z)
    z = conv3d_relu(z, mats["w4b"], "w4b")
    z = upsample_1_2_2(z)
    return _head(z, mats)      # fused conv4c + ReLU + conv4d + bias + sigmoid


if __name__ == "__main__":
    key = jax.random.PRNGKey(0)
    kp, k0, k1, k2, k3 = jax.random.split(key, 5)
    raw = init_params(kp)
    mats = jax.tree.map(jnp.asarray, prepare_params(raw))   # done once, outside the forward

    # Small shapes consistent with the decoder's channel / temporal / spatial contract
    # (channels fixed by the architecture; the T chain ends at T=1 for the final view):
    N = 1
    y0 = jax.random.normal(k0, (N, 1024, 4, 2, 2), jnp.float32)
    y1 = jax.random.normal(k1, (N, 832, 8, 4, 4), jnp.float32)
    y2 = jax.random.normal(k2, (N, 480, 16, 8, 8), jnp.float32)
    y3 = jax.random.normal(k3, (N, 192, 16, 16, 16), jnp.float32)

    fwd = jax.jit(decoder_conv_up)
    out = jax.block_until_ready(fwd(mats, y0, y1, y2, y3))

    assert out.shape == (N, 64, 64), out.shape
    assert bool(jnp.all(jnp.isfinite(out)))
    assert bool(jnp.all((out >= 0.0) & (out <= 1.0)))   # sigmoid output
    print("KERNEL_OK")
</pallas_src>

<mosaic_0001>
module attributes {stable_mosaic.version = 11 : i64} {
  func.func @_matmul_relu_kernel(%arg0: i32, %arg1: i32, %arg2: i32, %arg3: memref<16x1024xbf16, #tpu.memory_space<vmem>>, %arg4: memref<1024x256xbf16, #tpu.memory_space<vmem>>, %arg5: memref<16x256xbf16, #tpu.memory_space<vmem>>, %arg6: memref<16x256xf32, #tpu.memory_space<vmem>>) attributes {dimension_semantics = [#tpu.dimension_semantics<parallel>, #tpu.dimension_semantics<parallel>, #tpu.dimension_semantics<arbitrary>], iteration_bounds = array<i64: 1, 4, 9>, scalar_prefetch = 0 : i64, scratch_operands = 1 : i64, tpu.core_type = #tpu.core_type<tc>, window_params = [{transform_indices = @transform_0, window_bounds = array<i64: 16, 1024>}, {transform_indices = @transform_1, window_bounds = array<i64: 1024, 256>}, {transform_indices = @transform_2, window_bounds = array<i64: 16, 256>}]} {
    %c0_i32 = arith.constant 0 : i32
    %0 = arith.cmpi eq, %arg2, %c0_i32 : i32
    %1 = arith.extui %0 : i1 to i32
    %c0_i32_0 = arith.constant 0 : i32
    %2 = arith.cmpi ne, %1, %c0_i32_0 : i32
    scf.if %2 {
      %cst_9 = arith.constant 0.000000e+00 : f32
      %12 = vector.broadcast %cst_9 : f32 to vector<16x256xf32>
      %c0_10 = arith.constant 0 : index
      %c0_11 = arith.constant 0 : index
      %13 = vector.load %arg6[%c0_10, %c0_11] : memref<16x256xf32, #tpu.memory_space<vmem>>, vector<16x256xf32>
      tpu.vector_store %arg6[%c0_10, %c0_11], %12 {strides = array<i32>} : memref<16x256xf32, #tpu.memory_space<vmem>>, vector<16x256xf32>,
    } else {
    }
    %c0 = arith.constant 0 : index
    %c0_1 = arith.constant 0 : index
    %3 = vector.load %arg6[%c0, %c0_1] : memref<16x256xf32, #tpu.memory_space<vmem>>, vector<16x256xf32>
    %c0_2 = arith.constant 0 : index
    %c0_3 = arith.constant 0 : index
    %4 = vector.load %arg3[%c0_2, %c0_3] : memref<16x1024xbf16, #tpu.memory_space<vmem>>, vector<16x1024xbf16>
    %c0_4 = arith.constant 0 : index
    %c0_5 = arith.constant 0 : index
    %5 = vector.load %arg4[%c0_4, %c0_5] : memref<1024x256xbf16, #tpu.memory_space<vmem>>, vector<1024x256xbf16>
    %cst = arith.constant dense<0.000000e+00> : vector<16x256xf32>
    %6 = tpu.matmul %4, %5, %cst {dimension_numbers = #tpu.dot_dimension_numbers<[1], [0], [0], [1], [0, 0, 1, 1], [], []>} : vector<16x1024xbf16>, vector<1024x256xbf16>, vector<16x256xf32> -> vector<16x256xf32>
    %7 = arith.addf %3, %6 : vector<16x256xf32>
    %c0_6 = arith.constant 0 : index
    %c0_7 = arith.constant 0 : index
    %8 = vector.load %arg6[%c0_6, %c0_7] : memref<16x256xf32, #tpu.memory_space<vmem>>, vector<16x256xf32>
    tpu.vector_store %arg6[%c0_6, %c0_7], %7 {strides = array<i32>} : memref<16x256xf32, #tpu.memory_space<vmem>>, vector<16x256xf32>,
    %c8_i32 = arith.constant 8 : i32
    %9 = arith.cmpi eq, %arg2, %c8_i32 : i32
    %10 = arith.extui %9 : i1 to i32
    %c0_i32_8 = arith.constant 0 : i32
    %11 = arith.cmpi ne, %10, %c0_i32_8 : i32
    scf.if %11 {
      %c0_9 = arith.constant 0 : index
      %c0_10 = arith.constant 0 : index
      %12 = vector.load %arg6[%c0_9, %c0_10] : memref<16x256xf32, #tpu.memory_space<vmem>>, vector<16x256xf32>
      %cst_11 = arith.constant 0.000000e+00 : f32
      %13 = vector.broadcast %cst_11 : f32 to vector<16x256xf32>
      %14 = arith.maximumf %12, %13 : vector<16x256xf32>
      %15 = arith.truncf %14 : vector<16x256xf32> to vector<16x256xbf16>
      %c0_12 = arith.constant 0 : index
      %c0_13 = arith.constant 0 : index
      %16 = vector.load %arg5[%c0_12, %c0_13] : memref<16x256xbf16, #tpu.memory_space<vmem>>, vector<16x256xbf16>
      tpu.vector_store %arg5[%c0_12, %c0_13], %15 {strides = array<i32>} : memref<16x256xbf16, #tpu.memory_space<vmem>>, vector<16x256xbf16>,
    } else {
    }
    return
  }
  func.func @transform_0(%arg0: i32, %arg1: i32, %arg2: i32) -> (i32, i32) {
    %c0_i32 = arith.constant 0 : i32
    return %arg0, %arg2 : i32, i32
  }
  func.func @transform_1(%arg0: i32, %arg1: i32, %arg2: i32) -> (i32, i32) {
    %c0_i32 = arith.constant 0 : i32
    return %arg2, %arg1 : i32, i32
  }
  func.func @transform_2(%arg0: i32, %arg1: i32, %arg2: i32) -> (i32, i32) {
    %c0_i32 = arith.constant 0 : i32
    return %arg0, %arg1 : i32, i32
  }
}

module attributes {stable_mosaic.version = 11 : i64} {
  func.func @_matmul_relu_kernel(%arg0: i32, %arg1: i32, %arg2: i32, %arg3: memref<64x1024xbf16, #tpu.memory_space<vmem>>, %arg4: memref<1024x256xbf16, #tpu.memory_space<vmem>>, %arg5: memref<64x256xbf16, #tpu.memory_space<vmem>>, %arg6: memref<64x256xf32, #tpu.memory_space<vmem>>) attributes {dimension_semantics = [#tpu.dimension_semantics<parallel>, #tpu.dimension_semantics<parallel>, #tpu.dimension_semantics<arbitrary>], iteration_bounds = array<i64: 1, 2, 27>, scalar_prefetch = 0 : i64, scratch_operands = 1 : i64, tpu.core_type = #tpu.core_type<tc>, window_params = [{transform_indices = @transform_0, window_bounds = array<i64: 64, 1024>}, {transform_indices = @transform_1, window_bounds = array<i64: 1024, 256>}, {transform_indices = @transform_2, window_bounds = array<i64: 64, 256>}]} {
    %c0_i32 = arith.constant 0 : i32
    %0 = arith.cmpi eq, %arg2, %c0_i32 : i32
    %1 = arith.extui %0 : i1 to i32
    %c0_i32_0 = arith.constant 0 : i32
    %2 = arith.cmpi ne, %1, %c0_i32_0 : i32
    scf.if %2 {
      %cst_9 = arith.constant 0.000000e+00 : f32
      %12 = vector.broadcast %cst_9 : f32 to vector<64x256xf32>
      %c0_10 = arith.constant 0 : index
      %c0_11 = arith.constant 0 : index
      %13 = vector.load %arg6[%c0_10, %c0_11] : memref<64x256xf32, #tpu.memory_space<vmem>>, vector<64x256xf32>
      tpu.vector_store %arg6[%c0_10, %c0_11], %12 {strides = array<i32>} : memref<64x256xf32, #tpu.memory_space<vmem>>, vector<64x256xf32>,
    } else {
    }
    %c0 = arith.constant 0 : index
    %c0_1 = arith.constant 0 : index
    %3 = vector.load %arg6[%c0, %c0_1] : memref<64x256xf32, #tpu.memory_space<vmem>>, vector<64x256xf32>
    %c0_2 = arith.constant 0 : index
    %c0_3 = arith.constant 0 : index
    %4 = vector.load %arg3[%c0_2, %c0_3] : memref<64x1024xbf16, #tpu.memory_space<vmem>>, vector<64x1024xbf16>
    %c0_4 = arith.constant 0 : index
    %c0_5 = arith.constant 0 : index
    %5 = vector.load %arg4[%c0_4, %c0_5] : memref<1024x256xbf16, #tpu.memory_space<vmem>>, vector<1024x256xbf16>
    %cst = arith.constant dense<0.000000e+00> : vector<64x256xf32>
    %6 = tpu.matmul %4, %5, %cst {dimension_numbers = #tpu.dot_dimension_numbers<[1], [0], [0], [1], [0, 0, 1, 1], [], []>} : vector<64x1024xbf16>, vector<1024x256xbf16>, vector<64x256xf32> -> vector<64x256xf32>
    %7 = arith.addf %3, %6 : vector<64x256xf32>
    %c0_6 = arith.constant 0 : index
    %c0_7 = arith.constant 0 : index
    %8 = vector.load %arg6[%c0_6, %c0_7] : memref<64x256xf32, #tpu.memory_space<vmem>>, vector<64x256xf32>
    tpu.vector_store %arg6[%c0_6, %c0_7], %7 {strides = array<i32>} : memref<64x256xf32, #tpu.memory_space<vmem>>, vector<64x256xf32>,
    %c26_i32 = arith.constant 26 : i32
    %9 = arith.cmpi eq, %arg2, %c26_i32 : i32
    %10 = arith.extui %9 : i1 to i32
    %c0_i32_8 = arith.constant 0 : i32
    %11 = arith.cmpi ne, %10, %c0_i32_8 : i32
    scf.if %11 {
      %c0_9 = arith.constant 0 : index
      %c0_10 = arith.constant 0 : index
      %12 = vector.load %arg6[%c0_9, %c0_10] : memref<64x256xf32, #tpu.memory_space<vmem>>, vector<64x256xf32>
      %cst_11 = arith.constant 0.000000e+00 : f32
      %13 = vector.broadcast %cst_11 : f32 to vector<64x256xf32>
      %14 = arith.maximumf %12, %13 : vector<64x256xf32>
      %15 = arith.truncf %14 : vector<64x256xf32> to vector<64x256xbf16>
      %c0_12 = arith.constant 0 : index
      %c0_13 = arith.constant 0 : index
      %16 = vector.load %arg5[%c0_12, %c0_13] : memref<64x256xbf16, #tpu.memory_space<vmem>>, vector<64x256xbf16>
      tpu.vector_store %arg5[%c0_12, %c0_13], %15 {strides = array<i32>} : memref<64x256xbf16, #tpu.memory_space<vmem>>, vector<64x256xbf16>,
    } else {
    }
    return
  }
  func.func @transform_0(%arg0: i32, %arg1: i32, %arg2: i32) -> (i32, i32) {
    %c0_i32 = arith.constant 0 : i32
    return %arg0, %arg2 : i32, i32
  }
  func.func @transform_1(%arg0: i32, %arg1: i32, %arg2: i32) -> (i32, i32) {
    %c0_i32 = arith.constant 0 : i32
    return %arg2, %arg1 : i32, i32
  }
  func.func @transform_2(%arg0: i32, %arg1: i32, %arg2: i32) -> (i32, i32) {
    %c0_i32 = arith.constant 0 : i32
    return %arg0, %arg1 : i32, i32
  }
}

module attributes {stable_mosaic.version = 11 : i64} {
  func.func @_matmul_relu_kernel(%arg0: i32, %arg1: i32, %arg2: i32, %arg3: memref<128x512xbf16, #tpu.memory_space<vmem>>, %arg4: memref<512x256xbf16, #tpu.memory_space<vmem>>, %arg5: memref<128x256xbf16, #tpu.memory_space<vmem>>, %arg6: memref<128x256xf32, #tpu.memory_space<vmem>>) attributes {dimension_semantics = [#tpu.dimension_semantics<parallel>, #tpu.dimension_semantics<parallel>, #tpu.dimension_semantics<arbitrary>], iteration_bounds = array<i64: 2, 1, 45>, scalar_prefetch = 0 : i64, scratch_operands = 1 : i64, tpu.core_type = #tpu.core_type<tc>, window_params = [{transform_indices = @transform_0, window_bounds = array<i64: 128, 512>}, {transform_indices = @transform_1, window_bounds = array<i64: 512, 256>}, {transform_indices = @transform_2, window_bounds = array<i64: 128, 256>}]} {
    %c0_i32 = arith.constant 0 : i32
    %0 = arith.cmpi eq, %arg2, %c0_i32 : i32
    %1 = arith.extui %0 : i1 to i32
    %c0_i32_0 = arith.constant 0 : i32
    %2 = arith.cmpi ne, %1, %c0_i32_0 : i32
    scf.if %2 {
      %cst_9 = arith.constant 0.000000e+00 : f32
      %12 = vector.broadcast %cst_9 : f32 to vector<128x256xf32>
      %c0_10 = arith.constant 0 : index
      %c0_11 = arith.constant 0 : index
      %13 = vector.load %arg6[%c0_10, %c0_11] : memref<128x256xf32, #tpu.memory_space<vmem>>, vector<128x256xf32>
      tpu.vector_store %arg6[%c0_10, %c0_11], %12 {strides = array<i32>} : memref<128x256xf32, #tpu.memory_space<vmem>>, vector<128x256xf32>,
    } else {
    }
    %c0 = arith.constant 0 : index
    %c0_1 = arith.constant 0 : index
    %3 = vector.load %arg6[%c0, %c0_1] : memref<128x256xf32, #tpu.memory_space<vmem>>, vector<128x256xf32>
    %c0_2 = arith.constant 0 : index
    %c0_3 = arith.constant 0 : index
    %4 = vector.load %arg3[%c0_2, %c0_3] : memref<128x512xbf16, #tpu.memory_space<vmem>>, vector<128x512xbf16>
    %c0_4 = arith.constant 0 : index
    %c0_5 = arith.constant 0 : index
    %5 = vector.load %arg4[%c0_4, %c0_5] : memref<512x256xbf16, #tpu.memory_space<vmem>>, vector<512x256xbf16>
    %cst = arith.constant dense<0.000000e+00> : vector<128x256xf32>
    %6 = tpu.matmul %4, %5, %cst {dimension_numbers = #tpu.dot_dimension_numbers<[1], [0], [0], [1], [0, 0, 1, 1], [], []>} : vector<128x512xbf16>, vector<512x256xbf16>, vector<128x256xf32> -> vector<128x256xf32>
    %7 = arith.addf %3, %6 : vector<128x256xf32>
    %c0_6 = arith.constant 0 : index
    %c0_7 = arith.constant 0 : index
    %8 = vector.load %arg6[%c0_6, %c0_7] : memref<128x256xf32, #tpu.memory_space<vmem>>, vector<128x256xf32>
    tpu.vector_store %arg6[%c0_6, %c0_7], %7 {strides = array<i32>} : memref<128x256xf32, #tpu.memory_space<vmem>>, vector<128x256xf32>,
    %c44_i32 = arith.constant 44 : i32
    %9 = arith.cmpi eq, %arg2, %c44_i32 : i32
    %10 = arith.extui %9 : i1 to i32
    %c0_i32_8 = arith.constant 0 : i32
    %11 = arith.cmpi ne, %10, %c0_i32_8 : i32
    scf.if %11 {
      %c0_9 = arith.constant 0 : index
      %c0_10 = arith.constant 0 : index
      %12 = vector.load %arg6[%c0_9, %c0_10] : memref<128x256xf32, #tpu.memory_space<vmem>>, vector<128x256xf32>
      %cst_11 = arith.constant 0.000000e+00 : f32
      %13 = vector.broadcast %cst_11 : f32 to vector<128x256xf32>
      %14 = arith.maximumf %12, %13 : vector<128x256xf32>
      %15 = arith.truncf %14 : vector<128x256xf32> to vector<128x256xbf16>
      %c0_12 = arith.constant 0 : index
      %c0_13 = arith.constant 0 : index
      %16 = vector.load %arg5[%c0_12, %c0_13] : memref<128x256xbf16, #tpu.memory_space<vmem>>, vector<128x256xbf16>
      tpu.vector_store %arg5[%c0_12, %c0_13], %15 {strides = array<i32>} : memref<128x256xbf16, #tpu.memory_space<vmem>>, vector<128x256xbf16>,
    } else {
    }
    return
  }
  func.func @transform_0(%arg0: i32, %arg1: i32, %arg2: i32) -> (i32, i32) {
    %c0_i32 = arith.constant 0 : i32
    return %arg0, %arg2 : i32, i32
  }
  func.func @transform_1(%arg0: i32, %arg1: i32, %arg2: i32) -> (i32, i32) {
    %c0_i32 = arith.constant 0 : i32
    return %arg2, %arg1 : i32, i32
  }
  func.func @transform_2(%arg0: i32, %arg1: i32, %arg2: i32) -> (i32, i32) {
    %c0_i32 = arith.constant 0 : i32
    return %arg0, %arg1 : i32, i32
  }
}

module attributes {stable_mosaic.version = 11 : i64} {
  func.func @_matmul_relu_kernel(%arg0: i32, %arg1: i32, %arg2: i32, %arg3: memref<256x256xbf16, #tpu.memory_space<vmem>>, %arg4: memref<256x128xbf16, #tpu.memory_space<vmem>>, %arg5: memref<256x128xbf16, #tpu.memory_space<vmem>>, %arg6: memref<256x128xf32, #tpu.memory_space<vmem>>) attributes {dimension_semantics = [#tpu.dimension_semantics<parallel>, #tpu.dimension_semantics<parallel>, #tpu.dimension_semantics<arbitrary>], iteration_bounds = array<i64: 4, 1, 45>, scalar_prefetch = 0 : i64, scratch_operands = 1 : i64, tpu.core_type = #tpu.core_type<tc>, window_params = [{transform_indices = @transform_0, window_bounds = array<i64: 256, 256>}, {transform_indices = @transform_1, window_bounds = array<i64: 256, 128>}, {transform_indices = @transform_2, window_bounds = array<i64: 256, 128>}]} {
    %c0_i32 = arith.constant 0 : i32
    %0 = arith.cmpi eq, %arg2, %c0_i32 : i32
    %1 = arith.extui %0 : i1 to i32
    %c0_i32_0 = arith.constant 0 : i32
    %2 = arith.cmpi ne, %1, %c0_i32_0 : i32
    scf.if %2 {
      %cst_9 = arith.constant 0.000000e+00 : f32
      %12 = vector.broadcast %cst_9 : f32 to vector<256x128xf32>
      %c0_10 = arith.constant 0 : index
      %c0_11 = arith.constant 0 : index
      %13 = vector.load %arg6[%c0_10, %c0_11] : memref<256x128xf32, #tpu.memory_space<vmem>>, vector<256x128xf32>
      tpu.vector_store %arg6[%c0_10, %c0_11], %12 {strides = array<i32>} : memref<256x128xf32, #tpu.memory_space<vmem>>, vector<256x128xf32>,
    } else {
    }
    %c0 = arith.constant 0 : index
    %c0_1 = arith.constant 0 : index
    %3 = vector.load %arg6[%c0, %c0_1] : memref<256x128xf32, #tpu.memory_space<vmem>>, vector<256x128xf32>
    %c0_2 = arith.constant 0 : index
    %c0_3 = arith.constant 0 : index
    %4 = vector.load %arg3[%c0_2, %c0_3] : memref<256x256xbf16, #tpu.memory_space<vmem>>, vector<256x256xbf16>
    %c0_4 = arith.constant 0 : index
    %c0_5 = arith.constant 0 : index
    %5 = vector.load %arg4[%c0_4, %c0_5] : memref<256x128xbf16, #tpu.memory_space<vmem>>, vector<256x128xbf16>
    %cst = arith.constant dense<0.000000e+00> : vector<256x128xf32>
    %6 = tpu.matmul %4, %5, %cst {dimension_numbers = #tpu.dot_dimension_numbers<[1], [0], [0], [1], [0, 0, 1, 1], [], []>} : vector<256x256xbf16>, vector<256x128xbf16>, vector<256x128xf32> -> vector<256x128xf32>
    %7 = arith.addf %3, %6 : vector<256x128xf32>
    %c0_6 = arith.constant 0 : index
    %c0_7 = arith.constant 0 : index
    %8 = vector.load %arg6[%c0_6, %c0_7] : memref<256x128xf32, #tpu.memory_space<vmem>>, vector<256x128xf32>
    tpu.vector_store %arg6[%c0_6, %c0_7], %7 {strides = array<i32>} : memref<256x128xf32, #tpu.memory_space<vmem>>, vector<256x128xf32>,
    %c44_i32 = arith.constant 44 : i32
    %9 = arith.cmpi eq, %arg2, %c44_i32 : i32
    %10 = arith.extui %9 : i1 to i32
    %c0_i32_8 = arith.constant 0 : i32
    %11 = arith.cmpi ne, %10, %c0_i32_8 : i32
    scf.if %11 {
      %c0_9 = arith.constant 0 : index
      %c0_10 = arith.constant 0 : index
      %12 = vector.load %arg6[%c0_9, %c0_10] : memref<256x128xf32, #tpu.memory_space<vmem>>, vector<256x128xf32>
      %cst_11 = arith.constant 0.000000e+00 : f32
      %13 = vector.broadcast %cst_11 : f32 to vector<256x128xf32>
      %14 = arith.maximumf %12, %13 : vector<256x128xf32>
      %15 = arith.truncf %14 : vector<256x128xf32> to vector<256x128xbf16>
      %c0_12 = arith.constant 0 : index
      %c0_13 = arith.constant 0 : index
      %16 = vector.load %arg5[%c0_12, %c0_13] : memref<256x128xbf16, #tpu.memory_space<vmem>>, vector<256x128xbf16>
      tpu.vector_store %arg5[%c0_12, %c0_13], %15 {strides = array<i32>} : memref<256x128xbf16, #tpu.memory_space<vmem>>, vector<256x128xbf16>,
    } else {
    }
    return
  }
  func.func @transform_0(%arg0: i32, %arg1: i32, %arg2: i32) -> (i32, i32) {
    %c0_i32 = arith.constant 0 : i32
    return %arg0, %arg2 : i32, i32
  }
  func.func @transform_1(%arg0: i32, %arg1: i32, %arg2: i32) -> (i32, i32) {
    %c0_i32 = arith.constant 0 : i32
    return %arg2, %arg1 : i32, i32
  }
  func.func @transform_2(%arg0: i32, %arg1: i32, %arg2: i32) -> (i32, i32) {
    %c0_i32 = arith.constant 0 : i32
    return %arg0, %arg1 : i32, i32
  }
}

module attributes {stable_mosaic.version = 11 : i64} {
  func.func @_matmul_relu_kernel(%arg0: i32, %arg1: i32, %arg2: i32, %arg3: memref<256x256xbf16, #tpu.memory_space<vmem>>, %arg4: memref<256x128xbf16, #tpu.memory_space<vmem>>, %arg5: memref<256x128xbf16, #tpu.memory_space<vmem>>, %arg6: memref<256x128xf32, #tpu.memory_space<vmem>>) attributes {dimension_semantics = [#tpu.dimension_semantics<parallel>, #tpu.dimension_semantics<parallel>, #tpu.dimension_semantics<arbitrary>], iteration_bounds = array<i64: 8, 1, 9>, scalar_prefetch = 0 : i64, scratch_operands = 1 : i64, tpu.core_type = #tpu.core_type<tc>, window_params = [{transform_indices = @transform_0, window_bounds = array<i64: 256, 256>}, {transform_indices = @transform_1, window_bounds = array<i64: 256, 128>}, {transform_indices = @transform_2, window_bounds = array<i64: 256, 128>}]} {
    %c0_i32 = arith.constant 0 : i32
    %0 = arith.cmpi eq, %arg2, %c0_i32 : i32
    %1 = arith.extui %0 : i1 to i32
    %c0_i32_0 = arith.constant 0 : i32
    %2 = arith.cmpi ne, %1, %c0_i32_0 : i32
    scf.if %2 {
      %cst_9 = arith.constant 0.000000e+00 : f32
      %12 = vector.broadcast %cst_9 : f32 to vector<256x128xf32>
      %c0_10 = arith.constant 0 : index
      %c0_11 = arith.constant 0 : index
      %13 = vector.load %arg6[%c0_10, %c0_11] : memref<256x128xf32, #tpu.memory_space<vmem>>, vector<256x128xf32>
      tpu.vector_store %arg6[%c0_10, %c0_11], %12 {strides = array<i32>} : memref<256x128xf32, #tpu.memory_space<vmem>>, vector<256x128xf32>,
    } else {
    }
    %c0 = arith.constant 0 : index
    %c0_1 = arith.constant 0 : index
    %3 = vector.load %arg6[%c0, %c0_1] : memref<256x128xf32, #tpu.memory_space<vmem>>, vector<256x128xf32>
    %c0_2 = arith.constant 0 : index
    %c0_3 = arith.constant 0 : index
    %4 = vector.load %arg3[%c0_2, %c0_3] : memref<256x256xbf16, #tpu.memory_space<vmem>>, vector<256x256xbf16>
    %c0_4 = arith.constant 0 : index
    %c0_5 = arith.constant 0 : index
    %5 = vector.load %arg4[%c0_4, %c0_5] : memref<256x128xbf16, #tpu.memory_space<vmem>>, vector<256x128xbf16>
    %cst = arith.constant dense<0.000000e+00> : vector<256x128xf32>
    %6 = tpu.matmul %4, %5, %cst {dimension_numbers = #tpu.dot_dimension_numbers<[1], [0], [0], [1], [0, 0, 1, 1], [], []>} : vector<256x256xbf16>, vector<256x128xbf16>, vector<256x128xf32> -> vector<256x128xf32>
    %7 = arith.addf %3, %6 : vector<256x128xf32>
    %c0_6 = arith.constant 0 : index
    %c0_7 = arith.constant 0 : index
    %8 = vector.load %arg6[%c0_6, %c0_7] : memref<256x128xf32, #tpu.memory_space<vmem>>, vector<256x128xf32>
    tpu.vector_store %arg6[%c0_6, %c0_7], %7 {strides = array<i32>} : memref<256x128xf32, #tpu.memory_space<vmem>>, vector<256x128xf32>,
    %c8_i32 = arith.constant 8 : i32
    %9 = arith.cmpi eq, %arg2, %c8_i32 : i32
    %10 = arith.extui %9 : i1 to i32
    %c0_i32_8 = arith.constant 0 : i32
    %11 = arith.cmpi ne, %10, %c0_i32_8 : i32
    scf.if %11 {
      %c0_9 = arith.constant 0 : index
      %c0_10 = arith.constant 0 : index
      %12 = vector.load %arg6[%c0_9, %c0_10] : memref<256x128xf32, #tpu.memory_space<vmem>>, vector<256x128xf32>
      %cst_11 = arith.constant 0.000000e+00 : f32
      %13 = vector.broadcast %cst_11 : f32 to vector<256x128xf32>
      %14 = arith.maximumf %12, %13 : vector<256x128xf32>
      %15 = arith.truncf %14 : vector<256x128xf32> to vector<256x128xbf16>
      %c0_12 = arith.constant 0 : index
      %c0_13 = arith.constant 0 : index
      %16 = vector.load %arg5[%c0_12, %c0_13] : memref<256x128xbf16, #tpu.memory_space<vmem>>, vector<256x128xbf16>
      tpu.vector_store %arg5[%c0_12, %c0_13], %15 {strides = array<i32>} : memref<256x128xbf16, #tpu.memory_space<vmem>>, vector<256x128xbf16>,
    } else {
    }
    return
  }
  func.func @transform_0(%arg0: i32, %arg1: i32, %arg2: i32) -> (i32, i32) {
    %c0_i32 = arith.constant 0 : i32
    return %arg0, %arg2 : i32, i32
  }
  func.func @transform_1(%arg0: i32, %arg1: i32, %arg2: i32) -> (i32, i32) {
    %c0_i32 = arith.constant 0 : i32
    return %arg2, %arg1 : i32, i32
  }
  func.func @transform_2(%arg0: i32, %arg1: i32, %arg2: i32) -> (i32, i32) {
    %c0_i32 = arith.constant 0 : i32
    return %arg0, %arg1 : i32, i32
  }
}

module attributes {stable_mosaic.version = 11 : i64} {
  func.func @_head_kernel(%arg0: i32, %arg1: memref<256x256xbf16, #tpu.memory_space<vmem>>, %arg2: memref<256x128xbf16, #tpu.memory_space<vmem>>, %arg3: memref<128x128xbf16, #tpu.memory_space<vmem>>, %arg4: memref<1x128xf32, #tpu.memory_space<vmem>>, %arg5: memref<256x128xf32, #tpu.memory_space<vmem>>) attributes {dimension_semantics = [#tpu.dimension_semantics<parallel>], iteration_bounds = array<i64: 16>, scalar_prefetch = 0 : i64, scratch_operands = 0 : i64, tpu.core_type = #tpu.core_type<tc>, window_params = [{transform_indices = @transform_0, window_bounds = array<i64: 256, 256>}, {pipeline_mode = #tpu.pipeline_mode<synchronous>, transform_indices = @transform_1, window_bounds = array<i64: 256, 128>}, {pipeline_mode = #tpu.pipeline_mode<synchronous>, transform_indices = @transform_2, window_bounds = array<i64: 128, 128>}, {pipeline_mode = #tpu.pipeline_mode<synchronous>, transform_indices = @transform_3, window_bounds = array<i64: 1, 128>}, {transform_indices = @transform_4, window_bounds = array<i64: 256, 128>}]} {
    %c0 = arith.constant 0 : index
    %c0_0 = arith.constant 0 : index
    %0 = vector.load %arg1[%c0, %c0_0] : memref<256x256xbf16, #tpu.memory_space<vmem>>, vector<256x256xbf16>
    %c0_1 = arith.constant 0 : index
    %c0_2 = arith.constant 0 : index
    %1 = vector.load %arg2[%c0_1, %c0_2] : memref<256x128xbf16, #tpu.memory_space<vmem>>, vector<256x128xbf16>
    %cst = arith.constant dense<0.000000e+00> : vector<256x128xf32>
    %2 = tpu.matmul %0, %1, %cst {dimension_numbers = #tpu.dot_dimension_numbers<[1], [0], [0], [1], [0, 0, 1, 1], [], []>} : vector<256x256xbf16>, vector<256x128xbf16>, vector<256x128xf32> -> vector<256x128xf32>
    %cst_3 = arith.constant 0.000000e+00 : f32
    %3 = vector.broadcast %cst_3 : f32 to vector<256x128xf32>
    %4 = arith.maximumf %2, %3 : vector<256x128xf32>
    %5 = arith.truncf %4 : vector<256x128xf32> to vector<256x128xbf16>
    %c0_4 = arith.constant 0 : index
    %c0_5 = arith.constant 0 : index
    %6 = vector.load %arg3[%c0_4, %c0_5] : memref<128x128xbf16, #tpu.memory_space<vmem>>, vector<128x128xbf16>
    %cst_6 = arith.constant dense<0.000000e+00> : vector<256x128xf32>
    %7 = tpu.matmul %5, %6, %cst_6 {dimension_numbers = #tpu.dot_dimension_numbers<[1], [0], [0], [1], [0, 0, 1, 1], [], []>} : vector<256x128xbf16>, vector<128x128xbf16>, vector<256x128xf32> -> vector<256x128xf32>
    %c0_7 = arith.constant 0 : index
    %c0_8 = arith.constant 0 : index
    %8 = vector.load %arg4[%c0_7, %c0_8] : memref<1x128xf32, #tpu.memory_space<vmem>>, vector<1x128xf32>
    %9 = vector.broadcast %8 : vector<1x128xf32> to vector<256x128xf32>
    %10 = arith.addf %7, %9 : vector<256x128xf32>
    %11 = arith.negf %10 : vector<256x128xf32>
    %12 = math.exp %11 : vector<256x128xf32>
    %cst_9 = arith.constant 1.000000e+00 : f32
    %13 = vector.broadcast %cst_9 : f32 to vector<256x128xf32>
    %14 = arith.addf %13, %12 : vector<256x128xf32>
    %15 = arith.divf %13, %14 : vector<256x128xf32>
    %c0_10 = arith.constant 0 : index
    %c0_11 = arith.constant 0 : index
    %16 = vector.load %arg5[%c0_10, %c0_11] : memref<256x128xf32, #tpu.memory_space<vmem>>, vector<256x128xf32>
    tpu.vector_store %arg5[%c0_10, %c0_11], %15 {strides = array<i32>} : memref<256x128xf32, #tpu.memory_space<vmem>>, vector<256x128xf32>,
    return
  }
  func.func @transform_0(%arg0: i32) -> (i32, i32) {
    %c0_i32 = arith.constant 0 : i32
    %c0_i32_0 = arith.constant 0 : i32
    return %arg0, %c0_i32 : i32, i32
  }
  func.func @transform_1(%arg0: i32) -> (i32, i32) {
    %c0_i32 = arith.constant 0 : i32
    %c0_i32_0 = arith.constant 0 : i32
    %c0_i32_1 = arith.constant 0 : i32
    return %c0_i32, %c0_i32_0 : i32, i32
  }
  func.func @transform_2(%arg0: i32) -> (i32, i32) {
    %c0_i32 = arith.constant 0 : i32
    %c0_i32_0 = arith.constant 0 : i32
    %c0_i32_1 = arith.constant 0 : i32
    return %c0_i32, %c0_i32_0 : i32, i32
  }
  func.func @transform_3(%arg0: i32) -> (i32, i32) {
    %c0_i32 = arith.constant 0 : i32
    %c0_i32_0 = arith.constant 0 : i32
    %c0_i32_1 = arith.constant 0 : i32
    return %c0_i32, %c0_i32_0 : i32, i32
  }
  func.func @transform_4(%arg0: i32) -> (i32, i32) {
    %c0_i32 = arith.constant 0 : i32
    %c0_i32_0 = arith.constant 0 : i32
    return %arg0, %c0_i32 : i32, i32
  }
}

</mosaic_0001>

<bundles_post_ra>
// kernel: decoder_conv_up.6
= control target key start
LH: loop header
LB: loop body
LE: loop exit
PB: predicated region body
PF: predicated region fallthrough
CT: control target
= control target key end

     0   :  { %s2931_s0 = inlined_call_operand.vmem [shape: bf16[16,9216], index: 0, kind: input, shape index: {}]   ;;  %s2932_s1 = inlined_call_operand.hbm [shape: bf16[9216,1024], index: 1, kind: input, shape index: {}]   ;;  %s2933_s2 = inlined_call_operand.vmem [shape: bf16[16,1024], index: 2, kind: output, shape index: {}]  }
   0x1   :  { %2937 = sst [smem:[#allocation14_spill]] %s2931_s0 }
   0x2   :  { %7 = vsyncpa [#allocation5], 0 }
   0x3   :  { %9 = vsyncpa [#allocation5 + $0x1], 0  ;;  %s2435_s9 = smov 0   ;;  %s2437_s10 = smov 0  }
   0x4   :  { %s2439_s11 = smov 0   ;;  %s2441_s12 = smov 0  }
   0x5   :  { %s2443_s13 = smov 0   ;;  %s2445_s14 = smov 0  }
   0x6   :  { %s2447_s15 = smov 0   ;;  %s2449_s16 = smov 0  }
   0x7   :  { %s2451_s17 = smov 0   ;;  %s2453_s18 = smov 0  }
   0x8   :  { %s2455_s19 = smov 0   ;;  %s2457_s20 = smov 0  }
   0x9 LB: > { %2938 = sst [smem:[#allocation8_spill]] %s2394_s15  ;;  %s1480_s21 = sadd.s32 4294967295, %s2414_s20   ;;  %s2414_s20 = sphi %s2457_s20, %s15_s20   ;;  %s2410_s19 = sphi %s2455_s19, %s2963_s19   ;;  %s2406_s18 = sphi %s2453_s18, %s2962_s18   ;;  %s2402_s17 = sphi %s2451_s17, %s2961_s17   ;;  %s2398_s16 = sphi %s2449_s16, %s2960_s16   ;;  %s2394_s15 = sphi %s2447_s15, %s2952_s15   ;;  %s2390_s14 = sphi %s2445_s14, %s2951_s14   ;;  %s2386_s13 = sphi %s2443_s13, %s2959_s13   ;;  %s2382_s12 = sphi %s2441_s12, %s2958_s12   ;;  %s2378_s11 = sphi %s2439_s11, %s2957_s11   ;;  %s2374_s10 = sphi %s2437_s10, %s2956_s10   ;;  %s2370_s9 = sphi %s2435_s9, %s2955_s9  }
   0xa   : > { %s27_s22 = sadd.s32 1, %s2406_s18  ;;  %s30_s23 = sadd.s32 1, %s2410_s19 }
   0xb   : > { %p28_p0 = scmp.ge.s32.totalorder %s27_s22, 9  ;;  %s43_s24 = sadd.s32 1, %s2394_s15 }
   0xc   : > { %p50_p1 = scmp.ne.s32.totalorder %s2394_s15, %s2390_s14  ;;  %p51_p2 = scmp.eq.s32.totalorder %s2414_s20, 0 }
   0xd   : > { %s2965_s22 = smov (%p28_p0, %s27_s22), 0  ;;  %s2967_s23 = smov (!%p28_p0, %s30_s23), %s2410_s19 }
   0xe   : > { %2939 = sst [smem:[#allocation9_spill]] %s2965_s22  ;;  %s39_s25 = ssub.s32 %s2406_s18, %s2965_s22 }
   0xf   : > { %p32_p3 = scmp.ge.s32.totalorder %s2967_s23, 4  ;;  %p41_p4 = scmp.eq.s32.totalorder %s39_s25, 0 }
  0x10   : > { %p2507_p5 = por %p51_p2, %p50_p1  ;;  %s71_s27 = sadd.s32 1, %s2386_s13 }
  0x11   : > { %s2969_s23 = smov (%p32_p3, %s2967_s23), 0  ;;  %p78_p6 = scmp.ne.s32.totalorder %s2386_s13, %s2382_s12 }
  0x12   : > { %2941 = sst [smem:[#allocation10_spill]] %s2969_s23  ;;  %s67_s29 = ssub.s32 %s2410_s19, %s2969_s23 }
  0x13   : > { %s2515_s28 = scalar_select %p41_p4, %s2394_s15, %s43_s24  }
  0x14   : > { %s68_s30 = sor.u32 %s67_s29, %s39_s25  ;;  %p84_p7 = scmp.ne.s32.totalorder %s2382_s12, %s2378_s11 }
  0x15   : > { %2942 = sst [smem:[#allocation11_spill]] %s2515_s28  ;;  %p69_p8 = scmp.eq.s32.totalorder %s68_s30, 0 }
  0x16   : > { %p2523_p9 = por %p78_p6, %p51_p2  ;;  %p85_p10 = scmp.eq.s32.totalorder %s1480_s21, 0 }
  0x17   : > { %p97_p11 = scmp.eq.s32.totalorder %s67_s29, 0  ;;  %s99_s6 = sadd.s32 1, %s2374_s10 }
  0x18   : > { %s2530_s4 = scalar_select %p69_p8, %s2386_s13, %s71_s27  }
  0x19   : > { %p2532_p12 = por %p85_p10, %p84_p7  ;;  %p109_p13 = scmp.ne.s32.totalorder %s2374_s10, %s2370_s9 }
  0x1a   : > { %2944 = sst [smem:[#allocation12_spill]] %s2530_s4  ;;  %p110_p0 = scmp.eq.s32.totalorder %s1480_s21, 35 }
  0x1b   : > { %s2538_s7 = scalar_select %p97_p11, %s2374_s10, %s99_s6  }
  0x1c   : > { %p2544_p1 = por %p110_p0, %p109_p13  ;;  %p1483_p2 = scmp.ge.s32.totalorder %s2414_s20, 36 }
  0x1d   : > { %2946 = sst [smem:[#allocation13_spill]] %s2538_s7 }
  0x1e   : > { %132 = sbr.rel (%p1483_p2) target bundleno = 61 (0x3d), region = 16 }
  0x23   : > { %135 = sbr.rel (!%p2507_p5) target bundleno = 53 (0x35), region = 20  ;;  %s137_s11 = sand.u32 (%p2507_p5), 1, %s2394_s15  }
  0x24   : > { %s2047_s24 = sshll.u32 (%p2507_p5), %s2406_s18, 5  ;;  %s1484_s25 = sshll.u32 (%p2507_p5), %s137_s11, 6 }
  0x25   : > { %s2948_s0 = sld [smem:[#allocation14_spill]] (%p2507_p5)  ;;  %s139_s21 = scalar_lea.vmem (%p2507_p5), [#allocation3], %s1484_s25 }
  0x2b   : > { %s145_s30 = scalar_lea.vmem %s2948_s0, %s2047_s24 }
  0x2c   : > { %v158_v0 = vld [vmem:[%s145_s30] sm:$0xff]  ;;  %v160_v1 = vld [vmem:[%s145_s30 + $0x8] sm:$0xff]  ;;  %v162_v2 = vld [vmem:[%s145_s30 + $0x10] sm:$0xff] }
  0x2d   : > { %159 = vst [vmem:[%s139_s21] sm:$0xff] %v158_v0  ;;  %v164_v3 = vld [vmem:[%s145_s30 + $0x18] sm:$0xff]  ;;  %v166_v4 = vld [vmem:[%s145_s30 + $0x120] sm:$0xff]  ;;  %v168_v5 = vld [vmem:[%s145_s30 + $0x128] sm:$0xff] }
  0x2e   : > { %161 = vst [vmem:[%s139_s21 + $0x8] sm:$0xff] %v160_v1  ;;  %v170_v6 = vld [vmem:[%s145_s30 + $0x130] sm:$0xff]  ;;  %v172_v7 = vld [vmem:[%s145_s30 + $0x138] sm:$0xff] }
  0x2f   : > { %163 = vst [vmem:[%s139_s21 + $0x10] sm:$0xff] %v162_v2 }
  0x30   : > { %165 = vst [vmem:[%s139_s21 + $0x18] sm:$0xff] %v164_v3 }
  0x31   : > { %167 = vst [vmem:[%s139_s21 + $0x20] sm:$0xff] %v166_v4 }
  0x32   : > { %169 = vst [vmem:[%s139_s21 + $0x28] sm:$0xff] %v168_v5 }
  0x33   : > { %171 = vst [vmem:[%s139_s21 + $0x30] sm:$0xff] %v170_v6 }
  0x34   : > { %173 = vst [vmem:[%s139_s21 + $0x38] sm:$0xff] %v172_v7 }
  0x35 PF: > { %s180_s26 = sand.u32 1, %s2386_s13   ;;  %s1489_s6 = sshll.u32 %s2410_s19, 1 }
  0x36   : > { %s1487_s11 = sshll.u32 %s180_s26, 10  ;;  %s2048_s24 = sshll.u32 %s2406_s18, 10 }
  0x37   : > { %s190_s25 = sadd.s32 %s2048_s24, %s1489_s6  ;;  %s184_s27 = scalar_lea.vmem [#allocation4], %s1487_s11 }
  0x38   : > { %s195_s29 = sshll.u32 %s184_s27, 4  ;;  %s1491_s0 = sshll.u32 %s190_s25, 2  ;;  %s196_s29 = int_to_ptr.vmem [resolvable:$true] %s195_s29 }
  0x39   : > { %s192_s30 = scalar_lea.hbm %s2932_s1, %s1491_s0  ;;  %s181_s21 = scalar_lea.sflag [#allocation5], %s180_s26 }
  0x3a   : > { %s193_s28 = sshll.u32 %s192_s30, 4  ;;  %s2416_s15 = smov 512   ;;  %s194_s28 = int_to_ptr.hbm [resolvable:$true] %s193_s28 }
  0x3b   : > { %s2417_s4 = smov 128   ;;  %s2418_s7 = smov 8  }
  0x3c   : > { %2186 = dma.hbm_to_vmem [thread:$0]  (%p2523_p9), %s194_s28, 16384, %s196_s29, %s181_s21, %s2416_s15, %s2417_s4, %s2418_s7  }
  0x3d PF: > { %p1492_p3 = scmp.ge.s32.totalorder %s2414_s20, 1  ;;  %p203_p4 = scmp.lt.s32.totalorder %s2414_s20, 37 }
  0x3f   : > { %p204_p5 = pnand %p1492_p3, %p203_p4 }
  0x40   : > { %s210_s22 = sand.u32 (!%p204_p5), 1, %s2390_s14   ;;  %s216_s0 = sand.u32 (!%p204_p5), 1, %s2382_s12  }
  0x41   : > { %207 = sbr.rel (%p204_p5) target bundleno = 382 (0x17e), region = 47  ;;  %s1493_s23 = sshll.u32 (!%p204_p5), %s210_s22, 6 }
  0x42   : > { %s1494_s6 = sshll.u32 (!%p204_p5), %s216_s0, 10  ;;  %s2568_s26 = scalar_lea.vmem (!%p204_p5), [#allocation3], %s1493_s23 }
  0x43   : > { %s217_s11 = scalar_lea.sflag (!%p204_p5), [#allocation5], %s216_s0  ;;  %s2570_s24 = scalar_lea.vmem (!%p204_p5), [#allocation4], %s1494_s6 }
  0x46   : > { %2365 = dma.done.wait (%p2532_p12), %s217_s11, 16384  }
  0x47   : > { %2367 = vsyncadd (%p2532_p12), %s217_s11, 4294950912  ;;  %s242_s15 = sand.u32 1, %s2370_s9   ;;  %p1496_p6 = scmp.ne.s32.totalorder %s2398_s16, 0 }
  0x48   : > { %s1495_s28 = sshll.u32 %s242_s15, 4 }
  0x49   : > { %s2577_s3 = scalar_lea.vmem [#allocation6], %s1495_s28  ;;  %254 = sbr.rel (%p1496_p6) target bundleno = 83 (0x53), region = 59 }
  0x4e   : > { %v2419_v8 = vmov 0.0  }
  0x4f   : > { %255 = vst [vmem:[#allocation2 + $0x10] sm:$0xff] %v2419_v8 }
  0x50   : > { %256 = vst [vmem:[#allocation2] sm:$0xff] %v2419_v8 }
  0x51   : > { %257 = vst [vmem:[#allocation2 + $0x18] sm:$0xff] %v2419_v8 }
  0x52   : > { %258 = vst [vmem:[#allocation2 + $0x8] sm:$0xff] %v2419_v8 }
  0x53 PF: > { %v1587_v9 = vld [vmem:[%s2570_s24 + $0x70] sm:$0xf]  ;;  %v2072_v10 = vld [vmem:[%s2570_s24 + $0x74] sm:$0xf0]  ;;  %v1579_v20 = vld [vmem:[%s2570_s24 + $0x60] sm:$0xf] }
  0x54   : > { %v1651_v11 = vld [vmem:[%s2570_s24 + $0xf0] sm:$0xf]  ;;  %v1588_v12 = vor.u32 %v2072_v10, %v1587_v9  ;;  %v2088_v13 = vld [vmem:[%s2570_s24 + $0xf4] sm:$0xf0]  ;;  %v2070_v22 = vld [vmem:[%s2570_s24 + $0x64] sm:$0xf0] }
  0x55   : > { %v1715_v14 = vld [vmem:[%s2570_s24 + $0x170] sm:$0xf]  ;;  %v2104_v15 = vld [vmem:[%s2570_s24 + $0x174] sm:$0xf0]  ;;  %v1652_v16 = vor.u32 %v2088_v13, %v1651_v11  ;;  %v1643_v23 = vld [vmem:[%s2570_s24 + $0xe0] sm:$0xf]  ;;  %v1580_v25 = vor.u32 %v2070_v22, %v1579_v20 }
  0x56   : > { %v1716_v17 = vor.u32 %v2104_v15, %v1715_v14  ;;  %v1779_v18 = vld [vmem:[%s2570_s24 + $0x1f0] sm:$0xf]  ;;  %v2120_v19 = vld [vmem:[%s2570_s24 + $0x1f4] sm:$0xf0]  ;;  %1079 = vmatpush.bf16.msra.mxu0 %v1588_v12  ;;  %v2086_v24 = vld [vmem:[%s2570_s24 + $0xe4] sm:$0xf0] }
  0x57   : > { %v1780_v21 = vor.u32 %v2120_v19, %v1779_v18  ;;  %1093 = vmatpush.bf16.msra.mxu1 %v1652_v16  ;;  %v1644_v26 = vor.u32 %v2086_v24, %v1643_v23  ;;  %v1707_v27 = vld [vmem:[%s2570_s24 + $0x160] sm:$0xf]  ;;  %v2102_v28 = vld [vmem:[%s2570_s24 + $0x164] sm:$0xf0]  ;;  %v1571_v32 = vld [vmem:[%s2570_s24 + $0x50] sm:$0xf] }
  0x58   : > { %1107 = vmatpush.bf16.msra.mxu2 %v1716_v17  ;;  %v1771_v29 = vld [vmem:[%s2570_s24 + $0x1e0] sm:$0xf]  ;;  %v1708_v30 = vor.u32 %v2102_v28, %v1707_v27  ;;  %v2118_v31 = vld [vmem:[%s2570_s24 + $0x1e4] sm:$0xf0]  ;;  %v2068_v33 = vld [vmem:[%s2570_s24 + $0x54] sm:$0xf0] }
  0x59   : > { %1121 = vmatpush.bf16.msra.mxu3 %v1780_v21  ;;  %v1772_v34 = vor.u32 %v2118_v31, %v1771_v29  ;;  %v1635_v35 = vld [vmem:[%s2570_s24 + $0xd0] sm:$0xf]  ;;  %v2084_v36 = vld [vmem:[%s2570_s24 + $0xd4] sm:$0xf0]  ;;  %v1572_v38 = vor.u32 %v2068_v33, %v1571_v32  ;;  %v1563_v44 = vld [vmem:[%s2570_s24 + $0x40] sm:$0xf] }
  0x5a   : > { %v1699_v37 = vld [vmem:[%s2570_s24 + $0x150] sm:$0xf]  ;;  %1080 = vmatpush.bf16.msra.mxu0 %v1580_v25  ;;  %v2100_v39 = vld [vmem:[%s2570_s24 + $0x154] sm:$0xf0]  ;;  %v1636_v42 = vor.u32 %v2084_v36, %v1635_v35  ;;  %v2066_v45 = vld [vmem:[%s2570_s24 + $0x44] sm:$0xf0] }
  0x5b   : > { %v1763_v40 = vld [vmem:[%s2570_s24 + $0x1d0] sm:$0xf]  ;;  %v2116_v41 = vld [vmem:[%s2570_s24 + $0x1d4] sm:$0xf0]  ;;  %1094 = vmatpush.bf16.msra.mxu1 %v1644_v26  ;;  %v1700_v43 = vor.u32 %v2100_v39, %v1699_v37  ;;  %v1627_v46 = vld [vmem:[%s2570_s24 + $0xc0] sm:$0xf]  ;;  %v1564_v53 = vor.u32 %v2066_v45, %v1563_v44 }
  0x5c   : > { %1108 = vmatpush.bf16.msra.mxu2 %v1708_v30  ;;  %v1764_v47 = vor.u32 %v2116_v41, %v1763_v40  ;;  %v2082_v48 = vld [vmem:[%s2570_s24 + $0xc4] sm:$0xf0]  ;;  %v1691_v49 = vld [vmem:[%s2570_s24 + $0x140] sm:$0xf]  ;;  %v1555_v56 = vld [vmem:[%s2570_s24 + $0x30] sm:$0xf] }
  0x5d   : > { %1122 = vmatpush.bf16.msra.mxu3 %v1772_v34  ;;  %v2098_v50 = vld [vmem:[%s2570_s24 + $0x144] sm:$0xf0]  ;;  %v1755_v51 = vld [vmem:[%s2570_s24 + $0x1c0] sm:$0xf]  ;;  %v1628_v54 = vor.u32 %v2082_v48, %v1627_v46  ;;  %v2064_v57 = vld [vmem:[%s2570_s24 + $0x34] sm:$0xf0] }
  0x5e   : > { %v2114_v52 = vld [vmem:[%s2570_s24 + $0x1c4] sm:$0xf0]  ;;  %1081 = vmatpush.bf16.msra.mxu0 %v1572_v38  ;;  %v1692_v55 = vor.u32 %v2098_v50, %v1691_v49  ;;  %v1619_v58 = vld [vmem:[%s2570_s24 + $0xb0] sm:$0xf]  ;;  %v2080_v60 = vld [vmem:[%s2570_s24 + $0xb4] sm:$0xf0]  ;;  %v1556_v1 = vor.u32 %v2064_v57, %v1555_v56 }
  0x5f   : > { %1095 = vmatpush.bf16.msra.mxu1 %v1636_v42  ;;  %v1756_v59 = vor.u32 %v2114_v52, %v1755_v51  ;;  %v1683_v61 = vld [vmem:[%s2570_s24 + $0x130] sm:$0xf]  ;;  %v2096_v62 = vld [vmem:[%s2570_s24 + $0x134] sm:$0xf0]  ;;  %v1620_v2 = vor.u32 %v2080_v60, %v1619_v58  ;;  %v1547_v4 = vld [vmem:[%s2570_s24 + $0x20] sm:$0xf] }
  0x60   : > { %1109 = vmatpush.bf16.msra.mxu2 %v1700_v43  ;;  %v1747_v63 = vld [vmem:[%s2570_s24 + $0x1b0] sm:$0xf]  ;;  %v2112_v0 = vld [vmem:[%s2570_s24 + $0x1b4] sm:$0xf0]  ;;  %v1684_v3 = vor.u32 %v2096_v62, %v1683_v61  ;;  %v2062_v5 = vld [vmem:[%s2570_s24 + $0x24] sm:$0xf0] }
  0x61   : > { %1123 = vmatpush.bf16.msra.mxu3 %v1764_v47  ;;  %v1611_v6 = vld [vmem:[%s2570_s24 + $0xa0] sm:$0xf]  ;;  %v1748_v7 = vor.u32 %v2112_v0, %v1747_v63  ;;  %v2078_v8 = vld [vmem:[%s2570_s24 + $0xa4] sm:$0xf0]  ;;  %v1548_v13 = vor.u32 %v2062_v5, %v1547_v4  ;;  %v1539_v16 = vld [vmem:[%s2570_s24 + $0x10] sm:$0xf] }
  0x62   : > { %1082 = vmatpush.bf16.msra.mxu0 %v1564_v53  ;;  %v1675_v9 = vld [vmem:[%s2570_s24 + $0x120] sm:$0xf]  ;;  %v2094_v10 = vld [vmem:[%s2570_s24 + $0x124] sm:$0xf0]  ;;  %v1612_v14 = vor.u32 %v2078_v8, %v1611_v6  ;;  %v2060_v17 = vld [vmem:[%s2570_s24 + $0x14] sm:$0xf0] }
  0x63   : > { %1096 = vmatpush.bf16.msra.mxu1 %v1628_v54  ;;  %v1739_v11 = vld [vmem:[%s2570_s24 + $0x1a0] sm:$0xf]  ;;  %v2110_v12 = vld [vmem:[%s2570_s24 + $0x1a4] sm:$0xf0]  ;;  %v1676_v15 = vor.u32 %v2094_v10, %v1675_v9  ;;  %v1603_v18 = vld [vmem:[%s2570_s24 + $0x90] sm:$0xf]  ;;  %v1540_v25 = vor.u32 %v2060_v17, %v1539_v16 }
  0x64   : > { %1110 = vmatpush.bf16.msra.mxu2 %v1692_v55  ;;  %v1740_v19 = vor.u32 %v2110_v12, %v1739_v11  ;;  %v2076_v20 = vld [vmem:[%s2570_s24 + $0x94] sm:$0xf0]  ;;  %v1667_v21 = vld [vmem:[%s2570_s24 + $0x110] sm:$0xf]  ;;  %v1531_v26 = vld [vmem:[%s2570_s24] sm:$0xf] }
  0x65   : > { %1124 = vmatpush.bf16.msra.mxu3 %v1756_v59  ;;  %v2092_v22 = vld [vmem:[%s2570_s24 + $0x114] sm:$0xf0]  ;;  %v1731_v23 = vld [vmem:[%s2570_s24 + $0x190] sm:$0xf]  ;;  %v2058_v27 = vld [vmem:[%s2570_s24 + $0x4] sm:$0xf0]  ;;  %v1604_v28 = vor.u32 %v2076_v20, %v1603_v18 }
  0x66   : > { %1083 = vmatpush.bf16.msra.mxu0 %v1556_v1  ;;  %v2108_v24 = vld [vmem:[%s2570_s24 + $0x194] sm:$0xf0]  ;;  %v1668_v29 = vor.u32 %v2092_v22, %v1667_v21  ;;  %v1595_v30 = vld [vmem:[%s2570_s24 + $0x80] sm:$0xf]  ;;  %v2074_v31 = vld [vmem:[%s2570_s24 + $0x84] sm:$0xf0]  ;;  %v1532_v40 = vor.u32 %v2058_v27, %v1531_v26 }
  0x67   : > { %1097 = vmatpush.bf16.msra.mxu1 %v1620_v2  ;;  %v1659_v32 = vld [vmem:[%s2570_s24 + $0x100] sm:$0xf]  ;;  %v1732_v33 = vor.u32 %v2108_v24, %v1731_v23  ;;  %v2090_v34 = vld [vmem:[%s2570_s24 + $0x104] sm:$0xf0]  ;;  %v1843_v37 = vld [vmem:[%s2570_s24 + $0x270] sm:$0xf]  ;;  %v1596_v44 = vor.u32 %v2074_v31, %v1595_v30 }
  0x68   : > { %1111 = vmatpush.bf16.msra.mxu2 %v1684_v3  ;;  %v1723_v35 = vld [vmem:[%s2570_s24 + $0x180] sm:$0xf]  ;;  %v2106_v36 = vld [vmem:[%s2570_s24 + $0x184] sm:$0xf0]  ;;  %v2136_v38 = vld [vmem:[%s2570_s24 + $0x274] sm:$0xf0]  ;;  %v1660_v45 = vor.u32 %v2090_v34, %v1659_v32 }
  0x69   : > { %1125 = vmatpush.bf16.msra.mxu3 %v1748_v7  ;;  %v1907_v39 = vld [vmem:[%s2570_s24 + $0x2f0] sm:$0xf]  ;;  %v2152_v41 = vld [vmem:[%s2570_s24 + $0x2f4] sm:$0xf0]  ;;  %v1724_v48 = vor.u32 %v2106_v36, %v1723_v35  ;;  %v1844_v49 = vor.u32 %v2136_v38, %v1843_v37  ;;  %v1835_v50 = vld [vmem:[%s2570_s24 + $0x260] sm:$0xf] }
  0x6a   : > { %1084 = vmatpush.bf16.msra.mxu0 %v1548_v13  ;;  %v1971_v42 = vld [vmem:[%s2570_s24 + $0x370] sm:$0xf]  ;;  %v2168_v43 = vld [vmem:[%s2570_s24 + $0x374] sm:$0xf0]  ;;  %v2134_v51 = vld [vmem:[%s2570_s24 + $0x264] sm:$0xf0]  ;;  %v1908_v52 = vor.u32 %v2152_v41, %v1907_v39 }
  0x6b   : > { %1098 = vmatpush.bf16.msra.mxu1 %v1612_v14  ;;  %v2035_v46 = vld [vmem:[%s2570_s24 + $0x3f0] sm:$0xf]  ;;  %v2184_v47 = vld [vmem:[%s2570_s24 + $0x3f4] sm:$0xf0]  ;;  %v1972_v53 = vor.u32 %v2168_v43, %v1971_v42  ;;  %v1899_v54 = vld [vmem:[%s2570_s24 + $0x2e0] sm:$0xf]  ;;  %v1836_v0 = vor.u32 %v2134_v51, %v1835_v50 }
  0x6c   : > { %1112 = vmatpush.bf16.msra.mxu2 %v1676_v15  ;;  %v2150_v55 = vld [vmem:[%s2570_s24 + $0x2e4] sm:$0xf0]  ;;  %v1963_v56 = vld [vmem:[%s2570_s24 + $0x360] sm:$0xf]  ;;  %v2036_v57 = vor.u32 %v2184_v47, %v2035_v46  ;;  %v1827_v1 = vld [vmem:[%s2570_s24 + $0x250] sm:$0xf] }
  0x6d   : > { %1126 = vmatpush.bf16.msra.mxu3 %v1740_v19  ;;  %v2166_v58 = vld [vmem:[%s2570_s24 + $0x364] sm:$0xf0]  ;;  %v2027_v59 = vld [vmem:[%s2570_s24 + $0x3e0] sm:$0xf]  ;;  %v2132_v2 = vld [vmem:[%s2570_s24 + $0x254] sm:$0xf0]  ;;  %v1900_v5 = vor.u32 %v2150_v55, %v1899_v54 }
  0x6e   : > { %1085 = vmatpush.bf16.msra.mxu0 %v1540_v25  ;;  %v2182_v60 = vld [vmem:[%s2570_s24 + $0x3e4] sm:$0xf0]  ;;  %v1499_v61 = vld [vmem:[%s2568_s26] sm:$0xf]  ;;  %v1964_v6 = vor.u32 %v2166_v58, %v1963_v56  ;;  %v1891_v7 = vld [vmem:[%s2570_s24 + $0x2d0] sm:$0xf]  ;;  %v1828_v18 = vor.u32 %v2132_v2, %v1827_v1 }
  0x6f   : > { %1099 = vmatpush.bf16.msra.mxu1 %v1604_v28  ;;  %v2053_v62 = vld [vmem:[%s2568_s26 + $0x1c] sm:$0xf0]  ;;  %v1507_v63 = vld [vmem:[%s2568_s26 + $0x8] sm:$0xf]  ;;  %v2148_v8 = vld [vmem:[%s2570_s24 + $0x2d4] sm:$0xf0]  ;;  %v2028_v11 = vor.u32 %v2182_v60, %v2027_v59 }
  0x70   : > { %1113 = vmatpush.bf16.msra.mxu2 %v1668_v29  ;;  %v2665_v3 = vor.u32 %v2053_v62, %v1499_v61  ;;  %v2054_v4 = vld [vmem:[%s2568_s26 + $0x24] sm:$0xf0]  ;;  %v1955_v9 = vld [vmem:[%s2570_s24 + $0x350] sm:$0xf]  ;;  %v2164_v12 = vld [vmem:[%s2570_s24 + $0x354] sm:$0xf0]  ;;  %v1892_v21 = vor.u32 %v2148_v8, %v1891_v7 }
  0x71   : > { %1127 = vmatpush.bf16.msra.mxu3 %v1732_v33  ;;  %v2671_v10 = vor.u32 %v2054_v4, %v1507_v63  ;;  %v2019_v13 = vld [vmem:[%s2570_s24 + $0x3d0] sm:$0xf]  ;;  %v2180_v14 = vld [vmem:[%s2570_s24 + $0x3d4] sm:$0xf0]  ;;  %v2049_v15 = vld [vmem:[%s2568_s26 + $0x4] sm:$0xf]  ;;  %v1956_v22 = vor.u32 %v2164_v12, %v1955_v9 }
  0x72   : > { %1086 = vmatpush.bf16.msra.mxu0 %v1532_v40  ;;  %v1501_v16 = vld [vmem:[%s2568_s26 + $0x20] sm:$0xf0]  ;;  %v2050_v17 = vld [vmem:[%s2568_s26 + $0xc] sm:$0xf]  ;;  %v1819_v23 = vld [vmem:[%s2570_s24 + $0x240] sm:$0xf]  ;;  %v2020_v27 = vor.u32 %v2180_v14, %v2019_v13 }
  0x73   : > { %1100 = vmatpush.bf16.msra.mxu1 %v1596_v44  ;;  %v2681_v19 = vor.u32 %v2049_v15, %v1501_v16  ;;  %v1509_v20 = vld [vmem:[%s2568_s26 + $0x28] sm:$0xf0]  ;;  %v2130_v24 = vld [vmem:[%s2570_s24 + $0x244] sm:$0xf0]  ;;  %v1883_v25 = vld [vmem:[%s2570_s24 + $0x2c0] sm:$0xf] }
  0x74   : > { %1114 = vmatpush.bf16.msra.mxu2 %v1660_v45  ;;  %v2687_v26 = vor.u32 %v2050_v17, %v1509_v20  ;;  %v2146_v28 = vld [vmem:[%s2570_s24 + $0x2c4] sm:$0xf0]  ;;  %v1947_v29 = vld [vmem:[%s2570_s24 + $0x340] sm:$0xf]  ;;  %v1820_v33 = vor.u32 %v2130_v24, %v1819_v23  ;;  %v1811_v36 = vld [vmem:[%s2570_s24 + $0x230] sm:$0xf] }
  0x75   : > { %1128 = vmatpush.bf16.msra.mxu3 %v1724_v48  ;;  %1087 = vmatmul.bf16.vlgmr.msra.gmra.mxu0 %v2665_v3  ;;  %v2162_v30 = vld [vmem:[%s2570_s24 + $0x344] sm:$0xf0]  ;;  %v2011_v31 = vld [vmem:[%s2570_s24 + $0x3c0] sm:$0xf]  ;;  %v1884_v34 = vor.u32 %v2146_v28, %v1883_v25  ;;  %v2128_v37 = vld [vmem:[%s2570_s24 + $0x234] sm:$0xf0] }
  0x76   : > { %1135 = vmatpush.bf16.msrb.mxu0 %v1844_v49  ;;  %1101 = vmatmul.bf16.vlgmr.msra.gmra.mxu1 %v2681_v19  ;;  %v2178_v32 = vld [vmem:[%s2570_s24 + $0x3c4] sm:$0xf0]  ;;  %v1948_v35 = vor.u32 %v2162_v30, %v1947_v29  ;;  %v1875_v38 = vld [vmem:[%s2570_s24 + $0x2b0] sm:$0xf]  ;;  %v2144_v40 = vld [vmem:[%s2570_s24 + $0x2b4] sm:$0xf0]  ;;  %v1812_v45 = vor.u32 %v2128_v37, %v1811_v36 }
  0x77   : > { %1149 = vmatpush.bf16.msrb.mxu1 %v1908_v52  ;;  %1115 = vmatmul.bf16.vlgmr.msra.gmra.mxu2 %v2671_v10  ;;  %v2012_v39 = vor.u32 %v2178_v32, %v2011_v31  ;;  %v1939_v41 = vld [vmem:[%s2570_s24 + $0x330] sm:$0xf]  ;;  %v2160_v42 = vld [vmem:[%s2570_s24 + $0x334] sm:$0xf0]  ;;  %v1876_v46 = vor.u32 %v2144_v40, %v1875_v38  ;;  %v1803_v48 = vld [vmem:[%s2570_s24 + $0x220] sm:$0xf] }
  0x78   : > { %1163 = vmatpush.bf16.msrb.mxu2 %v1972_v53  ;;  %1129 = vmatmul.bf16.vlgmr.msra.gmra.mxu3 %v2687_v26  ;;  %v2003_v43 = vld [vmem:[%s2570_s24 + $0x3b0] sm:$0xf]  ;;  %v2176_v44 = vld [vmem:[%s2570_s24 + $0x3b4] sm:$0xf0]  ;;  %v1940_v47 = vor.u32 %v2160_v42, %v1939_v41  ;;  %v2126_v49 = vld [vmem:[%s2570_s24 + $0x224] sm:$0xf0] }
  0x79   : > { %1177 = vmatpush.bf16.msrb.mxu3 %v2036_v57  ;;  %v1867_v50 = vld [vmem:[%s2570_s24 + $0x2a0] sm:$0xf]  ;;  %v2004_v51 = vor.u32 %v2176_v44, %v2003_v43  ;;  %v2142_v52 = vld [vmem:[%s2570_s24 + $0x2a4] sm:$0xf0]  ;;  %v1804_v57 = vor.u32 %v2126_v49, %v1803_v48  ;;  %v1795_v58 = vld [vmem:[%s2570_s24 + $0x210] sm:$0xf] }
  0x7a   : > { %1136 = vmatpush.bf16.msrb.mxu0 %v1836_v0  ;;  %v1931_v53 = vld [vmem:[%s2570_s24 + $0x320] sm:$0xf]  ;;  %v2158_v54 = vld [vmem:[%s2570_s24 + $0x324] sm:$0xf0]  ;;  %v1868_v59 = vor.u32 %v2142_v52, %v1867_v50  ;;  %v2124_v61 = vld [vmem:[%s2570_s24 + $0x214] sm:$0xf0] }
  0x7b   : > { %1150 = vmatpush.bf16.msrb.mxu1 %v1900_v5  ;;  %v1995_v55 = vld [vmem:[%s2570_s24 + $0x3a0] sm:$0xf]  ;;  %v2174_v56 = vld [vmem:[%s2570_s24 + $0x3a4] sm:$0xf0]  ;;  %v1932_v60 = vor.u32 %v2158_v54, %v1931_v53  ;;  %v1859_v62 = vld [vmem:[%s2570_s24 + $0x290] sm:$0xf]  ;;  %v1796_v8 = vor.u32 %v2124_v61, %v1795_v58 }
  0x7c   : > { %1164 = vmatpush.bf16.msrb.mxu2 %v1964_v6  ;;  %v2140_v63 = vld [vmem:[%s2570_s24 + $0x294] sm:$0xf0]  ;;  %v1996_v0 = vor.u32 %v2174_v56, %v1995_v55  ;;  %v1923_v1 = vld [vmem:[%s2570_s24 + $0x310] sm:$0xf]  ;;  %v1787_v6 = vld [vmem:[%s2570_s24 + $0x200] sm:$0xf] }
  0x7d   : > { %1178 = vmatpush.bf16.msrb.mxu3 %v2028_v11  ;;  %v2156_v2 = vld [vmem:[%s2570_s24 + $0x314] sm:$0xf0]  ;;  %v1987_v4 = vld [vmem:[%s2570_s24 + $0x390] sm:$0xf]  ;;  %v2122_v7 = vld [vmem:[%s2570_s24 + $0x204] sm:$0xf0]  ;;  %v1860_v14 = vor.u32 %v2140_v63, %v1859_v62 }
  0x7e   : > { %1137 = vmatpush.bf16.msrb.mxu0 %v1828_v18  ;;  %v2172_v5 = vld [vmem:[%s2570_s24 + $0x394] sm:$0xf0]  ;;  %v1851_v9 = vld [vmem:[%s2570_s24 + $0x280] sm:$0xf]  ;;  %v2138_v11 = vld [vmem:[%s2570_s24 + $0x284] sm:$0xf0]  ;;  %v1924_v15 = vor.u32 %v2156_v2, %v1923_v1  ;;  %v1788_v28 = vor.u32 %v2122_v7, %v1787_v6 }
  0x7f   : > { %1151 = vmatpush.bf16.msrb.mxu1 %v1892_v21  ;;  %v1915_v12 = vld [vmem:[%s2570_s24 + $0x300] sm:$0xf]  ;;  %v2154_v13 = vld [vmem:[%s2570_s24 + $0x304] sm:$0xf0]  ;;  %v2071_v18 = vld [vmem:[%s2570_s24 + $0x74] sm:$0xf]  ;;  %v1988_v20 = vor.u32 %v2172_v5, %v1987_v4  ;;  %v1852_v32 = vor.u32 %v2138_v11, %v1851_v9 }
  0x80   : > { %1165 = vmatpush.bf16.msrb.mxu2 %v1956_v22  ;;  %v1979_v16 = vld [vmem:[%s2570_s24 + $0x380] sm:$0xf]  ;;  %v2170_v17 = vld [vmem:[%s2570_s24 + $0x384] sm:$0xf0]  ;;  %v1589_v21 = vld [vmem:[%s2570_s24 + $0x78] sm:$0xf0] }
  0x81   : > { %1179 = vmatpush.bf16.msrb.mxu3 %v2020_v27  ;;  %v2087_v22 = vld [vmem:[%s2570_s24 + $0xf4] sm:$0xf]  ;;  %v1653_v23 = vld [vmem:[%s2570_s24 + $0xf8] sm:$0xf0]  ;;  %v1515_v30 = vld [vmem:[%s2568_s26 + $0x10] sm:$0xf]  ;;  %v1980_v37 = vor.u32 %v2170_v17, %v1979_v16  ;;  %v1592_v38 = vor.u32 %v2071_v18, %v1589_v21 }
  0x82   : > { %1138 = vmatpush.bf16.msrb.mxu0 %v1820_v33  ;;  %v2103_v24 = vld [vmem:[%s2570_s24 + $0x174] sm:$0xf]  ;;  %v1717_v25 = vld [vmem:[%s2570_s24 + $0x178] sm:$0xf0]  ;;  %v2055_v31 = vld [vmem:[%s2568_s26 + $0x2c] sm:$0xf0]  ;;  %v1916_v33 = vor.u32 %v2154_v13, %v1915_v12  ;;  %v1656_v42 = vor.u32 %v2087_v22, %v1653_v23 }
  0x83   : > { %1152 = vmatpush.bf16.msrb.mxu1 %v1884_v34  ;;  %v2119_v27 = vld [vmem:[%s2570_s24 + $0x1f4] sm:$0xf]  ;;  %v1781_v29 = vld [vmem:[%s2570_s24 + $0x1f8] sm:$0xf0]  ;;  %v1523_v34 = vld [vmem:[%s2568_s26 + $0x18] sm:$0xf]  ;;  %v1720_v43 = vor.u32 %v2103_v24, %v1717_v25  ;;  %v2747_v48 = vor.u32 %v2055_v31, %v1515_v30 }
  0x84   : > { %1166 = vmatpush.bf16.msrb.mxu2 %v1948_v35  ;;  %v2056_v35 = vld [vmem:[%s2568_s26 + $0x34] sm:$0xf0]  ;;  %v2051_v36 = vld [vmem:[%s2568_s26 + $0x14] sm:$0xf]  ;;  %v2052_v40 = vld [vmem:[%s2568_s26 + $0x1c] sm:$0xf] }
  0x85   : > { %1180 = vmatpush.bf16.msrb.mxu3 %v2012_v39  ;;  %v1517_v39 = vld [vmem:[%s2568_s26 + $0x30] sm:$0xf0]  ;;  %v1525_v41 = vld [vmem:[%s2568_s26 + $0x38] sm:$0xf0]  ;;  %v2069_v44 = vld [vmem:[%s2570_s24 + $0x64] sm:$0xf]  ;;  %v2752_v52 = vor.u32 %v2056_v35, %v1523_v34 }
  0x86   : > { %1139 = vmatpush.bf16.msrb.mxu0 %v1812_v45  ;;  %v1581_v45 = vld [vmem:[%s2570_s24 + $0x68] sm:$0xf0]  ;;  %v2101_v50 = vld [vmem:[%s2570_s24 + $0x164] sm:$0xf]  ;;  %v2754_v53 = vor.u32 %v2051_v36, %v1517_v39  ;;  %v2758_v56 = vor.u32 %v2052_v40, %v1525_v41  ;;  %v1573_v61 = vld [vmem:[%s2570_s24 + $0x58] sm:$0xf0] }
  0x87   : > { %1153 = vmatpush.bf16.msrb.mxu1 %v1876_v46  ;;  %v2085_v46 = vld [vmem:[%s2570_s24 + $0xe4] sm:$0xf]  ;;  %v1645_v49 = vld [vmem:[%s2570_s24 + $0xe8] sm:$0xf0]  ;;  %v2083_v62 = vld [vmem:[%s2570_s24 + $0xd4] sm:$0xf] }
  0x88   : > { %1167 = vmatpush.bf16.msrb.mxu2 %v1940_v47  ;;  %v1784_v47 = vor.u32 %v2119_v27, %v1781_v29  ;;  %v2117_v54 = vld [vmem:[%s2570_s24 + $0x1e4] sm:$0xf]  ;;  %v1773_v55 = vld [vmem:[%s2570_s24 + $0x1e8] sm:$0xf0]  ;;  %v1648_v58 = vor.u32 %v2085_v46, %v1645_v49  ;;  %v2099_v1 = vld [vmem:[%s2570_s24 + $0x154] sm:$0xf] }
  0x89   : > { %1181 = vmatpush.bf16.msrb.mxu3 %v2004_v51  ;;  %v1709_v51 = vld [vmem:[%s2570_s24 + $0x168] sm:$0xf0]  ;;  %v1776_v63 = vor.u32 %v2117_v54, %v1773_v55  ;;  %v1701_v2 = vld [vmem:[%s2570_s24 + $0x158] sm:$0xf0]  ;;  %v2115_v4 = vld [vmem:[%s2570_s24 + $0x1d4] sm:$0xf] }
  0x8a   : > { %1140 = vmatpush.bf16.msrb.mxu0 %v1804_v57  ;;  %v1584_v57 = vor.u32 %v2069_v44, %v1581_v45  ;;  %v1765_v5 = vld [vmem:[%s2570_s24 + $0x1d8] sm:$0xf0]  ;;  %v2065_v9 = vld [vmem:[%s2570_s24 + $0x44] sm:$0xf]  ;;  %v1565_v11 = vld [vmem:[%s2570_s24 + $0x48] sm:$0xf0] }
  0x8b   : > { %1154 = vmatpush.bf16.msrb.mxu1 %v1868_v59  ;;  %v1712_v59 = vor.u32 %v2101_v50, %v1709_v51  ;;  %v2081_v12 = vld [vmem:[%s2570_s24 + $0xc4] sm:$0xf]  ;;  %v1768_v13 = vor.u32 %v2115_v4, %v1765_v5  ;;  %v1693_v16 = vld [vmem:[%s2570_s24 + $0x148] sm:$0xf0]  ;;  %v2063_v23 = vld [vmem:[%s2570_s24 + $0x34] sm:$0xf] }
  0x8c   : > { %1168 = vmatpush.bf16.msrb.mxu2 %v1932_v60  ;;  %v2067_v60 = vld [vmem:[%s2570_s24 + $0x54] sm:$0xf]  ;;  %v2113_v17 = vld [vmem:[%s2570_s24 + $0x1c4] sm:$0xf]  ;;  %v1757_v18 = vld [vmem:[%s2570_s24 + $0x1c8] sm:$0xf0] }
  0x8d   : > { %1182 = vmatpush.bf16.msrb.mxu3 %v1996_v0  ;;  %v1637_v0 = vld [vmem:[%s2570_s24 + $0xd8] sm:$0xf0]  ;;  %v1576_v6 = vor.u32 %v2067_v60, %v1573_v61  ;;  %v2079_v25 = vld [vmem:[%s2570_s24 + $0xb4] sm:$0xf]  ;;  %v1760_v27 = vor.u32 %v2113_v17, %v1757_v18  ;;  %v2061_v36 = vld [vmem:[%s2570_s24 + $0x24] sm:$0xf] }
  0x8e   : > { %1141 = vmatpush.bf16.msrb.mxu0 %v1796_v8  ;;  %v1640_v7 = vor.u32 %v2083_v62, %v1637_v0  ;;  %v1704_v8 = vor.u32 %v2099_v1, %v1701_v2  ;;  %v1557_v24 = vld [vmem:[%s2570_s24 + $0x38] sm:$0xf0]  ;;  %v2095_v29 = vld [vmem:[%s2570_s24 + $0x134] sm:$0xf]  ;;  %v1613_v40 = vld [vmem:[%s2570_s24 + $0xa8] sm:$0xf0] }
  0x8f   : > { %1155 = vmatpush.bf16.msrb.mxu1 %v1860_v14  ;;  %v1629_v14 = vld [vmem:[%s2570_s24 + $0xc8] sm:$0xf0]  ;;  %v1685_v30 = vld [vmem:[%s2570_s24 + $0x138] sm:$0xf0]  ;;  %v2111_v31 = vld [vmem:[%s2570_s24 + $0x1b4] sm:$0xf] }
  0x90   : > { %1169 = vmatpush.bf16.msrb.mxu2 %v1924_v15  ;;  %v2097_v15 = vld [vmem:[%s2570_s24 + $0x144] sm:$0xf]  ;;  %v1632_v21 = vor.u32 %v2081_v12, %v1629_v14  ;;  %v1688_v35 = vor.u32 %v2095_v29, %v1685_v30  ;;  %v1741_v44 = vld [vmem:[%s2570_s24 + $0x1a8] sm:$0xf0]  ;;  %v2059_v49 = vld [vmem:[%s2570_s24 + $0x14] sm:$0xf] }
  0x91   : > { %1183 = vmatpush.bf16.msrb.mxu3 %v1988_v20  ;;  %v1568_v20 = vor.u32 %v2065_v9, %v1565_v11  ;;  %v1696_v22 = vor.u32 %v2097_v15, %v1693_v16  ;;  %v2093_v41 = vld [vmem:[%s2570_s24 + $0x124] sm:$0xf]  ;;  %v1541_v50 = vld [vmem:[%s2570_s24 + $0x18] sm:$0xf0]  ;;  %v2075_v51 = vld [vmem:[%s2570_s24 + $0x94] sm:$0xf] }
  0x92   : > { %1142 = vmatpush.bf16.msrb.mxu0 %v1788_v28  ;;  %v1621_v28 = vld [vmem:[%s2570_s24 + $0xb8] sm:$0xf0]  ;;  %v1544_v61 = vor.u32 %v2059_v49, %v1541_v50  ;;  %v2057_v62 = vld [vmem:[%s2570_s24 + $0x4] sm:$0xf]  ;;  %v1597_v4 = vld [vmem:[%s2570_s24 + $0x88] sm:$0xf0] }
  0x93   : > { %1156 = vmatpush.bf16.msrb.mxu1 %v1852_v32  ;;  %v1749_v32 = vld [vmem:[%s2570_s24 + $0x1b8] sm:$0xf0]  ;;  %v1624_v34 = vor.u32 %v2079_v25, %v1621_v28  ;;  %v2073_v2 = vld [vmem:[%s2570_s24 + $0x84] sm:$0xf]  ;;  %v1725_v9 = vld [vmem:[%s2570_s24 + $0x188] sm:$0xf0] }
  0x94   : > { %1170 = vmatpush.bf16.msrb.mxu2 %v1916_v33  ;;  %v1560_v33 = vor.u32 %v2063_v23, %v1557_v24  ;;  %v1752_v39 = vor.u32 %v2111_v31, %v1749_v32  ;;  %v1605_v55 = vld [vmem:[%s2570_s24 + $0x98] sm:$0xf0]  ;;  %v2089_v5 = vld [vmem:[%s2570_s24 + $0x104] sm:$0xf]  ;;  %v2135_v11 = vld [vmem:[%s2570_s24 + $0x274] sm:$0xf]  ;;  %v1600_v18 = vor.u32 %v2073_v2, %v1597_v4 }
  0x95   : > { %1184 = vmatpush.bf16.msrb.mxu3 %v1980_v37  ;;  %1143 = vmatmul.bf16.vlgmr.msrb.gmra.mxu0 %v2747_v48  ;;  %v1549_v37 = vld [vmem:[%s2570_s24 + $0x28] sm:$0xf0]  ;;  %v1733_v60 = vld [vmem:[%s2570_s24 + $0x198] sm:$0xf0]  ;;  %v1608_v0 = vor.u32 %v2075_v51, %v1605_v55  ;;  %v2167_v16 = vld [vmem:[%s2570_s24 + $0x374] sm:$0xf] }
  0x96   : > { %1191 = vmatpush.bf16.msra.mxu0 %v1592_v38  ;;  %1157 = vmatmul.bf16.vlgmr.msrb.gmra.mxu1 %v2754_v53  ;;  %v2077_v38 = vld [vmem:[%s2570_s24 + $0xa4] sm:$0xf]  ;;  %v1552_v45 = vor.u32 %v2061_v36, %v1549_v37  ;;  %v1845_v12 = vld [vmem:[%s2570_s24 + $0x278] sm:$0xf0]  ;;  %v1837_v29 = vld [vmem:[%s2570_s24 + $0x268] sm:$0xf0] }
  0x97   : > { %1205 = vmatpush.bf16.msra.mxu1 %v1656_v42  ;;  %1171 = vmatmul.bf16.vlgmr.msrb.gmra.mxu2 %v2752_v52  ;;  %v1677_v42 = vld [vmem:[%s2570_s24 + $0x128] sm:$0xf0]  ;;  %v1616_v46 = vor.u32 %v2077_v38, %v1613_v40  ;;  %v1909_v15 = vld [vmem:[%s2570_s24 + $0x2f8] sm:$0xf0]  ;;  %v1848_v24 = vor.u32 %v2135_v11, %v1845_v12  ;;  %v2133_v28 = vld [vmem:[%s2570_s24 + $0x264] sm:$0xf] }
  0x98   : > { %1219 = vmatpush.bf16.msra.mxu2 %v1720_v43  ;;  %1185 = vmatmul.bf16.vlgmr.msrb.gmra.mxu3 %v2758_v56  ;;  %v2109_v43 = vld [vmem:[%s2570_s24 + $0x1a4] sm:$0xf]  ;;  %v1973_v17 = vld [vmem:[%s2570_s24 + $0x378] sm:$0xf0]  ;;  %v1901_v32 = vld [vmem:[%s2570_s24 + $0x2e8] sm:$0xf0]  ;;  %v1840_v37 = vor.u32 %v2133_v28, %v1837_v29 }
  0x99   : > { %1233 = vmatpush.bf16.msra.mxu3 %v1784_v47  ;;  %v1680_v47 = vor.u32 %v2093_v41, %v1677_v42  ;;  %v1744_v54 = vor.u32 %v2109_v43, %v1741_v44  ;;  %v2149_v30 = vld [vmem:[%s2570_s24 + $0x2e4] sm:$0xf]  ;;  %v2029_v36 = vld [vmem:[%s2570_s24 + $0x3e8] sm:$0xf0]  ;;  %v2131_v40 = vld [vmem:[%s2570_s24 + $0x254] sm:$0xf] }
  0x9a   : > { %1192 = vmatpush.bf16.msra.mxu0 %v1584_v57  ;;  %v2091_v57 = vld [vmem:[%s2570_s24 + $0x114] sm:$0xf]  ;;  %v1904_v38 = vor.u32 %v2149_v30, %v1901_v32  ;;  %v1829_v41 = vld [vmem:[%s2570_s24 + $0x258] sm:$0xf0]  ;;  %v2145_v55 = vld [vmem:[%s2570_s24 + $0x2c4] sm:$0xf] }
  0x9b   : > { %1206 = vmatpush.bf16.msra.mxu1 %v1648_v58  ;;  %v1669_v58 = vld [vmem:[%s2570_s24 + $0x118] sm:$0xf0]  ;;  %v2147_v42 = vld [vmem:[%s2570_s24 + $0x2d4] sm:$0xf]  ;;  %v1832_v50 = vor.u32 %v2131_v40, %v1829_v41  ;;  %v2121_v40 = vld [vmem:[%s2570_s24 + $0x204] sm:$0xf] }
  0x9c   : > { %1220 = vmatpush.bf16.msra.mxu2 %v1712_v59  ;;  %v2107_v59 = vld [vmem:[%s2570_s24 + $0x194] sm:$0xf]  ;;  %v1672_v1 = vor.u32 %v2091_v57, %v1669_v58  ;;  %v1893_v44 = vld [vmem:[%s2570_s24 + $0x2d8] sm:$0xf0]  ;;  %v1885_v58 = vld [vmem:[%s2570_s24 + $0x2c8] sm:$0xf0] }
  0x9d   : > { %1234 = vmatpush.bf16.msra.mxu3 %v1776_v63  ;;  %v1533_v63 = vld [vmem:[%s2570_s24 + $0x8] sm:$0xf0]  ;;  %v2021_v49 = vld [vmem:[%s2570_s24 + $0x3d8] sm:$0xf0]  ;;  %v2143_v2 = vld [vmem:[%s2570_s24 + $0x2b4] sm:$0xf] }
  0x9e   : > { %1193 = vmatpush.bf16.msra.mxu0 %v1576_v6  ;;  %v1736_v6 = vor.u32 %v2107_v59, %v1733_v60  ;;  %v1536_v14 = vor.u32 %v2057_v62, %v1533_v63  ;;  %v1949_v59 = vld [vmem:[%s2570_s24 + $0x348] sm:$0xf0]  ;;  %v2177_v60 = vld [vmem:[%s2570_s24 + $0x3c4] sm:$0xf]  ;;  %v1888_v62 = vor.u32 %v2145_v55, %v1885_v58  ;;  %v2123_v28 = vld [vmem:[%s2570_s24 + $0x214] sm:$0xf] }
  0x9f   : > { %1207 = vmatpush.bf16.msra.mxu1 %v1640_v7  ;;  %v1661_v7 = vld [vmem:[%s2570_s24 + $0x108] sm:$0xf0]  ;;  %v1797_v29 = vld [vmem:[%s2570_s24 + $0x218] sm:$0xf0]  ;;  %v2139_v30 = vld [vmem:[%s2570_s24 + $0x294] sm:$0xf] }
  0xa0   : > { %1221 = vmatpush.bf16.msra.mxu2 %v1704_v8  ;;  %v2105_v8 = vld [vmem:[%s2570_s24 + $0x184] sm:$0xf]  ;;  %v1861_v32 = vld [vmem:[%s2570_s24 + $0x298] sm:$0xf0]  ;;  %v1789_v41 = vld [vmem:[%s2570_s24 + $0x208] sm:$0xf0] }
  0xa1   : > { %1235 = vmatpush.bf16.msra.mxu3 %v1768_v13  ;;  %v2151_v13 = vld [vmem:[%s2570_s24 + $0x2f4] sm:$0xf]  ;;  %v1728_v23 = vor.u32 %v2105_v8, %v1725_v9  ;;  %v2005_v9 = vld [vmem:[%s2570_s24 + $0x3b8] sm:$0xf0]  ;;  %p2041_p7 = scmp.ne.s32.totalorder %s2398_s16, 8 }
  0xa2   : > { %1194 = vmatpush.bf16.msra.mxu0 %v1568_v20  ;;  %v1664_v20 = vor.u32 %v2089_v5, %v1661_v7  ;;  %v1912_v25 = vor.u32 %v2151_v13, %v1909_v15  ;;  %v1877_v5 = vld [vmem:[%s2570_s24 + $0x2b8] sm:$0xf0]  ;;  %v2175_v8 = vld [vmem:[%s2570_s24 + $0x3b4] sm:$0xf]  ;;  %v1805_v15 = vld [vmem:[%s2570_s24 + $0x228] sm:$0xf0] }
  0xa3   : > { %1208 = vmatpush.bf16.msra.mxu1 %v1632_v21  ;;  %v2183_v21 = vld [vmem:[%s2570_s24 + $0x3f4] sm:$0xf]  ;;  %v1941_v7 = vld [vmem:[%s2570_s24 + $0x338] sm:$0xf0]  ;;  %v1880_v12 = vor.u32 %v2143_v2, %v1877_v5 }
  0xa4   : > { %1222 = vmatpush.bf16.msra.mxu2 %v1696_v22  ;;  %v2037_v22 = vld [vmem:[%s2570_s24 + $0x3f8] sm:$0xf0] }
  0xa5   : > { %1236 = vmatpush.bf16.msra.mxu3 %v1760_v27  ;;  %v1976_v27 = vor.u32 %v2167_v16, %v1973_v17  ;;  %v2040_v31 = vor.u32 %v2183_v21, %v2037_v22  ;;  %v2141_v16 = vld [vmem:[%s2570_s24 + $0x2a4] sm:$0xf]  ;;  %v2008_v17 = vor.u32 %v2175_v8, %v2005_v9  ;;  %v1933_v21 = vld [vmem:[%s2570_s24 + $0x328] sm:$0xf0]  ;;  %v259_v8 = vld [vmem:[#allocation2 + $0x10] sm:$0xff] }
  0xa6   : > { %1195 = vmatpush.bf16.msra.mxu0 %v1560_v33  ;;  %v2165_v33 = vld [vmem:[%s2570_s24 + $0x364] sm:$0xf] }
  0xa7   : > { %1209 = vmatpush.bf16.msra.mxu1 %v1624_v34  ;;  %v1965_v34 = vld [vmem:[%s2570_s24 + $0x368] sm:$0xf0]  ;;  %v2173_v22 = vld [vmem:[%s2570_s24 + $0x3a4] sm:$0xf] }
  0xa8   : > { %1223 = vmatpush.bf16.msra.mxu2 %v1688_v35  ;;  %v2181_v35 = vld [vmem:[%s2570_s24 + $0x3e4] sm:$0xf] }
  0xa9   : > { %1237 = vmatpush.bf16.msra.mxu3 %v1752_v39  ;;  %v1968_v39 = vor.u32 %v2165_v33, %v1965_v34  ;;  %v2032_v43 = vor.u32 %v2181_v35, %v2029_v36  ;;  %v2155_v33 = vld [vmem:[%s2570_s24 + $0x314] sm:$0xf]  ;;  %v1925_v34 = vld [vmem:[%s2570_s24 + $0x318] sm:$0xf0] }
  0xaa   : > { %1196 = vmatpush.bf16.msra.mxu0 %v1552_v45  ;;  %v2163_v45 = vld [vmem:[%s2570_s24 + $0x354] sm:$0xf]  ;;  %v1989_v36 = vld [vmem:[%s2570_s24 + $0x398] sm:$0xf0] }
  0xab   : > { %1210 = vmatpush.bf16.msra.mxu1 %v1616_v46  ;;  %v1957_v46 = vld [vmem:[%s2570_s24 + $0x358] sm:$0xf0]  ;;  %v2171_v35 = vld [vmem:[%s2570_s24 + $0x394] sm:$0xf] }
  0xac   : > { %1224 = vmatpush.bf16.msra.mxu2 %v1680_v47  ;;  %v2179_v47 = vld [vmem:[%s2570_s24 + $0x3d4] sm:$0xf]  ;;  %v1960_v51 = vor.u32 %v2163_v45, %v1957_v46  ;;  %v2153_v45 = vld [vmem:[%s2570_s24 + $0x304] sm:$0xf]  ;;  %v1917_v46 = vld [vmem:[%s2570_s24 + $0x308] sm:$0xf0] }
  0xad   : > { %1238 = vmatpush.bf16.msra.mxu3 %v1744_v54  ;;  %v2129_v54 = vld [vmem:[%s2570_s24 + $0x244] sm:$0xf]  ;;  %v2024_v57 = vor.u32 %v2179_v47, %v2021_v49  ;;  %v1981_v49 = vld [vmem:[%s2570_s24 + $0x388] sm:$0xf0] }
  0xae   : > { %1197 = vmatpush.bf16.msra.mxu0 %v1544_v61  ;;  %v2169_v47 = vld [vmem:[%s2570_s24 + $0x384] sm:$0xf] }
  0xaf   : > { %1211 = vmatpush.bf16.msra.mxu1 %v1608_v0  ;;  %v2127_v0 = vld [vmem:[%s2570_s24 + $0x234] sm:$0xf] }
  0xb0   : > { %1225 = vmatpush.bf16.msra.mxu2 %v1672_v1  ;;  %v1813_v1 = vld [vmem:[%s2570_s24 + $0x238] sm:$0xf0] }
  0xb1   : > { %1239 = vmatpush.bf16.msra.mxu3 %v1736_v6  ;;  %v2159_v6 = vld [vmem:[%s2570_s24 + $0x334] sm:$0xf]  ;;  %v1816_v11 = vor.u32 %v2127_v0, %v1813_v1 }
  0xb2   : > { %1198 = vmatpush.bf16.msra.mxu0 %v1536_v14  ;;  %v1944_v13 = vor.u32 %v2159_v6, %v1941_v7  ;;  %v2125_v14 = vld [vmem:[%s2570_s24 + $0x224] sm:$0xf] }
  0xb3   : > { %1212 = vmatpush.bf16.msra.mxu1 %v1600_v18  ;;  %v1869_v18 = vld [vmem:[%s2570_s24 + $0x2a8] sm:$0xf0] }
  0xb4   : > { %1226 = vmatpush.bf16.msra.mxu2 %v1664_v20  ;;  %v2157_v20 = vld [vmem:[%s2570_s24 + $0x324] sm:$0xf] }
  0xb5   : > { %1240 = vmatpush.bf16.msra.mxu3 %v1728_v23  ;;  %1199 = vmatmul.bf16.vlgmr.msra.gmra.mxu0 %v2665_v3  ;;  %v2161_v3 = vld [vmem:[%s2570_s24 + $0x344] sm:$0xf]  ;;  %v1997_v23 = vld [vmem:[%s2570_s24 + $0x3a8] sm:$0xf0] }
  0xb6   : > { %1247 = vmatpush.bf16.msrb.mxu0 %v1848_v24  ;;  %1213 = vmatmul.bf16.vlgmr.msra.gmra.mxu1 %v2681_v19  ;;  %v2013_v19 = vld [vmem:[%s2570_s24 + $0x3c8] sm:$0xf0]  ;;  %v1952_v63 = vor.u32 %v2161_v3, %v1949_v59  ;;  %v1808_v24 = vor.u32 %v2125_v14, %v1805_v15 }
  0xb7   : > { %1261 = vmatpush.bf16.msrb.mxu1 %v1912_v25  ;;  %1227 = vmatmul.bf16.vlgmr.msra.gmra.mxu2 %v2671_v10  ;;  %v1896_v10 = vor.u32 %v2147_v42, %v1893_v44  ;;  %v2016_v4 = vor.u32 %v2177_v60, %v2013_v19  ;;  %v1872_v25 = vor.u32 %v2141_v16, %v1869_v18  ;;  %v2137_v42 = vld [vmem:[%s2570_s24 + $0x284] sm:$0xf]  ;;  %v1853_v44 = vld [vmem:[%s2570_s24 + $0x288] sm:$0xf0]  ;;  %v261_v18 = vld [vmem:[#allocation2 + $0x18] sm:$0xff] }
  0xb8   : > { %1275 = vmatpush.bf16.msrb.mxu2 %v1976_v27  ;;  %1241 = vmatmul.bf16.vlgmr.msra.gmra.mxu3 %v2687_v26  ;;  %v1821_v26 = vld [vmem:[%s2570_s24 + $0x248] sm:$0xf0]  ;;  %v1936_v27 = vor.u32 %v2157_v20, %v1933_v21 }
  0xb9   : > { %1289 = vmatpush.bf16.msrb.mxu3 %v2040_v31  ;;  %v1824_v61 = vor.u32 %v2129_v54, %v1821_v26  ;;  %v2000_v31 = vor.u32 %v2173_v22, %v1997_v23  ;;  %v1984_v54 = vor.u32 %v2169_v47, %v1981_v49 }
  0xba   : > { %1248 = vmatpush.bf16.msrb.mxu0 %v1840_v37  ;;  %v1800_v37 = vor.u32 %v2123_v28, %v1797_v29 }
  0xbb   : > { %1262 = vmatpush.bf16.msrb.mxu1 %v1904_v38  ;;  %v1864_v38 = vor.u32 %v2139_v30, %v1861_v32 }
  0xbc   : > { %1276 = vmatpush.bf16.msrb.mxu2 %v1968_v39  ;;  %v1928_v39 = vor.u32 %v2155_v33, %v1925_v34 }
  0xbd   : > { %1290 = vmatpush.bf16.msrb.mxu3 %v2032_v43  ;;  %v1992_v43 = vor.u32 %v2171_v35, %v1989_v36 }
  0xbe   : > { %1249 = vmatpush.bf16.msrb.mxu0 %v1832_v50  ;;  %v1792_v50 = vor.u32 %v2121_v40, %v1789_v41 }
  0xbf   : > { %1263 = vmatpush.bf16.msrb.mxu1 %v1896_v10  ;;  %v1856_v10 = vor.u32 %v2137_v42, %v1853_v44 }
  0xc0   : > { %1277 = vmatpush.bf16.msrb.mxu2 %v1960_v51  ;;  %v1920_v51 = vor.u32 %v2153_v45, %v1917_v46  ;;  %v260_v45 = vld [vmem:[#allocation2] sm:$0xff] }
  0xc1   : > { %1291 = vmatpush.bf16.msrb.mxu3 %v2024_v57 }
  0xc2   : > { %1250 = vmatpush.bf16.msrb.mxu0 %v1824_v61 }
  0xc3   : > { %1264 = vmatpush.bf16.msrb.mxu1 %v1888_v62 }
  0xc4   : > { %1278 = vmatpush.bf16.msrb.mxu2 %v1952_v63 }
  0xc5   : > { %1292 = vmatpush.bf16.msrb.mxu3 %v2016_v4 }
  0xc6   : > { %1251 = vmatpush.bf16.msrb.mxu0 %v1816_v11 }
  0xc7   : > { %1265 = vmatpush.bf16.msrb.mxu1 %v1880_v12 }
  0xc8   : > { %1279 = vmatpush.bf16.msrb.mxu2 %v1944_v13 }
  0xc9   : > { %1293 = vmatpush.bf16.msrb.mxu3 %v2008_v17 }
  0xca   : > { %1252 = vmatpush.bf16.msrb.mxu0 %v1808_v24 }
  0xcb   : > { %1266 = vmatpush.bf16.msrb.mxu1 %v1872_v25 }
  0xcc   : > { %1280 = vmatpush.bf16.msrb.mxu2 %v1936_v27 }
  0xcd   : > { %1294 = vmatpush.bf16.msrb.mxu3 %v2000_v31 }
  0xce   : > { %1253 = vmatpush.bf16.msrb.mxu0 %v1800_v37 }
  0xcf   : > { %1267 = vmatpush.bf16.msrb.mxu1 %v1864_v38 }
  0xd0   : > { %1281 = vmatpush.bf16.msrb.mxu2 %v1928_v39 }
  0xd1   : > { %1295 = vmatpush.bf16.msrb.mxu3 %v1992_v43 }
  0xd2   : > { %1254 = vmatpush.bf16.msrb.mxu0 %v1792_v50 }
  0xd3   : > { %1268 = vmatpush.bf16.msrb.mxu1 %v1856_v10 }
  0xd4   : > { %1282 = vmatpush.bf16.msrb.mxu2 %v1920_v51 }
  0xd5   : > { %1296 = vmatpush.bf16.msrb.mxu3 %v1984_v54  ;;  %1255 = vmatmul.bf16.vlgmr.msrb.gmra.mxu0 %v2747_v48 }
  0xd6   : > { %1269 = vmatmul.bf16.vlgmr.msrb.gmra.mxu1 %v2754_v53 }
  0xd7   : > { %1283 = vmatmul.bf16.vlgmr.msrb.gmra.mxu2 %v2752_v52 }
  0xd8   : > { %1297 = vmatmul.bf16.vlgmr.msrb.gmra.mxu3 %v2758_v56 }
  0xf2   : > { %v1088_v26 = vpop.f32.mrf.mxu0 }
  0xf3   : > { %v1102_v55 = vpop.f32.mrf.mxu1 }
  0xf4   : > { %v1103_v3 = vadd.f32 %v1102_v55, %v1088_v26  ;;  %v262_v26 = vld [vmem:[#allocation2 + $0x8] sm:$0xff] }
  0xfa   : > { %v1116_v57 = vpop.f32.mrf.mxu2  ;;  %v1090_v59 = vpop.f32.mrf.mxu0 }
  0xfb   : > { %v1130_v58 = vpop.f32.mrf.mxu3  ;;  %v1104_v60 = vpop.f32.mrf.mxu1  ;;  %v1117_v19 = vadd.f32 %v1116_v57, %v1103_v3 }
  0xfc   : > { %v1105_v0 = vadd.f32 %v1104_v60, %v1090_v59 }
  0xfd   : > { %v1131_v61 = vadd.f32 %v1130_v58, %v1117_v19 }
 0x102   : > { %v1118_v62 = vpop.f32.mrf.mxu2 }
 0x103   : > { %v1132_v63 = vpop.f32.mrf.mxu3  ;;  %v1119_v53 = vadd.f32 %v1118_v62, %v1105_v0 }
 0x105   : > { %v1133_v5 = vadd.f32 %v1132_v63, %v1119_v53 }
 0x112   : > { %v1144_v1 = vpop.f32.mrf.mxu0 }
 0x113   : > { %v1145_v48 = vadd.f32 %v1144_v1, %v1131_v61  ;;  %v1158_v2 = vpop.f32.mrf.mxu1 }
 0x115   : > { %v1159_v4 = vadd.f32 %v1158_v2, %v1145_v48 }
 0x11a   : > { %v1172_v52 = vpop.f32.mrf.mxu2  ;;  %v1146_v6 = vpop.f32.mrf.mxu0 }
 0x11b   : > { %v1173_v56 = vadd.f32 %v1172_v52, %v1159_v4  ;;  %v1186_v7 = vpop.f32.mrf.mxu3  ;;  %v1147_v9 = vadd.f32 %v1146_v6, %v1133_v5  ;;  %v1160_v12 = vpop.f32.mrf.mxu1 }
 0x11d   : > { %v1187_v11 = vadd.f32 %v1186_v7, %v1173_v56  ;;  %v1161_v14 = vadd.f32 %v1160_v12, %v1147_v9 }
 0x11f   : > { %v1303_v13 = vadd.f32 %v1187_v11, %v259_v8 }
 0x121   : > { %1307 = vst [vmem:[#allocation2 + $0x10] sm:$0xff] %v1303_v13 }
 0x122   : > { %v1174_v15 = vpop.f32.mrf.mxu2 }
 0x123   : > { %v1175_v16 = vadd.f32 %v1174_v15, %v1161_v14  ;;  %v1188_v17 = vpop.f32.mrf.mxu3 }
 0x125   : > { %v1189_v20 = vadd.f32 %v1188_v17, %v1175_v16 }
 0x127   : > { %v1305_v21 = vadd.f32 %v1189_v20, %v261_v18 }
 0x129   : > { %1309 = vst [vmem:[#allocation2 + $0x18] sm:$0xff] %v1305_v21 }
 0x132   : > { %v1200_v22 = vpop.f32.mrf.mxu0 }
 0x133   : > { %v1214_v23 = vpop.f32.mrf.mxu1 }
 0x134   : > { %v1215_v27 = vadd.f32 %v1214_v23, %v1200_v22 }
 0x13a   : > { %v1228_v24 = vpop.f32.mrf.mxu2  ;;  %v1202_v28 = vpop.f32.mrf.mxu0 }
 0x13b   : > { %v1242_v25 = vpop.f32.mrf.mxu3  ;;  %v1216_v29 = vpop.f32.mrf.mxu1  ;;  %v1229_v30 = vadd.f32 %v1228_v24, %v1215_v27 }
 0x13c   : > { %v1217_v33 = vadd.f32 %v1216_v29, %v1202_v28 }
 0x13d   : > { %v1243_v32 = vadd.f32 %v1242_v25, %v1229_v30 }
 0x142   : > { %v1230_v31 = vpop.f32.mrf.mxu2 }
 0x143   : > { %v1244_v34 = vpop.f32.mrf.mxu3  ;;  %v1231_v38 = vadd.f32 %v1230_v31, %v1217_v33 }
 0x145   : > { %v1245_v41 = vadd.f32 %v1244_v34, %v1231_v38 }
 0x152   : > { %v1256_v35 = vpop.f32.mrf.mxu0 }
 0x153   : > { %v1257_v36 = vadd.f32 %v1256_v35, %v1243_v32  ;;  %v1270_v37 = vpop.f32.mrf.mxu1 }
 0x155   : > { %v1271_v39 = vadd.f32 %v1270_v37, %v1257_v36 }
 0x15a   : > { %v1284_v40 = vpop.f32.mrf.mxu2  ;;  %v1258_v44 = vpop.f32.mrf.mxu0 }
 0x15b   : > { %v1285_v42 = vadd.f32 %v1284_v40, %v1271_v39  ;;  %v1298_v43 = vpop.f32.mrf.mxu3  ;;  %v1259_v47 = vadd.f32 %v1258_v44, %v1245_v41  ;;  %v1272_v50 = vpop.f32.mrf.mxu1 }
 0x15d   : > { %v1299_v46 = vadd.f32 %v1298_v43, %v1285_v42  ;;  %v1273_v10 = vadd.f32 %v1272_v50, %v1259_v47 }
 0x15f   : > { %v1304_v49 = vadd.f32 %v1299_v46, %v260_v45 }
 0x161   : > { %1308 = vst [vmem:[#allocation2] sm:$0xff] %v1304_v49 }
 0x162   : > { %v1286_v51 = vpop.f32.mrf.mxu2 }
 0x163   : > { %v1287_v54 = vadd.f32 %v1286_v51, %v1273_v10  ;;  %v1300_v55 = vpop.f32.mrf.mxu3 }
 0x165   : > { %v1301_v57 = vadd.f32 %v1300_v55, %v1287_v54  ;;  %1314 = sbr.rel (%p2041_p7) target bundleno = 374 (0x176), region = 63 }
 0x167   : > { %v1306_v58 = vadd.f32 %v1301_v57, %v262_v26 }
 0x169   : > { %1310 = vst [vmem:[#allocation2 + $0x8] sm:$0xff] %v1306_v58 }
 0x16a   : > { %v1315_v3 = vld [vmem:[#allocation2 + $0x10] sm:$0xff]  ;;  %v1316_v59 = vld [vmem:[#allocation2] sm:$0xff]  ;;  %v1317_v60 = vld [vmem:[#allocation2 + $0x18] sm:$0xff] }
 0x16b   : > { %v1319_v19 = vmax.f32 %v1315_v3, 0.0  ;;  %v1320_v61 = vmax.f32 %v1316_v59, 0.0  ;;  %v1321_v63 = vmax.f32 %v1317_v60, 0.0 }
 0x16d   : > { %v1323_v1 = vpack.c.bf16 %v1320_v61, %v1319_v19 }
 0x16f   : > { %1325 = vst [vmem:[%s2577_s3] sm:$0xff] %v1323_v1 }
 0x170   : > { %v1318_v62 = vld [vmem:[#allocation2 + $0x8] sm:$0xff] }
 0x171   : > { %v1322_v0 = vmax.f32 %v1318_v62, 0.0 }
 0x173   : > { %v1324_v48 = vpack.c.bf16 %v1322_v0, %v1321_v63 }
 0x175   : > { %1326 = vst [vmem:[%s2577_s3 + $0x8] sm:$0xff] %v1324_v48 }
 0x176 PF: > { %1333 = sbr.rel (!%p2544_p1) target bundleno = 382 (0x17e), region = 67  ;;  %s2185_s9 = sshll.u32 (%p2544_p1), %s2402_s17, 3  ;;  %v1370_v2 = vld [vmem:[%s2577_s3] sm:$0xff] (%p2544_p1) }
 0x177   : > { %s1339_s4 = scalar_lea.vmem (%p2544_p1), %s2933_s2, %s2185_s9 }
 0x178   : > { %1371 = vst [vmem:[%s1339_s4] sm:$0xff] (%p2544_p1), %v1370_v2 }
 0x17c   : > { %v1372_v53 = vld [vmem:[%s2577_s3 + $0x8] sm:$0xff] }
 0x17d   : > { %1373 = vst [vmem:[%s1339_s4 + $0x20] sm:$0xff] %v1372_v53 }
 0x17e PF: > { %s15_s20 = sadd.s32 1, %s2414_s20   ;;  %s2949_s5 = sld [smem:[#allocation13_spill]] }
 0x17f   : > { %p12_p8 = scmp.ge.s32.totalorder %s15_s20, 38   ;;  %s2950_s7 = sld [smem:[#allocation12_spill]] }
 0x180   : > { %s2951_s14 = sld [smem:[#allocation8_spill]]  ;;  %s2955_s9 = smov %s2374_s10 }
 0x181   : > { %s2952_s15 = sld [smem:[#allocation11_spill]]  ;;  %s2957_s11 = smov %s2382_s12 }
 0x182   : > { %s2953_s8 = sld [smem:[#allocation9_spill]]  ;;  %s2958_s12 = smov %s2386_s13 }
 0x183   : > { %s2954_s25 = sld [smem:[#allocation10_spill]]  ;;  %s2960_s16 = smov %s2406_s18 }
 0x184   : > { %s2956_s10 = smov %s2949_s5  ;;  %s2961_s17 = smov %s2410_s19 }
 0x185   : > { %s2959_s13 = smov %s2950_s7  ;;  %14 = sbr.rel (!%p12_p8) target bundleno = 9 (0x9), region = 145 }
 0x188   : > { %s2962_s18 = smov %s2953_s8 }
 0x189   : > { %s2963_s19 = smov %s2954_s25 }
 0x18a   :  { %1389 = vsyncpa [#allocation5], 1 }
 0x18b   :  { %1391 = vsyncpa [#allocation5 + $0x1], 1 }

// kernel: decoder_conv_up.7
= control target key start
LH: loop header
LB: loop body
LE: loop exit
PB: predicated region body
PF: predicated region fallthrough
CT: control target
= control target key end

     0   :  { %s3556_s9 = smov 0   ;;  %s3558_s10 = smov 0   ;;  %s4649_s0 = inlined_call_operand.vmem [shape: bf16[64,27648], index: 0, kind: input, shape index: {}]   ;;  %s4650_s1 = inlined_call_operand.vmem [shape: bf16[27648,512], index: 1, kind: input, shape index: {}]   ;;  %s4651_s2 = inlined_call_operand.vmem [shape: bf16[64,512], index: 2, kind: output, shape index: {}]  }
   0x1   :  { %s3560_s11 = smov 0   ;;  %s3562_s12 = smov 0  }
   0x2   :  { %s3564_s13 = smov 0   ;;  %s3566_s14 = smov 0  }
   0x3   :  { %s3568_s15 = smov 0   ;;  %s3570_s16 = smov 0  }
   0x4   :  { %s3572_s17 = smov 0   ;;  %s3574_s18 = smov 0  }
   0x5   :  { %s3576_s19 = smov 0  }
   0x6 LB: > { %s2537_s20 = sadd.s32 4294967295, %s3538_s19   ;;  %s24_s21 = sadd.s32 1, %s3530_s17  ;;  %s3538_s19 = sphi %s3576_s19, %s12_s19   ;;  %s3534_s18 = sphi %s3574_s18, %s4664_s18   ;;  %s3530_s17 = sphi %s3572_s17, %s4663_s17   ;;  %s3526_s16 = sphi %s3570_s16, %s4662_s16   ;;  %s3522_s15 = sphi %s3568_s15, %s4661_s15   ;;  %s3518_s14 = sphi %s3566_s14, %s4660_s14   ;;  %s3514_s13 = sphi %s3564_s13, %s4659_s13   ;;  %s3510_s12 = sphi %s3562_s12, %s4658_s12   ;;  %s3506_s11 = sphi %s3560_s11, %s4657_s11   ;;  %s3502_s10 = sphi %s3558_s10, %s4656_s10   ;;  %s3498_s9 = sphi %s3556_s9, %s4655_s9  }
   0x7   : > { %p25_p0 = scmp.ge.s32.totalorder %s24_s21, 27  ;;  %s27_s22 = sadd.s32 1, %s3534_s18 }
   0x8   : > { %s40_s23 = sadd.s32 1, %s3518_s14  ;;  %p47_p1 = scmp.ne.s32.totalorder %s3518_s14, %s3514_s13 }
   0x9   : > { %s4666_s21 = smov (%p25_p0, %s24_s21), 0  ;;  %s4668_s22 = smov (!%p25_p0, %s27_s22), %s3534_s18 }
   0xa   : > { %s36_s24 = ssub.s32 %s3530_s17, %s4666_s21  ;;  %p48_p2 = scmp.eq.s32.totalorder %s3538_s19, 0 }
   0xb   : > { %p29_p3 = scmp.ge.s32.totalorder %s4668_s22, 2  ;;  %p38_p4 = scmp.eq.s32.totalorder %s36_s24, 0 }
   0xc   : > { %p3623_p5 = por %p48_p2, %p47_p1  ;;  %s68_s26 = sadd.s32 1, %s3510_s12 }
   0xd   : > { %s4670_s22 = smov (%p29_p3, %s4668_s22), 0  ;;  %p75_p6 = scmp.ne.s32.totalorder %s3510_s12, %s3506_s11 }
   0xe   : > { %s3631_s27 = scalar_select %p38_p4, %s3518_s14, %s40_s23  }
   0xf   : > { %s64_s28 = ssub.s32 %s3534_s18, %s4670_s22  ;;  %p3637_p9 = por %p75_p6, %p48_p2 }
  0x10   : > { %s65_s29 = sor.u32 %s64_s28, %s36_s24  ;;  %p94_p7 = scmp.eq.s32.totalorder %s64_s28, 0 }
  0x11   : > { %p66_p8 = scmp.eq.s32.totalorder %s65_s29, 0  ;;  %s96_s3 = sadd.s32 1, %s3502_s10 }
  0x12   : > { %p106_p10 = scmp.ne.s32.totalorder %s3502_s10, %s3498_s9  ;;  %p107_p11 = scmp.eq.s32.totalorder %s2537_s20, 53 }
  0x13   : > { %s3645_s4 = scalar_select %p66_p8, %s3510_s12, %s68_s26  }
  0x14   : > { %s3648_s5 = scalar_select %p94_p7, %s3502_s10, %s96_s3  }
  0x15   : > { %p3650_p12 = por %p107_p11, %p106_p10  ;;  %p2540_p13 = scmp.ge.s32.totalorder %s3538_s19, 54 }
  0x17   : > { %129 = sbr.rel (%p2540_p13) target bundleno = 199 (0xc7), region = 16 }
  0x1c   : > { %132 = sbr.rel (!%p3623_p5) target bundleno = 64 (0x40), region = 20  ;;  %s134_s7 = sand.u32 (%p3623_p5), 1, %s3518_s14  }
  0x1d   : > { %s3200_s8 = sshll.u32 (%p3623_p5), %s3530_s17, 5  ;;  %s2541_s23 = sshll.u32 (%p3623_p5), %s134_s7, 8 }
  0x1e   : > { %s3662_s28 = scalar_lea.vmem (%p3623_p5), %s4649_s0, %s3200_s8  ;;  %s3667_s20 = scalar_lea.vmem (%p3623_p5), [#allocation3], %s2541_s23 }
  0x1f   : > { %v155_v0 = vld [vmem:[%s3662_s28] sm:$0xff] (%p3623_p5)  ;;  %v157_v1 = vld [vmem:[%s3662_s28 + $0x8] sm:$0xff] (%p3623_p5)  ;;  %v159_v2 = vld [vmem:[%s3662_s28 + $0x10] sm:$0xff] (%p3623_p5) }
  0x20   : > { %156 = vst [vmem:[%s3667_s20] sm:$0xff] (%p3623_p5), %v155_v0  ;;  %v161_v3 = vld [vmem:[%s3662_s28 + $0x18] sm:$0xff] (%p3623_p5)  ;;  %v163_v4 = vld [vmem:[%s3662_s28 + $0x360] sm:$0xff] (%p3623_p5)  ;;  %v165_v5 = vld [vmem:[%s3662_s28 + $0x368] sm:$0xff] (%p3623_p5) }
  0x21   : > { %158 = vst [vmem:[%s3667_s20 + $0x8] sm:$0xff] %v157_v1  ;;  %v167_v6 = vld [vmem:[%s3662_s28 + $0x370] sm:$0xff]  ;;  %v169_v7 = vld [vmem:[%s3662_s28 + $0x378] sm:$0xff]  ;;  %v171_v8 = vld [vmem:[%s3662_s28 + $0x6c0] sm:$0xff] }
  0x22   : > { %160 = vst [vmem:[%s3667_s20 + $0x10] sm:$0xff] %v159_v2  ;;  %v173_v9 = vld [vmem:[%s3662_s28 + $0x6c8] sm:$0xff]  ;;  %v175_v10 = vld [vmem:[%s3662_s28 + $0x6d0] sm:$0xff]  ;;  %v177_v11 = vld [vmem:[%s3662_s28 + $0x6d8] sm:$0xff] }
  0x23   : > { %162 = vst [vmem:[%s3667_s20 + $0x18] sm:$0xff] %v161_v3  ;;  %v179_v12 = vld [vmem:[%s3662_s28 + $0xa20] sm:$0xff]  ;;  %v181_v13 = vld [vmem:[%s3662_s28 + $0xa28] sm:$0xff]  ;;  %v183_v14 = vld [vmem:[%s3662_s28 + $0xa30] sm:$0xff] }
  0x24   : > { %164 = vst [vmem:[%s3667_s20 + $0x20] sm:$0xff] %v163_v4  ;;  %v185_v15 = vld [vmem:[%s3662_s28 + $0xa38] sm:$0xff]  ;;  %v187_v16 = vld [vmem:[%s3662_s28 + $0xd80] sm:$0xff]  ;;  %v189_v17 = vld [vmem:[%s3662_s28 + $0xd88] sm:$0xff] }
  0x25   : > { %166 = vst [vmem:[%s3667_s20 + $0x28] sm:$0xff] %v165_v5  ;;  %v191_v18 = vld [vmem:[%s3662_s28 + $0xd90] sm:$0xff]  ;;  %v193_v19 = vld [vmem:[%s3662_s28 + $0xd98] sm:$0xff]  ;;  %v195_v20 = vld [vmem:[%s3662_s28 + $0x10e0] sm:$0xff] }
  0x26   : > { %168 = vst [vmem:[%s3667_s20 + $0x30] sm:$0xff] %v167_v6  ;;  %v197_v21 = vld [vmem:[%s3662_s28 + $0x10e8] sm:$0xff]  ;;  %v199_v22 = vld [vmem:[%s3662_s28 + $0x10f0] sm:$0xff]  ;;  %v201_v23 = vld [vmem:[%s3662_s28 + $0x10f8] sm:$0xff] }
  0x27   : > { %170 = vst [vmem:[%s3667_s20 + $0x38] sm:$0xff] %v169_v7  ;;  %v203_v24 = vld [vmem:[%s3662_s28 + $0x1440] sm:$0xff]  ;;  %v205_v25 = vld [vmem:[%s3662_s28 + $0x1448] sm:$0xff]  ;;  %v207_v26 = vld [vmem:[%s3662_s28 + $0x1450] sm:$0xff] }
  0x28   : > { %172 = vst [vmem:[%s3667_s20 + $0x40] sm:$0xff] %v171_v8  ;;  %v209_v27 = vld [vmem:[%s3662_s28 + $0x1458] sm:$0xff]  ;;  %v211_v28 = vld [vmem:[%s3662_s28 + $0x17a0] sm:$0xff]  ;;  %v213_v29 = vld [vmem:[%s3662_s28 + $0x17a8] sm:$0xff] }
  0x29   : > { %174 = vst [vmem:[%s3667_s20 + $0x48] sm:$0xff] %v173_v9  ;;  %v215_v30 = vld [vmem:[%s3662_s28 + $0x17b0] sm:$0xff]  ;;  %v217_v31 = vld [vmem:[%s3662_s28 + $0x17b8] sm:$0xff] }
  0x2a   : > { %176 = vst [vmem:[%s3667_s20 + $0x50] sm:$0xff] %v175_v10 }
  0x2b   : > { %178 = vst [vmem:[%s3667_s20 + $0x58] sm:$0xff] %v177_v11 }
  0x2c   : > { %180 = vst [vmem:[%s3667_s20 + $0x60] sm:$0xff] %v179_v12 }
  0x2d   : > { %182 = vst [vmem:[%s3667_s20 + $0x68] sm:$0xff] %v181_v13 }
  0x2e   : > { %184 = vst [vmem:[%s3667_s20 + $0x70] sm:$0xff] %v183_v14 }
  0x2f   : > { %186 = vst [vmem:[%s3667_s20 + $0x78] sm:$0xff] %v185_v15 }
  0x30   : > { %188 = vst [vmem:[%s3667_s20 + $0x80] sm:$0xff] %v187_v16 }
  0x31   : > { %190 = vst [vmem:[%s3667_s20 + $0x88] sm:$0xff] %v189_v17 }
  0x32   : > { %192 = vst [vmem:[%s3667_s20 + $0x90] sm:$0xff] %v191_v18 }
  0x33   : > { %194 = vst [vmem:[%s3667_s20 + $0x98] sm:$0xff] %v193_v19 }
  0x34   : > { %196 = vst [vmem:[%s3667_s20 + $0xa0] sm:$0xff] %v195_v20 }
  0x35   : > { %198 = vst [vmem:[%s3667_s20 + $0xa8] sm:$0xff] %v197_v21 }
  0x36   : > { %200 = vst [vmem:[%s3667_s20 + $0xb0] sm:$0xff] %v199_v22 }
  0x37   : > { %202 = vst [vmem:[%s3667_s20 + $0xb8] sm:$0xff] %v201_v23 }
  0x38   : > { %204 = vst [vmem:[%s3667_s20 + $0xc0] sm:$0xff] %v203_v24 }
  0x39   : > { %206 = vst [vmem:[%s3667_s20 + $0xc8] sm:$0xff] %v205_v25 }
  0x3a   : > { %208 = vst [vmem:[%s3667_s20 + $0xd0] sm:$0xff] %v207_v26 }
  0x3b   : > { %210 = vst [vmem:[%s3667_s20 + $0xd8] sm:$0xff] %v209_v27 }
  0x3c   : > { %212 = vst [vmem:[%s3667_s20 + $0xe0] sm:$0xff] %v211_v28 }
  0x3d   : > { %214 = vst [vmem:[%s3667_s20 + $0xe8] sm:$0xff] %v213_v29 }
  0x3e   : > { %216 = vst [vmem:[%s3667_s20 + $0xf0] sm:$0xff] %v215_v30 }
  0x3f   : > { %218 = vst [vmem:[%s3667_s20 + $0xf8] sm:$0xff] %v217_v31 }
  0x40 PF: > { %224 = sbr.rel (!%p3637_p9) target bundleno = 199 (0xc7), region = 43  ;;  %s226_s25 = sand.u32 (%p3637_p9), 1, %s3510_s12  }
  0x41   : > { %s2546_s29 = sshll.u32 (%p3637_p9), %s3534_s18, 1  ;;  %s2544_s3 = sshll.u32 (%p3637_p9), %s226_s25, 10 }
  0x42   : > { %s3201_s7 = sshll.u32 (%p3637_p9), %s3530_s17, 9  ;;  %s3743_s30 = scalar_lea.vmem (%p3637_p9), [#allocation4], %s2544_s3 }
  0x43   : > { %s232_s8 = sadd.s32 (%p3637_p9), %s3201_s7, %s2546_s29 }
  0x44   : > { %s2548_s23 = sshll.u32 (%p3637_p9), %s232_s8, 2 }
  0x45   : > { %s3738_s28 = scalar_lea.vmem %s4650_s1, %s2548_s23 }
  0x46   : > { %v517_v32 = vld [vmem:[%s3738_s28] sm:$0xff]  ;;  %v519_v33 = vld [vmem:[%s3738_s28 + $0x10] sm:$0xff] }
  0x47   : > { %v521_v34 = vld [vmem:[%s3738_s28 + $0x20] sm:$0xff]  ;;  %518 = vst [vmem:[%s3743_s30] sm:$0xff] %v517_v32  ;;  %v523_v35 = vld [vmem:[%s3738_s28 + $0x30] sm:$0xff] }
  0x48   : > { %520 = vst [vmem:[%s3743_s30 + $0x8] sm:$0xff] %v519_v33  ;;  %v525_v36 = vld [vmem:[%s3738_s28 + $0x40] sm:$0xff]  ;;  %v527_v37 = vld [vmem:[%s3738_s28 + $0x50] sm:$0xff] }
  0x49   : > { %522 = vst [vmem:[%s3743_s30 + $0x10] sm:$0xff] %v521_v34  ;;  %v529_v38 = vld [vmem:[%s3738_s28 + $0x60] sm:$0xff]  ;;  %v531_v39 = vld [vmem:[%s3738_s28 + $0x70] sm:$0xff] }
  0x4a   : > { %524 = vst [vmem:[%s3743_s30 + $0x18] sm:$0xff] %v523_v35  ;;  %v533_v40 = vld [vmem:[%s3738_s28 + $0x80] sm:$0xff]  ;;  %v535_v41 = vld [vmem:[%s3738_s28 + $0x90] sm:$0xff] }
  0x4b   : > { %526 = vst [vmem:[%s3743_s30 + $0x20] sm:$0xff] %v525_v36  ;;  %v537_v42 = vld [vmem:[%s3738_s28 + $0xa0] sm:$0xff]  ;;  %v539_v43 = vld [vmem:[%s3738_s28 + $0xb0] sm:$0xff] }
  0x4c   : > { %528 = vst [vmem:[%s3743_s30 + $0x28] sm:$0xff] %v527_v37  ;;  %v541_v44 = vld [vmem:[%s3738_s28 + $0xc0] sm:$0xff]  ;;  %v543_v45 = vld [vmem:[%s3738_s28 + $0xd0] sm:$0xff] }
  0x4d   : > { %530 = vst [vmem:[%s3743_s30 + $0x30] sm:$0xff] %v529_v38  ;;  %v545_v46 = vld [vmem:[%s3738_s28 + $0xe0] sm:$0xff]  ;;  %v547_v47 = vld [vmem:[%s3738_s28 + $0xf0] sm:$0xff] }
  0x4e   : > { %532 = vst [vmem:[%s3743_s30 + $0x38] sm:$0xff] %v531_v39  ;;  %v549_v48 = vld [vmem:[%s3738_s28 + $0x100] sm:$0xff]  ;;  %v551_v49 = vld [vmem:[%s3738_s28 + $0x110] sm:$0xff] }
  0x4f   : > { %534 = vst [vmem:[%s3743_s30 + $0x40] sm:$0xff] %v533_v40  ;;  %v553_v50 = vld [vmem:[%s3738_s28 + $0x120] sm:$0xff]  ;;  %v555_v51 = vld [vmem:[%s3738_s28 + $0x130] sm:$0xff] }
  0x50   : > { %536 = vst [vmem:[%s3743_s30 + $0x48] sm:$0xff] %v535_v41  ;;  %v557_v52 = vld [vmem:[%s3738_s28 + $0x140] sm:$0xff]  ;;  %v559_v53 = vld [vmem:[%s3738_s28 + $0x150] sm:$0xff] }
  0x51   : > { %538 = vst [vmem:[%s3743_s30 + $0x50] sm:$0xff] %v537_v42  ;;  %v561_v54 = vld [vmem:[%s3738_s28 + $0x160] sm:$0xff]  ;;  %v563_v55 = vld [vmem:[%s3738_s28 + $0x170] sm:$0xff] }
  0x52   : > { %540 = vst [vmem:[%s3743_s30 + $0x58] sm:$0xff] %v539_v43  ;;  %v565_v56 = vld [vmem:[%s3738_s28 + $0x180] sm:$0xff]  ;;  %v567_v57 = vld [vmem:[%s3738_s28 + $0x190] sm:$0xff] }
  0x53   : > { %542 = vst [vmem:[%s3743_s30 + $0x60] sm:$0xff] %v541_v44  ;;  %v569_v58 = vld [vmem:[%s3738_s28 + $0x1a0] sm:$0xff]  ;;  %v571_v59 = vld [vmem:[%s3738_s28 + $0x1b0] sm:$0xff] }
  0x54   : > { %544 = vst [vmem:[%s3743_s30 + $0x68] sm:$0xff] %v543_v45  ;;  %v573_v60 = vld [vmem:[%s3738_s28 + $0x1c0] sm:$0xff]  ;;  %v575_v61 = vld [vmem:[%s3738_s28 + $0x1d0] sm:$0xff] }
  0x55   : > { %546 = vst [vmem:[%s3743_s30 + $0x70] sm:$0xff] %v545_v46  ;;  %v577_v62 = vld [vmem:[%s3738_s28 + $0x1e0] sm:$0xff]  ;;  %v579_v63 = vld [vmem:[%s3738_s28 + $0x1f0] sm:$0xff] }
  0x56   : > { %548 = vst [vmem:[%s3743_s30 + $0x78] sm:$0xff] %v547_v47  ;;  %v581_v0 = vld [vmem:[%s3738_s28 + $0x200] sm:$0xff]  ;;  %v583_v1 = vld [vmem:[%s3738_s28 + $0x210] sm:$0xff] }
  0x57   : > { %550 = vst [vmem:[%s3743_s30 + $0x80] sm:$0xff] %v549_v48  ;;  %v585_v2 = vld [vmem:[%s3738_s28 + $0x220] sm:$0xff]  ;;  %v587_v3 = vld [vmem:[%s3738_s28 + $0x230] sm:$0xff] }
  0x58   : > { %552 = vst [vmem:[%s3743_s30 + $0x88] sm:$0xff] %v551_v49  ;;  %v589_v4 = vld [vmem:[%s3738_s28 + $0x240] sm:$0xff]  ;;  %v591_v5 = vld [vmem:[%s3738_s28 + $0x250] sm:$0xff] }
  0x59   : > { %554 = vst [vmem:[%s3743_s30 + $0x90] sm:$0xff] %v553_v50  ;;  %v593_v6 = vld [vmem:[%s3738_s28 + $0x260] sm:$0xff]  ;;  %v595_v7 = vld [vmem:[%s3738_s28 + $0x270] sm:$0xff] }
  0x5a   : > { %556 = vst [vmem:[%s3743_s30 + $0x98] sm:$0xff] %v555_v51  ;;  %v597_v8 = vld [vmem:[%s3738_s28 + $0x280] sm:$0xff]  ;;  %v599_v9 = vld [vmem:[%s3738_s28 + $0x290] sm:$0xff] }
  0x5b   : > { %558 = vst [vmem:[%s3743_s30 + $0xa0] sm:$0xff] %v557_v52  ;;  %v601_v10 = vld [vmem:[%s3738_s28 + $0x2a0] sm:$0xff]  ;;  %v603_v11 = vld [vmem:[%s3738_s28 + $0x2b0] sm:$0xff] }
  0x5c   : > { %560 = vst [vmem:[%s3743_s30 + $0xa8] sm:$0xff] %v559_v53  ;;  %v605_v12 = vld [vmem:[%s3738_s28 + $0x2c0] sm:$0xff]  ;;  %v607_v13 = vld [vmem:[%s3738_s28 + $0x2d0] sm:$0xff] }
  0x5d   : > { %562 = vst [vmem:[%s3743_s30 + $0xb0] sm:$0xff] %v561_v54  ;;  %v609_v14 = vld [vmem:[%s3738_s28 + $0x2e0] sm:$0xff]  ;;  %v611_v15 = vld [vmem:[%s3738_s28 + $0x2f0] sm:$0xff] }
  0x5e   : > { %564 = vst [vmem:[%s3743_s30 + $0xb8] sm:$0xff] %v563_v55  ;;  %v613_v16 = vld [vmem:[%s3738_s28 + $0x300] sm:$0xff]  ;;  %v615_v17 = vld [vmem:[%s3738_s28 + $0x310] sm:$0xff] }
  0x5f   : > { %566 = vst [vmem:[%s3743_s30 + $0xc0] sm:$0xff] %v565_v56  ;;  %v617_v18 = vld [vmem:[%s3738_s28 + $0x320] sm:$0xff]  ;;  %v619_v19 = vld [vmem:[%s3738_s28 + $0x330] sm:$0xff] }
  0x60   : > { %568 = vst [vmem:[%s3743_s30 + $0xc8] sm:$0xff] %v567_v57  ;;  %v621_v20 = vld [vmem:[%s3738_s28 + $0x340] sm:$0xff]  ;;  %v623_v21 = vld [vmem:[%s3738_s28 + $0x350] sm:$0xff] }
  0x61   : > { %570 = vst [vmem:[%s3743_s30 + $0xd0] sm:$0xff] %v569_v58  ;;  %v625_v22 = vld [vmem:[%s3738_s28 + $0x360] sm:$0xff]  ;;  %v627_v23 = vld [vmem:[%s3738_s28 + $0x370] sm:$0xff] }
  0x62   : > { %572 = vst [vmem:[%s3743_s30 + $0xd8] sm:$0xff] %v571_v59  ;;  %v629_v24 = vld [vmem:[%s3738_s28 + $0x380] sm:$0xff]  ;;  %v631_v25 = vld [vmem:[%s3738_s28 + $0x390] sm:$0xff] }
  0x63   : > { %574 = vst [vmem:[%s3743_s30 + $0xe0] sm:$0xff] %v573_v60  ;;  %v633_v26 = vld [vmem:[%s3738_s28 + $0x3a0] sm:$0xff]  ;;  %v635_v27 = vld [vmem:[%s3738_s28 + $0x3b0] sm:$0xff] }
  0x64   : > { %576 = vst [vmem:[%s3743_s30 + $0xe8] sm:$0xff] %v575_v61  ;;  %v637_v28 = vld [vmem:[%s3738_s28 + $0x3c0] sm:$0xff]  ;;  %v639_v29 = vld [vmem:[%s3738_s28 + $0x3d0] sm:$0xff] }
  0x65   : > { %578 = vst [vmem:[%s3743_s30 + $0xf0] sm:$0xff] %v577_v62  ;;  %v641_v30 = vld [vmem:[%s3738_s28 + $0x3e0] sm:$0xff]  ;;  %v643_v31 = vld [vmem:[%s3738_s28 + $0x3f0] sm:$0xff] }
  0x66   : > { %580 = vst [vmem:[%s3743_s30 + $0xf8] sm:$0xff] %v579_v63  ;;  %v645_v32 = vld [vmem:[%s3738_s28 + $0x400] sm:$0xff]  ;;  %v647_v33 = vld [vmem:[%s3738_s28 + $0x410] sm:$0xff] }
  0x67   : > { %582 = vst [vmem:[%s3743_s30 + $0x100] sm:$0xff] %v581_v0  ;;  %v649_v34 = vld [vmem:[%s3738_s28 + $0x420] sm:$0xff]  ;;  %v651_v35 = vld [vmem:[%s3738_s28 + $0x430] sm:$0xff] }
  0x68   : > { %584 = vst [vmem:[%s3743_s30 + $0x108] sm:$0xff] %v583_v1  ;;  %v653_v36 = vld [vmem:[%s3738_s28 + $0x440] sm:$0xff]  ;;  %v655_v37 = vld [vmem:[%s3738_s28 + $0x450] sm:$0xff] }
  0x69   : > { %586 = vst [vmem:[%s3743_s30 + $0x110] sm:$0xff] %v585_v2  ;;  %v657_v38 = vld [vmem:[%s3738_s28 + $0x460] sm:$0xff]  ;;  %v659_v39 = vld [vmem:[%s3738_s28 + $0x470] sm:$0xff] }
  0x6a   : > { %588 = vst [vmem:[%s3743_s30 + $0x118] sm:$0xff] %v587_v3  ;;  %v661_v40 = vld [vmem:[%s3738_s28 + $0x480] sm:$0xff]  ;;  %v663_v41 = vld [vmem:[%s3738_s28 + $0x490] sm:$0xff] }
  0x6b   : > { %590 = vst [vmem:[%s3743_s30 + $0x120] sm:$0xff] %v589_v4  ;;  %v665_v42 = vld [vmem:[%s3738_s28 + $0x4a0] sm:$0xff]  ;;  %v667_v43 = vld [vmem:[%s3738_s28 + $0x4b0] sm:$0xff] }
  0x6c   : > { %592 = vst [vmem:[%s3743_s30 + $0x128] sm:$0xff] %v591_v5  ;;  %v669_v44 = vld [vmem:[%s3738_s28 + $0x4c0] sm:$0xff]  ;;  %v671_v45 = vld [vmem:[%s3738_s28 + $0x4d0] sm:$0xff] }
  0x6d   : > { %594 = vst [vmem:[%s3743_s30 + $0x130] sm:$0xff] %v593_v6  ;;  %v673_v46 = vld [vmem:[%s3738_s28 + $0x4e0] sm:$0xff]  ;;  %v675_v47 = vld [vmem:[%s3738_s28 + $0x4f0] sm:$0xff] }
  0x6e   : > { %596 = vst [vmem:[%s3743_s30 + $0x138] sm:$0xff] %v595_v7  ;;  %v677_v48 = vld [vmem:[%s3738_s28 + $0x500] sm:$0xff]  ;;  %v679_v49 = vld [vmem:[%s3738_s28 + $0x510] sm:$0xff] }
  0x6f   : > { %598 = vst [vmem:[%s3743_s30 + $0x140] sm:$0xff] %v597_v8  ;;  %v681_v50 = vld [vmem:[%s3738_s28 + $0x520] sm:$0xff]  ;;  %v683_v51 = vld [vmem:[%s3738_s28 + $0x530] sm:$0xff] }
  0x70   : > { %600 = vst [vmem:[%s3743_s30 + $0x148] sm:$0xff] %v599_v9  ;;  %v685_v52 = vld [vmem:[%s3738_s28 + $0x540] sm:$0xff]  ;;  %v687_v53 = vld [vmem:[%s3738_s28 + $0x550] sm:$0xff] }
  0x71   : > { %602 = vst [vmem:[%s3743_s30 + $0x150] sm:$0xff] %v601_v10  ;;  %v689_v54 = vld [vmem:[%s3738_s28 + $0x560] sm:$0xff]  ;;  %v691_v55 = vld [vmem:[%s3738_s28 + $0x570] sm:$0xff] }
  0x72   : > { %604 = vst [vmem:[%s3743_s30 + $0x158] sm:$0xff] %v603_v11  ;;  %v693_v56 = vld [vmem:[%s3738_s28 + $0x580] sm:$0xff]  ;;  %v695_v57 = vld [vmem:[%s3738_s28 + $0x590] sm:$0xff] }
  0x73   : > { %606 = vst [vmem:[%s3743_s30 + $0x160] sm:$0xff] %v605_v12  ;;  %v697_v58 = vld [vmem:[%s3738_s28 + $0x5a0] sm:$0xff]  ;;  %v699_v59 = vld [vmem:[%s3738_s28 + $0x5b0] sm:$0xff] }
  0x74   : > { %608 = vst [vmem:[%s3743_s30 + $0x168] sm:$0xff] %v607_v13  ;;  %v701_v60 = vld [vmem:[%s3738_s28 + $0x5c0] sm:$0xff]  ;;  %v703_v61 = vld [vmem:[%s3738_s28 + $0x5d0] sm:$0xff] }
  0x75   : > { %610 = vst [vmem:[%s3743_s30 + $0x170] sm:$0xff] %v609_v14  ;;  %v705_v62 = vld [vmem:[%s3738_s28 + $0x5e0] sm:$0xff]  ;;  %v707_v63 = vld [vmem:[%s3738_s28 + $0x5f0] sm:$0xff] }
  0x76   : > { %612 = vst [vmem:[%s3743_s30 + $0x178] sm:$0xff] %v611_v15  ;;  %v709_v0 = vld [vmem:[%s3738_s28 + $0x600] sm:$0xff]  ;;  %v711_v1 = vld [vmem:[%s3738_s28 + $0x610] sm:$0xff] }
  0x77   : > { %614 = vst [vmem:[%s3743_s30 + $0x180] sm:$0xff] %v613_v16  ;;  %v713_v2 = vld [vmem:[%s3738_s28 + $0x620] sm:$0xff]  ;;  %v715_v3 = vld [vmem:[%s3738_s28 + $0x630] sm:$0xff] }
  0x78   : > { %616 = vst [vmem:[%s3743_s30 + $0x188] sm:$0xff] %v615_v17  ;;  %v717_v4 = vld [vmem:[%s3738_s28 + $0x640] sm:$0xff]  ;;  %v719_v5 = vld [vmem:[%s3738_s28 + $0x650] sm:$0xff] }
  0x79   : > { %618 = vst [vmem:[%s3743_s30 + $0x190] sm:$0xff] %v617_v18  ;;  %v721_v6 = vld [vmem:[%s3738_s28 + $0x660] sm:$0xff]  ;;  %v723_v7 = vld [vmem:[%s3738_s28 + $0x670] sm:$0xff] }
  0x7a   : > { %620 = vst [vmem:[%s3743_s30 + $0x198] sm:$0xff] %v619_v19  ;;  %v725_v8 = vld [vmem:[%s3738_s28 + $0x680] sm:$0xff]  ;;  %v727_v9 = vld [vmem:[%s3738_s28 + $0x690] sm:$0xff] }
  0x7b   : > { %622 = vst [vmem:[%s3743_s30 + $0x1a0] sm:$0xff] %v621_v20  ;;  %v729_v10 = vld [vmem:[%s3738_s28 + $0x6a0] sm:$0xff]  ;;  %v731_v11 = vld [vmem:[%s3738_s28 + $0x6b0] sm:$0xff] }
  0x7c   : > { %624 = vst [vmem:[%s3743_s30 + $0x1a8] sm:$0xff] %v623_v21  ;;  %v733_v12 = vld [vmem:[%s3738_s28 + $0x6c0] sm:$0xff]  ;;  %v735_v13 = vld [vmem:[%s3738_s28 + $0x6d0] sm:$0xff] }
  0x7d   : > { %626 = vst [vmem:[%s3743_s30 + $0x1b0] sm:$0xff] %v625_v22  ;;  %v737_v14 = vld [vmem:[%s3738_s28 + $0x6e0] sm:$0xff]  ;;  %v739_v15 = vld [vmem:[%s3738_s28 + $0x6f0] sm:$0xff] }
  0x7e   : > { %628 = vst [vmem:[%s3743_s30 + $0x1b8] sm:$0xff] %v627_v23  ;;  %v741_v16 = vld [vmem:[%s3738_s28 + $0x700] sm:$0xff]  ;;  %v743_v17 = vld [vmem:[%s3738_s28 + $0x710] sm:$0xff] }
  0x7f   : > { %630 = vst [vmem:[%s3743_s30 + $0x1c0] sm:$0xff] %v629_v24  ;;  %v745_v18 = vld [vmem:[%s3738_s28 + $0x720] sm:$0xff]  ;;  %v747_v19 = vld [vmem:[%s3738_s28 + $0x730] sm:$0xff] }
  0x80   : > { %632 = vst [vmem:[%s3743_s30 + $0x1c8] sm:$0xff] %v631_v25  ;;  %v749_v20 = vld [vmem:[%s3738_s28 + $0x740] sm:$0xff]  ;;  %v751_v21 = vld [vmem:[%s3738_s28 + $0x750] sm:$0xff] }
  0x81   : > { %634 = vst [vmem:[%s3743_s30 + $0x1d0] sm:$0xff] %v633_v26  ;;  %v753_v22 = vld [vmem:[%s3738_s28 + $0x760] sm:$0xff]  ;;  %v755_v23 = vld [vmem:[%s3738_s28 + $0x770] sm:$0xff] }
  0x82   : > { %636 = vst [vmem:[%s3743_s30 + $0x1d8] sm:$0xff] %v635_v27  ;;  %v757_v24 = vld [vmem:[%s3738_s28 + $0x780] sm:$0xff]  ;;  %v759_v25 = vld [vmem:[%s3738_s28 + $0x790] sm:$0xff] }
  0x83   : > { %638 = vst [vmem:[%s3743_s30 + $0x1e0] sm:$0xff] %v637_v28  ;;  %v761_v26 = vld [vmem:[%s3738_s28 + $0x7a0] sm:$0xff]  ;;  %v763_v27 = vld [vmem:[%s3738_s28 + $0x7b0] sm:$0xff] }
  0x84   : > { %640 = vst [vmem:[%s3743_s30 + $0x1e8] sm:$0xff] %v639_v29  ;;  %v765_v28 = vld [vmem:[%s3738_s28 + $0x7c0] sm:$0xff]  ;;  %v767_v29 = vld [vmem:[%s3738_s28 + $0x7d0] sm:$0xff] }
  0x85   : > { %642 = vst [vmem:[%s3743_s30 + $0x1f0] sm:$0xff] %v641_v30  ;;  %v769_v30 = vld [vmem:[%s3738_s28 + $0x7e0] sm:$0xff] }
  0x86   : > { %644 = vst [vmem:[%s3743_s30 + $0x1f8] sm:$0xff] %v643_v31  ;;  %v771_v31 = vld [vmem:[%s3738_s28 + $0x7f0] sm:$0xff] }
  0x87   : > { %646 = vst [vmem:[%s3743_s30 + $0x200] sm:$0xff] %v645_v32 }
  0x88   : > { %648 = vst [vmem:[%s3743_s30 + $0x208] sm:$0xff] %v647_v33 }
  0x89   : > { %650 = vst [vmem:[%s3743_s30 + $0x210] sm:$0xff] %v649_v34 }
  0x8a   : > { %652 = vst [vmem:[%s3743_s30 + $0x218] sm:$0xff] %v651_v35 }
  0x8b   : > { %654 = vst [vmem:[%s3743_s30 + $0x220] sm:$0xff] %v653_v36 }
  0x8c   : > { %656 = vst [vmem:[%s3743_s30 + $0x228] sm:$0xff] %v655_v37 }
  0x8d   : > { %658 = vst [vmem:[%s3743_s30 + $0x230] sm:$0xff] %v657_v38 }
  0x8e   : > { %660 = vst [vmem:[%s3743_s30 + $0x238] sm:$0xff] %v659_v39 }
  0x8f   : > { %662 = vst [vmem:[%s3743_s30 + $0x240] sm:$0xff] %v661_v40 }
  0x90   : > { %664 = vst [vmem:[%s3743_s30 + $0x248] sm:$0xff] %v663_v41 }
  0x91   : > { %666 = vst [vmem:[%s3743_s30 + $0x250] sm:$0xff] %v665_v42 }
  0x92   : > { %668 = vst [vmem:[%s3743_s30 + $0x258] sm:$0xff] %v667_v43 }
  0x93   : > { %670 = vst [vmem:[%s3743_s30 + $0x260] sm:$0xff] %v669_v44 }
  0x94   : > { %672 = vst [vmem:[%s3743_s30 + $0x268] sm:$0xff] %v671_v45 }
  0x95   : > { %674 = vst [vmem:[%s3743_s30 + $0x270] sm:$0xff] %v673_v46 }
  0x96   : > { %676 = vst [vmem:[%s3743_s30 + $0x278] sm:$0xff] %v675_v47 }
  0x97   : > { %678 = vst [vmem:[%s3743_s30 + $0x280] sm:$0xff] %v677_v48 }
  0x98   : > { %680 = vst [vmem:[%s3743_s30 + $0x288] sm:$0xff] %v679_v49 }
  0x99   : > { %682 = vst [vmem:[%s3743_s30 + $0x290] sm:$0xff] %v681_v50 }
  0x9a   : > { %684 = vst [vmem:[%s3743_s30 + $0x298] sm:$0xff] %v683_v51 }
  0x9b   : > { %686 = vst [vmem:[%s3743_s30 + $0x2a0] sm:$0xff] %v685_v52 }
  0x9c   : > { %688 = vst [vmem:[%s3743_s30 + $0x2a8] sm:$0xff] %v687_v53 }
  0x9d   : > { %690 = vst [vmem:[%s3743_s30 + $0x2b0] sm:$0xff] %v689_v54 }
  0x9e   : > { %692 = vst [vmem:[%s3743_s30 + $0x2b8] sm:$0xff] %v691_v55 }
  0x9f   : > { %694 = vst [vmem:[%s3743_s30 + $0x2c0] sm:$0xff] %v693_v56 }
  0xa0   : > { %696 = vst [vmem:[%s3743_s30 + $0x2c8] sm:$0xff] %v695_v57 }
  0xa1   : > { %698 = vst [vmem:[%s3743_s30 + $0x2d0] sm:$0xff] %v697_v58 }
  0xa2   : > { %700 = vst [vmem:[%s3743_s30 + $0x2d8] sm:$0xff] %v699_v59 }
  0xa3   : > { %702 = vst [vmem:[%s3743_s30 + $0x2e0] sm:$0xff] %v701_v60 }
  0xa4   : > { %704 = vst [vmem:[%s3743_s30 + $0x2e8] sm:$0xff] %v703_v61 }
  0xa5   : > { %706 = vst [vmem:[%s3743_s30 + $0x2f0] sm:$0xff] %v705_v62 }
  0xa6   : > { %708 = vst [vmem:[%s3743_s30 + $0x2f8] sm:$0xff] %v707_v63 }
  0xa7   : > { %710 = vst [vmem:[%s3743_s30 + $0x300] sm:$0xff] %v709_v0 }
  0xa8   : > { %712 = vst [vmem:[%s3743_s30 + $0x308] sm:$0xff] %v711_v1 }
  0xa9   : > { %714 = vst [vmem:[%s3743_s30 + $0x310] sm:$0xff] %v713_v2 }
  0xaa   : > { %716 = vst [vmem:[%s3743_s30 + $0x318] sm:$0xff] %v715_v3 }
  0xab   : > { %718 = vst [vmem:[%s3743_s30 + $0x320] sm:$0xff] %v717_v4 }
  0xac   : > { %720 = vst [vmem:[%s3743_s30 + $0x328] sm:$0xff] %v719_v5 }
  0xad   : > { %722 = vst [vmem:[%s3743_s30 + $0x330] sm:$0xff] %v721_v6 }
  0xae   : > { %724 = vst [vmem:[%s3743_s30 + $0x338] sm:$0xff] %v723_v7 }
  0xaf   : > { %726 = vst [vmem:[%s3743_s30 + $0x340] sm:$0xff] %v725_v8 }
  0xb0   : > { %728 = vst [vmem:[%s3743_s30 + $0x348] sm:$0xff] %v727_v9 }
  0xb1   : > { %730 = vst [vmem:[%s3743_s30 + $0x350] sm:$0xff] %v729_v10 }
  0xb2   : > { %732 = vst [vmem:[%s3743_s30 + $0x358] sm:$0xff] %v731_v11 }
  0xb3   : > { %734 = vst [vmem:[%s3743_s30 + $0x360] sm:$0xff] %v733_v12 }
  0xb4   : > { %736 = vst [vmem:[%s3743_s30 + $0x368] sm:$0xff] %v735_v13 }
  0xb5   : > { %738 = vst [vmem:[%s3743_s30 + $0x370] sm:$0xff] %v737_v14 }
  0xb6   : > { %740 = vst [vmem:[%s3743_s30 + $0x378] sm:$0xff] %v739_v15 }
  0xb7   : > { %742 = vst [vmem:[%s3743_s30 + $0x380] sm:$0xff] %v741_v16 }
  0xb8   : > { %744 = vst [vmem:[%s3743_s30 + $0x388] sm:$0xff] %v743_v17 }
  0xb9   : > { %746 = vst [vmem:[%s3743_s30 + $0x390] sm:$0xff] %v745_v18 }
  0xba   : > { %748 = vst [vmem:[%s3743_s30 + $0x398] sm:$0xff] %v747_v19 }
  0xbb   : > { %750 = vst [vmem:[%s3743_s30 + $0x3a0] sm:$0xff] %v749_v20 }
  0xbc   : > { %752 = vst [vmem:[%s3743_s30 + $0x3a8] sm:$0xff] %v751_v21 }
  0xbd   : > { %754 = vst [vmem:[%s3743_s30 + $0x3b0] sm:$0xff] %v753_v22 }
  0xbe   : > { %756 = vst [vmem:[%s3743_s30 + $0x3b8] sm:$0xff] %v755_v23 }
  0xbf   : > { %758 = vst [vmem:[%s3743_s30 + $0x3c0] sm:$0xff] %v757_v24 }
  0xc0   : > { %760 = vst [vmem:[%s3743_s30 + $0x3c8] sm:$0xff] %v759_v25 }
  0xc1   : > { %762 = vst [vmem:[%s3743_s30 + $0x3d0] sm:$0xff] %v761_v26 }
  0xc2   : > { %764 = vst [vmem:[%s3743_s30 + $0x3d8] sm:$0xff] %v763_v27 }
  0xc3   : > { %766 = vst [vmem:[%s3743_s30 + $0x3e0] sm:$0xff] %v765_v28 }
  0xc4   : > { %768 = vst [vmem:[%s3743_s30 + $0x3e8] sm:$0xff] %v767_v29 }
  0xc5   : > { %770 = vst [vmem:[%s3743_s30 + $0x3f0] sm:$0xff] %v769_v30 }
  0xc6   : > { %772 = vst [vmem:[%s3743_s30 + $0x3f8] sm:$0xff] %v771_v31 }
  0xc7 PF: > { %p2549_p0 = scmp.ge.s32.totalorder %s3538_s19, 1  ;;  %p777_p1 = scmp.lt.s32.totalorder %s3538_s19, 55 }
  0xc9   : > { %p778_p2 = pnand %p2549_p0, %p777_p1 }
  0xca   : > { %s784_s20 = sand.u32 (!%p778_p2), 1, %s3514_s13   ;;  %s791_s25 = sand.u32 (!%p778_p2), 1, %s3506_s11  }
  0xcb   : > { %781 = sbr.rel (%p778_p2) target bundleno = 677 (0x2a5), region = 81  ;;  %s2550_s29 = sshll.u32 (!%p778_p2), %s784_s20, 8 }
  0xcc   : > { %s2551_s3 = sshll.u32 (!%p778_p2), %s791_s25, 10  ;;  %s812_s7 = sand.u32 (!%p778_p2), 1, %s3498_s9  }
  0xcd   : > { %s2552_s8 = sshll.u32 (!%p778_p2), %s812_s7, 6  ;;  %s4003_s23 = scalar_lea.vmem (!%p778_p2), [#allocation3], %s2550_s29 }
  0xce   : > { %s4005_s24 = scalar_lea.vmem (!%p778_p2), [#allocation4], %s2551_s3  ;;  %s4007_s26 = scalar_lea.vmem (!%p778_p2), [#allocation5], %s2552_s8 }
  0xcf   : > { %p2553_p3 = scmp.ne.s32.totalorder (!%p778_p2), %s3522_s15, 0 }
  0xd1   : > { %824 = sbr.rel (%p2553_p3) target bundleno = 231 (0xe7), region = 93 }
  0xd6   : > { %v3540_v32 = vmov 0.0  }
  0xd7   : > { %825 = vst [vmem:[#allocation2 + $0x30] sm:$0xff] %v3540_v32 }
  0xd8   : > { %826 = vst [vmem:[#allocation2] sm:$0xff] %v3540_v32 }
  0xd9   : > { %827 = vst [vmem:[#allocation2 + $0x58] sm:$0xff] %v3540_v32 }
  0xda   : > { %828 = vst [vmem:[#allocation2 + $0x18] sm:$0xff] %v3540_v32 }
  0xdb   : > { %829 = vst [vmem:[#allocation2 + $0x50] sm:$0xff] %v3540_v32 }
  0xdc   : > { %830 = vst [vmem:[#allocation2 + $0x68] sm:$0xff] %v3540_v32 }
  0xdd   : > { %831 = vst [vmem:[#allocation2 + $0x8] sm:$0xff] %v3540_v32 }
  0xde   : > { %832 = vst [vmem:[#allocation2 + $0x48] sm:$0xff] %v3540_v32 }
  0xdf   : > { %833 = vst [vmem:[#allocation2 + $0x40] sm:$0xff] %v3540_v32 }
  0xe0   : > { %834 = vst [vmem:[#allocation2 + $0x20] sm:$0xff] %v3540_v32 }
  0xe1   : > { %835 = vst [vmem:[#allocation2 + $0x10] sm:$0xff] %v3540_v32 }
  0xe2   : > { %836 = vst [vmem:[#allocation2 + $0x38] sm:$0xff] %v3540_v32 }
  0xe3   : > { %837 = vst [vmem:[#allocation2 + $0x60] sm:$0xff] %v3540_v32 }
  0xe4   : > { %838 = vst [vmem:[#allocation2 + $0x70] sm:$0xff] %v3540_v32 }
  0xe5   : > { %839 = vst [vmem:[#allocation2 + $0x78] sm:$0xff] %v3540_v32 }
  0xe6   : > { %840 = vst [vmem:[#allocation2 + $0x28] sm:$0xff] %v3540_v32 }
  0xe7 PF: > { %v2740_v33 = vld [vmem:[%s4005_s24 + $0x70] sm:$0xf]  ;;  %v3249_v34 = vld [vmem:[%s4005_s24 + $0x74] sm:$0xf0]  ;;  %v2732_v44 = vld [vmem:[%s4005_s24 + $0x60] sm:$0xf] }
  0xe8   : > { %v2804_v35 = vld [vmem:[%s4005_s24 + $0xf0] sm:$0xf]  ;;  %v2741_v36 = vor.u32 %v3249_v34, %v2740_v33  ;;  %v3265_v37 = vld [vmem:[%s4005_s24 + $0xf4] sm:$0xf0]  ;;  %v3247_v46 = vld [vmem:[%s4005_s24 + $0x64] sm:$0xf0] }
  0xe9   : > { %v2868_v38 = vld [vmem:[%s4005_s24 + $0x170] sm:$0xf]  ;;  %v3281_v39 = vld [vmem:[%s4005_s24 + $0x174] sm:$0xf0]  ;;  %v2805_v40 = vor.u32 %v3265_v37, %v2804_v35  ;;  %v2796_v47 = vld [vmem:[%s4005_s24 + $0xe0] sm:$0xf]  ;;  %v2733_v49 = vor.u32 %v3247_v46, %v2732_v44 }
  0xea   : > { %v2869_v41 = vor.u32 %v3281_v39, %v2868_v38  ;;  %v2932_v42 = vld [vmem:[%s4005_s24 + $0x1f0] sm:$0xf]  ;;  %v3297_v43 = vld [vmem:[%s4005_s24 + $0x1f4] sm:$0xf0]  ;;  %1817 = vmatpush.bf16.msra.mxu0 %v2741_v36  ;;  %v3263_v48 = vld [vmem:[%s4005_s24 + $0xe4] sm:$0xf0] }
  0xeb   : > { %v2933_v45 = vor.u32 %v3297_v43, %v2932_v42  ;;  %1846 = vmatpush.bf16.msra.mxu1 %v2805_v40  ;;  %v2797_v50 = vor.u32 %v3263_v48, %v2796_v47  ;;  %v2860_v51 = vld [vmem:[%s4005_s24 + $0x160] sm:$0xf]  ;;  %v3279_v52 = vld [vmem:[%s4005_s24 + $0x164] sm:$0xf0]  ;;  %v2724_v56 = vld [vmem:[%s4005_s24 + $0x50] sm:$0xf] }
  0xec   : > { %1875 = vmatpush.bf16.msra.mxu2 %v2869_v41  ;;  %v2924_v53 = vld [vmem:[%s4005_s24 + $0x1e0] sm:$0xf]  ;;  %v2861_v54 = vor.u32 %v3279_v52, %v2860_v51  ;;  %v3295_v55 = vld [vmem:[%s4005_s24 + $0x1e4] sm:$0xf0]  ;;  %v3245_v57 = vld [vmem:[%s4005_s24 + $0x54] sm:$0xf0] }
  0xed   : > { %1904 = vmatpush.bf16.msra.mxu3 %v2933_v45  ;;  %v2925_v58 = vor.u32 %v3295_v55, %v2924_v53  ;;  %v2788_v59 = vld [vmem:[%s4005_s24 + $0xd0] sm:$0xf]  ;;  %v3261_v60 = vld [vmem:[%s4005_s24 + $0xd4] sm:$0xf0]  ;;  %v2725_v62 = vor.u32 %v3245_v57, %v2724_v56  ;;  %v2716_v4 = vld [vmem:[%s4005_s24 + $0x40] sm:$0xf] }
  0xee   : > { %v2852_v61 = vld [vmem:[%s4005_s24 + $0x150] sm:$0xf]  ;;  %1818 = vmatpush.bf16.msra.mxu0 %v2733_v49  ;;  %v3277_v63 = vld [vmem:[%s4005_s24 + $0x154] sm:$0xf0]  ;;  %v2789_v2 = vor.u32 %v3261_v60, %v2788_v59  ;;  %v3243_v5 = vld [vmem:[%s4005_s24 + $0x44] sm:$0xf0] }
  0xef   : > { %v2916_v0 = vld [vmem:[%s4005_s24 + $0x1d0] sm:$0xf]  ;;  %v3293_v1 = vld [vmem:[%s4005_s24 + $0x1d4] sm:$0xf0]  ;;  %1847 = vmatpush.bf16.msra.mxu1 %v2797_v50  ;;  %v2853_v3 = vor.u32 %v3277_v63, %v2852_v61  ;;  %v2780_v6 = vld [vmem:[%s4005_s24 + $0xc0] sm:$0xf]  ;;  %v2717_v13 = vor.u32 %v3243_v5, %v2716_v4 }
  0xf0   : > { %1876 = vmatpush.bf16.msra.mxu2 %v2861_v54  ;;  %v2917_v7 = vor.u32 %v3293_v1, %v2916_v0  ;;  %v3259_v8 = vld [vmem:[%s4005_s24 + $0xc4] sm:$0xf0]  ;;  %v2844_v9 = vld [vmem:[%s4005_s24 + $0x140] sm:$0xf]  ;;  %v2708_v16 = vld [vmem:[%s4005_s24 + $0x30] sm:$0xf] }
  0xf1   : > { %1905 = vmatpush.bf16.msra.mxu3 %v2925_v58  ;;  %v3275_v10 = vld [vmem:[%s4005_s24 + $0x144] sm:$0xf0]  ;;  %v2908_v11 = vld [vmem:[%s4005_s24 + $0x1c0] sm:$0xf]  ;;  %v2781_v14 = vor.u32 %v3259_v8, %v2780_v6  ;;  %v3241_v17 = vld [vmem:[%s4005_s24 + $0x34] sm:$0xf0] }
  0xf2   : > { %v3291_v12 = vld [vmem:[%s4005_s24 + $0x1c4] sm:$0xf0]  ;;  %1819 = vmatpush.bf16.msra.mxu0 %v2725_v62  ;;  %v2845_v15 = vor.u32 %v3275_v10, %v2844_v9  ;;  %v2772_v18 = vld [vmem:[%s4005_s24 + $0xb0] sm:$0xf]  ;;  %v3257_v20 = vld [vmem:[%s4005_s24 + $0xb4] sm:$0xf0]  ;;  %v2709_v25 = vor.u32 %v3241_v17, %v2708_v16 }
  0xf3   : > { %1848 = vmatpush.bf16.msra.mxu1 %v2789_v2  ;;  %v2909_v19 = vor.u32 %v3291_v12, %v2908_v11  ;;  %v2836_v21 = vld [vmem:[%s4005_s24 + $0x130] sm:$0xf]  ;;  %v3273_v22 = vld [vmem:[%s4005_s24 + $0x134] sm:$0xf0]  ;;  %v2773_v26 = vor.u32 %v3257_v20, %v2772_v18  ;;  %v2700_v28 = vld [vmem:[%s4005_s24 + $0x20] sm:$0xf] }
  0xf4   : > { %1877 = vmatpush.bf16.msra.mxu2 %v2853_v3  ;;  %v2900_v23 = vld [vmem:[%s4005_s24 + $0x1b0] sm:$0xf]  ;;  %v3289_v24 = vld [vmem:[%s4005_s24 + $0x1b4] sm:$0xf0]  ;;  %v2837_v27 = vor.u32 %v3273_v22, %v2836_v21  ;;  %v3239_v29 = vld [vmem:[%s4005_s24 + $0x24] sm:$0xf0] }
  0xf5   : > { %1906 = vmatpush.bf16.msra.mxu3 %v2917_v7  ;;  %v2764_v30 = vld [vmem:[%s4005_s24 + $0xa0] sm:$0xf]  ;;  %v2901_v31 = vor.u32 %v3289_v24, %v2900_v23  ;;  %v3255_v32 = vld [vmem:[%s4005_s24 + $0xa4] sm:$0xf0]  ;;  %v2701_v37 = vor.u32 %v3239_v29, %v2700_v28  ;;  %v2692_v40 = vld [vmem:[%s4005_s24 + $0x10] sm:$0xf] }
  0xf6   : > { %1820 = vmatpush.bf16.msra.mxu0 %v2717_v13  ;;  %v2828_v33 = vld [vmem:[%s4005_s24 + $0x120] sm:$0xf]  ;;  %v3271_v34 = vld [vmem:[%s4005_s24 + $0x124] sm:$0xf0]  ;;  %v2765_v38 = vor.u32 %v3255_v32, %v2764_v30  ;;  %v3237_v41 = vld [vmem:[%s4005_s24 + $0x14] sm:$0xf0] }
  0xf7   : > { %1849 = vmatpush.bf16.msra.mxu1 %v2781_v14  ;;  %v2892_v35 = vld [vmem:[%s4005_s24 + $0x1a0] sm:$0xf]  ;;  %v3287_v36 = vld [vmem:[%s4005_s24 + $0x1a4] sm:$0xf0]  ;;  %v2829_v39 = vor.u32 %v3271_v34, %v2828_v33  ;;  %v2756_v42 = vld [vmem:[%s4005_s24 + $0x90] sm:$0xf]  ;;  %v2693_v50 = vor.u32 %v3237_v41, %v2692_v40 }
  0xf8   : > { %1878 = vmatpush.bf16.msra.mxu2 %v2845_v15  ;;  %v2893_v43 = vor.u32 %v3287_v36, %v2892_v35  ;;  %v3253_v44 = vld [vmem:[%s4005_s24 + $0x94] sm:$0xf0]  ;;  %v2820_v45 = vld [vmem:[%s4005_s24 + $0x110] sm:$0xf]  ;;  %v2684_v49 = vld [vmem:[%s4005_s24] sm:$0xf] }
  0xf9   : > { %1907 = vmatpush.bf16.msra.mxu3 %v2909_v19  ;;  %v3269_v46 = vld [vmem:[%s4005_s24 + $0x114] sm:$0xf0]  ;;  %v2884_v47 = vld [vmem:[%s4005_s24 + $0x190] sm:$0xf]  ;;  %v3235_v51 = vld [vmem:[%s4005_s24 + $0x4] sm:$0xf0]  ;;  %v2757_v54 = vor.u32 %v3253_v44, %v2756_v42 }
  0xfa   : > { %1821 = vmatpush.bf16.msra.mxu0 %v2709_v25  ;;  %v3285_v48 = vld [vmem:[%s4005_s24 + $0x194] sm:$0xf0]  ;;  %v2748_v52 = vld [vmem:[%s4005_s24 + $0x80] sm:$0xf]  ;;  %v3251_v53 = vld [vmem:[%s4005_s24 + $0x84] sm:$0xf0]  ;;  %v2821_v55 = vor.u32 %v3269_v46, %v2820_v45  ;;  %v2685_v3 = vor.u32 %v3235_v51, %v2684_v49 }
  0xfb   : > { %1850 = vmatpush.bf16.msra.mxu1 %v2773_v26  ;;  %v2812_v56 = vld [vmem:[%s4005_s24 + $0x100] sm:$0xf]  ;;  %v3267_v57 = vld [vmem:[%s4005_s24 + $0x104] sm:$0xf0]  ;;  %v2885_v59 = vor.u32 %v3285_v48, %v2884_v47  ;;  %v3202_v63 = vld [vmem:[%s4003_s23 + $0x4] sm:$0xf]  ;;  %v2749_v7 = vor.u32 %v3251_v53, %v2748_v52 }
  0xfc   : > { %1879 = vmatpush.bf16.msra.mxu2 %v2837_v27  ;;  %v2876_v58 = vld [vmem:[%s4005_s24 + $0x180] sm:$0xf]  ;;  %v3283_v60 = vld [vmem:[%s4005_s24 + $0x184] sm:$0xf0]  ;;  %v2558_v0 = vld [vmem:[%s4003_s23 + $0x20] sm:$0xf0]  ;;  %v2813_v8 = vor.u32 %v3267_v57, %v2812_v56 }
  0xfd   : > { %1908 = vmatpush.bf16.msra.mxu3 %v2901_v31  ;;  %v2556_v61 = vld [vmem:[%s4003_s23] sm:$0xf]  ;;  %v3124_v1 = vld [vmem:[%s4005_s24 + $0x370] sm:$0xf]  ;;  %v3345_v2 = vld [vmem:[%s4005_s24 + $0x374] sm:$0xf0]  ;;  %v2877_v12 = vor.u32 %v3283_v60, %v2876_v58  ;;  %v4094_v22 = vor.u32 %v3202_v63, %v2558_v0 }
  0xfe   : > { %1822 = vmatpush.bf16.msra.mxu0 %v2701_v37  ;;  %v3206_v62 = vld [vmem:[%s4003_s23 + $0x1c] sm:$0xf0]  ;;  %v2564_v4 = vld [vmem:[%s4003_s23 + $0x8] sm:$0xf]  ;;  %v3188_v5 = vld [vmem:[%s4005_s24 + $0x3f0] sm:$0xf]  ;;  %v3125_v13 = vor.u32 %v3345_v2, %v3124_v1 }
  0xff   : > { %1851 = vmatpush.bf16.msra.mxu1 %v2765_v38  ;;  %v3361_v6 = vld [vmem:[%s4005_s24 + $0x3f4] sm:$0xf0]  ;;  %v3207_v9 = vld [vmem:[%s4003_s23 + $0x24] sm:$0xf0]  ;;  %v3203_v10 = vld [vmem:[%s4003_s23 + $0xc] sm:$0xf]  ;;  %v4089_v17 = vor.u32 %v3206_v62, %v2556_v61 }
 0x100   : > { %1880 = vmatpush.bf16.msra.mxu2 %v2829_v39  ;;  %v2566_v11 = vld [vmem:[%s4003_s23 + $0x28] sm:$0xf0]  ;;  %v2996_v14 = vld [vmem:[%s4005_s24 + $0x270] sm:$0xf]  ;;  %v3313_v15 = vld [vmem:[%s4005_s24 + $0x274] sm:$0xf0]  ;;  %v3189_v18 = vor.u32 %v3361_v6, %v3188_v5  ;;  %v4096_v23 = vor.u32 %v3207_v9, %v2564_v4 }
 0x101   : > { %1909 = vmatpush.bf16.msra.mxu3 %v2893_v43  ;;  %v3060_v16 = vld [vmem:[%s4005_s24 + $0x2f0] sm:$0xf]  ;;  %v3329_v19 = vld [vmem:[%s4005_s24 + $0x2f4] sm:$0xf0]  ;;  %v3116_v20 = vld [vmem:[%s4005_s24 + $0x360] sm:$0xf]  ;;  %v4100_v26 = vor.u32 %v3203_v10, %v2566_v11  ;;  %v2997_v27 = vor.u32 %v3313_v15, %v2996_v14 }
 0x102   : > { %1823 = vmatpush.bf16.msra.mxu0 %v2693_v50  ;;  %v3343_v21 = vld [vmem:[%s4005_s24 + $0x364] sm:$0xf0]  ;;  %v3180_v24 = vld [vmem:[%s4005_s24 + $0x3e0] sm:$0xf]  ;;  %v3061_v28 = vor.u32 %v3329_v19, %v3060_v16  ;;  %v3108_v35 = vld [vmem:[%s4005_s24 + $0x350] sm:$0xf] }
 0x103   : > { %1852 = vmatpush.bf16.msra.mxu1 %v2757_v54  ;;  %v3359_v25 = vld [vmem:[%s4005_s24 + $0x3e4] sm:$0xf0]  ;;  %v3117_v29 = vor.u32 %v3343_v21, %v3116_v20  ;;  %v2988_v30 = vld [vmem:[%s4005_s24 + $0x260] sm:$0xf]  ;;  %v3341_v36 = vld [vmem:[%s4005_s24 + $0x354] sm:$0xf0] }
 0x104   : > { %1881 = vmatpush.bf16.msra.mxu2 %v2821_v55  ;;  %v3311_v31 = vld [vmem:[%s4005_s24 + $0x264] sm:$0xf0]  ;;  %v3052_v32 = vld [vmem:[%s4005_s24 + $0x2e0] sm:$0xf]  ;;  %v3181_v33 = vor.u32 %v3359_v25, %v3180_v24  ;;  %v3172_v37 = vld [vmem:[%s4005_s24 + $0x3d0] sm:$0xf]  ;;  %v3109_v41 = vor.u32 %v3341_v36, %v3108_v35 }
 0x105   : > { %1910 = vmatpush.bf16.msra.mxu3 %v2885_v59  ;;  %v3327_v34 = vld [vmem:[%s4005_s24 + $0x2e4] sm:$0xf0]  ;;  %v3357_v38 = vld [vmem:[%s4005_s24 + $0x3d4] sm:$0xf0]  ;;  %v2989_v39 = vor.u32 %v3311_v31, %v2988_v30  ;;  %v2980_v42 = vld [vmem:[%s4005_s24 + $0x250] sm:$0xf] }
 0x106   : > { %1824 = vmatpush.bf16.msra.mxu0 %v2685_v3  ;;  %v3053_v40 = vor.u32 %v3327_v34, %v3052_v32  ;;  %v3309_v43 = vld [vmem:[%s4005_s24 + $0x254] sm:$0xf0]  ;;  %v3044_v44 = vld [vmem:[%s4005_s24 + $0x2d0] sm:$0xf]  ;;  %v3173_v45 = vor.u32 %v3357_v38, %v3172_v37  ;;  %v3100_v47 = vld [vmem:[%s4005_s24 + $0x340] sm:$0xf] }
 0x107   : > { %1853 = vmatpush.bf16.msra.mxu1 %v2749_v7  ;;  %v3325_v46 = vld [vmem:[%s4005_s24 + $0x2d4] sm:$0xf0]  ;;  %v3339_v48 = vld [vmem:[%s4005_s24 + $0x344] sm:$0xf0]  ;;  %v3164_v49 = vld [vmem:[%s4005_s24 + $0x3c0] sm:$0xf]  ;;  %v2981_v51 = vor.u32 %v3309_v43, %v2980_v42 }
 0x108   : > { %1882 = vmatpush.bf16.msra.mxu2 %v2813_v8  ;;  %v3355_v50 = vld [vmem:[%s4005_s24 + $0x3c4] sm:$0xf0]  ;;  %v2588_v52 = vld [vmem:[%s4003_s23 + $0x40] sm:$0xf]  ;;  %v3045_v54 = vor.u32 %v3325_v46, %v3044_v44  ;;  %v3101_v55 = vor.u32 %v3339_v48, %v3100_v47  ;;  %v3210_v59 = vld [vmem:[%s4003_s23 + $0x44] sm:$0xf] }
 0x109   : > { %1911 = vmatpush.bf16.msra.mxu3 %v2877_v12  ;;  %1825 = vmatmul.bf16.vlgmr.msra.gmra.mxu0 %v4089_v17  ;;  %v3214_v53 = vld [vmem:[%s4003_s23 + $0x5c] sm:$0xf0]  ;;  %v3307_v57 = vld [vmem:[%s4005_s24 + $0x244] sm:$0xf0]  ;;  %v2590_v60 = vld [vmem:[%s4003_s23 + $0x60] sm:$0xf0]  ;;  %v3165_v61 = vor.u32 %v3355_v50, %v3164_v49 }
 0x10a   : > { %1854 = vmatmul.bf16.vlgmr.msra.gmra.mxu1 %v4094_v22  ;;  %1933 = vmatpush.bf16.msrb.mxu0 %v2997_v27  ;;  %v2972_v56 = vld [vmem:[%s4005_s24 + $0x240] sm:$0xf]  ;;  %v3323_v62 = vld [vmem:[%s4005_s24 + $0x2c4] sm:$0xf0]  ;;  %v3092_v63 = vld [vmem:[%s4005_s24 + $0x330] sm:$0xf]  ;;  %v4146_v19 = vor.u32 %v3210_v59, %v2590_v60 }
 0x10b   : > { %1883 = vmatmul.bf16.vlgmr.msra.gmra.mxu2 %v4096_v23  ;;  %1962 = vmatpush.bf16.msrb.mxu1 %v3061_v28  ;;  %v3036_v58 = vld [vmem:[%s4005_s24 + $0x2c0] sm:$0xf]  ;;  %v3337_v0 = vld [vmem:[%s4005_s24 + $0x334] sm:$0xf0]  ;;  %v2596_v1 = vld [vmem:[%s4003_s23 + $0x48] sm:$0xf]  ;;  %v2973_v7 = vor.u32 %v3307_v57, %v2972_v56 }
 0x10c   : > { %1991 = vmatpush.bf16.msrb.mxu2 %v3125_v13  ;;  %1912 = vmatmul.bf16.vlgmr.msra.gmra.mxu3 %v4100_v26  ;;  %v3156_v2 = vld [vmem:[%s4005_s24 + $0x3b0] sm:$0xf]  ;;  %v3353_v3 = vld [vmem:[%s4005_s24 + $0x3b4] sm:$0xf0]  ;;  %v3215_v4 = vld [vmem:[%s4003_s23 + $0x64] sm:$0xf0]  ;;  %v3037_v8 = vor.u32 %v3323_v62, %v3036_v58  ;;  %v3093_v9 = vor.u32 %v3337_v0, %v3092_v63  ;;  %v4141_v13 = vor.u32 %v3214_v53, %v2588_v52 }
 0x10d   : > { %2020 = vmatpush.bf16.msrb.mxu3 %v3189_v18  ;;  %v3211_v5 = vld [vmem:[%s4003_s23 + $0x4c] sm:$0xf]  ;;  %v2964_v10 = vld [vmem:[%s4005_s24 + $0x230] sm:$0xf]  ;;  %v3305_v11 = vld [vmem:[%s4005_s24 + $0x234] sm:$0xf0]  ;;  %v3157_v14 = vor.u32 %v3353_v3, %v3156_v2  ;;  %v4148_v20 = vor.u32 %v3215_v4, %v2596_v1 }
 0x10e   : > { %1934 = vmatpush.bf16.msrb.mxu0 %v2989_v39  ;;  %v2598_v6 = vld [vmem:[%s4003_s23 + $0x68] sm:$0xf0]  ;;  %v3028_v12 = vld [vmem:[%s4005_s24 + $0x2b0] sm:$0xf]  ;;  %v3321_v15 = vld [vmem:[%s4005_s24 + $0x2b4] sm:$0xf0]  ;;  %v2965_v27 = vor.u32 %v3305_v11, %v2964_v10 }
 0x10f   : > { %1963 = vmatpush.bf16.msrb.mxu1 %v3053_v40  ;;  %v3084_v16 = vld [vmem:[%s4005_s24 + $0x320] sm:$0xf]  ;;  %v3335_v18 = vld [vmem:[%s4005_s24 + $0x324] sm:$0xf0]  ;;  %v4152_v25 = vor.u32 %v3211_v5, %v2598_v6  ;;  %v3029_v28 = vor.u32 %v3321_v15, %v3028_v12  ;;  %v3076_v36 = vld [vmem:[%s4005_s24 + $0x310] sm:$0xf] }
 0x110   : > { %1992 = vmatpush.bf16.msrb.mxu2 %v3117_v29  ;;  %v3148_v21 = vld [vmem:[%s4005_s24 + $0x3a0] sm:$0xf]  ;;  %v3351_v24 = vld [vmem:[%s4005_s24 + $0x3a4] sm:$0xf0]  ;;  %v3085_v29 = vor.u32 %v3335_v18, %v3084_v16  ;;  %v3333_v37 = vld [vmem:[%s4005_s24 + $0x314] sm:$0xf0] }
 0x111   : > { %2021 = vmatpush.bf16.msrb.mxu3 %v3181_v33  ;;  %v2956_v30 = vld [vmem:[%s4005_s24 + $0x220] sm:$0xf]  ;;  %v3303_v31 = vld [vmem:[%s4005_s24 + $0x224] sm:$0xf0]  ;;  %v3149_v32 = vor.u32 %v3351_v24, %v3148_v21  ;;  %v2948_v38 = vld [vmem:[%s4005_s24 + $0x210] sm:$0xf]  ;;  %v3077_v40 = vor.u32 %v3333_v37, %v3076_v36 }
 0x112   : > { %1935 = vmatpush.bf16.msrb.mxu0 %v2981_v51  ;;  %v3020_v33 = vld [vmem:[%s4005_s24 + $0x2a0] sm:$0xf]  ;;  %v3319_v34 = vld [vmem:[%s4005_s24 + $0x2a4] sm:$0xf0]  ;;  %v2957_v35 = vor.u32 %v3303_v31, %v2956_v30  ;;  %v3140_v42 = vld [vmem:[%s4005_s24 + $0x390] sm:$0xf] }
 0x113   : > { %1964 = vmatpush.bf16.msrb.mxu1 %v3045_v54  ;;  %v3021_v39 = vor.u32 %v3319_v34, %v3020_v33  ;;  %v3349_v43 = vld [vmem:[%s4005_s24 + $0x394] sm:$0xf0]  ;;  %v3068_v47 = vld [vmem:[%s4005_s24 + $0x300] sm:$0xf]  ;;  %v3331_v48 = vld [vmem:[%s4005_s24 + $0x304] sm:$0xf0] }
 0x114   : > { %1993 = vmatpush.bf16.msrb.mxu2 %v3109_v41  ;;  %v3301_v41 = vld [vmem:[%s4005_s24 + $0x214] sm:$0xf0]  ;;  %v3141_v44 = vor.u32 %v3349_v43, %v3140_v42  ;;  %v3132_v50 = vld [vmem:[%s4005_s24 + $0x380] sm:$0xf]  ;;  %v3347_v51 = vld [vmem:[%s4005_s24 + $0x384] sm:$0xf0]  ;;  %v3069_v53 = vor.u32 %v3331_v48, %v3068_v47 }
 0x115   : > { %2022 = vmatpush.bf16.msrb.mxu3 %v3173_v45  ;;  %v3012_v45 = vld [vmem:[%s4005_s24 + $0x290] sm:$0xf]  ;;  %v3317_v46 = vld [vmem:[%s4005_s24 + $0x294] sm:$0xf0]  ;;  %v2949_v49 = vor.u32 %v3301_v41, %v2948_v38  ;;  %v2940_v54 = vld [vmem:[%s4005_s24 + $0x200] sm:$0xf]  ;;  %v3133_v56 = vor.u32 %v3347_v51, %v3132_v50 }
 0x116   : > { %1936 = vmatpush.bf16.msrb.mxu0 %v2973_v7  ;;  %v3013_v52 = vor.u32 %v3317_v46, %v3012_v45  ;;  %v3004_v57 = vld [vmem:[%s4005_s24 + $0x280] sm:$0xf]  ;;  %v3315_v58 = vld [vmem:[%s4005_s24 + $0x284] sm:$0xf0]  ;;  %v2622_v62 = vld [vmem:[%s4003_s23 + $0xa0] sm:$0xf0] }
 0x117   : > { %1965 = vmatpush.bf16.msrb.mxu1 %v3037_v8  ;;  %v2620_v59 = vld [vmem:[%s4003_s23 + $0x80] sm:$0xf]  ;;  %v2628_v63 = vld [vmem:[%s4003_s23 + $0x88] sm:$0xf]  ;;  %v3219_v2 = vld [vmem:[%s4003_s23 + $0x8c] sm:$0xf]  ;;  %v3005_v4 = vor.u32 %v3315_v58, %v3004_v57 }
 0x118   : > { %1994 = vmatpush.bf16.msrb.mxu2 %v3101_v55  ;;  %v3299_v55 = vld [vmem:[%s4005_s24 + $0x204] sm:$0xf0]  ;;  %v3222_v60 = vld [vmem:[%s4003_s23 + $0x9c] sm:$0xf0]  ;;  %v2630_v3 = vld [vmem:[%s4003_s23 + $0xa8] sm:$0xf0] }
 0x119   : > { %2023 = vmatpush.bf16.msrb.mxu3 %v3165_v61  ;;  %1830 = vmatmul.bf16.gmra.mxu0 %v4141_v13  ;;  %v3218_v61 = vld [vmem:[%s4003_s23 + $0x84] sm:$0xf]  ;;  %v3223_v0 = vld [vmem:[%s4003_s23 + $0xa4] sm:$0xf0]  ;;  %v2941_v1 = vor.u32 %v3299_v55, %v2940_v54  ;;  %v4186_v5 = vor.u32 %v3222_v60, %v2620_v59  ;;  %v4192_v8 = vor.u32 %v3219_v2, %v2630_v3  ;;  %v2870_v10 = vld [vmem:[%s4005_s24 + $0x178] sm:$0xf0] }
 0x11a   : > { %1859 = vmatmul.bf16.gmra.mxu1 %v4146_v19  ;;  %1937 = vmatpush.bf16.msrb.mxu0 %v2965_v27  ;;  %v4188_v6 = vor.u32 %v3218_v61, %v2622_v62  ;;  %v4190_v7 = vor.u32 %v3223_v0, %v2628_v63  ;;  %v3248_v11 = vld [vmem:[%s4005_s24 + $0x74] sm:$0xf]  ;;  %v2934_v16 = vld [vmem:[%s4005_s24 + $0x1f8] sm:$0xf0]  ;;  %v2862_v30 = vld [vmem:[%s4005_s24 + $0x168] sm:$0xf0] }
 0x11b   : > { %1888 = vmatmul.bf16.gmra.mxu2 %v4148_v20  ;;  %1966 = vmatpush.bf16.msrb.mxu1 %v3029_v28  ;;  %v3296_v15 = vld [vmem:[%s4005_s24 + $0x1f4] sm:$0xf]  ;;  %v2806_v27 = vld [vmem:[%s4005_s24 + $0xf8] sm:$0xf0]  ;;  %v3278_v28 = vld [vmem:[%s4005_s24 + $0x164] sm:$0xf] }
 0x11c   : > { %1995 = vmatpush.bf16.msrb.mxu2 %v3093_v9  ;;  %1917 = vmatmul.bf16.gmra.mxu3 %v4152_v25  ;;  %v3280_v9 = vld [vmem:[%s4005_s24 + $0x174] sm:$0xf]  ;;  %v2937_v21 = vor.u32 %v3296_v15, %v2934_v16  ;;  %v3246_v31 = vld [vmem:[%s4005_s24 + $0x64] sm:$0xf]  ;;  %v2865_v33 = vor.u32 %v3278_v28, %v2862_v30  ;;  %v2926_v36 = vld [vmem:[%s4005_s24 + $0x1e8] sm:$0xf0] }
 0x11d   : > { %2024 = vmatpush.bf16.msrb.mxu3 %v3157_v14  ;;  %v2873_v12 = vor.u32 %v3280_v9, %v2870_v10  ;;  %v2742_v14 = vld [vmem:[%s4005_s24 + $0x78] sm:$0xf0]  ;;  %v3264_v24 = vld [vmem:[%s4005_s24 + $0xf4] sm:$0xf]  ;;  %v3262_v37 = vld [vmem:[%s4005_s24 + $0xe4] sm:$0xf] }
 0x11e   : > { %1938 = vmatpush.bf16.msrb.mxu0 %v2957_v35  ;;  %v2745_v18 = vor.u32 %v3248_v11, %v2742_v14  ;;  %v3294_v35 = vld [vmem:[%s4005_s24 + $0x1e4] sm:$0xf]  ;;  %v2652_v41 = vld [vmem:[%s4003_s23 + $0xc0] sm:$0xf]  ;;  %v2660_v45 = vld [vmem:[%s4003_s23 + $0xc8] sm:$0xf] }
 0x11f   : > { %1967 = vmatpush.bf16.msrb.mxu1 %v3021_v39  ;;  %v2929_v38 = vor.u32 %v3294_v35, %v2926_v36  ;;  %v2798_v39 = vld [vmem:[%s4005_s24 + $0xe8] sm:$0xf0]  ;;  %v3230_v42 = vld [vmem:[%s4003_s23 + $0xdc] sm:$0xf0]  ;;  %v3226_v43 = vld [vmem:[%s4003_s23 + $0xc4] sm:$0xf] }
 0x120   : > { %1996 = vmatpush.bf16.msrb.mxu2 %v3085_v29  ;;  %v2809_v29 = vor.u32 %v3264_v24, %v2806_v27  ;;  %v3231_v46 = vld [vmem:[%s4003_s23 + $0xe4] sm:$0xf0]  ;;  %v3227_v47 = vld [vmem:[%s4003_s23 + $0xcc] sm:$0xf]  ;;  %v2854_v54 = vld [vmem:[%s4005_s24 + $0x158] sm:$0xf0] }
 0x121   : > { %2025 = vmatpush.bf16.msrb.mxu3 %v3149_v32  ;;  %v2734_v32 = vld [vmem:[%s4005_s24 + $0x68] sm:$0xf0]  ;;  %v4226_v51 = vor.u32 %v3231_v46, %v2660_v45  ;;  %v3244_v55 = vld [vmem:[%s4005_s24 + $0x54] sm:$0xf]  ;;  %v2726_v57 = vld [vmem:[%s4005_s24 + $0x58] sm:$0xf0] }
 0x122   : > { %1939 = vmatpush.bf16.msrb.mxu0 %v2949_v49  ;;  %v2737_v34 = vor.u32 %v3246_v31, %v2734_v32  ;;  %v2662_v48 = vld [vmem:[%s4003_s23 + $0xe8] sm:$0xf0]  ;;  %v4222_v49 = vor.u32 %v3230_v42, %v2652_v41  ;;  %v3292_v58 = vld [vmem:[%s4005_s24 + $0x1d4] sm:$0xf]  ;;  %v2918_v59 = vld [vmem:[%s4005_s24 + $0x1d8] sm:$0xf0]  ;;  %v2729_v60 = vor.u32 %v3244_v55, %v2726_v57 }
 0x123   : > { %1968 = vmatpush.bf16.msrb.mxu1 %v3013_v52  ;;  %v4228_v52 = vor.u32 %v3227_v47, %v2662_v48  ;;  %v2921_v61 = vor.u32 %v3292_v58, %v2918_v59  ;;  %v3260_v62 = vld [vmem:[%s4005_s24 + $0xd4] sm:$0xf]  ;;  %v2790_v63 = vld [vmem:[%s4005_s24 + $0xd8] sm:$0xf0]  ;;  %v3274_v0 = vld [vmem:[%s4005_s24 + $0x144] sm:$0xf] }
 0x124   : > { %1997 = vmatpush.bf16.msrb.mxu2 %v3077_v40  ;;  %v2801_v40 = vor.u32 %v3262_v37, %v2798_v39  ;;  %v2846_v2 = vld [vmem:[%s4005_s24 + $0x148] sm:$0xf0]  ;;  %v3242_v3 = vld [vmem:[%s4005_s24 + $0x44] sm:$0xf]  ;;  %v3208_v24 = vld [vmem:[%s4003_s23 + $0x2c] sm:$0xf0] }
 0x125   : > { %2026 = vmatpush.bf16.msrb.mxu3 %v3141_v44  ;;  %v2654_v44 = vld [vmem:[%s4003_s23 + $0xe0] sm:$0xf0]  ;;  %v2849_v9 = vor.u32 %v3274_v0, %v2846_v2  ;;  %v2782_v16 = vld [vmem:[%s4005_s24 + $0xc8] sm:$0xf0]  ;;  %v3204_v27 = vld [vmem:[%s4003_s23 + $0x14] sm:$0xf] }
 0x126   : > { %1940 = vmatpush.bf16.msrb.mxu0 %v2941_v1  ;;  %v4224_v50 = vor.u32 %v3226_v43, %v2654_v44  ;;  %v2793_v1 = vor.u32 %v3260_v62, %v2790_v63  ;;  %v3290_v11 = vld [vmem:[%s4005_s24 + $0x1c4] sm:$0xf]  ;;  %v2574_v28 = vld [vmem:[%s4003_s23 + $0x30] sm:$0xf0]  ;;  %v3209_v30 = vld [vmem:[%s4003_s23 + $0x34] sm:$0xf0] }
 0x127   : > { %1969 = vmatpush.bf16.msrb.mxu1 %v3005_v4  ;;  %v2718_v4 = vld [vmem:[%s4005_s24 + $0x48] sm:$0xf0]  ;;  %v3258_v14 = vld [vmem:[%s4005_s24 + $0xc4] sm:$0xf]  ;;  %v3205_v31 = vld [vmem:[%s4003_s23 + $0x1c] sm:$0xf] }
 0x128   : > { %1998 = vmatpush.bf16.msrb.mxu2 %v3069_v53  ;;  %v3276_v53 = vld [vmem:[%s4005_s24 + $0x154] sm:$0xf]  ;;  %v2721_v10 = vor.u32 %v3242_v3, %v2718_v4  ;;  %v2582_v32 = vld [vmem:[%s4003_s23 + $0x38] sm:$0xf0]  ;;  %v3270_v48 = vld [vmem:[%s4005_s24 + $0x124] sm:$0xf] }
 0x129   : > { %2027 = vmatpush.bf16.msrb.mxu3 %v3133_v56  ;;  %1835 = vmatmul.bf16.gmra.mxu0 %v4186_v5  ;;  %v2857_v56 = vor.u32 %v3276_v53, %v2854_v54  ;;  %v4264_v36 = vor.u32 %v3205_v31, %v2582_v32  ;;  %v3272_v37 = vld [vmem:[%s4005_s24 + $0x134] sm:$0xf]  ;;  %v2710_v41 = vld [vmem:[%s4005_s24 + $0x38] sm:$0xf0]  ;;  %v2830_v54 = vld [vmem:[%s4005_s24 + $0x128] sm:$0xf0] }
 0x12a   : > { %1864 = vmatmul.bf16.gmra.mxu1 %v4188_v6  ;;  %2049 = vmatpush.bf16.msra.mxu0 %v2745_v18  ;;  %v2785_v18 = vor.u32 %v3258_v14, %v2782_v16  ;;  %v3240_v39 = vld [vmem:[%s4005_s24 + $0x34] sm:$0xf]  ;;  %v2902_v43 = vld [vmem:[%s4005_s24 + $0x1b8] sm:$0xf0]  ;;  %v3238_v55 = vld [vmem:[%s4005_s24 + $0x24] sm:$0xf]  ;;  %v2833_v57 = vor.u32 %v3270_v48, %v2830_v54 }
 0x12b   : > { %1893 = vmatmul.bf16.gmra.mxu2 %v4190_v7  ;;  %2078 = vmatpush.bf16.msra.mxu1 %v2809_v29  ;;  %v2580_v29 = vld [vmem:[%s4003_s23 + $0x18] sm:$0xf]  ;;  %v3288_v42 = vld [vmem:[%s4005_s24 + $0x1b4] sm:$0xf]  ;;  %v2713_v44 = vor.u32 %v3240_v39, %v2710_v41  ;;  %v2774_v47 = vld [vmem:[%s4005_s24 + $0xb8] sm:$0xf0] }
 0x12c   : > { %1922 = vmatmul.bf16.gmra.mxu3 %v4192_v8  ;;  %2107 = vmatpush.bf16.msra.mxu2 %v2873_v12  ;;  %v2910_v12 = vld [vmem:[%s4005_s24 + $0x1c8] sm:$0xf0]  ;;  %v4262_v35 = vor.u32 %v3209_v30, %v2580_v29  ;;  %v2905_v45 = vor.u32 %v3288_v42, %v2902_v43  ;;  %v3256_v46 = vld [vmem:[%s4005_s24 + $0xb4] sm:$0xf]  ;;  %v3286_v59 = vld [vmem:[%s4005_s24 + $0x1a4] sm:$0xf] }
 0x12d   : > { %2136 = vmatpush.bf16.msra.mxu3 %v2937_v21  ;;  %v2913_v15 = vor.u32 %v3290_v11, %v2910_v12  ;;  %v2572_v21 = vld [vmem:[%s4003_s23 + $0x10] sm:$0xf]  ;;  %v2777_v53 = vor.u32 %v3256_v46, %v2774_v47  ;;  %v2766_v63 = vld [vmem:[%s4005_s24 + $0xa8] sm:$0xf0]  ;;  %v3212_v3 = vld [vmem:[%s4003_s23 + $0x54] sm:$0xf] }
 0x12e   : > { %2050 = vmatpush.bf16.msra.mxu0 %v2737_v34  ;;  %v4260_v34 = vor.u32 %v3204_v27, %v2574_v28  ;;  %v3216_v2 = vld [vmem:[%s4003_s23 + $0x6c] sm:$0xf0]  ;;  %v2606_v4 = vld [vmem:[%s4003_s23 + $0x70] sm:$0xf0]  ;;  %v3213_v11 = vld [vmem:[%s4003_s23 + $0x5c] sm:$0xf] }
 0x12f   : > { %2079 = vmatpush.bf16.msra.mxu1 %v2801_v40  ;;  %v2614_v12 = vld [vmem:[%s4003_s23 + $0x78] sm:$0xf0]  ;;  %v3236_v27 = vld [vmem:[%s4005_s24 + $0x14] sm:$0xf]  ;;  %v2814_v42 = vld [vmem:[%s4005_s24 + $0x108] sm:$0xf0] }
 0x130   : > { %2108 = vmatpush.bf16.msra.mxu2 %v2865_v33  ;;  %v4258_v33 = vor.u32 %v3208_v24, %v2572_v21  ;;  %v3268_v21 = vld [vmem:[%s4005_s24 + $0x114] sm:$0xf]  ;;  %v2822_v24 = vld [vmem:[%s4005_s24 + $0x118] sm:$0xf0]  ;;  %v3234_v43 = vld [vmem:[%s4005_s24 + $0x4] sm:$0xf] }
 0x131   : > { %2137 = vmatpush.bf16.msra.mxu3 %v2929_v38  ;;  %v2838_v38 = vld [vmem:[%s4005_s24 + $0x138] sm:$0xf0]  ;;  %v2825_v28 = vor.u32 %v3268_v21, %v2822_v24  ;;  %v3284_v30 = vld [vmem:[%s4005_s24 + $0x194] sm:$0xf]  ;;  %v3282_v47 = vld [vmem:[%s4005_s24 + $0x184] sm:$0xf] }
 0x132   : > { %2051 = vmatpush.bf16.msra.mxu0 %v2729_v60  ;;  %v2841_v40 = vor.u32 %v3272_v37, %v2838_v38  ;;  %v2894_v60 = vld [vmem:[%s4005_s24 + $0x1a8] sm:$0xf0]  ;;  %v2694_v29 = vld [vmem:[%s4005_s24 + $0x18] sm:$0xf0]  ;;  %v3252_v38 = vld [vmem:[%s4005_s24 + $0x94] sm:$0xf] }
 0x133   : > { %2080 = vmatpush.bf16.msra.mxu1 %v2793_v1  ;;  %v2897_v62 = vor.u32 %v3286_v59, %v2894_v60  ;;  %v2604_v1 = vld [vmem:[%s4003_s23 + $0x50] sm:$0xf]  ;;  %v2886_v31 = vld [vmem:[%s4005_s24 + $0x198] sm:$0xf0]  ;;  %v2697_v32 = vor.u32 %v3236_v27, %v2694_v29  ;;  %v2878_v48 = vld [vmem:[%s4005_s24 + $0x188] sm:$0xf0] }
 0x134   : > { %2109 = vmatpush.bf16.msra.mxu2 %v2857_v56  ;;  %v2702_v56 = vld [vmem:[%s4005_s24 + $0x28] sm:$0xf0]  ;;  %v4294_v14 = vor.u32 %v3216_v2, %v2604_v1  ;;  %v2889_v37 = vor.u32 %v3284_v30, %v2886_v31  ;;  %v2758_v39 = vld [vmem:[%s4005_s24 + $0x98] sm:$0xf0]  ;;  %v2881_v54 = vor.u32 %v3282_v47, %v2878_v48  ;;  %v3220_v59 = vld [vmem:[%s4003_s23 + $0x94] sm:$0xf] }
 0x135   : > { %2138 = vmatpush.bf16.msra.mxu3 %v2921_v61  ;;  %v2705_v58 = vor.u32 %v3238_v55, %v2702_v56  ;;  %v3254_v61 = vld [vmem:[%s4005_s24 + $0xa4] sm:$0xf]  ;;  %v2761_v41 = vor.u32 %v3252_v38, %v2758_v39  ;;  %v2750_v55 = vld [vmem:[%s4005_s24 + $0x88] sm:$0xf0]  ;;  %v2638_v60 = vld [vmem:[%s4003_s23 + $0xb0] sm:$0xf0] }
 0x136   : > { %2052 = vmatpush.bf16.msra.mxu0 %v2721_v10  ;;  %v2769_v0 = vor.u32 %v3254_v61, %v2766_v63  ;;  %v3217_v10 = vld [vmem:[%s4003_s23 + $0x74] sm:$0xf0]  ;;  %v3221_v63 = vld [vmem:[%s4003_s23 + $0x9c] sm:$0xf]  ;;  %v4332_v2 = vor.u32 %v3220_v59, %v2638_v60  ;;  %v3360_v24 = vld [vmem:[%s4005_s24 + $0x3f4] sm:$0xf] }
 0x137   : > { %2081 = vmatpush.bf16.msra.mxu1 %v2785_v18  ;;  %v4300_v18 = vor.u32 %v3213_v11, %v2614_v12  ;;  %v2644_v61 = vld [vmem:[%s4003_s23 + $0x98] sm:$0xf]  ;;  %v3312_v11 = vld [vmem:[%s4005_s24 + $0x274] sm:$0xf]  ;;  %v2998_v21 = vld [vmem:[%s4005_s24 + $0x278] sm:$0xf0] }
 0x138   : > { %2110 = vmatpush.bf16.msra.mxu2 %v2849_v9  ;;  %v2612_v9 = vld [vmem:[%s4003_s23 + $0x58] sm:$0xf]  ;;  %v3190_v27 = vld [vmem:[%s4005_s24 + $0x3f8] sm:$0xf0]  ;;  %v2668_v30 = vld [vmem:[%s4003_s23 + $0xd0] sm:$0xf] }
 0x139   : > { %1840 = vmatmul.bf16.gmra.mxu0 %v4222_v49  ;;  %2139 = vmatpush.bf16.msra.mxu3 %v2913_v15  ;;  %v4296_v15 = vor.u32 %v3212_v3, %v2606_v4  ;;  %v4298_v16 = vor.u32 %v3217_v10, %v2612_v9  ;;  %v3344_v9 = vld [vmem:[%s4005_s24 + $0x374] sm:$0xf]  ;;  %v3126_v10 = vld [vmem:[%s4005_s24 + $0x378] sm:$0xf0]  ;;  %v3193_v29 = vor.u32 %v3360_v24, %v3190_v27  ;;  %v3232_v31 = vld [vmem:[%s4003_s23 + $0xec] sm:$0xf0] }
 0x13a   : > { %1869 = vmatmul.bf16.gmra.mxu1 %v4224_v50  ;;  %2053 = vmatpush.bf16.msra.mxu0 %v2713_v44  ;;  %v2686_v44 = vld [vmem:[%s4005_s24 + $0x8] sm:$0xf0]  ;;  %v3129_v12 = vor.u32 %v3344_v9, %v3126_v10  ;;  %v3342_v38 = vld [vmem:[%s4005_s24 + $0x364] sm:$0xf]  ;;  %v2670_v48 = vld [vmem:[%s4003_s23 + $0xf0] sm:$0xf0] }
 0x13b   : > { %1898 = vmatmul.bf16.gmra.mxu2 %v4226_v51  ;;  %2082 = vmatpush.bf16.msra.mxu1 %v2777_v53  ;;  %v2689_v46 = vor.u32 %v3234_v43, %v2686_v44  ;;  %v3250_v53 = vld [vmem:[%s4005_s24 + $0x84] sm:$0xf]  ;;  %v3228_v43 = vld [vmem:[%s4003_s23 + $0xd4] sm:$0xf]  ;;  %v3182_v47 = vld [vmem:[%s4005_s24 + $0x3e8] sm:$0xf0] }
 0x13c   : > { %1927 = vmatmul.bf16.gmra.mxu3 %v4228_v52  ;;  %2111 = vmatpush.bf16.msra.mxu2 %v2841_v40  ;;  %v3266_v40 = vld [vmem:[%s4005_s24 + $0x104] sm:$0xf]  ;;  %v2753_v56 = vor.u32 %v3250_v53, %v2750_v55  ;;  %v2676_v53 = vld [vmem:[%s4003_s23 + $0xd8] sm:$0xf]  ;;  %v4366_v59 = vor.u32 %v3228_v43, %v2670_v48  ;;  %v3340_v9 = vld [vmem:[%s4005_s24 + $0x354] sm:$0xf] }
 0x13d   : > { %2140 = vmatpush.bf16.msra.mxu3 %v2905_v45  ;;  %v2817_v45 = vor.u32 %v3266_v40, %v2814_v42  ;;  %v3118_v40 = vld [vmem:[%s4005_s24 + $0x368] sm:$0xf0]  ;;  %v3110_v10 = vld [vmem:[%s4005_s24 + $0x358] sm:$0xf0]  ;;  %v3356_v24 = vld [vmem:[%s4005_s24 + $0x3d4] sm:$0xf] }
 0x13e   : > { %2054 = vmatpush.bf16.msra.mxu0 %v2705_v58  ;;  %v3224_v58 = vld [vmem:[%s4003_s23 + $0xac] sm:$0xf0]  ;;  %v2990_v42 = vld [vmem:[%s4005_s24 + $0x268] sm:$0xf0]  ;;  %v3121_v44 = vor.u32 %v3342_v38, %v3118_v40  ;;  %v3174_v27 = vld [vmem:[%s4005_s24 + $0x3d8] sm:$0xf0] }
 0x13f   : > { %2083 = vmatpush.bf16.msra.mxu1 %v2769_v0  ;;  %v2646_v0 = vld [vmem:[%s4003_s23 + $0xb8] sm:$0xf0]  ;;  %v3102_v38 = vld [vmem:[%s4005_s24 + $0x348] sm:$0xf0]  ;;  %v3354_v43 = vld [vmem:[%s4005_s24 + $0x3c4] sm:$0xf] }
 0x140   : > { %2112 = vmatpush.bf16.msra.mxu2 %v2833_v57  ;;  %v2636_v57 = vld [vmem:[%s4003_s23 + $0x90] sm:$0xf]  ;;  %v4336_v4 = vor.u32 %v3221_v63, %v2646_v0  ;;  %v3054_v63 = vld [vmem:[%s4005_s24 + $0x2e8] sm:$0xf0]  ;;  %v3322_v48 = vld [vmem:[%s4005_s24 + $0x2c4] sm:$0xf] }
 0x141   : > { %2141 = vmatpush.bf16.msra.mxu3 %v2897_v62  ;;  %v3225_v62 = vld [vmem:[%s4003_s23 + $0xb4] sm:$0xf0]  ;;  %v4330_v1 = vor.u32 %v3224_v58, %v2636_v57  ;;  %v2678_v57 = vld [vmem:[%s4003_s23 + $0xf8] sm:$0xf0]  ;;  %v4364_v58 = vor.u32 %v3232_v31, %v2668_v30  ;;  %v3324_v30 = vld [vmem:[%s4005_s24 + $0x2d4] sm:$0xf] }
 0x142   : > { %2055 = vmatpush.bf16.msra.mxu0 %v2697_v32  ;;  %v4334_v3 = vor.u32 %v3225_v62, %v2644_v61  ;;  %v3328_v32 = vld [vmem:[%s4005_s24 + $0x2f4] sm:$0xf]  ;;  %v3326_v62 = vld [vmem:[%s4005_s24 + $0x2e4] sm:$0xf]  ;;  %v3046_v31 = vld [vmem:[%s4005_s24 + $0x2d8] sm:$0xf0] }
 0x143   : > { %2084 = vmatpush.bf16.msra.mxu1 %v2761_v41  ;;  %v3310_v41 = vld [vmem:[%s4005_s24 + $0x264] sm:$0xf]  ;;  %v3057_v0 = vor.u32 %v3326_v62, %v3054_v63  ;;  %v2974_v40 = vld [vmem:[%s4005_s24 + $0x248] sm:$0xf0]  ;;  %v2966_v63 = vld [vmem:[%s4005_s24 + $0x238] sm:$0xf0] }
 0x144   : > { %2113 = vmatpush.bf16.msra.mxu2 %v2825_v28  ;;  %v3001_v28 = vor.u32 %v3312_v11, %v2998_v21  ;;  %v3308_v11 = vld [vmem:[%s4005_s24 + $0x254] sm:$0xf]  ;;  %v2982_v21 = vld [vmem:[%s4005_s24 + $0x258] sm:$0xf0]  ;;  %p3194_p4 = scmp.ne.s32.totalorder %s3522_s15, 26 }
 0x145   : > { %2142 = vmatpush.bf16.msra.mxu3 %v2889_v37  ;;  %v3062_v37 = vld [vmem:[%s4005_s24 + $0x2f8] sm:$0xf0] }
 0x146   : > { %2056 = vmatpush.bf16.msra.mxu0 %v2689_v46  ;;  %v3065_v39 = vor.u32 %v3328_v32, %v3062_v37  ;;  %v3358_v46 = vld [vmem:[%s4005_s24 + $0x3e4] sm:$0xf]  ;;  %v3049_v37 = vor.u32 %v3324_v30, %v3046_v31  ;;  %v2958_v30 = vld [vmem:[%s4005_s24 + $0x228] sm:$0xf0] }
 0x147   : > { %2085 = vmatpush.bf16.msra.mxu1 %v2753_v56  ;;  %v3185_v55 = vor.u32 %v3358_v46, %v3182_v47  ;;  %v3229_v56 = vld [vmem:[%s4003_s23 + $0xdc] sm:$0xf]  ;;  %v3338_v32 = vld [vmem:[%s4005_s24 + $0x344] sm:$0xf] }
 0x148   : > { %2114 = vmatpush.bf16.msra.mxu2 %v2817_v45  ;;  %v2993_v45 = vor.u32 %v3310_v41, %v2990_v42  ;;  %v4370_v61 = vor.u32 %v3229_v56, %v2678_v57  ;;  %v3105_v41 = vor.u32 %v3338_v32, %v3102_v38  ;;  %v3094_v56 = vld [vmem:[%s4005_s24 + $0x338] sm:$0xf0]  ;;  %v3304_v57 = vld [vmem:[%s4005_s24 + $0x234] sm:$0xf]  ;;  %v3150_v38 = vld [vmem:[%s4005_s24 + $0x3a8] sm:$0xf0] }
 0x149   : > { %1941 = vmatmul.bf16.vlgmr.msrb.gmra.mxu0 %v4258_v33  ;;  %2143 = vmatpush.bf16.msra.mxu3 %v2881_v54  ;;  %v3233_v54 = vld [vmem:[%s4003_s23 + $0xf4] sm:$0xf0] }
 0x14a   : > { %1970 = vmatmul.bf16.vlgmr.msrb.gmra.mxu1 %v4260_v34  ;;  %2165 = vmatpush.bf16.msrb.mxu0 %v3001_v28  ;;  %v4368_v60 = vor.u32 %v3233_v54, %v2676_v53  ;;  %v2985_v28 = vor.u32 %v3308_v11, %v2982_v21  ;;  %v3038_v53 = vld [vmem:[%s4005_s24 + $0x2c8] sm:$0xf0]  ;;  %v3030_v21 = vld [vmem:[%s4005_s24 + $0x2b8] sm:$0xf0] }
 0x14b   : > { %1999 = vmatmul.bf16.vlgmr.msrb.gmra.mxu2 %v4262_v35  ;;  %2194 = vmatpush.bf16.msrb.mxu1 %v3065_v39  ;;  %v3306_v39 = vld [vmem:[%s4005_s24 + $0x244] sm:$0xf]  ;;  %v3041_v54 = vor.u32 %v3322_v48, %v3038_v53  ;;  %v3332_v53 = vld [vmem:[%s4005_s24 + $0x314] sm:$0xf] }
 0x14c   : > { %2028 = vmatmul.bf16.vlgmr.msrb.gmra.mxu3 %v4264_v36  ;;  %2223 = vmatpush.bf16.msrb.mxu2 %v3129_v12  ;;  %v3113_v12 = vor.u32 %v3340_v9, %v3110_v10  ;;  %v2977_v42 = vor.u32 %v3306_v39, %v2974_v40 }
 0x14d   : > { %2252 = vmatpush.bf16.msrb.mxu3 %v3193_v29  ;;  %v3177_v29 = vor.u32 %v3356_v24, %v3174_v27  ;;  %v3334_v24 = vld [vmem:[%s4005_s24 + $0x324] sm:$0xf] }
 0x14e   : > { %2166 = vmatpush.bf16.msrb.mxu0 %v2993_v45 }
 0x14f   : > { %2195 = vmatpush.bf16.msrb.mxu1 %v3057_v0  ;;  %v3352_v0 = vld [vmem:[%s4005_s24 + $0x3b4] sm:$0xf] }
 0x150   : > { %2224 = vmatpush.bf16.msrb.mxu2 %v3121_v44  ;;  %v3166_v44 = vld [vmem:[%s4005_s24 + $0x3c8] sm:$0xf0] }
 0x151   : > { %2253 = vmatpush.bf16.msrb.mxu3 %v3185_v55  ;;  %v3169_v45 = vor.u32 %v3354_v43, %v3166_v44  ;;  %v3336_v55 = vld [vmem:[%s4005_s24 + $0x334] sm:$0xf]  ;;  %v3318_v44 = vld [vmem:[%s4005_s24 + $0x2a4] sm:$0xf] }
 0x152   : > { %2167 = vmatpush.bf16.msrb.mxu0 %v2985_v28  ;;  %v3097_v62 = vor.u32 %v3336_v55, %v3094_v56  ;;  %v3086_v28 = vld [vmem:[%s4005_s24 + $0x328] sm:$0xf0]  ;;  %v3300_v55 = vld [vmem:[%s4005_s24 + $0x214] sm:$0xf] }
 0x153   : > { %2196 = vmatpush.bf16.msrb.mxu1 %v3049_v37  ;;  %v3089_v31 = vor.u32 %v3334_v24, %v3086_v28  ;;  %v3350_v37 = vld [vmem:[%s4005_s24 + $0x3a4] sm:$0xf]  ;;  %v3070_v24 = vld [vmem:[%s4005_s24 + $0x308] sm:$0xf0] }
 0x154   : > { %2225 = vmatpush.bf16.msrb.mxu2 %v3113_v12  ;;  %v3320_v12 = vld [vmem:[%s4005_s24 + $0x2b4] sm:$0xf]  ;;  %v3153_v39 = vor.u32 %v3350_v37, %v3150_v38  ;;  %v2942_v28 = vld [vmem:[%s4005_s24 + $0x208] sm:$0xf0] }
 0x155   : > { %2254 = vmatpush.bf16.msrb.mxu3 %v3177_v29  ;;  %v3033_v27 = vor.u32 %v3320_v12, %v3030_v21  ;;  %v3302_v29 = vld [vmem:[%s4005_s24 + $0x224] sm:$0xf] }
 0x156   : > { %2168 = vmatpush.bf16.msrb.mxu0 %v2977_v42  ;;  %v2961_v32 = vor.u32 %v3302_v29, %v2958_v30  ;;  %v3330_v12 = vld [vmem:[%s4005_s24 + $0x304] sm:$0xf] }
 0x157   : > { %2197 = vmatpush.bf16.msrb.mxu1 %v3041_v54  ;;  %v3078_v54 = vld [vmem:[%s4005_s24 + $0x318] sm:$0xf0]  ;;  %v3073_v29 = vor.u32 %v3330_v12, %v3070_v24 }
 0x158   : > { %2226 = vmatpush.bf16.msrb.mxu2 %v3105_v41  ;;  %v3081_v56 = vor.u32 %v3332_v53, %v3078_v54 }
 0x159   : > { %1946 = vmatmul.bf16.gmra.mxu0 %v4294_v14  ;;  %2255 = vmatpush.bf16.msrb.mxu3 %v3169_v45  ;;  %v3022_v45 = vld [vmem:[%s4005_s24 + $0x2a8] sm:$0xf0] }
 0x15a   : > { %1975 = vmatmul.bf16.gmra.mxu1 %v4296_v15  ;;  %v3025_v48 = vor.u32 %v3318_v44, %v3022_v45  ;;  %v3006_v44 = vld [vmem:[%s4005_s24 + $0x288] sm:$0xf0] }
 0x15b   : > { %2004 = vmatmul.bf16.gmra.mxu2 %v4298_v16  ;;  %2198 = vmatpush.bf16.msrb.mxu1 %v3033_v27  ;;  %v3298_v27 = vld [vmem:[%s4005_s24 + $0x204] sm:$0xf] }
 0x15c   : > { %2033 = vmatmul.bf16.gmra.mxu3 %v4300_v18  ;;  %2227 = vmatpush.bf16.msrb.mxu2 %v3097_v62  ;;  %v3348_v62 = vld [vmem:[%s4005_s24 + $0x394] sm:$0xf]  ;;  %v2945_v30 = vor.u32 %v3298_v27, %v2942_v28 }
 0x15f   : > { %2199 = vmatpush.bf16.msrb.mxu1 %v3025_v48 }
 0x160   : > { %2228 = vmatpush.bf16.msrb.mxu2 %v3089_v31  ;;  %v3346_v31 = vld [vmem:[%s4005_s24 + $0x384] sm:$0xf] }
 0x164   : > { %2229 = vmatpush.bf16.msrb.mxu2 %v3081_v56 }
 0x168   : > { %2230 = vmatpush.bf16.msrb.mxu2 %v3073_v29 }
 0x169   : > { %1951 = vmatmul.bf16.gmra.mxu0 %v4330_v1 }
 0x16a   : > { %1980 = vmatmul.bf16.gmra.mxu1 %v4332_v2 }
 0x16b   : > { %2009 = vmatmul.bf16.gmra.mxu2 %v4334_v3 }
 0x16c   : > { %2038 = vmatmul.bf16.gmra.mxu3 %v4336_v4 }
 0x179   : > { %1956 = vmatmul.bf16.gmra.mxu0 %v4364_v58 }
 0x17a   : > { %1985 = vmatmul.bf16.gmra.mxu1 %v4366_v59 }
 0x17b   : > { %2014 = vmatmul.bf16.gmra.mxu2 %v4368_v60 }
 0x17c   : > { %2043 = vmatmul.bf16.gmra.mxu3 %v4370_v61 }
 0x186   : > { %v4392_v46 = vpop.f32.mrf.mxu0 }
 0x187   : > { %v4394_v47 = vpop.f32.mrf.mxu1 }
 0x189   : > { %2057 = vmatmul.bf16.vlgmr.msra.gmra.mxu0 %v4089_v17  ;;  %v3158_v17 = vld [vmem:[%s4005_s24 + $0x3b8] sm:$0xf0] }
 0x18a   : > { %2086 = vmatmul.bf16.vlgmr.msra.gmra.mxu1 %v4094_v22  ;;  %v2969_v22 = vor.u32 %v3304_v57, %v2966_v63  ;;  %v2950_v57 = vld [vmem:[%s4005_s24 + $0x218] sm:$0xf0] }
 0x18b   : > { %2115 = vmatmul.bf16.vlgmr.msra.gmra.mxu2 %v4096_v23  ;;  %v3161_v23 = vor.u32 %v3352_v0, %v3158_v17 }
 0x18c   : > { %2144 = vmatmul.bf16.vlgmr.msra.gmra.mxu3 %v4100_v26  ;;  %2169 = vmatpush.bf16.msrb.mxu0 %v2969_v22  ;;  %v3316_v22 = vld [vmem:[%s4005_s24 + $0x294] sm:$0xf] }
 0x18d   : > { %2256 = vmatpush.bf16.msrb.mxu3 %v3161_v23  ;;  %v3014_v23 = vld [vmem:[%s4005_s24 + $0x298] sm:$0xf0] }
 0x18e   : > { %v4408_v9 = vpop.f32.mrf.mxu2  ;;  %v4412_v10 = vpop.f32.mrf.mxu0  ;;  %v3017_v21 = vor.u32 %v3316_v22, %v3014_v23  ;;  %v1856_v23 = vadd.f32 %v4394_v47, %v4392_v46 }
 0x18f   : > { %v4410_v26 = vpop.f32.mrf.mxu3  ;;  %v4414_v11 = vpop.f32.mrf.mxu1 }
 0x190   : > { %2170 = vmatpush.bf16.msrb.mxu0 %v2961_v32  ;;  %v3134_v32 = vld [vmem:[%s4005_s24 + $0x388] sm:$0xf0]  ;;  %2200 = vmatpush.bf16.msrb.mxu1 %v3017_v21  ;;  %v1885_v12 = vadd.f32 %v4408_v9, %v1856_v23  ;;  %v1858_v24 = vadd.f32 %v4414_v11, %v4412_v10 }
 0x191   : > { %2257 = vmatpush.bf16.msrb.mxu3 %v3153_v39  ;;  %v3137_v37 = vor.u32 %v3346_v31, %v3134_v32  ;;  %v3314_v39 = vld [vmem:[%s4005_s24 + $0x284] sm:$0xf]  ;;  %v841_v31 = vld [vmem:[#allocation2 + $0x30] sm:$0xff] }
 0x192   : > { %v3009_v53 = vor.u32 %v3314_v39, %v3006_v44 }
 0x194   : > { %2201 = vmatpush.bf16.msrb.mxu1 %v3009_v53  ;;  %v843_v53 = vld [vmem:[#allocation2 + $0x58] sm:$0xff] }
 0x196   : > { %v4424_v40 = vpop.f32.mrf.mxu2  ;;  %v4428_v42 = vpop.f32.mrf.mxu0 }
 0x197   : > { %v4426_v41 = vpop.f32.mrf.mxu3  ;;  %v4430_v43 = vpop.f32.mrf.mxu1  ;;  %v1887_v28 = vadd.f32 %v4424_v40, %v1858_v24 }
 0x199   : > { %2062 = vmatmul.bf16.gmra.mxu0 %v4141_v13  ;;  %v3142_v13 = vld [vmem:[%s4005_s24 + $0x398] sm:$0xf0]  ;;  %v1916_v9 = vadd.f32 %v4426_v41, %v1887_v28 }
 0x19a   : > { %2091 = vmatmul.bf16.gmra.mxu1 %v4146_v19  ;;  %v2953_v19 = vor.u32 %v3300_v55, %v2950_v57 }
 0x19b   : > { %2120 = vmatmul.bf16.gmra.mxu2 %v4148_v20  ;;  %v3145_v20 = vor.u32 %v3348_v62, %v3142_v13 }
 0x19c   : > { %2149 = vmatmul.bf16.gmra.mxu3 %v4152_v25  ;;  %2171 = vmatpush.bf16.msrb.mxu0 %v2953_v19 }
 0x19d   : > { %2258 = vmatpush.bf16.msrb.mxu3 %v3145_v20 }
 0x19e   : > { %v4444_v63 = vpop.f32.mrf.mxu2  ;;  %v4448_v0 = vpop.f32.mrf.mxu0 }
 0x19f   : > { %v4446_v25 = vpop.f32.mrf.mxu3  ;;  %v4450_v17 = vpop.f32.mrf.mxu1 }
 0x1a0   : > { %2172 = vmatpush.bf16.msrb.mxu0 %v2945_v30 }
 0x1a1   : > { %2259 = vmatpush.bf16.msrb.mxu3 %v3137_v37 }
 0x1a6   : > { %v4460_v38 = vpop.f32.mrf.mxu2  ;;  %v4466_v48 = vpop.f32.mrf.mxu0 }
 0x1a7   : > { %v4464_v45 = vpop.f32.mrf.mxu3  ;;  %v4468_v54 = vpop.f32.mrf.mxu1 }
 0x1a9   : > { %2067 = vmatmul.bf16.gmra.mxu0 %v4186_v5 }
 0x1aa   : > { %2096 = vmatmul.bf16.gmra.mxu1 %v4188_v6 }
 0x1ab   : > { %2125 = vmatmul.bf16.gmra.mxu2 %v4190_v7 }
 0x1ac   : > { %2154 = vmatmul.bf16.gmra.mxu3 %v4192_v8 }
 0x1ae   : > { %v4474_v55 = vpop.f32.mrf.mxu2  ;;  %v4478_v57 = vpop.f32.mrf.mxu0 }
 0x1af   : > { %v4476_v56 = vpop.f32.mrf.mxu3  ;;  %v4480_v62 = vpop.f32.mrf.mxu1 }
 0x1b6   : > { %v4482_v13 = vpop.f32.mrf.mxu2  ;;  %v4486_v20 = vpop.f32.mrf.mxu0 }
 0x1b7   : > { %v4484_v19 = vpop.f32.mrf.mxu3  ;;  %v4488_v5 = vpop.f32.mrf.mxu1 }
 0x1b9   : > { %2072 = vmatmul.bf16.gmra.mxu0 %v4222_v49 }
 0x1ba   : > { %2101 = vmatmul.bf16.gmra.mxu1 %v4224_v50  ;;  %v1914_v50 = vadd.f32 %v4410_v26, %v1885_v12  ;;  %v1863_v12 = vadd.f32 %v4450_v17, %v4448_v0 }
 0x1bb   : > { %2130 = vmatmul.bf16.gmra.mxu2 %v4226_v51 }
 0x1bc   : > { %2159 = vmatmul.bf16.gmra.mxu3 %v4228_v52 }
 0x1be   : > { %v4494_v6 = vpop.f32.mrf.mxu2  ;;  %v4498_v8 = vpop.f32.mrf.mxu0 }
 0x1bf   : > { %v4496_v7 = vpop.f32.mrf.mxu3  ;;  %v4500_v22 = vpop.f32.mrf.mxu1 }
 0x1c6   : > { %v4505_v49 = vpop.f32.mrf.mxu2  ;;  %v1942_v52 = vpop.f32.mrf.mxu0 }
 0x1c7   : > { %v4508_v51 = vpop.f32.mrf.mxu3  ;;  %v1971_v21 = vpop.f32.mrf.mxu1  ;;  %v1943_v27 = vadd.f32 %v1942_v52, %v1914_v50 }
 0x1c9   : > { %2173 = vmatmul.bf16.vlgmr.msrb.gmra.mxu0 %v4258_v33  ;;  %v1972_v46 = vadd.f32 %v1971_v21, %v1943_v27  ;;  %v1861_v33 = vadd.f32 %v4430_v43, %v4428_v42  ;;  %v1892_v43 = vadd.f32 %v4460_v38, %v1863_v12  ;;  %v845_v27 = vld [vmem:[#allocation2 + $0x50] sm:$0xff]  ;;  %v1873_v12 = vadd.f32 %v4500_v22, %v4498_v8 }
 0x1ca   : > { %2202 = vmatmul.bf16.vlgmr.msrb.gmra.mxu1 %v4260_v34 }
 0x1cb   : > { %2231 = vmatmul.bf16.vlgmr.msrb.gmra.mxu2 %v4262_v35  ;;  %v1890_v34 = vadd.f32 %v4444_v63, %v1861_v33  ;;  %v1921_v21 = vadd.f32 %v4464_v45, %v1892_v43 }
 0x1cc   : > { %2260 = vmatmul.bf16.vlgmr.msrb.gmra.mxu3 %v4264_v36 }
 0x1cd   : > { %v1919_v37 = vadd.f32 %v4446_v25, %v1890_v34 }
 0x1ce   : > { %v2000_v47 = vpop.f32.mrf.mxu2  ;;  %v1944_v30 = vpop.f32.mrf.mxu0 }
 0x1cf   : > { %v2001_v26 = vadd.f32 %v2000_v47, %v1972_v46  ;;  %v2029_v29 = vpop.f32.mrf.mxu3  ;;  %v1973_v10 = vpop.f32.mrf.mxu1  ;;  %v1945_v40 = vadd.f32 %v1944_v30, %v1916_v9  ;;  %v847_v30 = vld [vmem:[#allocation2 + $0x8] sm:$0xff] }
 0x1d1   : > { %v2030_v11 = vadd.f32 %v2029_v29, %v2001_v26  ;;  %v1974_v35 = vadd.f32 %v1973_v10, %v1945_v40  ;;  %v1868_v10 = vadd.f32 %v4480_v62, %v4478_v57 }
 0x1d3   : > { %v2281_v32 = vadd.f32 %v2030_v11, %v841_v31 }
 0x1d5   : > { %2297 = vst [vmem:[#allocation2 + $0x30] sm:$0xff] %v2281_v32  ;;  %v849_v32 = vld [vmem:[#allocation2 + $0x40] sm:$0xff] }
 0x1d6   : > { %v2002_v36 = vpop.f32.mrf.mxu2  ;;  %v1947_v44 = vpop.f32.mrf.mxu0 }
 0x1d7   : > { %v2003_v39 = vadd.f32 %v2002_v36, %v1974_v35  ;;  %v2031_v41 = vpop.f32.mrf.mxu3  ;;  %v1976_v23 = vpop.f32.mrf.mxu1  ;;  %v1948_v42 = vadd.f32 %v1947_v44, %v1919_v37 }
 0x1d9   : > { %v2032_v50 = vadd.f32 %v2031_v41, %v2003_v39  ;;  %2178 = vmatmul.bf16.gmra.mxu0 %v4294_v14  ;;  %v1977_v25 = vadd.f32 %v1976_v23, %v1948_v42  ;;  %v1866_v14 = vadd.f32 %v4468_v54, %v4466_v48  ;;  %v1897_v54 = vadd.f32 %v4482_v13, %v1868_v10 }
 0x1da   : > { %2207 = vmatmul.bf16.gmra.mxu1 %v4296_v15 }
 0x1db   : > { %v2283_v63 = vadd.f32 %v2032_v50, %v843_v53  ;;  %2236 = vmatmul.bf16.gmra.mxu2 %v4298_v16  ;;  %v1895_v15 = vadd.f32 %v4474_v55, %v1866_v14  ;;  %v1926_v40 = vadd.f32 %v4484_v19, %v1897_v54  ;;  %v851_v53 = vld [vmem:[#allocation2 + $0x10] sm:$0xff] }
 0x1dc   : > { %2265 = vmatmul.bf16.gmra.mxu3 %v4300_v18 }
 0x1dd   : > { %2299 = vst [vmem:[#allocation2 + $0x58] sm:$0xff] %v2283_v63  ;;  %v1924_v9 = vadd.f32 %v4476_v56, %v1895_v15 }
 0x1de   : > { %v2005_v52 = vpop.f32.mrf.mxu2  ;;  %v1949_v17 = vpop.f32.mrf.mxu0 }
 0x1df   : > { %v2006_v24 = vadd.f32 %v2005_v52, %v1977_v25  ;;  %v2034_v0 = vpop.f32.mrf.mxu3  ;;  %v1978_v28 = vpop.f32.mrf.mxu1  ;;  %v1950_v46 = vadd.f32 %v1949_v17, %v1921_v21  ;;  %v853_v25 = vld [vmem:[#allocation2 + $0x60] sm:$0xff] }
 0x1e1   : > { %v2035_v38 = vadd.f32 %v2034_v0, %v2006_v24  ;;  %v1979_v18 = vadd.f32 %v1978_v28, %v1950_v46 }
 0x1e3   : > { %v2285_v16 = vadd.f32 %v2035_v38, %v845_v27 }
 0x1e5   : > { %2301 = vst [vmem:[#allocation2 + $0x50] sm:$0xff] %v2285_v16 }
 0x1e6   : > { %v2007_v47 = vpop.f32.mrf.mxu2  ;;  %v1952_v29 = vpop.f32.mrf.mxu0 }
 0x1e7   : > { %v2008_v26 = vadd.f32 %v2007_v47, %v1979_v18  ;;  %v2036_v45 = vpop.f32.mrf.mxu3  ;;  %v1981_v31 = vpop.f32.mrf.mxu1  ;;  %v1953_v48 = vadd.f32 %v1952_v29, %v1924_v9 }
 0x1e9   : > { %v2037_v33 = vadd.f32 %v2036_v45, %v2008_v26  ;;  %2183 = vmatmul.bf16.gmra.mxu0 %v4330_v1  ;;  %v1982_v56 = vadd.f32 %v1981_v31, %v1953_v48  ;;  %v1871_v1 = vadd.f32 %v4488_v5, %v4486_v20  ;;  %v1902_v5 = vadd.f32 %v4505_v49, %v1873_v12 }
 0x1ea   : > { %2212 = vmatmul.bf16.gmra.mxu1 %v4332_v2 }
 0x1eb   : > { %v2287_v55 = vadd.f32 %v2037_v33, %v847_v30  ;;  %2241 = vmatmul.bf16.gmra.mxu2 %v4334_v3  ;;  %v1900_v2 = vadd.f32 %v4494_v6, %v1871_v1  ;;  %v1931_v43 = vadd.f32 %v4508_v51, %v1902_v5 }
 0x1ec   : > { %2270 = vmatmul.bf16.gmra.mxu3 %v4336_v4 }
 0x1ed   : > { %2303 = vst [vmem:[#allocation2 + $0x8] sm:$0xff] %v2287_v55  ;;  %v1929_v39 = vadd.f32 %v4496_v7, %v1900_v2 }
 0x1ee   : > { %v2010_v11 = vpop.f32.mrf.mxu2  ;;  %v1954_v62 = vpop.f32.mrf.mxu0 }
 0x1ef   : > { %v2011_v34 = vadd.f32 %v2010_v11, %v1982_v56  ;;  %v2039_v57 = vpop.f32.mrf.mxu3  ;;  %v1983_v35 = vpop.f32.mrf.mxu1  ;;  %v1955_v36 = vadd.f32 %v1954_v62, %v1926_v40 }
 0x1f1   : > { %v2040_v13 = vadd.f32 %v2039_v57, %v2011_v34  ;;  %v1984_v4 = vadd.f32 %v1983_v35, %v1955_v36 }
 0x1f3   : > { %v2289_v3 = vadd.f32 %v2040_v13, %v849_v32 }
 0x1f5   : > { %2305 = vst [vmem:[#allocation2 + $0x40] sm:$0xff] %v2289_v3 }
 0x1f6   : > { %v2012_v37 = vpop.f32.mrf.mxu2  ;;  %v1957_v44 = vpop.f32.mrf.mxu0 }
 0x1f7   : > { %v2013_v41 = vadd.f32 %v2012_v37, %v1984_v4  ;;  %v2041_v19 = vpop.f32.mrf.mxu3  ;;  %v1986_v23 = vpop.f32.mrf.mxu1  ;;  %v1958_v20 = vadd.f32 %v1957_v44, %v1929_v39 }
 0x1f9   : > { %v2042_v50 = vadd.f32 %v2041_v19, %v2013_v41  ;;  %2188 = vmatmul.bf16.gmra.mxu0 %v4364_v58  ;;  %v1987_v7 = vadd.f32 %v1986_v23, %v1958_v20 }
 0x1fa   : > { %2217 = vmatmul.bf16.gmra.mxu1 %v4366_v59 }
 0x1fb   : > { %v2291_v6 = vadd.f32 %v2042_v50, %v851_v53  ;;  %2246 = vmatmul.bf16.gmra.mxu2 %v4368_v60 }
 0x1fc   : > { %2275 = vmatmul.bf16.gmra.mxu3 %v4370_v61  ;;  %v855_v61 = vld [vmem:[#allocation2 + $0x78] sm:$0xff] }
 0x1fd   : > { %2307 = vst [vmem:[#allocation2 + $0x10] sm:$0xff] %v2291_v6 }
 0x1fe   : > { %v2015_v42 = vpop.f32.mrf.mxu2  ;;  %v1959_v22 = vpop.f32.mrf.mxu0 }
 0x1ff   : > { %v2016_v63 = vadd.f32 %v2015_v42, %v1987_v7  ;;  %v2044_v8 = vpop.f32.mrf.mxu3  ;;  %v1988_v52 = vpop.f32.mrf.mxu1  ;;  %v1960_v21 = vadd.f32 %v1959_v22, %v1931_v43  ;;  %v842_v7 = vld [vmem:[#allocation2] sm:$0xff] }
 0x201   : > { %v2045_v58 = vadd.f32 %v2044_v8, %v2016_v63  ;;  %v1989_v24 = vadd.f32 %v1988_v52, %v1960_v21 }
 0x203   : > { %v2293_v49 = vadd.f32 %v2045_v58, %v853_v25 }
 0x205   : > { %2309 = vst [vmem:[#allocation2 + $0x60] sm:$0xff] %v2293_v49 }
 0x206   : > { %v2017_v59 = vpop.f32.mrf.mxu2  ;;  %v2058_v17 = vpop.f32.mrf.mxu0 }
 0x207   : > { %v2018_v0 = vadd.f32 %v2017_v59, %v1989_v24  ;;  %v2046_v60 = vpop.f32.mrf.mxu3  ;;  %v2087_v27 = vpop.f32.mrf.mxu1 }
 0x208   : > { %v2088_v36 = vadd.f32 %v2087_v27, %v2058_v17 }
 0x209   : > { %v2047_v28 = vadd.f32 %v2046_v60, %v2018_v0  ;;  %v844_v0 = vld [vmem:[#allocation2 + $0x18] sm:$0xff] }
 0x20b   : > { %v2295_v14 = vadd.f32 %v2047_v28, %v855_v61 }
 0x20d   : > { %2311 = vst [vmem:[#allocation2 + $0x78] sm:$0xff] %v2295_v14 }
 0x20e   : > { %v2116_v51 = vpop.f32.mrf.mxu2  ;;  %v2060_v46 = vpop.f32.mrf.mxu0 }
 0x20f   : > { %v2145_v38 = vpop.f32.mrf.mxu3  ;;  %v2089_v15 = vpop.f32.mrf.mxu1  ;;  %v2117_v2 = vadd.f32 %v2116_v51, %v2088_v36 }
 0x210   : > { %v2090_v19 = vadd.f32 %v2089_v15, %v2060_v46 }
 0x211   : > { %v2146_v4 = vadd.f32 %v2145_v38, %v2117_v2 }
 0x216   : > { %v2118_v16 = vpop.f32.mrf.mxu2  ;;  %v2063_v47 = vpop.f32.mrf.mxu0 }
 0x217   : > { %v2147_v18 = vpop.f32.mrf.mxu3  ;;  %v2092_v9 = vpop.f32.mrf.mxu1  ;;  %v2119_v53 = vadd.f32 %v2118_v16, %v2090_v19 }
 0x218   : > { %v2093_v43 = vadd.f32 %v2092_v9, %v2063_v47  ;;  %v846_v47 = vld [vmem:[#allocation2 + $0x68] sm:$0xff] }
 0x219   : > { %v2148_v50 = vadd.f32 %v2147_v18, %v2119_v53 }
 0x21e   : > { %v2121_v26 = vpop.f32.mrf.mxu2  ;;  %v2065_v29 = vpop.f32.mrf.mxu0 }
 0x21f   : > { %v2150_v45 = vpop.f32.mrf.mxu3  ;;  %v2094_v30 = vpop.f32.mrf.mxu1  ;;  %v2122_v22 = vadd.f32 %v2121_v26, %v2093_v43 }
 0x220   : > { %v2095_v17 = vadd.f32 %v2094_v30, %v2065_v29 }
 0x221   : > { %v2151_v21 = vadd.f32 %v2150_v45, %v2122_v22 }
 0x226   : > { %v2123_v31 = vpop.f32.mrf.mxu2  ;;  %v2068_v33 = vpop.f32.mrf.mxu0 }
 0x227   : > { %v2152_v10 = vpop.f32.mrf.mxu3  ;;  %v2097_v48 = vpop.f32.mrf.mxu1  ;;  %v2124_v28 = vadd.f32 %v2123_v31, %v2095_v17 }
 0x228   : > { %v2098_v26 = vadd.f32 %v2097_v48, %v2068_v33 }
 0x229   : > { %v2153_v46 = vadd.f32 %v2152_v10, %v2124_v28  ;;  %v854_v28 = vld [vmem:[#allocation2 + $0x70] sm:$0xff] }
 0x22e   : > { %v2126_v54 = vpop.f32.mrf.mxu2  ;;  %v4556_v56 = vpop.f32.mrf.mxu0 }
 0x22f   : > { %v4554_v55 = vpop.f32.mrf.mxu3  ;;  %v4558_v11 = vpop.f32.mrf.mxu1  ;;  %v2127_v2 = vadd.f32 %v2126_v54, %v2098_v26 }
 0x230   : > { %v2100_v53 = vadd.f32 %v4558_v11, %v4556_v56 }
 0x231   : > { %v2156_v31 = vadd.f32 %v4554_v55, %v2127_v2 }
 0x236   : > { %v4560_v40 = vpop.f32.mrf.mxu2  ;;  %v4564_v57 = vpop.f32.mrf.mxu0 }
 0x237   : > { %v4562_v34 = vpop.f32.mrf.mxu3  ;;  %v4566_v62 = vpop.f32.mrf.mxu1  ;;  %v2129_v33 = vadd.f32 %v4560_v40, %v2100_v53 }
 0x238   : > { %v2103_v43 = vadd.f32 %v4566_v62, %v4564_v57 }
 0x23e   : > { %v4568_v32 = vpop.f32.mrf.mxu2  ;;  %v4572_v1 = vpop.f32.mrf.mxu0 }
 0x23f   : > { %v4570_v35 = vpop.f32.mrf.mxu3  ;;  %v4574_v13 = vpop.f32.mrf.mxu1  ;;  %v2132_v11 = vadd.f32 %v4568_v32, %v2103_v43 }
 0x246   : > { %v4576_v3 = vpop.f32.mrf.mxu2  ;;  %v2174_v39 = vpop.f32.mrf.mxu0 }
 0x247   : > { %v4578_v37 = vpop.f32.mrf.mxu3  ;;  %v2203_v41 = vpop.f32.mrf.mxu1  ;;  %v2175_v44 = vadd.f32 %v2174_v39, %v2146_v4 }
 0x249   : > { %v2204_v23 = vadd.f32 %v2203_v41, %v2175_v44  ;;  %v848_v44 = vld [vmem:[#allocation2 + $0x48] sm:$0xff] }
 0x24e   : > { %v2232_v12 = vpop.f32.mrf.mxu2  ;;  %v2176_v6 = vpop.f32.mrf.mxu0 }
 0x24f   : > { %v2233_v20 = vadd.f32 %v2232_v12, %v2204_v23  ;;  %v2261_v5 = vpop.f32.mrf.mxu3  ;;  %v2205_v42 = vpop.f32.mrf.mxu1  ;;  %v2177_v8 = vadd.f32 %v2176_v6, %v2148_v50 }
 0x251   : > { %v2262_v63 = vadd.f32 %v2261_v5, %v2233_v20  ;;  %v2206_v52 = vadd.f32 %v2205_v42, %v2177_v8  ;;  %v2158_v20 = vadd.f32 %v4562_v34, %v2129_v33 }
 0x253   : > { %v2282_v25 = vadd.f32 %v2262_v63, %v842_v7  ;;  %v850_v7 = vld [vmem:[#allocation2 + $0x20] sm:$0xff] }
 0x255   : > { %2298 = vst [vmem:[#allocation2] sm:$0xff] %v2282_v25  ;;  %v2161_v25 = vadd.f32 %v4570_v35, %v2132_v11 }
 0x256   : > { %v2234_v58 = vpop.f32.mrf.mxu2  ;;  %v2179_v59 = vpop.f32.mrf.mxu0 }
 0x257   : > { %v2235_v49 = vadd.f32 %v2234_v58, %v2206_v52  ;;  %v2263_v24 = vpop.f32.mrf.mxu3  ;;  %v2208_v60 = vpop.f32.mrf.mxu1  ;;  %v2180_v27 = vadd.f32 %v2179_v59, %v2151_v21  ;;  %v852_v21 = vld [vmem:[#allocation2 + $0x38] sm:$0xff] }
 0x259   : > { %v2264_v61 = vadd.f32 %v2263_v24, %v2235_v49  ;;  %v2209_v51 = vadd.f32 %v2208_v60, %v2180_v27  ;;  %v2105_v49 = vadd.f32 %v4574_v13, %v4572_v1 }
 0x25b   : > { %v2284_v14 = vadd.f32 %v2264_v61, %v844_v0  ;;  %v2134_v62 = vadd.f32 %v4576_v3, %v2105_v49 }
 0x25d   : > { %2300 = vst [vmem:[#allocation2 + $0x18] sm:$0xff] %v2284_v14  ;;  %v2163_v17 = vadd.f32 %v4578_v37, %v2134_v62 }
 0x25e   : > { %v2237_v38 = vpop.f32.mrf.mxu2  ;;  %v2181_v18 = vpop.f32.mrf.mxu0 }
 0x25f   : > { %v2238_v15 = vadd.f32 %v2237_v38, %v2209_v51  ;;  %v2266_v16 = vpop.f32.mrf.mxu3  ;;  %v2210_v9 = vpop.f32.mrf.mxu1  ;;  %v2182_v36 = vadd.f32 %v2181_v18, %v2153_v46 }
 0x261   : > { %v2267_v45 = vadd.f32 %v2266_v16, %v2238_v15  ;;  %v2211_v29 = vadd.f32 %v2210_v9, %v2182_v36  ;;  %v856_v16 = vld [vmem:[#allocation2 + $0x28] sm:$0xff] }
 0x263   : > { %v2286_v4 = vadd.f32 %v2267_v45, %v846_v47 }
 0x265   : > { %2302 = vst [vmem:[#allocation2 + $0x68] sm:$0xff] %v2286_v4 }
 0x266   : > { %v2239_v30 = vpop.f32.mrf.mxu2  ;;  %v2184_v19 = vpop.f32.mrf.mxu0 }
 0x267   : > { %v2240_v39 = vadd.f32 %v2239_v30, %v2211_v29  ;;  %v2268_v41 = vpop.f32.mrf.mxu3  ;;  %v2213_v10 = vpop.f32.mrf.mxu1  ;;  %v2185_v12 = vadd.f32 %v2184_v19, %v2156_v31 }
 0x269   : > { %v2269_v23 = vadd.f32 %v2268_v41, %v2240_v39  ;;  %v2214_v54 = vadd.f32 %v2213_v10, %v2185_v12 }
 0x26b   : > { %v2288_v48 = vadd.f32 %v2269_v23, %v848_v44 }
 0x26d   : > { %2304 = vst [vmem:[#allocation2 + $0x48] sm:$0xff] %v2288_v48 }
 0x26e   : > { %v2242_v50 = vpop.f32.mrf.mxu2  ;;  %v2186_v6 = vpop.f32.mrf.mxu0 }
 0x26f   : > { %v2243_v5 = vadd.f32 %v2242_v50, %v2214_v54  ;;  %v2271_v55 = vpop.f32.mrf.mxu3  ;;  %v2215_v42 = vpop.f32.mrf.mxu1  ;;  %v2187_v56 = vadd.f32 %v2186_v6, %v2158_v20 }
 0x271   : > { %v2272_v63 = vadd.f32 %v2271_v55, %v2243_v5  ;;  %v2216_v40 = vadd.f32 %v2215_v42, %v2187_v56 }
 0x273   : > { %v2290_v8 = vadd.f32 %v2272_v63, %v850_v7 }
 0x275   : > { %2306 = vst [vmem:[#allocation2 + $0x20] sm:$0xff] %v2290_v8 }
 0x276   : > { %v2244_v22 = vpop.f32.mrf.mxu2  ;;  %v2189_v58 = vpop.f32.mrf.mxu0 }
 0x277   : > { %v2245_v52 = vadd.f32 %v2244_v22, %v2216_v40  ;;  %v2273_v34 = vpop.f32.mrf.mxu3  ;;  %v2190_v59 = vadd.f32 %v2189_v58, %v2161_v25  ;;  %v2218_v57 = vpop.f32.mrf.mxu1 }
 0x279   : > { %v2274_v24 = vadd.f32 %v2273_v34, %v2245_v52  ;;  %v2219_v32 = vadd.f32 %v2218_v57, %v2190_v59 }
 0x27b   : > { %v2292_v0 = vadd.f32 %v2274_v24, %v852_v21 }
 0x27d   : > { %2308 = vst [vmem:[#allocation2 + $0x38] sm:$0xff] %v2292_v0 }
 0x27e   : > { %v2247_v60 = vpop.f32.mrf.mxu2  ;;  %v2191_v27 = vpop.f32.mrf.mxu0 }
 0x27f   : > { %v2248_v61 = vadd.f32 %v2247_v60, %v2219_v32  ;;  %v2276_v35 = vpop.f32.mrf.mxu3  ;;  %v2192_v51 = vadd.f32 %v2191_v27, %v2163_v17  ;;  %v2220_v46 = vpop.f32.mrf.mxu1 }
 0x281   : > { %v2277_v14 = vadd.f32 %v2276_v35, %v2248_v61  ;;  %v2221_v1 = vadd.f32 %v2220_v46, %v2192_v51 }
 0x283   : > { %v2294_v38 = vadd.f32 %v2277_v14, %v854_v28 }
 0x285   : > { %2310 = vst [vmem:[#allocation2 + $0x70] sm:$0xff] %v2294_v38 }
 0x286   : > { %v2249_v13 = vpop.f32.mrf.mxu2 }
 0x287   : > { %v2250_v15 = vadd.f32 %v2249_v13, %v2221_v1  ;;  %v2278_v3 = vpop.f32.mrf.mxu3 }
 0x289   : > { %v2279_v18 = vadd.f32 %v2278_v3, %v2250_v15  ;;  %2316 = sbr.rel (%p3194_p4) target bundleno = 667 (0x29b), region = 97 }
 0x28b   : > { %v2296_v47 = vadd.f32 %v2279_v18, %v856_v16 }
 0x28d   : > { %2312 = vst [vmem:[#allocation2 + $0x28] sm:$0xff] %v2296_v47 }
 0x28e   : > { %v2317_v37 = vld [vmem:[#allocation2 + $0x30] sm:$0xff]  ;;  %v2318_v9 = vld [vmem:[#allocation2] sm:$0xff]  ;;  %v2319_v26 = vld [vmem:[#allocation2 + $0x58] sm:$0xff] }
 0x28f   : > { %v2333_v45 = vmax.f32 %v2317_v37, 0.0  ;;  %v2334_v36 = vmax.f32 %v2318_v9, 0.0  ;;  %v2320_v2 = vld [vmem:[#allocation2 + $0x18] sm:$0xff]  ;;  %v2335_v4 = vmax.f32 %v2319_v26, 0.0  ;;  %v2321_v29 = vld [vmem:[#allocation2 + $0x50] sm:$0xff]  ;;  %v2322_v30 = vld [vmem:[#allocation2 + $0x68] sm:$0xff] }
 0x290   : > { %v2336_v31 = vmax.f32 %v2320_v2, 0.0  ;;  %v2337_v39 = vmax.f32 %v2321_v29, 0.0  ;;  %v2338_v41 = vmax.f32 %v2322_v30, 0.0  ;;  %v2323_v19 = vld [vmem:[#allocation2 + $0x8] sm:$0xff]  ;;  %v2325_v10 = vld [vmem:[#allocation2 + $0x40] sm:$0xff]  ;;  %v2327_v54 = vld [vmem:[#allocation2 + $0x10] sm:$0xff] }
 0x291   : > { %v2324_v44 = vld [vmem:[#allocation2 + $0x48] sm:$0xff]  ;;  %v2349_v53 = vpack.c.bf16 %v2334_v36, %v2333_v45  ;;  %v2339_v23 = vmax.f32 %v2323_v19, 0.0  ;;  %v2326_v33 = vld [vmem:[#allocation2 + $0x20] sm:$0xff]  ;;  %v2341_v48 = vmax.f32 %v2325_v10, 0.0  ;;  %v2328_v50 = vld [vmem:[#allocation2 + $0x38] sm:$0xff]  ;;  %v2343_v6 = vmax.f32 %v2327_v54, 0.0 }
 0x292   : > { %v2340_v12 = vmax.f32 %v2324_v44, 0.0  ;;  %v2350_v20 = vpack.c.bf16 %v2336_v31, %v2335_v4  ;;  %v2351_v5 = vpack.c.bf16 %v2338_v41, %v2337_v39  ;;  %v2342_v55 = vmax.f32 %v2326_v33, 0.0  ;;  %v2329_v7 = vld [vmem:[#allocation2 + $0x60] sm:$0xff]  ;;  %v2330_v42 = vld [vmem:[#allocation2 + $0x70] sm:$0xff]  ;;  %v2331_v43 = vld [vmem:[#allocation2 + $0x78] sm:$0xff] }
 0x293   : > { %2357 = vst [vmem:[%s4007_s26] sm:$0xff] %v2349_v53  ;;  %v2344_v56 = vmax.f32 %v2328_v50, 0.0  ;;  %v2345_v11 = vmax.f32 %v2329_v7, 0.0  ;;  %v2346_v8 = vmax.f32 %v2330_v42, 0.0  ;;  %v2347_v25 = vmax.f32 %v2331_v43, 0.0 }
 0x294   : > { %v2352_v63 = vpack.c.bf16 %v2340_v12, %v2339_v23  ;;  %v2332_v40 = vld [vmem:[#allocation2 + $0x28] sm:$0xff]  ;;  %2358 = vst [vmem:[%s4007_s26 + $0x8] sm:$0xff] %v2350_v20  ;;  %v2353_v22 = vpack.c.bf16 %v2342_v55, %v2341_v48 }
 0x295   : > { %v2348_v52 = vmax.f32 %v2332_v40, 0.0  ;;  %2359 = vst [vmem:[%s4007_s26 + $0x10] sm:$0xff] %v2351_v5  ;;  %v2354_v34 = vpack.c.bf16 %v2344_v56, %v2343_v6  ;;  %v2355_v58 = vpack.c.bf16 %v2346_v8, %v2345_v11 }
 0x296   : > { %2360 = vst [vmem:[%s4007_s26 + $0x18] sm:$0xff] %v2352_v63 }
 0x297   : > { %v2356_v21 = vpack.c.bf16 %v2348_v52, %v2347_v25  ;;  %2361 = vst [vmem:[%s4007_s26 + $0x20] sm:$0xff] %v2353_v22 }
 0x298   : > { %2362 = vst [vmem:[%s4007_s26 + $0x28] sm:$0xff] %v2354_v34 }
 0x299   : > { %2363 = vst [vmem:[%s4007_s26 + $0x30] sm:$0xff] %v2355_v58 }
 0x29a   : > { %2364 = vst [vmem:[%s4007_s26 + $0x38] sm:$0xff] %v2356_v21 }
 0x29b PF: > { %2371 = sbr.rel (!%p3650_p12) target bundleno = 677 (0x2a5), region = 101  ;;  %s3362_s9 = sshll.u32 (%p3650_p12), %s3526_s16, 3  ;;  %v2420_v49 = vld [vmem:[%s4007_s26] sm:$0xff] (%p3650_p12)  ;;  %v2422_v24 = vld [vmem:[%s4007_s26 + $0x8] sm:$0xff] (%p3650_p12) }
 0x29c   : > { %s2377_s15 = scalar_lea.vmem (%p3650_p12), %s4651_s2, %s3362_s9  ;;  %v2424_v59 = vld [vmem:[%s4007_s26 + $0x10] sm:$0xff] (%p3650_p12) }
 0x29d   : > { %2421 = vst [vmem:[%s2377_s15] sm:$0xff] (%p3650_p12), %v2420_v49  ;;  %v2426_v57 = vld [vmem:[%s4007_s26 + $0x18] sm:$0xff] (%p3650_p12) }
 0x29e   : > { %2423 = vst [vmem:[%s2377_s15 + $0x10] sm:$0xff] (%p3650_p12), %v2422_v24  ;;  %v2428_v62 = vld [vmem:[%s4007_s26 + $0x20] sm:$0xff] (%p3650_p12) }
 0x29f   : > { %2425 = vst [vmem:[%s2377_s15 + $0x20] sm:$0xff] (%p3650_p12), %v2424_v59  ;;  %v2430_v0 = vld [vmem:[%s4007_s26 + $0x28] sm:$0xff] (%p3650_p12) }
 0x2a0   : > { %2427 = vst [vmem:[%s2377_s15 + $0x30] sm:$0xff] %v2426_v57  ;;  %v2432_v32 = vld [vmem:[%s4007_s26 + $0x30] sm:$0xff] }
 0x2a1   : > { %2429 = vst [vmem:[%s2377_s15 + $0x40] sm:$0xff] %v2428_v62  ;;  %v2434_v60 = vld [vmem:[%s4007_s26 + $0x38] sm:$0xff] }
 0x2a2   : > { %2431 = vst [vmem:[%s2377_s15 + $0x50] sm:$0xff] %v2430_v0 }
 0x2a3   : > { %2433 = vst [vmem:[%s2377_s15 + $0x60] sm:$0xff] %v2432_v32 }
 0x2a4   : > { %2435 = vst [vmem:[%s2377_s15 + $0x70] sm:$0xff] %v2434_v60 }
 0x2a5 PF: > { %s12_s19 = sadd.s32 1, %s3538_s19   ;;  %s4655_s9 = smov %s3502_s10 }
 0x2a6   : > { %p9_p5 = scmp.ge.s32.totalorder %s12_s19, 56   ;;  %s4656_s10 = smov %s3648_s5 }
 0x2a7   : > { %s4657_s11 = smov %s3510_s12  ;;  %s4658_s12 = smov %s3645_s4 }
 0x2a8   : > { %s4659_s13 = smov %s3518_s14  ;;  %s4660_s14 = smov %s3631_s27 }
 0x2a9   : > { %s4661_s15 = smov %s3530_s17  ;;  %s4662_s16 = smov %s3534_s18 }
 0x2aa   : > { %s4663_s17 = smov %s4666_s21  ;;  %s4664_s18 = smov %s4670_s22 }
 0x2ab   :  { %11 = sbr.rel (!%p9_p5) target bundleno = 6 (0x6), region = 178 }

// kernel: decoder_conv_up.8
= control target key start
LH: loop header
LB: loop body
LE: loop exit
PB: predicated region body
PF: predicated region fallthrough
CT: control target
= control target key end

     0   :  { %s2257_s9 = smov 0   ;;  %s2259_s10 = smov 0   ;;  %s2761_s0 = inlined_call_operand.vmem [shape: bf16[256,23040], index: 0, kind: input, shape index: {}]   ;;  %s2762_s1 = inlined_call_operand.vmem [shape: bf16[23040,256], index: 1, kind: input, shape index: {}]   ;;  %s2763_s2 = inlined_call_operand.vmem [shape: bf16[256,256], index: 2, kind: output, shape index: {}]  }
   0x1   :  { %s2261_s11 = smov 0   ;;  %s2263_s12 = smov 0  }
   0x2   :  { %s2265_s13 = smov 0   ;;  %s2267_s14 = smov 0  }
   0x3   :  { %s2269_s15 = smov 0  }
   0x4 LB: > { %s24_s16 = sadd.s32 1, %s2231_s13  ;;  %s31_s17 = sadd.s32 1, %s2235_s14  ;;  %s2239_s15 = sphi %s2269_s15, %s12_s15   ;;  %s2235_s14 = sphi %s2267_s14, %s2769_s14   ;;  %s2231_s13 = sphi %s2265_s13, %s2768_s13   ;;  %s2227_s12 = sphi %s2263_s12, %s2767_s12   ;;  %s2223_s11 = sphi %s2261_s11, %s2766_s11   ;;  %s2219_s10 = sphi %s2259_s10, %s2765_s10   ;;  %s2215_s9 = sphi %s2257_s9, %s2764_s9  }
   0x5   : > { %p25_p0 = scmp.ge.s32.totalorder %s24_s16, 45  ;;  %p47_p1 = scmp.ne.s32.totalorder %s2219_s10, %s2215_s9 }
   0x6   : > { %p48_p2 = scmp.eq.s32.totalorder %s2239_s15, 0  ;;  %s40_s21 = sadd.s32 1, %s2219_s10 }
   0x7   : > { %s2771_s16 = smov (%p25_p0, %s24_s16), 0  ;;  %s2773_s17 = smov (!%p25_p0, %s31_s17), %s2235_s14 }
   0x8   : > { %p49_p3 = por %p48_p2, %p47_p1  ;;  %p33_p4 = scmp.ge.s32.totalorder %s2773_s17, 2 }
   0x9   : > { %s36_s18 = ssub.s32 %s2231_s13, %s2771_s16  ;;  %p1627_p6 = scmp.ge.s32.totalorder %s2239_s15, 90 }
   0xa   : > { %s2775_s17 = smov (%p33_p4, %s2773_s17), 0 }
   0xb   : > { %s35_s19 = ssub.s32 %s2235_s14, %s2775_s17  ;;  %129 = sbr.rel (%p1627_p6) target bundleno = 56 (0x38), region = 16 }
   0xc   : > { %s37_s20 = sor.u32 %s36_s18, %s35_s19 }
   0xd   : > { %p38_p5 = scmp.eq.s32.totalorder %s37_s20, 0 }
   0xf   : > { %s2308_s22 = scalar_select %p38_p5, %s2219_s10, %s40_s21  }
  0x10   : > { %132 = sbr.rel (!%p49_p3) target bundleno = 56 (0x38), region = 20  ;;  %s134_s23 = sand.u32 (%p49_p3), 1, %s2219_s10  }
  0x11   : > { %s1630_s24 = sshll.u32 (%p49_p3), %s2231_s13, 2  ;;  %s1628_s25 = sshll.u32 (%p49_p3), %s134_s23, 8 }
  0x12   : > { %s2127_s26 = smul.u32 (%p49_p3), 2880, %s2235_s14  ;;  %s2322_s4 = scalar_lea.vmem (%p49_p3), [#allocation3], %s1628_s25 }
  0x14   : > { %s140_s27 = sadd.s32 (%p49_p3), %s2127_s26, %s1630_s24 }
  0x15   : > { %s1632_s28 = sshll.u32 %s140_s27, 2 }
  0x16   : > { %s2317_s3 = scalar_lea.vmem %s2761_s0, %s1632_s28 }
  0x17   : > { %v155_v0 = vld [vmem:[%s2317_s3] sm:$0xff]  ;;  %v157_v1 = vld [vmem:[%s2317_s3 + $0x8] sm:$0xff]  ;;  %v159_v2 = vld [vmem:[%s2317_s3 + $0x2d0] sm:$0xff] }
  0x18   : > { %156 = vst [vmem:[%s2322_s4] sm:$0xff] %v155_v0  ;;  %v161_v3 = vld [vmem:[%s2317_s3 + $0x2d8] sm:$0xff]  ;;  %v163_v4 = vld [vmem:[%s2317_s3 + $0x5a0] sm:$0xff]  ;;  %v165_v5 = vld [vmem:[%s2317_s3 + $0x5a8] sm:$0xff] }
  0x19   : > { %158 = vst [vmem:[%s2322_s4 + $0x8] sm:$0xff] %v157_v1  ;;  %v167_v6 = vld [vmem:[%s2317_s3 + $0x870] sm:$0xff]  ;;  %v169_v7 = vld [vmem:[%s2317_s3 + $0x878] sm:$0xff]  ;;  %v171_v8 = vld [vmem:[%s2317_s3 + $0xb40] sm:$0xff] }
  0x1a   : > { %160 = vst [vmem:[%s2322_s4 + $0x10] sm:$0xff] %v159_v2  ;;  %v173_v9 = vld [vmem:[%s2317_s3 + $0xb48] sm:$0xff]  ;;  %v175_v10 = vld [vmem:[%s2317_s3 + $0xe10] sm:$0xff]  ;;  %v177_v11 = vld [vmem:[%s2317_s3 + $0xe18] sm:$0xff] }
  0x1b   : > { %162 = vst [vmem:[%s2322_s4 + $0x18] sm:$0xff] %v161_v3  ;;  %v179_v12 = vld [vmem:[%s2317_s3 + $0x10e0] sm:$0xff]  ;;  %v181_v13 = vld [vmem:[%s2317_s3 + $0x10e8] sm:$0xff]  ;;  %v183_v14 = vld [vmem:[%s2317_s3 + $0x13b0] sm:$0xff] }
  0x1c   : > { %164 = vst [vmem:[%s2322_s4 + $0x20] sm:$0xff] %v163_v4  ;;  %v185_v15 = vld [vmem:[%s2317_s3 + $0x13b8] sm:$0xff]  ;;  %v187_v16 = vld [vmem:[%s2317_s3 + $0x1680] sm:$0xff]  ;;  %v189_v17 = vld [vmem:[%s2317_s3 + $0x1688] sm:$0xff] }
  0x1d   : > { %166 = vst [vmem:[%s2322_s4 + $0x28] sm:$0xff] %v165_v5  ;;  %v191_v18 = vld [vmem:[%s2317_s3 + $0x1950] sm:$0xff]  ;;  %v193_v19 = vld [vmem:[%s2317_s3 + $0x1958] sm:$0xff]  ;;  %v195_v20 = vld [vmem:[%s2317_s3 + $0x1c20] sm:$0xff] }
  0x1e   : > { %168 = vst [vmem:[%s2322_s4 + $0x30] sm:$0xff] %v167_v6  ;;  %v197_v21 = vld [vmem:[%s2317_s3 + $0x1c28] sm:$0xff]  ;;  %v199_v22 = vld [vmem:[%s2317_s3 + $0x1ef0] sm:$0xff]  ;;  %v201_v23 = vld [vmem:[%s2317_s3 + $0x1ef8] sm:$0xff] }
  0x1f   : > { %170 = vst [vmem:[%s2322_s4 + $0x38] sm:$0xff] %v169_v7  ;;  %v203_v24 = vld [vmem:[%s2317_s3 + $0x21c0] sm:$0xff]  ;;  %v205_v25 = vld [vmem:[%s2317_s3 + $0x21c8] sm:$0xff]  ;;  %v207_v26 = vld [vmem:[%s2317_s3 + $0x2490] sm:$0xff] }
  0x20   : > { %172 = vst [vmem:[%s2322_s4 + $0x40] sm:$0xff] %v171_v8  ;;  %v209_v27 = vld [vmem:[%s2317_s3 + $0x2498] sm:$0xff]  ;;  %v211_v28 = vld [vmem:[%s2317_s3 + $0x2760] sm:$0xff]  ;;  %v213_v29 = vld [vmem:[%s2317_s3 + $0x2768] sm:$0xff] }
  0x21   : > { %174 = vst [vmem:[%s2322_s4 + $0x48] sm:$0xff] %v173_v9  ;;  %v215_v30 = vld [vmem:[%s2317_s3 + $0x2a30] sm:$0xff]  ;;  %v217_v31 = vld [vmem:[%s2317_s3 + $0x2a38] sm:$0xff] }
  0x22   : > { %176 = vst [vmem:[%s2322_s4 + $0x50] sm:$0xff] %v175_v10 }
  0x23   : > { %178 = vst [vmem:[%s2322_s4 + $0x58] sm:$0xff] %v177_v11 }
  0x24   : > { %180 = vst [vmem:[%s2322_s4 + $0x60] sm:$0xff] %v179_v12 }
  0x25   : > { %182 = vst [vmem:[%s2322_s4 + $0x68] sm:$0xff] %v181_v13 }
  0x26   : > { %184 = vst [vmem:[%s2322_s4 + $0x70] sm:$0xff] %v183_v14 }
  0x27   : > { %186 = vst [vmem:[%s2322_s4 + $0x78] sm:$0xff] %v185_v15 }
  0x28   : > { %188 = vst [vmem:[%s2322_s4 + $0x80] sm:$0xff] %v187_v16 }
  0x29   : > { %190 = vst [vmem:[%s2322_s4 + $0x88] sm:$0xff] %v189_v17 }
  0x2a   : > { %192 = vst [vmem:[%s2322_s4 + $0x90] sm:$0xff] %v191_v18 }
  0x2b   : > { %194 = vst [vmem:[%s2322_s4 + $0x98] sm:$0xff] %v193_v19 }
  0x2c   : > { %196 = vst [vmem:[%s2322_s4 + $0xa0] sm:$0xff] %v195_v20 }
  0x2d   : > { %198 = vst [vmem:[%s2322_s4 + $0xa8] sm:$0xff] %v197_v21 }
  0x2e   : > { %200 = vst [vmem:[%s2322_s4 + $0xb0] sm:$0xff] %v199_v22 }
  0x2f   : > { %202 = vst [vmem:[%s2322_s4 + $0xb8] sm:$0xff] %v201_v23 }
  0x30   : > { %204 = vst [vmem:[%s2322_s4 + $0xc0] sm:$0xff] %v203_v24 }
  0x31   : > { %206 = vst [vmem:[%s2322_s4 + $0xc8] sm:$0xff] %v205_v25 }
  0x32   : > { %208 = vst [vmem:[%s2322_s4 + $0xd0] sm:$0xff] %v207_v26 }
  0x33   : > { %210 = vst [vmem:[%s2322_s4 + $0xd8] sm:$0xff] %v209_v27 }
  0x34   : > { %212 = vst [vmem:[%s2322_s4 + $0xe0] sm:$0xff] %v211_v28 }
  0x35   : > { %214 = vst [vmem:[%s2322_s4 + $0xe8] sm:$0xff] %v213_v29 }
  0x36   : > { %216 = vst [vmem:[%s2322_s4 + $0xf0] sm:$0xff] %v215_v30 }
  0x37   : > { %218 = vst [vmem:[%s2322_s4 + $0xf8] sm:$0xff] %v217_v31 }
  0x38 PF: > { %p1633_p7 = scmp.ge.s32.totalorder %s2239_s15, 1  ;;  %p238_p8 = scmp.lt.s32.totalorder %s2239_s15, 91 }
  0x3a   : > { %p239_p9 = pnand %p1633_p7, %p238_p8 }
  0x3b   : > { %s245_s5 = sand.u32 (!%p239_p9), 1, %s2215_s9   ;;  %s1635_s6 = sshll.u32 (!%p239_p9), %s2223_s11, 6 }
  0x3c   : > { %242 = sbr.rel (%p239_p9) target bundleno = 550 (0x226), region = 47  ;;  %s1634_s7 = sshll.u32 (!%p239_p9), %s245_s5, 8 }
  0x3d   : > { %p285_p10 = scmp.lt.s32.totalorder (!%p239_p9), %s1635_s6, 2879  ;;  %s1638_s8 = sshll.u32 (!%p239_p9), %s2227_s12, 4 }
  0x3e   : > { %p297_p11 = scmp.lt.s32.totalorder (!%p239_p9), %s1638_s8, 31  ;;  %s2400_s9 = scalar_lea.vmem (!%p239_p9), [#allocation3], %s1634_s7 }
  0x3f   : > { %p1641_p12 = scmp.ne.s32.totalorder (!%p239_p9), %s2223_s11, 0 }
  0x41   : > { %s2777_s6 = smov (!%p285_p10, %s1635_s6), 2879  ;;  %s2779_s8 = smov (!%p297_p11, %s1638_s8), 31 }
  0x42   : > { %s2029_s18 = sshll.u32 %s2777_s6, 3  ;;  %s2030_s23 = sshll.u32 %s2779_s8, 3 }
  0x43   : > { %s2393_s21 = scalar_lea.vmem %s2762_s1, %s2029_s18  ;;  %s2398_s26 = scalar_lea.vmem %s2763_s2, %s2030_s23 }
  0x44   : > { %310 = sbr.rel (%p1641_p12) target bundleno = 106 (0x6a), region = 55 }
  0x49   : > { %v2241_v32 = vmov 0.0  }
  0x4a   : > { %311 = vst [vmem:[#allocation2 + $0xb0] sm:$0xff] %v2241_v32 }
  0x4b   : > { %312 = vst [vmem:[#allocation2] sm:$0xff] %v2241_v32 }
  0x4c   : > { %313 = vst [vmem:[#allocation2 + $0xd8] sm:$0xff] %v2241_v32 }
  0x4d   : > { %314 = vst [vmem:[#allocation2 + $0x18] sm:$0xff] %v2241_v32 }
  0x4e   : > { %315 = vst [vmem:[#allocation2 + $0x50] sm:$0xff] %v2241_v32 }
  0x4f   : > { %316 = vst [vmem:[#allocation2 + $0x68] sm:$0xff] %v2241_v32 }
  0x50   : > { %317 = vst [vmem:[#allocation2 + $0x30] sm:$0xff] %v2241_v32 }
  0x51   : > { %318 = vst [vmem:[#allocation2 + $0x48] sm:$0xff] %v2241_v32 }
  0x52   : > { %319 = vst [vmem:[#allocation2 + $0x80] sm:$0xff] %v2241_v32 }
  0x53   : > { %320 = vst [vmem:[#allocation2 + $0x88] sm:$0xff] %v2241_v32 }
  0x54   : > { %321 = vst [vmem:[#allocation2 + $0xe8] sm:$0xff] %v2241_v32 }
  0x55   : > { %322 = vst [vmem:[#allocation2 + $0xb8] sm:$0xff] %v2241_v32 }
  0x56   : > { %323 = vst [vmem:[#allocation2 + $0x60] sm:$0xff] %v2241_v32 }
  0x57   : > { %324 = vst [vmem:[#allocation2 + $0xf0] sm:$0xff] %v2241_v32 }
  0x58   : > { %325 = vst [vmem:[#allocation2 + $0x8] sm:$0xff] %v2241_v32 }
  0x59   : > { %326 = vst [vmem:[#allocation2 + $0x78] sm:$0xff] %v2241_v32 }
  0x5a   : > { %327 = vst [vmem:[#allocation2 + $0x38] sm:$0xff] %v2241_v32 }
  0x5b   : > { %328 = vst [vmem:[#allocation2 + $0x58] sm:$0xff] %v2241_v32 }
  0x5c   : > { %329 = vst [vmem:[#allocation2 + $0x40] sm:$0xff] %v2241_v32 }
  0x5d   : > { %330 = vst [vmem:[#allocation2 + $0xc8] sm:$0xff] %v2241_v32 }
  0x5e   : > { %331 = vst [vmem:[#allocation2 + $0xe0] sm:$0xff] %v2241_v32 }
  0x5f   : > { %332 = vst [vmem:[#allocation2 + $0x90] sm:$0xff] %v2241_v32 }
  0x60   : > { %333 = vst [vmem:[#allocation2 + $0x70] sm:$0xff] %v2241_v32 }
  0x61   : > { %334 = vst [vmem:[#allocation2 + $0xc0] sm:$0xff] %v2241_v32 }
  0x62   : > { %335 = vst [vmem:[#allocation2 + $0xa8] sm:$0xff] %v2241_v32 }
  0x63   : > { %336 = vst [vmem:[#allocation2 + $0xd0] sm:$0xff] %v2241_v32 }
  0x64   : > { %337 = vst [vmem:[#allocation2 + $0x10] sm:$0xff] %v2241_v32 }
  0x65   : > { %338 = vst [vmem:[#allocation2 + $0x28] sm:$0xff] %v2241_v32 }
  0x66   : > { %339 = vst [vmem:[#allocation2 + $0xa0] sm:$0xff] %v2241_v32 }
  0x67   : > { %340 = vst [vmem:[#allocation2 + $0xf8] sm:$0xff] %v2241_v32 }
  0x68   : > { %341 = vst [vmem:[#allocation2 + $0x20] sm:$0xff] %v2241_v32 }
  0x69   : > { %342 = vst [vmem:[#allocation2 + $0x98] sm:$0xff] %v2241_v32 }
  0x6a PF: > { %v1828_v33 = vld [vmem:[%s2393_s21 + $0x70] sm:$0xf]  ;;  %v2078_v34 = vld [vmem:[%s2393_s21 + $0x74] sm:$0xf0]  ;;  %v1820_v44 = vld [vmem:[%s2393_s21 + $0x60] sm:$0xf] }
  0x6b   : > { %v1892_v35 = vld [vmem:[%s2393_s21 + $0xf0] sm:$0xf]  ;;  %v1829_v36 = vor.u32 %v2078_v34, %v1828_v33  ;;  %v2094_v37 = vld [vmem:[%s2393_s21 + $0xf4] sm:$0xf0]  ;;  %v2076_v46 = vld [vmem:[%s2393_s21 + $0x64] sm:$0xf0] }
  0x6c   : > { %v1956_v38 = vld [vmem:[%s2393_s21 + $0x170] sm:$0xf]  ;;  %v2110_v39 = vld [vmem:[%s2393_s21 + $0x174] sm:$0xf0]  ;;  %v1893_v40 = vor.u32 %v2094_v37, %v1892_v35  ;;  %v1884_v47 = vld [vmem:[%s2393_s21 + $0xe0] sm:$0xf]  ;;  %v1821_v49 = vor.u32 %v2076_v46, %v1820_v44 }
  0x6d   : > { %v1957_v41 = vor.u32 %v2110_v39, %v1956_v38  ;;  %v2020_v42 = vld [vmem:[%s2393_s21 + $0x1f0] sm:$0xf]  ;;  %v2126_v43 = vld [vmem:[%s2393_s21 + $0x1f4] sm:$0xf0]  ;;  %951 = vmatpush.bf16.msra.mxu0 %v1829_v36  ;;  %v2092_v48 = vld [vmem:[%s2393_s21 + $0xe4] sm:$0xf0] }
  0x6e   : > { %v2021_v45 = vor.u32 %v2126_v43, %v2020_v42  ;;  %1000 = vmatpush.bf16.msra.mxu1 %v1893_v40  ;;  %v1885_v50 = vor.u32 %v2092_v48, %v1884_v47  ;;  %v1948_v51 = vld [vmem:[%s2393_s21 + $0x160] sm:$0xf]  ;;  %v2108_v52 = vld [vmem:[%s2393_s21 + $0x164] sm:$0xf0]  ;;  %v1812_v56 = vld [vmem:[%s2393_s21 + $0x50] sm:$0xf] }
  0x6f   : > { %1049 = vmatpush.bf16.msra.mxu2 %v1957_v41  ;;  %v2012_v53 = vld [vmem:[%s2393_s21 + $0x1e0] sm:$0xf]  ;;  %v1949_v54 = vor.u32 %v2108_v52, %v1948_v51  ;;  %v2124_v55 = vld [vmem:[%s2393_s21 + $0x1e4] sm:$0xf0]  ;;  %v2074_v57 = vld [vmem:[%s2393_s21 + $0x54] sm:$0xf0] }
  0x70   : > { %1098 = vmatpush.bf16.msra.mxu3 %v2021_v45  ;;  %v2013_v58 = vor.u32 %v2124_v55, %v2012_v53  ;;  %v1876_v59 = vld [vmem:[%s2393_s21 + $0xd0] sm:$0xf]  ;;  %v2090_v60 = vld [vmem:[%s2393_s21 + $0xd4] sm:$0xf0]  ;;  %v1813_v62 = vor.u32 %v2074_v57, %v1812_v56  ;;  %v1804_v4 = vld [vmem:[%s2393_s21 + $0x40] sm:$0xf] }
  0x71   : > { %v1940_v61 = vld [vmem:[%s2393_s21 + $0x150] sm:$0xf]  ;;  %952 = vmatpush.bf16.msra.mxu0 %v1821_v49  ;;  %v2106_v63 = vld [vmem:[%s2393_s21 + $0x154] sm:$0xf0]  ;;  %v1877_v2 = vor.u32 %v2090_v60, %v1876_v59  ;;  %v2072_v5 = vld [vmem:[%s2393_s21 + $0x44] sm:$0xf0] }
  0x72   : > { %v2004_v0 = vld [vmem:[%s2393_s21 + $0x1d0] sm:$0xf]  ;;  %v2122_v1 = vld [vmem:[%s2393_s21 + $0x1d4] sm:$0xf0]  ;;  %1001 = vmatpush.bf16.msra.mxu1 %v1885_v50  ;;  %v1941_v3 = vor.u32 %v2106_v63, %v1940_v61  ;;  %v1868_v6 = vld [vmem:[%s2393_s21 + $0xc0] sm:$0xf]  ;;  %v1805_v13 = vor.u32 %v2072_v5, %v1804_v4 }
  0x73   : > { %1050 = vmatpush.bf16.msra.mxu2 %v1949_v54  ;;  %v2005_v7 = vor.u32 %v2122_v1, %v2004_v0  ;;  %v2088_v8 = vld [vmem:[%s2393_s21 + $0xc4] sm:$0xf0]  ;;  %v1932_v9 = vld [vmem:[%s2393_s21 + $0x140] sm:$0xf]  ;;  %v1796_v16 = vld [vmem:[%s2393_s21 + $0x30] sm:$0xf] }
  0x74   : > { %1099 = vmatpush.bf16.msra.mxu3 %v2013_v58  ;;  %v2104_v10 = vld [vmem:[%s2393_s21 + $0x144] sm:$0xf0]  ;;  %v1996_v11 = vld [vmem:[%s2393_s21 + $0x1c0] sm:$0xf]  ;;  %v1869_v14 = vor.u32 %v2088_v8, %v1868_v6  ;;  %v2070_v17 = vld [vmem:[%s2393_s21 + $0x34] sm:$0xf0] }
  0x75   : > { %v2120_v12 = vld [vmem:[%s2393_s21 + $0x1c4] sm:$0xf0]  ;;  %953 = vmatpush.bf16.msra.mxu0 %v1813_v62  ;;  %v1933_v15 = vor.u32 %v2104_v10, %v1932_v9  ;;  %v1860_v18 = vld [vmem:[%s2393_s21 + $0xb0] sm:$0xf]  ;;  %v2086_v20 = vld [vmem:[%s2393_s21 + $0xb4] sm:$0xf0]  ;;  %v1797_v25 = vor.u32 %v2070_v17, %v1796_v16 }
  0x76   : > { %1002 = vmatpush.bf16.msra.mxu1 %v1877_v2  ;;  %v1997_v19 = vor.u32 %v2120_v12, %v1996_v11  ;;  %v1924_v21 = vld [vmem:[%s2393_s21 + $0x130] sm:$0xf]  ;;  %v2102_v22 = vld [vmem:[%s2393_s21 + $0x134] sm:$0xf0]  ;;  %v1861_v26 = vor.u32 %v2086_v20, %v1860_v18  ;;  %v1788_v28 = vld [vmem:[%s2393_s21 + $0x20] sm:$0xf] }
  0x77   : > { %1051 = vmatpush.bf16.msra.mxu2 %v1941_v3  ;;  %v1988_v23 = vld [vmem:[%s2393_s21 + $0x1b0] sm:$0xf]  ;;  %v2118_v24 = vld [vmem:[%s2393_s21 + $0x1b4] sm:$0xf0]  ;;  %v1925_v27 = vor.u32 %v2102_v22, %v1924_v21  ;;  %v2068_v29 = vld [vmem:[%s2393_s21 + $0x24] sm:$0xf0] }
  0x78   : > { %1100 = vmatpush.bf16.msra.mxu3 %v2005_v7  ;;  %v1852_v30 = vld [vmem:[%s2393_s21 + $0xa0] sm:$0xf]  ;;  %v1989_v31 = vor.u32 %v2118_v24, %v1988_v23  ;;  %v2084_v32 = vld [vmem:[%s2393_s21 + $0xa4] sm:$0xf0]  ;;  %v1789_v37 = vor.u32 %v2068_v29, %v1788_v28  ;;  %v1780_v40 = vld [vmem:[%s2393_s21 + $0x10] sm:$0xf] }
  0x79   : > { %954 = vmatpush.bf16.msra.mxu0 %v1805_v13  ;;  %v1916_v33 = vld [vmem:[%s2393_s21 + $0x120] sm:$0xf]  ;;  %v2100_v34 = vld [vmem:[%s2393_s21 + $0x124] sm:$0xf0]  ;;  %v1853_v38 = vor.u32 %v2084_v32, %v1852_v30  ;;  %v2066_v41 = vld [vmem:[%s2393_s21 + $0x14] sm:$0xf0] }
  0x7a   : > { %1003 = vmatpush.bf16.msra.mxu1 %v1869_v14  ;;  %v1980_v35 = vld [vmem:[%s2393_s21 + $0x1a0] sm:$0xf]  ;;  %v2116_v36 = vld [vmem:[%s2393_s21 + $0x1a4] sm:$0xf0]  ;;  %v1917_v39 = vor.u32 %v2100_v34, %v1916_v33  ;;  %v1844_v42 = vld [vmem:[%s2393_s21 + $0x90] sm:$0xf]  ;;  %v1781_v50 = vor.u32 %v2066_v41, %v1780_v40 }
  0x7b   : > { %1052 = vmatpush.bf16.msra.mxu2 %v1933_v15  ;;  %v1981_v43 = vor.u32 %v2116_v36, %v1980_v35  ;;  %v2082_v44 = vld [vmem:[%s2393_s21 + $0x94] sm:$0xf0]  ;;  %v1908_v45 = vld [vmem:[%s2393_s21 + $0x110] sm:$0xf]  ;;  %v1772_v49 = vld [vmem:[%s2393_s21] sm:$0xf] }
  0x7c   : > { %1101 = vmatpush.bf16.msra.mxu3 %v1997_v19  ;;  %v2098_v46 = vld [vmem:[%s2393_s21 + $0x114] sm:$0xf0]  ;;  %v1972_v47 = vld [vmem:[%s2393_s21 + $0x190] sm:$0xf]  ;;  %v2064_v51 = vld [vmem:[%s2393_s21 + $0x4] sm:$0xf0]  ;;  %v1845_v54 = vor.u32 %v2082_v44, %v1844_v42 }
  0x7d   : > { %955 = vmatpush.bf16.msra.mxu0 %v1797_v25  ;;  %v2114_v48 = vld [vmem:[%s2393_s21 + $0x194] sm:$0xf0]  ;;  %v1836_v52 = vld [vmem:[%s2393_s21 + $0x80] sm:$0xf]  ;;  %v2080_v53 = vld [vmem:[%s2393_s21 + $0x84] sm:$0xf0]  ;;  %v1909_v55 = vor.u32 %v2098_v46, %v1908_v45  ;;  %v1773_v3 = vor.u32 %v2064_v51, %v1772_v49 }
  0x7e   : > { %1004 = vmatpush.bf16.msra.mxu1 %v1861_v26  ;;  %v1900_v56 = vld [vmem:[%s2393_s21 + $0x100] sm:$0xf]  ;;  %v2096_v57 = vld [vmem:[%s2393_s21 + $0x104] sm:$0xf0]  ;;  %v1973_v59 = vor.u32 %v2114_v48, %v1972_v47  ;;  %v2033_v62 = vld [vmem:[%s2400_s9 + $0xc] sm:$0xf0]  ;;  %v1837_v7 = vor.u32 %v2080_v53, %v1836_v52 }
  0x7f   : > { %1053 = vmatpush.bf16.msra.mxu2 %v1925_v27  ;;  %v1964_v58 = vld [vmem:[%s2393_s21 + $0x180] sm:$0xf]  ;;  %v2112_v60 = vld [vmem:[%s2393_s21 + $0x184] sm:$0xf0]  ;;  %v2031_v63 = vld [vmem:[%s2400_s9 + $0x4] sm:$0xf]  ;;  %v1901_v8 = vor.u32 %v2096_v57, %v1900_v56 }
  0x80   : > { %1102 = vmatpush.bf16.msra.mxu3 %v1989_v31  ;;  %v1644_v61 = vld [vmem:[%s2400_s9] sm:$0xf]  ;;  %v1646_v0 = vld [vmem:[%s2400_s9 + $0x10] sm:$0xf0]  ;;  %v1958_v2 = vld [vmem:[%s2393_s21 + $0x178] sm:$0xf0]  ;;  %v1965_v12 = vor.u32 %v2112_v60, %v1964_v58 }
  0x81   : > { %956 = vmatpush.bf16.msra.mxu0 %v1789_v37  ;;  %v2109_v1 = vld [vmem:[%s2393_s21 + $0x174] sm:$0xf]  ;;  %v1652_v4 = vld [vmem:[%s2400_s9 + $0x8] sm:$0xf]  ;;  %v2022_v6 = vld [vmem:[%s2393_s21 + $0x1f8] sm:$0xf0]  ;;  %v2482_v17 = vor.u32 %v2033_v62, %v1644_v61  ;;  %v2487_v22 = vor.u32 %v2031_v63, %v1646_v0 }
  0x82   : > { %1005 = vmatpush.bf16.msra.mxu1 %v1853_v38  ;;  %v2125_v5 = vld [vmem:[%s2393_s21 + $0x1f4] sm:$0xf]  ;;  %v2034_v9 = vld [vmem:[%s2400_s9 + $0x14] sm:$0xf0]  ;;  %v2032_v10 = vld [vmem:[%s2400_s9 + $0xc] sm:$0xf]  ;;  %v1961_v13 = vor.u32 %v2109_v1, %v1958_v2 }
  0x83   : > { %1054 = vmatpush.bf16.msra.mxu2 %v1917_v39  ;;  %v1654_v11 = vld [vmem:[%s2400_s9 + $0x18] sm:$0xf0]  ;;  %v2077_v14 = vld [vmem:[%s2393_s21 + $0x74] sm:$0xf]  ;;  %v2025_v18 = vor.u32 %v2125_v5, %v2022_v6  ;;  %v2107_v20 = vld [vmem:[%s2393_s21 + $0x164] sm:$0xf]  ;;  %v2489_v23 = vor.u32 %v2034_v9, %v1652_v4 }
  0x84   : > { %1103 = vmatpush.bf16.msra.mxu3 %v1981_v43  ;;  %v1830_v15 = vld [vmem:[%s2393_s21 + $0x78] sm:$0xf0]  ;;  %v2093_v16 = vld [vmem:[%s2393_s21 + $0xf4] sm:$0xf]  ;;  %v1950_v21 = vld [vmem:[%s2393_s21 + $0x168] sm:$0xf0]  ;;  %v2493_v26 = vor.u32 %v2032_v10, %v1654_v11 }
  0x85   : > { %957 = vmatpush.bf16.msra.mxu0 %v1781_v50  ;;  %v1894_v19 = vld [vmem:[%s2393_s21 + $0xf8] sm:$0xf0]  ;;  %v2123_v24 = vld [vmem:[%s2393_s21 + $0x1e4] sm:$0xf]  ;;  %v2014_v25 = vld [vmem:[%s2393_s21 + $0x1e8] sm:$0xf0]  ;;  %v1833_v27 = vor.u32 %v2077_v14, %v1830_v15  ;;  %v1953_v29 = vor.u32 %v2107_v20, %v1950_v21 }
  0x86   : > { %1006 = vmatpush.bf16.msra.mxu1 %v1845_v54  ;;  %v1897_v28 = vor.u32 %v2093_v16, %v1894_v19  ;;  %v2075_v30 = vld [vmem:[%s2393_s21 + $0x64] sm:$0xf]  ;;  %v1822_v31 = vld [vmem:[%s2393_s21 + $0x68] sm:$0xf0]  ;;  %v2017_v32 = vor.u32 %v2123_v24, %v2014_v25  ;;  %v2105_v36 = vld [vmem:[%s2393_s21 + $0x154] sm:$0xf] }
  0x87   : > { %1055 = vmatpush.bf16.msra.mxu2 %v1909_v55  ;;  %v2091_v33 = vld [vmem:[%s2393_s21 + $0xe4] sm:$0xf]  ;;  %v1886_v34 = vld [vmem:[%s2393_s21 + $0xe8] sm:$0xf0]  ;;  %v1825_v35 = vor.u32 %v2075_v30, %v1822_v31  ;;  %v1942_v37 = vld [vmem:[%s2393_s21 + $0x158] sm:$0xf0] }
  0x88   : > { %1104 = vmatpush.bf16.msra.mxu3 %v1973_v59  ;;  %v2121_v38 = vld [vmem:[%s2393_s21 + $0x1d4] sm:$0xf]  ;;  %v1889_v39 = vor.u32 %v2091_v33, %v1886_v34  ;;  %v1945_v40 = vor.u32 %v2105_v36, %v1942_v37  ;;  %v2006_v41 = vld [vmem:[%s2393_s21 + $0x1d8] sm:$0xf0]  ;;  %v1660_v49 = vld [vmem:[%s2400_s9 + $0x20] sm:$0xf] }
  0x89   : > { %958 = vmatpush.bf16.msra.mxu0 %v1773_v3  ;;  %v2073_v42 = vld [vmem:[%s2393_s21 + $0x54] sm:$0xf]  ;;  %v1814_v43 = vld [vmem:[%s2393_s21 + $0x58] sm:$0xf0]  ;;  %v2009_v44 = vor.u32 %v2121_v38, %v2006_v41  ;;  %v2037_v50 = vld [vmem:[%s2400_s9 + $0x2c] sm:$0xf0] }
  0x8a   : > { %1007 = vmatpush.bf16.msra.mxu1 %v1837_v7  ;;  %v2089_v45 = vld [vmem:[%s2393_s21 + $0xd4] sm:$0xf]  ;;  %v1878_v46 = vld [vmem:[%s2393_s21 + $0xd8] sm:$0xf0]  ;;  %v1817_v47 = vor.u32 %v2073_v42, %v1814_v43  ;;  %v2035_v51 = vld [vmem:[%s2400_s9 + $0x24] sm:$0xf]  ;;  %v2519_v57 = vor.u32 %v2037_v50, %v1660_v49 }
  0x8b   : > { %1056 = vmatpush.bf16.msra.mxu2 %v1901_v8  ;;  %v1881_v48 = vor.u32 %v2089_v45, %v1878_v46  ;;  %v1662_v52 = vld [vmem:[%s2400_s9 + $0x30] sm:$0xf0]  ;;  %v1668_v53 = vld [vmem:[%s2400_s9 + $0x28] sm:$0xf]  ;;  %v2038_v54 = vld [vmem:[%s2400_s9 + $0x34] sm:$0xf0] }
  0x8c   : > { %1105 = vmatpush.bf16.msra.mxu3 %v1965_v12  ;;  %959 = vmatmul.bf16.vlgmr.msra.gmra.mxu0 %v2482_v17  ;;  %v2036_v55 = vld [vmem:[%s2400_s9 + $0x2c] sm:$0xf]  ;;  %v1670_v56 = vld [vmem:[%s2400_s9 + $0x38] sm:$0xf0]  ;;  %v2521_v58 = vor.u32 %v2035_v51, %v1662_v52  ;;  %v2523_v59 = vor.u32 %v2038_v54, %v1668_v53  ;;  %v2103_v61 = vld [vmem:[%s2393_s21 + $0x144] sm:$0xf] }
  0x8d   : > { %1008 = vmatmul.bf16.vlgmr.msra.gmra.mxu1 %v2487_v22  ;;  %1147 = vmatpush.bf16.msrb.mxu0 %v1833_v27  ;;  %v2525_v60 = vor.u32 %v2036_v55, %v1670_v56  ;;  %v1934_v62 = vld [vmem:[%s2393_s21 + $0x148] sm:$0xf0]  ;;  %v2119_v63 = vld [vmem:[%s2393_s21 + $0x1c4] sm:$0xf]  ;;  %v1676_v9 = vld [vmem:[%s2400_s9 + $0x40] sm:$0xf] }
  0x8e   : > { %1057 = vmatmul.bf16.vlgmr.msra.gmra.mxu2 %v2489_v23  ;;  %1196 = vmatpush.bf16.msrb.mxu1 %v1897_v28  ;;  %v1937_v0 = vor.u32 %v2103_v61, %v1934_v62  ;;  %v1998_v1 = vld [vmem:[%s2393_s21 + $0x1c8] sm:$0xf0]  ;;  %v2071_v2 = vld [vmem:[%s2393_s21 + $0x44] sm:$0xf]  ;;  %v2041_v10 = vld [vmem:[%s2400_s9 + $0x4c] sm:$0xf0] }
  0x8f   : > { %1245 = vmatpush.bf16.msrb.mxu2 %v1961_v13  ;;  %1106 = vmatmul.bf16.vlgmr.msra.gmra.mxu3 %v2493_v26  ;;  %v1806_v3 = vld [vmem:[%s2393_s21 + $0x48] sm:$0xf0]  ;;  %v2001_v4 = vor.u32 %v2119_v63, %v1998_v1  ;;  %v2087_v6 = vld [vmem:[%s2393_s21 + $0xc4] sm:$0xf]  ;;  %v1678_v12 = vld [vmem:[%s2400_s9 + $0x50] sm:$0xf0] }
  0x90   : > { %1294 = vmatpush.bf16.msrb.mxu3 %v2025_v18  ;;  %v1809_v5 = vor.u32 %v2071_v2, %v1806_v3  ;;  %v1870_v7 = vld [vmem:[%s2393_s21 + $0xc8] sm:$0xf0]  ;;  %v2039_v11 = vld [vmem:[%s2400_s9 + $0x44] sm:$0xf]  ;;  %v1684_v13 = vld [vmem:[%s2400_s9 + $0x48] sm:$0xf]  ;;  %v2547_v18 = vor.u32 %v2041_v10, %v1676_v9 }
  0x91   : > { %1148 = vmatpush.bf16.msrb.mxu0 %v1825_v35  ;;  %v1873_v8 = vor.u32 %v2087_v6, %v1870_v7  ;;  %v2042_v14 = vld [vmem:[%s2400_s9 + $0x54] sm:$0xf0]  ;;  %v2040_v15 = vld [vmem:[%s2400_s9 + $0x4c] sm:$0xf]  ;;  %v1686_v16 = vld [vmem:[%s2400_s9 + $0x58] sm:$0xf0]  ;;  %v2549_v19 = vor.u32 %v2039_v11, %v1678_v12 }
  0x92   : > { %1197 = vmatpush.bf16.msrb.mxu1 %v1889_v39  ;;  %v2551_v20 = vor.u32 %v2042_v14, %v1684_v13  ;;  %v2553_v21 = vor.u32 %v2040_v15, %v1686_v16  ;;  %v2101_v24 = vld [vmem:[%s2393_s21 + $0x134] sm:$0xf]  ;;  %v1926_v25 = vld [vmem:[%s2393_s21 + $0x138] sm:$0xf0]  ;;  %v1692_v37 = vld [vmem:[%s2400_s9 + $0x60] sm:$0xf] }
  0x93   : > { %1246 = vmatpush.bf16.msrb.mxu2 %v1953_v29  ;;  %v2117_v27 = vld [vmem:[%s2393_s21 + $0x1b4] sm:$0xf]  ;;  %v1929_v28 = vor.u32 %v2101_v24, %v1926_v25  ;;  %v1990_v29 = vld [vmem:[%s2393_s21 + $0x1b8] sm:$0xf0]  ;;  %v2045_v38 = vld [vmem:[%s2400_s9 + $0x6c] sm:$0xf0] }
  0x94   : > { %1295 = vmatpush.bf16.msrb.mxu3 %v2017_v32  ;;  %v2069_v30 = vld [vmem:[%s2393_s21 + $0x34] sm:$0xf]  ;;  %v1798_v31 = vld [vmem:[%s2393_s21 + $0x38] sm:$0xf0]  ;;  %v1993_v32 = vor.u32 %v2117_v27, %v1990_v29  ;;  %v2043_v39 = vld [vmem:[%s2400_s9 + $0x64] sm:$0xf]  ;;  %v2575_v45 = vor.u32 %v2045_v38, %v1692_v37 }
  0x95   : > { %1149 = vmatpush.bf16.msrb.mxu0 %v1817_v47  ;;  %v1801_v33 = vor.u32 %v2069_v30, %v1798_v31  ;;  %v2085_v34 = vld [vmem:[%s2393_s21 + $0xb4] sm:$0xf]  ;;  %v1862_v35 = vld [vmem:[%s2393_s21 + $0xb8] sm:$0xf0]  ;;  %v1700_v41 = vld [vmem:[%s2400_s9 + $0x68] sm:$0xf] }
  0x96   : > { %1198 = vmatpush.bf16.msrb.mxu1 %v1881_v48  ;;  %v1865_v36 = vor.u32 %v2085_v34, %v1862_v35  ;;  %v2046_v42 = vld [vmem:[%s2400_s9 + $0x74] sm:$0xf0]  ;;  %v2044_v43 = vld [vmem:[%s2400_s9 + $0x6c] sm:$0xf]  ;;  %v2099_v49 = vld [vmem:[%s2393_s21 + $0x124] sm:$0xf] }
  0x97   : > { %1247 = vmatpush.bf16.msrb.mxu2 %v1945_v40  ;;  %v1694_v40 = vld [vmem:[%s2400_s9 + $0x70] sm:$0xf0]  ;;  %v2579_v47 = vor.u32 %v2046_v42, %v1700_v41  ;;  %v1918_v50 = vld [vmem:[%s2393_s21 + $0x128] sm:$0xf0]  ;;  %v2115_v51 = vld [vmem:[%s2393_s21 + $0x1a4] sm:$0xf] }
  0x98   : > { %1296 = vmatpush.bf16.msrb.mxu3 %v2009_v44  ;;  %v1702_v44 = vld [vmem:[%s2400_s9 + $0x78] sm:$0xf0]  ;;  %v2577_v46 = vor.u32 %v2043_v39, %v1694_v40  ;;  %v1921_v52 = vor.u32 %v2099_v49, %v1918_v50  ;;  %v1982_v53 = vld [vmem:[%s2393_s21 + $0x1a8] sm:$0xf0]  ;;  %v2067_v54 = vld [vmem:[%s2393_s21 + $0x24] sm:$0xf] }
  0x99   : > { %1150 = vmatpush.bf16.msrb.mxu0 %v1809_v5  ;;  %v2581_v48 = vor.u32 %v2044_v43, %v1702_v44  ;;  %v1790_v55 = vld [vmem:[%s2393_s21 + $0x28] sm:$0xf0]  ;;  %v1985_v56 = vor.u32 %v2115_v51, %v1982_v53  ;;  %v2083_v62 = vld [vmem:[%s2393_s21 + $0xa4] sm:$0xf]  ;;  %v1708_v1 = vld [vmem:[%s2400_s9 + $0x80] sm:$0xf] }
  0x9a   : > { %1199 = vmatpush.bf16.msrb.mxu1 %v1873_v8  ;;  %v1793_v61 = vor.u32 %v2067_v54, %v1790_v55  ;;  %v1854_v63 = vld [vmem:[%s2393_s21 + $0xa8] sm:$0xf0]  ;;  %v2049_v2 = vld [vmem:[%s2400_s9 + $0x8c] sm:$0xf0]  ;;  %v2047_v3 = vld [vmem:[%s2400_s9 + $0x84] sm:$0xf] }
  0x9b   : > { %1248 = vmatpush.bf16.msrb.mxu2 %v1937_v0  ;;  %v1857_v0 = vor.u32 %v2083_v62, %v1854_v63  ;;  %v1716_v5 = vld [vmem:[%s2400_s9 + $0x88] sm:$0xf]  ;;  %v2050_v6 = vld [vmem:[%s2400_s9 + $0x94] sm:$0xf0]  ;;  %v2048_v7 = vld [vmem:[%s2400_s9 + $0x8c] sm:$0xf]  ;;  %v2603_v9 = vor.u32 %v2049_v2, %v1708_v1 }
  0x9c   : > { %964 = vmatmul.bf16.gmra.mxu0 %v2519_v57  ;;  %1297 = vmatpush.bf16.msrb.mxu3 %v2001_v4  ;;  %v1710_v4 = vld [vmem:[%s2400_s9 + $0x90] sm:$0xf0]  ;;  %v1718_v8 = vld [vmem:[%s2400_s9 + $0x98] sm:$0xf0]  ;;  %v2607_v11 = vor.u32 %v2050_v6, %v1716_v5  ;;  %v2053_v34 = vld [vmem:[%s2400_s9 + $0xac] sm:$0xf0] }
  0x9d   : > { %1013 = vmatmul.bf16.gmra.mxu1 %v2521_v58  ;;  %1151 = vmatpush.bf16.msrb.mxu0 %v1801_v33  ;;  %v2605_v10 = vor.u32 %v2047_v3, %v1710_v4  ;;  %v2609_v12 = vor.u32 %v2048_v7, %v1718_v8  ;;  %v2097_v13 = vld [vmem:[%s2393_s21 + $0x114] sm:$0xf]  ;;  %v1910_v14 = vld [vmem:[%s2393_s21 + $0x118] sm:$0xf0]  ;;  %v1724_v33 = vld [vmem:[%s2400_s9 + $0xa0] sm:$0xf] }
  0x9e   : > { %1062 = vmatmul.bf16.gmra.mxu2 %v2523_v59  ;;  %1200 = vmatpush.bf16.msrb.mxu1 %v1865_v36  ;;  %v2113_v15 = vld [vmem:[%s2393_s21 + $0x194] sm:$0xf]  ;;  %v1913_v16 = vor.u32 %v2097_v13, %v1910_v14  ;;  %v1974_v24 = vld [vmem:[%s2393_s21 + $0x198] sm:$0xf0]  ;;  %v2051_v35 = vld [vmem:[%s2400_s9 + $0xa4] sm:$0xf]  ;;  %v2631_v41 = vor.u32 %v2053_v34, %v1724_v33 }
  0x9f   : > { %1111 = vmatmul.bf16.gmra.mxu3 %v2525_v60  ;;  %1249 = vmatpush.bf16.msrb.mxu2 %v1929_v28  ;;  %v2065_v25 = vld [vmem:[%s2393_s21 + $0x14] sm:$0xf]  ;;  %v1782_v27 = vld [vmem:[%s2393_s21 + $0x18] sm:$0xf0]  ;;  %v1977_v28 = vor.u32 %v2113_v15, %v1974_v24  ;;  %v1732_v37 = vld [vmem:[%s2400_s9 + $0xa8] sm:$0xf] }
  0xa0   : > { %1298 = vmatpush.bf16.msrb.mxu3 %v1993_v32  ;;  %v1785_v29 = vor.u32 %v2065_v25, %v1782_v27  ;;  %v2081_v30 = vld [vmem:[%s2393_s21 + $0x94] sm:$0xf]  ;;  %v1846_v31 = vld [vmem:[%s2393_s21 + $0x98] sm:$0xf0]  ;;  %v2054_v38 = vld [vmem:[%s2400_s9 + $0xb4] sm:$0xf0] }
  0xa1   : > { %1152 = vmatpush.bf16.msrb.mxu0 %v1793_v61  ;;  %v1849_v32 = vor.u32 %v2081_v30, %v1846_v31  ;;  %v1726_v36 = vld [vmem:[%s2400_s9 + $0xb0] sm:$0xf0]  ;;  %v2052_v39 = vld [vmem:[%s2400_s9 + $0xac] sm:$0xf]  ;;  %v1734_v40 = vld [vmem:[%s2400_s9 + $0xb8] sm:$0xf0]  ;;  %v2635_v43 = vor.u32 %v2054_v38, %v1732_v37 }
  0xa2   : > { %1201 = vmatpush.bf16.msrb.mxu1 %v1857_v0  ;;  %v2633_v42 = vor.u32 %v2051_v35, %v1726_v36  ;;  %v2637_v44 = vor.u32 %v2052_v39, %v1734_v40  ;;  %v2095_v49 = vld [vmem:[%s2393_s21 + $0x104] sm:$0xf]  ;;  %v1902_v50 = vld [vmem:[%s2393_s21 + $0x108] sm:$0xf0]  ;;  %v1740_v1 = vld [vmem:[%s2400_s9 + $0xc0] sm:$0xf] }
  0xa3   : > { %1250 = vmatpush.bf16.msrb.mxu2 %v1921_v52  ;;  %v2111_v51 = vld [vmem:[%s2393_s21 + $0x184] sm:$0xf]  ;;  %v1905_v52 = vor.u32 %v2095_v49, %v1902_v50  ;;  %v1966_v53 = vld [vmem:[%s2393_s21 + $0x188] sm:$0xf0]  ;;  %v2057_v2 = vld [vmem:[%s2400_s9 + $0xcc] sm:$0xf0] }
  0xa4   : > { %1299 = vmatpush.bf16.msrb.mxu3 %v1985_v56  ;;  %v2063_v54 = vld [vmem:[%s2393_s21 + $0x4] sm:$0xf]  ;;  %v1774_v55 = vld [vmem:[%s2393_s21 + $0x8] sm:$0xf0]  ;;  %v1969_v56 = vor.u32 %v2111_v51, %v1966_v53  ;;  %v1742_v4 = vld [vmem:[%s2400_s9 + $0xd0] sm:$0xf0]  ;;  %v2659_v13 = vor.u32 %v2057_v2, %v1740_v1 }
  0xa5   : > { %1153 = vmatpush.bf16.msrb.mxu0 %v1785_v29  ;;  %v1777_v61 = vor.u32 %v2063_v54, %v1774_v55  ;;  %v2079_v62 = vld [vmem:[%s2393_s21 + $0x84] sm:$0xf]  ;;  %v1838_v63 = vld [vmem:[%s2393_s21 + $0x88] sm:$0xf0]  ;;  %v1748_v5 = vld [vmem:[%s2400_s9 + $0xc8] sm:$0xf] }
  0xa6   : > { %1202 = vmatpush.bf16.msrb.mxu1 %v1849_v32  ;;  %v1841_v0 = vor.u32 %v2079_v62, %v1838_v63  ;;  %v2055_v3 = vld [vmem:[%s2400_s9 + $0xc4] sm:$0xf]  ;;  %v2058_v6 = vld [vmem:[%s2400_s9 + $0xd4] sm:$0xf0]  ;;  %v2056_v7 = vld [vmem:[%s2400_s9 + $0xcc] sm:$0xf] }
  0xa7   : > { %1251 = vmatpush.bf16.msrb.mxu2 %v1913_v16  ;;  %v1750_v8 = vld [vmem:[%s2400_s9 + $0xd8] sm:$0xf0]  ;;  %v2661_v14 = vor.u32 %v2055_v3, %v1742_v4  ;;  %v2663_v15 = vor.u32 %v2058_v6, %v1748_v5  ;;  %v1756_v24 = vld [vmem:[%s2400_s9 + $0xe0] sm:$0xf]  ;;  %v2061_v25 = vld [vmem:[%s2400_s9 + $0xec] sm:$0xf0] }
  0xa8   : > { %1300 = vmatpush.bf16.msrb.mxu3 %v1977_v28  ;;  %v2665_v16 = vor.u32 %v2056_v7, %v1750_v8  ;;  %v2059_v27 = vld [vmem:[%s2400_s9 + $0xe4] sm:$0xf]  ;;  %v1758_v28 = vld [vmem:[%s2400_s9 + $0xf0] sm:$0xf0]  ;;  %v1764_v29 = vld [vmem:[%s2400_s9 + $0xe8] sm:$0xf]  ;;  %v2679_v33 = vor.u32 %v2061_v25, %v1756_v24 }
  0xa9   : > { %1154 = vmatpush.bf16.msrb.mxu0 %v1777_v61  ;;  %v2062_v30 = vld [vmem:[%s2400_s9 + $0xf4] sm:$0xf0]  ;;  %v2060_v31 = vld [vmem:[%s2400_s9 + $0xec] sm:$0xf]  ;;  %v1766_v32 = vld [vmem:[%s2400_s9 + $0xf8] sm:$0xf0]  ;;  %v2681_v34 = vor.u32 %v2059_v27, %v1758_v28 }
  0xaa   : > { %1203 = vmatpush.bf16.msrb.mxu1 %v1841_v0  ;;  %v2683_v35 = vor.u32 %v2062_v30, %v1764_v29  ;;  %v2685_v36 = vor.u32 %v2060_v31, %v1766_v32  ;;  %v345_v0 = vld [vmem:[#allocation2 + $0xd8] sm:$0xff]  ;;  %v347_v6 = vld [vmem:[#allocation2 + $0x50] sm:$0xff]  ;;  %p2026_p13 = scmp.ne.s32.totalorder %s2223_s11, 44 }
  0xab   : > { %1252 = vmatpush.bf16.msrb.mxu2 %v1905_v52  ;;  %v343_v52 = vld [vmem:[#allocation2 + $0xb0] sm:$0xff] }
  0xac   : > { %969 = vmatmul.bf16.gmra.mxu0 %v2547_v18  ;;  %1301 = vmatpush.bf16.msrb.mxu3 %v1969_v56 }
  0xad   : > { %1018 = vmatmul.bf16.gmra.mxu1 %v2549_v19 }
  0xae   : > { %1067 = vmatmul.bf16.gmra.mxu2 %v2551_v20 }
  0xaf   : > { %1116 = vmatmul.bf16.gmra.mxu3 %v2553_v21 }
  0xbc   : > { %974 = vmatmul.bf16.gmra.mxu0 %v2575_v45 }
  0xbd   : > { %1023 = vmatmul.bf16.gmra.mxu1 %v2577_v46 }
  0xbe   : > { %1072 = vmatmul.bf16.gmra.mxu2 %v2579_v47 }
  0xbf   : > { %1121 = vmatmul.bf16.gmra.mxu3 %v2581_v48 }
  0xcc   : > { %979 = vmatmul.bf16.gmra.mxu0 %v2603_v9 }
  0xcd   : > { %1028 = vmatmul.bf16.gmra.mxu1 %v2605_v10 }
  0xce   : > { %1077 = vmatmul.bf16.gmra.mxu2 %v2607_v11 }
  0xcf   : > { %1126 = vmatmul.bf16.gmra.mxu3 %v2609_v12 }
  0xdc   : > { %984 = vmatmul.bf16.gmra.mxu0 %v2631_v41 }
  0xdd   : > { %1033 = vmatmul.bf16.gmra.mxu1 %v2633_v42 }
  0xde   : > { %1082 = vmatmul.bf16.gmra.mxu2 %v2635_v43 }
  0xdf   : > { %1131 = vmatmul.bf16.gmra.mxu3 %v2637_v44 }
  0xec   : > { %989 = vmatmul.bf16.gmra.mxu0 %v2659_v13 }
  0xed   : > { %1038 = vmatmul.bf16.gmra.mxu1 %v2661_v14 }
  0xee   : > { %1087 = vmatmul.bf16.gmra.mxu2 %v2663_v15 }
  0xef   : > { %1136 = vmatmul.bf16.gmra.mxu3 %v2665_v16 }
  0xfc   : > { %994 = vmatmul.bf16.gmra.mxu0 %v2679_v33 }
  0xfd   : > { %1043 = vmatmul.bf16.gmra.mxu1 %v2681_v34 }
  0xfe   : > { %1092 = vmatmul.bf16.gmra.mxu2 %v2683_v35 }
  0xff   : > { %1141 = vmatmul.bf16.gmra.mxu3 %v2685_v36 }
 0x109   : > { %v960_v37 = vpop.f32.mrf.mxu0 }
 0x10a   : > { %v1009_v38 = vpop.f32.mrf.mxu1 }
 0x10b   : > { %v1010_v39 = vadd.f32 %v1009_v38, %v960_v37 }
 0x10c   : > { %1155 = vmatmul.bf16.vlgmr.msrb.gmra.mxu0 %v2482_v17 }
 0x10d   : > { %1204 = vmatmul.bf16.vlgmr.msrb.gmra.mxu1 %v2487_v22 }
 0x10e   : > { %1253 = vmatmul.bf16.vlgmr.msrb.gmra.mxu2 %v2489_v23 }
 0x10f   : > { %1302 = vmatmul.bf16.vlgmr.msrb.gmra.mxu3 %v2493_v26 }
 0x111   : > { %v1058_v40 = vpop.f32.mrf.mxu2  ;;  %v962_v51 = vpop.f32.mrf.mxu0 }
 0x112   : > { %v1059_v49 = vadd.f32 %v1058_v40, %v1010_v39  ;;  %v1107_v50 = vpop.f32.mrf.mxu3  ;;  %v1011_v53 = vpop.f32.mrf.mxu1  ;;  %v351_v40 = vld [vmem:[#allocation2 + $0x80] sm:$0xff] }
 0x113   : > { %v1012_v56 = vadd.f32 %v1011_v53, %v962_v51 }
 0x114   : > { %v1108_v54 = vadd.f32 %v1107_v50, %v1059_v49 }
 0x116   : > { %v1343_v55 = vadd.f32 %v1108_v54, %v343_v52 }
 0x118   : > { %1375 = vst [vmem:[#allocation2 + $0xb0] sm:$0xff] %v1343_v55 }
 0x119   : > { %v1060_v61 = vpop.f32.mrf.mxu2  ;;  %v965_v63 = vpop.f32.mrf.mxu0 }
 0x11a   : > { %v1061_v62 = vadd.f32 %v1060_v61, %v1012_v56  ;;  %v1109_v17 = vpop.f32.mrf.mxu3  ;;  %v1014_v22 = vpop.f32.mrf.mxu1 }
 0x11b   : > { %v1015_v26 = vadd.f32 %v1014_v22, %v965_v63  ;;  %v355_v22 = vld [vmem:[#allocation2 + $0x60] sm:$0xff] }
 0x11c   : > { %v1110_v1 = vadd.f32 %v1109_v17, %v1061_v62  ;;  %1160 = vmatmul.bf16.gmra.mxu0 %v2519_v57 }
 0x11d   : > { %1209 = vmatmul.bf16.gmra.mxu1 %v2521_v58  ;;  %v349_v58 = vld [vmem:[#allocation2 + $0x30] sm:$0xff] }
 0x11e   : > { %v1345_v23 = vadd.f32 %v1110_v1, %v345_v0  ;;  %1258 = vmatmul.bf16.gmra.mxu2 %v2523_v59 }
 0x11f   : > { %1307 = vmatmul.bf16.gmra.mxu3 %v2525_v60 }
 0x120   : > { %1377 = vst [vmem:[#allocation2 + $0xd8] sm:$0xff] %v1345_v23 }
 0x121   : > { %v1063_v2 = vpop.f32.mrf.mxu2  ;;  %v967_v5 = vpop.f32.mrf.mxu0 }
 0x122   : > { %v1064_v3 = vadd.f32 %v1063_v2, %v1015_v26  ;;  %v1112_v4 = vpop.f32.mrf.mxu3  ;;  %v1016_v7 = vpop.f32.mrf.mxu1 }
 0x123   : > { %v1017_v25 = vadd.f32 %v1016_v7, %v967_v5 }
 0x124   : > { %v1113_v8 = vadd.f32 %v1112_v4, %v1064_v3 }
 0x126   : > { %v1347_v24 = vadd.f32 %v1113_v8, %v347_v6 }
 0x128   : > { %1379 = vst [vmem:[#allocation2 + $0x50] sm:$0xff] %v1347_v24 }
 0x129   : > { %v1065_v57 = vpop.f32.mrf.mxu2  ;;  %v970_v29 = vpop.f32.mrf.mxu0 }
 0x12a   : > { %v1066_v27 = vadd.f32 %v1065_v57, %v1017_v25  ;;  %v1114_v28 = vpop.f32.mrf.mxu3  ;;  %v1019_v30 = vpop.f32.mrf.mxu1 }
 0x12b   : > { %v1020_v31 = vadd.f32 %v1019_v30, %v970_v29 }
 0x12c   : > { %v1115_v59 = vadd.f32 %v1114_v28, %v1066_v27  ;;  %1165 = vmatmul.bf16.gmra.mxu0 %v2547_v18  ;;  %v359_v27 = vld [vmem:[#allocation2 + $0x38] sm:$0xff] }
 0x12d   : > { %1214 = vmatmul.bf16.gmra.mxu1 %v2549_v19  ;;  %v353_v19 = vld [vmem:[#allocation2 + $0xe8] sm:$0xff] }
 0x12e   : > { %v1349_v60 = vadd.f32 %v1115_v59, %v349_v58  ;;  %1263 = vmatmul.bf16.gmra.mxu2 %v2551_v20 }
 0x12f   : > { %1312 = vmatmul.bf16.gmra.mxu3 %v2553_v21 }
 0x130   : > { %1381 = vst [vmem:[#allocation2 + $0x30] sm:$0xff] %v1349_v60 }
 0x131   : > { %v1068_v32 = vpop.f32.mrf.mxu2  ;;  %v972_v39 = vpop.f32.mrf.mxu0 }
 0x132   : > { %v1069_v37 = vadd.f32 %v1068_v32, %v1020_v31  ;;  %v1117_v38 = vpop.f32.mrf.mxu3  ;;  %v1021_v49 = vpop.f32.mrf.mxu1 }
 0x133   : > { %v1022_v52 = vadd.f32 %v1021_v49, %v972_v39 }
 0x134   : > { %v1118_v50 = vadd.f32 %v1117_v38, %v1069_v37 }
 0x136   : > { %v1351_v51 = vadd.f32 %v1118_v50, %v351_v40  ;;  %v363_v50 = vld [vmem:[#allocation2 + $0xe0] sm:$0xff] }
 0x138   : > { %1383 = vst [vmem:[#allocation2 + $0x80] sm:$0xff] %v1351_v51 }
 0x139   : > { %v1070_v18 = vpop.f32.mrf.mxu2  ;;  %v975_v55 = vpop.f32.mrf.mxu0 }
 0x13a   : > { %v1071_v53 = vadd.f32 %v1070_v18, %v1022_v52  ;;  %v1119_v54 = vpop.f32.mrf.mxu3  ;;  %v1024_v56 = vpop.f32.mrf.mxu1 }
 0x13b   : > { %v1025_v61 = vadd.f32 %v1024_v56, %v975_v55 }
 0x13c   : > { %v1120_v20 = vadd.f32 %v1119_v54, %v1071_v53  ;;  %1170 = vmatmul.bf16.gmra.mxu0 %v2575_v45 }
 0x13d   : > { %1219 = vmatmul.bf16.gmra.mxu1 %v2577_v46  ;;  %v357_v46 = vld [vmem:[#allocation2 + $0x8] sm:$0xff] }
 0x13e   : > { %v1353_v21 = vadd.f32 %v1120_v20, %v353_v19  ;;  %1268 = vmatmul.bf16.gmra.mxu2 %v2579_v47 }
 0x13f   : > { %1317 = vmatmul.bf16.gmra.mxu3 %v2581_v48 }
 0x140   : > { %1385 = vst [vmem:[#allocation2 + $0xe8] sm:$0xff] %v1353_v21 }
 0x141   : > { %v1073_v62 = vpop.f32.mrf.mxu2  ;;  %v977_v0 = vpop.f32.mrf.mxu0 }
 0x142   : > { %v1074_v17 = vadd.f32 %v1073_v62, %v1025_v61  ;;  %v1122_v63 = vpop.f32.mrf.mxu3  ;;  %v1026_v1 = vpop.f32.mrf.mxu1 }
 0x143   : > { %v1027_v2 = vadd.f32 %v1026_v1, %v977_v0 }
 0x144   : > { %v1123_v23 = vadd.f32 %v1122_v63, %v1074_v17  ;;  %v367_v63 = vld [vmem:[#allocation2 + $0xa8] sm:$0xff] }
 0x146   : > { %v1355_v26 = vadd.f32 %v1123_v23, %v355_v22 }
 0x148   : > { %1387 = vst [vmem:[#allocation2 + $0x60] sm:$0xff] %v1355_v26 }
 0x149   : > { %v1075_v45 = vpop.f32.mrf.mxu2  ;;  %v980_v5 = vpop.f32.mrf.mxu0 }
 0x14a   : > { %v1076_v3 = vadd.f32 %v1075_v45, %v1027_v2  ;;  %v1124_v4 = vpop.f32.mrf.mxu3  ;;  %v1029_v6 = vpop.f32.mrf.mxu1 }
 0x14b   : > { %v1030_v7 = vadd.f32 %v1029_v6, %v980_v5 }
 0x14c   : > { %v1125_v47 = vadd.f32 %v1124_v4, %v1076_v3  ;;  %1175 = vmatmul.bf16.gmra.mxu0 %v2603_v9 }
 0x14d   : > { %1224 = vmatmul.bf16.gmra.mxu1 %v2605_v10  ;;  %v361_v10 = vld [vmem:[#allocation2 + $0x40] sm:$0xff] }
 0x14e   : > { %v1357_v48 = vadd.f32 %v1125_v47, %v357_v46  ;;  %1273 = vmatmul.bf16.gmra.mxu2 %v2607_v11 }
 0x14f   : > { %1322 = vmatmul.bf16.gmra.mxu3 %v2609_v12 }
 0x150   : > { %1389 = vst [vmem:[#allocation2 + $0x8] sm:$0xff] %v1357_v48  ;;  %v371_v48 = vld [vmem:[#allocation2 + $0xa0] sm:$0xff] }
 0x151   : > { %v1078_v8 = vpop.f32.mrf.mxu2  ;;  %v982_v57 = vpop.f32.mrf.mxu0 }
 0x152   : > { %v1079_v24 = vadd.f32 %v1078_v8, %v1030_v7  ;;  %v1127_v25 = vpop.f32.mrf.mxu3  ;;  %v1031_v28 = vpop.f32.mrf.mxu1 }
 0x153   : > { %v1032_v30 = vadd.f32 %v1031_v28, %v982_v57 }
 0x154   : > { %v1128_v29 = vadd.f32 %v1127_v25, %v1079_v24 }
 0x156   : > { %v1359_v58 = vadd.f32 %v1128_v29, %v359_v27 }
 0x158   : > { %1391 = vst [vmem:[#allocation2 + $0x38] sm:$0xff] %v1359_v58 }
 0x159   : > { %v1080_v9 = vpop.f32.mrf.mxu2  ;;  %v985_v31 = vpop.f32.mrf.mxu0 }
 0x15a   : > { %v1081_v59 = vadd.f32 %v1080_v9, %v1032_v30  ;;  %v1129_v60 = vpop.f32.mrf.mxu3  ;;  %v1034_v32 = vpop.f32.mrf.mxu1 }
 0x15b   : > { %v1035_v37 = vadd.f32 %v1034_v32, %v985_v31  ;;  %v344_v31 = vld [vmem:[#allocation2] sm:$0xff] }
 0x15c   : > { %v1130_v11 = vadd.f32 %v1129_v60, %v1081_v59  ;;  %1180 = vmatmul.bf16.gmra.mxu0 %v2631_v41 }
 0x15d   : > { %1229 = vmatmul.bf16.gmra.mxu1 %v2633_v42  ;;  %v365_v42 = vld [vmem:[#allocation2 + $0x70] sm:$0xff] }
 0x15e   : > { %v1361_v12 = vadd.f32 %v1130_v11, %v361_v10  ;;  %1278 = vmatmul.bf16.gmra.mxu2 %v2635_v43 }
 0x15f   : > { %1327 = vmatmul.bf16.gmra.mxu3 %v2637_v44 }
 0x160   : > { %1393 = vst [vmem:[#allocation2 + $0x40] sm:$0xff] %v1361_v12 }
 0x161   : > { %v1083_v38 = vpop.f32.mrf.mxu2  ;;  %v987_v49 = vpop.f32.mrf.mxu0 }
 0x162   : > { %v1084_v39 = vadd.f32 %v1083_v38, %v1035_v37  ;;  %v1132_v40 = vpop.f32.mrf.mxu3  ;;  %v1036_v51 = vpop.f32.mrf.mxu1 }
 0x163   : > { %v1037_v53 = vadd.f32 %v1036_v51, %v987_v49  ;;  %v346_v49 = vld [vmem:[#allocation2 + $0x18] sm:$0xff] }
 0x164   : > { %v1133_v52 = vadd.f32 %v1132_v40, %v1084_v39 }
 0x166   : > { %v1363_v18 = vadd.f32 %v1133_v52, %v363_v50 }
 0x168   : > { %1395 = vst [vmem:[#allocation2 + $0xe0] sm:$0xff] %v1363_v18 }
 0x169   : > { %v1085_v41 = vpop.f32.mrf.mxu2  ;;  %v990_v19 = vpop.f32.mrf.mxu0 }
 0x16a   : > { %v1086_v54 = vadd.f32 %v1085_v41, %v1037_v53  ;;  %v1134_v55 = vpop.f32.mrf.mxu3  ;;  %v1039_v56 = vpop.f32.mrf.mxu1 }
 0x16b   : > { %v1040_v20 = vadd.f32 %v1039_v56, %v990_v19  ;;  %v348_v19 = vld [vmem:[#allocation2 + $0x68] sm:$0xff] }
 0x16c   : > { %v1135_v43 = vadd.f32 %v1134_v55, %v1086_v54  ;;  %1185 = vmatmul.bf16.gmra.mxu0 %v2659_v13 }
 0x16d   : > { %1234 = vmatmul.bf16.gmra.mxu1 %v2661_v14  ;;  %v369_v14 = vld [vmem:[#allocation2 + $0x10] sm:$0xff] }
 0x16e   : > { %v1365_v44 = vadd.f32 %v1135_v43, %v365_v42  ;;  %1283 = vmatmul.bf16.gmra.mxu2 %v2663_v15 }
 0x16f   : > { %1332 = vmatmul.bf16.gmra.mxu3 %v2665_v16 }
 0x170   : > { %1397 = vst [vmem:[#allocation2 + $0x70] sm:$0xff] %v1365_v44 }
 0x171   : > { %v1088_v21 = vpop.f32.mrf.mxu2  ;;  %v992_v17 = vpop.f32.mrf.mxu0 }
 0x172   : > { %v1089_v61 = vadd.f32 %v1088_v21, %v1040_v20  ;;  %v1137_v62 = vpop.f32.mrf.mxu3  ;;  %v1041_v0 = vpop.f32.mrf.mxu1 }
 0x173   : > { %v1042_v23 = vadd.f32 %v1041_v0, %v992_v17  ;;  %v350_v17 = vld [vmem:[#allocation2 + $0x48] sm:$0xff] }
 0x174   : > { %v1138_v22 = vadd.f32 %v1137_v62, %v1089_v61 }
 0x176   : > { %v1367_v1 = vadd.f32 %v1138_v22, %v367_v63 }
 0x178   : > { %1399 = vst [vmem:[#allocation2 + $0xa8] sm:$0xff] %v1367_v1 }
 0x179   : > { %v1090_v13 = vpop.f32.mrf.mxu2  ;;  %v995_v45 = vpop.f32.mrf.mxu0 }
 0x17a   : > { %v1091_v26 = vadd.f32 %v1090_v13, %v1042_v23  ;;  %v1139_v2 = vpop.f32.mrf.mxu3  ;;  %v1044_v3 = vpop.f32.mrf.mxu1 }
 0x17b   : > { %v1045_v4 = vadd.f32 %v1044_v3, %v995_v45  ;;  %v352_v45 = vld [vmem:[#allocation2 + $0x88] sm:$0xff] }
 0x17c   : > { %v1140_v15 = vadd.f32 %v1139_v2, %v1091_v26  ;;  %1190 = vmatmul.bf16.gmra.mxu0 %v2679_v33 }
 0x17d   : > { %1239 = vmatmul.bf16.gmra.mxu1 %v2681_v34  ;;  %v373_v34 = vld [vmem:[#allocation2 + $0x20] sm:$0xff] }
 0x17e   : > { %v1369_v16 = vadd.f32 %v1140_v15, %v369_v14  ;;  %1288 = vmatmul.bf16.gmra.mxu2 %v2683_v35 }
 0x17f   : > { %1337 = vmatmul.bf16.gmra.mxu3 %v2685_v36 }
 0x180   : > { %1401 = vst [vmem:[#allocation2 + $0x10] sm:$0xff] %v1369_v16 }
 0x181   : > { %v1093_v5 = vpop.f32.mrf.mxu2  ;;  %v997_v47 = vpop.f32.mrf.mxu0 }
 0x182   : > { %v1094_v46 = vadd.f32 %v1093_v5, %v1045_v4  ;;  %v1142_v6 = vpop.f32.mrf.mxu3  ;;  %v1046_v7 = vpop.f32.mrf.mxu1 }
 0x183   : > { %v1047_v25 = vadd.f32 %v1046_v7, %v997_v47  ;;  %v354_v47 = vld [vmem:[#allocation2 + $0xb8] sm:$0xff] }
 0x184   : > { %v1143_v8 = vadd.f32 %v1142_v6, %v1094_v46 }
 0x186   : > { %v1371_v24 = vadd.f32 %v1143_v8, %v371_v48 }
 0x188   : > { %1403 = vst [vmem:[#allocation2 + $0xa0] sm:$0xff] %v1371_v24 }
 0x189   : > { %v1095_v33 = vpop.f32.mrf.mxu2  ;;  %v1156_v28 = vpop.f32.mrf.mxu0 }
 0x18a   : > { %v1096_v57 = vadd.f32 %v1095_v33, %v1047_v25  ;;  %v1144_v27 = vpop.f32.mrf.mxu3  ;;  %v1205_v29 = vpop.f32.mrf.mxu1 }
 0x18b   : > { %v1206_v36 = vadd.f32 %v1205_v29, %v1156_v28  ;;  %v356_v28 = vld [vmem:[#allocation2 + $0xf0] sm:$0xff] }
 0x18c   : > { %v1145_v35 = vadd.f32 %v1144_v27, %v1096_v57 }
 0x18e   : > { %v1373_v58 = vadd.f32 %v1145_v35, %v373_v34 }
 0x190   : > { %1405 = vst [vmem:[#allocation2 + $0x20] sm:$0xff] %v1373_v58 }
 0x191   : > { %v1254_v30 = vpop.f32.mrf.mxu2  ;;  %v1158_v60 = vpop.f32.mrf.mxu0 }
 0x192   : > { %v1255_v9 = vadd.f32 %v1254_v30, %v1206_v36  ;;  %v1303_v59 = vpop.f32.mrf.mxu3  ;;  %v1207_v10 = vpop.f32.mrf.mxu1 }
 0x193   : > { %v1208_v12 = vadd.f32 %v1207_v10, %v1158_v60  ;;  %v358_v60 = vld [vmem:[#allocation2 + $0x78] sm:$0xff] }
 0x194   : > { %v1304_v32 = vadd.f32 %v1303_v59, %v1255_v9 }
 0x196   : > { %v1344_v11 = vadd.f32 %v1304_v32, %v344_v31 }
 0x198   : > { %1376 = vst [vmem:[#allocation2] sm:$0xff] %v1344_v11 }
 0x199   : > { %v1256_v37 = vpop.f32.mrf.mxu2  ;;  %v1161_v40 = vpop.f32.mrf.mxu0 }
 0x19a   : > { %v1257_v38 = vadd.f32 %v1256_v37, %v1208_v12  ;;  %v1305_v39 = vpop.f32.mrf.mxu3  ;;  %v1210_v50 = vpop.f32.mrf.mxu1 }
 0x19b   : > { %v1211_v18 = vadd.f32 %v1210_v50, %v1161_v40  ;;  %v360_v40 = vld [vmem:[#allocation2 + $0x58] sm:$0xff] }
 0x19c   : > { %v1306_v51 = vadd.f32 %v1305_v39, %v1257_v38 }
 0x19e   : > { %v1346_v52 = vadd.f32 %v1306_v51, %v346_v49 }
 0x1a0   : > { %1378 = vst [vmem:[#allocation2 + $0x18] sm:$0xff] %v1346_v52 }
 0x1a1   : > { %v1259_v53 = vpop.f32.mrf.mxu2  ;;  %v1163_v55 = vpop.f32.mrf.mxu0 }
 0x1a2   : > { %v1260_v41 = vadd.f32 %v1259_v53, %v1211_v18  ;;  %v1308_v54 = vpop.f32.mrf.mxu3  ;;  %v1212_v42 = vpop.f32.mrf.mxu1 }
 0x1a3   : > { %v1213_v44 = vadd.f32 %v1212_v42, %v1163_v55  ;;  %v362_v55 = vld [vmem:[#allocation2 + $0xc8] sm:$0xff] }
 0x1a4   : > { %v1309_v56 = vadd.f32 %v1308_v54, %v1260_v41 }
 0x1a6   : > { %v1348_v43 = vadd.f32 %v1309_v56, %v348_v19 }
 0x1a8   : > { %1380 = vst [vmem:[#allocation2 + $0x68] sm:$0xff] %v1348_v43 }
 0x1a9   : > { %v1261_v20 = vpop.f32.mrf.mxu2  ;;  %v1166_v62 = vpop.f32.mrf.mxu0 }
 0x1aa   : > { %v1262_v21 = vadd.f32 %v1261_v20, %v1213_v44  ;;  %v1310_v61 = vpop.f32.mrf.mxu3  ;;  %v1215_v63 = vpop.f32.mrf.mxu1 }
 0x1ab   : > { %v1216_v1 = vadd.f32 %v1215_v63, %v1166_v62  ;;  %v364_v62 = vld [vmem:[#allocation2 + $0x90] sm:$0xff] }
 0x1ac   : > { %v1311_v0 = vadd.f32 %v1310_v61, %v1262_v21 }
 0x1ae   : > { %v1350_v22 = vadd.f32 %v1311_v0, %v350_v17 }
 0x1b0   : > { %1382 = vst [vmem:[#allocation2 + $0x48] sm:$0xff] %v1350_v22 }
 0x1b1   : > { %v1264_v23 = vpop.f32.mrf.mxu2  ;;  %v1168_v2 = vpop.f32.mrf.mxu0 }
 0x1b2   : > { %v1265_v13 = vadd.f32 %v1264_v23, %v1216_v1  ;;  %v1313_v26 = vpop.f32.mrf.mxu3  ;;  %v1217_v14 = vpop.f32.mrf.mxu1 }
 0x1b3   : > { %v1218_v16 = vadd.f32 %v1217_v14, %v1168_v2  ;;  %v366_v2 = vld [vmem:[#allocation2 + $0xc0] sm:$0xff] }
 0x1b4   : > { %v1314_v3 = vadd.f32 %v1313_v26, %v1265_v13 }
 0x1b6   : > { %v1352_v15 = vadd.f32 %v1314_v3, %v352_v45 }
 0x1b8   : > { %1384 = vst [vmem:[#allocation2 + $0x88] sm:$0xff] %v1352_v15 }
 0x1b9   : > { %v1266_v4 = vpop.f32.mrf.mxu2  ;;  %v1171_v6 = vpop.f32.mrf.mxu0 }
 0x1ba   : > { %v1267_v5 = vadd.f32 %v1266_v4, %v1218_v16  ;;  %v1315_v46 = vpop.f32.mrf.mxu3  ;;  %v1220_v48 = vpop.f32.mrf.mxu1 }
 0x1bb   : > { %v1221_v24 = vadd.f32 %v1220_v48, %v1171_v6  ;;  %v368_v6 = vld [vmem:[#allocation2 + $0xd0] sm:$0xff] }
 0x1bc   : > { %v1316_v7 = vadd.f32 %v1315_v46, %v1267_v5 }
 0x1be   : > { %v1354_v8 = vadd.f32 %v1316_v7, %v354_v47 }
 0x1c0   : > { %1386 = vst [vmem:[#allocation2 + $0xb8] sm:$0xff] %v1354_v8 }
 0x1c1   : > { %v1269_v25 = vpop.f32.mrf.mxu2  ;;  %v1173_v27 = vpop.f32.mrf.mxu0 }
 0x1c2   : > { %v1270_v33 = vadd.f32 %v1269_v25, %v1221_v24  ;;  %v1318_v57 = vpop.f32.mrf.mxu3  ;;  %v1222_v34 = vpop.f32.mrf.mxu1 }
 0x1c3   : > { %v1223_v58 = vadd.f32 %v1222_v34, %v1173_v27 }
 0x1c4   : > { %v1319_v29 = vadd.f32 %v1318_v57, %v1270_v33  ;;  %v370_v57 = vld [vmem:[#allocation2 + $0x28] sm:$0xff] }
 0x1c6   : > { %v1356_v35 = vadd.f32 %v1319_v29, %v356_v28 }
 0x1c8   : > { %1388 = vst [vmem:[#allocation2 + $0xf0] sm:$0xff] %v1356_v35 }
 0x1c9   : > { %v1271_v36 = vpop.f32.mrf.mxu2  ;;  %v1176_v59 = vpop.f32.mrf.mxu0 }
 0x1ca   : > { %v1272_v30 = vadd.f32 %v1271_v36, %v1223_v58  ;;  %v1320_v9 = vpop.f32.mrf.mxu3  ;;  %v1225_v31 = vpop.f32.mrf.mxu1 }
 0x1cb   : > { %v1226_v11 = vadd.f32 %v1225_v31, %v1176_v59 }
 0x1cc   : > { %v1321_v10 = vadd.f32 %v1320_v9, %v1272_v30  ;;  %v372_v9 = vld [vmem:[#allocation2 + $0xf8] sm:$0xff] }
 0x1ce   : > { %v1358_v32 = vadd.f32 %v1321_v10, %v358_v60 }
 0x1d0   : > { %1390 = vst [vmem:[#allocation2 + $0x78] sm:$0xff] %v1358_v32 }
 0x1d1   : > { %v1274_v12 = vpop.f32.mrf.mxu2  ;;  %v1178_v39 = vpop.f32.mrf.mxu0 }
 0x1d2   : > { %v1275_v37 = vadd.f32 %v1274_v12, %v1226_v11  ;;  %v1323_v38 = vpop.f32.mrf.mxu3  ;;  %v1227_v49 = vpop.f32.mrf.mxu1 }
 0x1d3   : > { %v1228_v52 = vadd.f32 %v1227_v49, %v1178_v39 }
 0x1d4   : > { %v1324_v50 = vadd.f32 %v1323_v38, %v1275_v37  ;;  %v374_v37 = vld [vmem:[#allocation2 + $0x98] sm:$0xff] }
 0x1d6   : > { %v1360_v51 = vadd.f32 %v1324_v50, %v360_v40 }
 0x1d8   : > { %1392 = vst [vmem:[#allocation2 + $0x58] sm:$0xff] %v1360_v51 }
 0x1d9   : > { %v1276_v18 = vpop.f32.mrf.mxu2  ;;  %v1181_v54 = vpop.f32.mrf.mxu0 }
 0x1da   : > { %v1277_v53 = vadd.f32 %v1276_v18, %v1228_v52  ;;  %v1325_v41 = vpop.f32.mrf.mxu3  ;;  %v1230_v19 = vpop.f32.mrf.mxu1 }
 0x1db   : > { %v1231_v43 = vadd.f32 %v1230_v19, %v1181_v54 }
 0x1dc   : > { %v1326_v42 = vadd.f32 %v1325_v41, %v1277_v53 }
 0x1de   : > { %v1362_v56 = vadd.f32 %v1326_v42, %v362_v55 }
 0x1e0   : > { %1394 = vst [vmem:[#allocation2 + $0xc8] sm:$0xff] %v1362_v56 }
 0x1e1   : > { %v1279_v44 = vpop.f32.mrf.mxu2  ;;  %v1183_v61 = vpop.f32.mrf.mxu0 }
 0x1e2   : > { %v1280_v20 = vadd.f32 %v1279_v44, %v1231_v43  ;;  %v1328_v21 = vpop.f32.mrf.mxu3  ;;  %v1232_v17 = vpop.f32.mrf.mxu1 }
 0x1e3   : > { %v1233_v22 = vadd.f32 %v1232_v17, %v1183_v61 }
 0x1e4   : > { %v1329_v63 = vadd.f32 %v1328_v21, %v1280_v20 }
 0x1e6   : > { %v1364_v0 = vadd.f32 %v1329_v63, %v364_v62 }
 0x1e8   : > { %1396 = vst [vmem:[#allocation2 + $0x90] sm:$0xff] %v1364_v0 }
 0x1e9   : > { %v1281_v1 = vpop.f32.mrf.mxu2  ;;  %v1186_v26 = vpop.f32.mrf.mxu0 }
 0x1ea   : > { %v1282_v23 = vadd.f32 %v1281_v1, %v1233_v22  ;;  %v1330_v13 = vpop.f32.mrf.mxu3  ;;  %v1235_v45 = vpop.f32.mrf.mxu1 }
 0x1eb   : > { %v1236_v15 = vadd.f32 %v1235_v45, %v1186_v26 }
 0x1ec   : > { %v1331_v14 = vadd.f32 %v1330_v13, %v1282_v23 }
 0x1ee   : > { %v1366_v3 = vadd.f32 %v1331_v14, %v366_v2 }
 0x1f0   : > { %1398 = vst [vmem:[#allocation2 + $0xc0] sm:$0xff] %v1366_v3 }
 0x1f1   : > { %v1284_v16 = vpop.f32.mrf.mxu2  ;;  %v1188_v46 = vpop.f32.mrf.mxu0 }
 0x1f2   : > { %v1285_v4 = vadd.f32 %v1284_v16, %v1236_v15  ;;  %v1333_v5 = vpop.f32.mrf.mxu3  ;;  %v1237_v47 = vpop.f32.mrf.mxu1 }
 0x1f3   : > { %v1238_v8 = vadd.f32 %v1237_v47, %v1188_v46 }
 0x1f4   : > { %v1334_v48 = vadd.f32 %v1333_v5, %v1285_v4 }
 0x1f6   : > { %v1368_v7 = vadd.f32 %v1334_v48, %v368_v6 }
 0x1f8   : > { %1400 = vst [vmem:[#allocation2 + $0xd0] sm:$0xff] %v1368_v7 }
 0x1f9   : > { %v1286_v24 = vpop.f32.mrf.mxu2  ;;  %v1191_v27 = vpop.f32.mrf.mxu0 }
 0x1fa   : > { %v1287_v25 = vadd.f32 %v1286_v24, %v1238_v8  ;;  %v1335_v33 = vpop.f32.mrf.mxu3  ;;  %v1240_v28 = vpop.f32.mrf.mxu1 }
 0x1fb   : > { %v1241_v35 = vadd.f32 %v1240_v28, %v1191_v27 }
 0x1fc   : > { %v1336_v34 = vadd.f32 %v1335_v33, %v1287_v25 }
 0x1fe   : > { %v1370_v29 = vadd.f32 %v1336_v34, %v370_v57 }
 0x200   : > { %1402 = vst [vmem:[#allocation2 + $0x28] sm:$0xff] %v1370_v29 }
 0x201   : > { %v1289_v58 = vpop.f32.mrf.mxu2  ;;  %v1193_v60 = vpop.f32.mrf.mxu0 }
 0x202   : > { %v1290_v36 = vadd.f32 %v1289_v58, %v1241_v35  ;;  %v1338_v30 = vpop.f32.mrf.mxu3  ;;  %v1242_v31 = vpop.f32.mrf.mxu1 }
 0x203   : > { %v1243_v32 = vadd.f32 %v1242_v31, %v1193_v60 }
 0x204   : > { %v1339_v59 = vadd.f32 %v1338_v30, %v1290_v36 }
 0x206   : > { %v1372_v10 = vadd.f32 %v1339_v59, %v372_v9 }
 0x208   : > { %1404 = vst [vmem:[#allocation2 + $0xf8] sm:$0xff] %v1372_v10 }
 0x209   : > { %v1291_v11 = vpop.f32.mrf.mxu2 }
 0x20a   : > { %v1292_v12 = vadd.f32 %v1291_v11, %v1243_v32  ;;  %v1340_v38 = vpop.f32.mrf.mxu3 }
 0x20c   : > { %v1341_v39 = vadd.f32 %v1340_v38, %v1292_v12  ;;  %1410 = sbr.rel (%p2026_p13) target bundleno = 550 (0x226), region = 59 }
 0x20e   : > { %v1374_v40 = vadd.f32 %v1341_v39, %v374_v37 }
 0x210   : > { %1406 = vst [vmem:[#allocation2 + $0x98] sm:$0xff] %v1374_v40 }
 0x211   : > { %v1411_v49 = vld [vmem:[#allocation2 + $0xb0] sm:$0xff]  ;;  %v1412_v50 = vld [vmem:[#allocation2] sm:$0xff]  ;;  %v1413_v51 = vld [vmem:[#allocation2 + $0xd8] sm:$0xff] }
 0x212   : > { %v1443_v52 = vmax.f32 %v1411_v49, 0.0  ;;  %v1444_v18 = vmax.f32 %v1412_v50, 0.0  ;;  %v1414_v53 = vld [vmem:[#allocation2 + $0x18] sm:$0xff]  ;;  %v1445_v41 = vmax.f32 %v1413_v51, 0.0  ;;  %v1415_v54 = vld [vmem:[#allocation2 + $0x50] sm:$0xff]  ;;  %v1416_v55 = vld [vmem:[#allocation2 + $0x68] sm:$0xff] }
 0x213   : > { %v1446_v19 = vmax.f32 %v1414_v53, 0.0  ;;  %v1447_v42 = vmax.f32 %v1415_v54, 0.0  ;;  %v1448_v56 = vmax.f32 %v1416_v55, 0.0  ;;  %v1417_v43 = vld [vmem:[#allocation2 + $0x30] sm:$0xff]  ;;  %v1418_v44 = vld [vmem:[#allocation2 + $0x48] sm:$0xff]  ;;  %v1419_v20 = vld [vmem:[#allocation2 + $0x80] sm:$0xff] }
 0x214   : > { %v1475_v21 = vpack.c.bf16 %v1444_v18, %v1443_v52  ;;  %v1449_v61 = vmax.f32 %v1417_v43, 0.0  ;;  %v1450_v62 = vmax.f32 %v1418_v44, 0.0  ;;  %v1420_v17 = vld [vmem:[#allocation2 + $0x88] sm:$0xff]  ;;  %v1451_v63 = vmax.f32 %v1419_v20, 0.0  ;;  %v1422_v22 = vld [vmem:[#allocation2 + $0xb8] sm:$0xff]  ;;  %v1423_v2 = vld [vmem:[#allocation2 + $0x60] sm:$0xff] }
 0x215   : > { %v1421_v0 = vld [vmem:[#allocation2 + $0xe8] sm:$0xff]  ;;  %v1476_v1 = vpack.c.bf16 %v1446_v19, %v1445_v41  ;;  %v1477_v23 = vpack.c.bf16 %v1448_v56, %v1447_v42  ;;  %v1452_v13 = vmax.f32 %v1420_v17, 0.0  ;;  %v1424_v45 = vld [vmem:[#allocation2 + $0xf0] sm:$0xff]  ;;  %v1454_v15 = vmax.f32 %v1422_v22, 0.0  ;;  %v1426_v5 = vld [vmem:[#allocation2 + $0x78] sm:$0xff] }
 0x216   : > { %v1453_v26 = vmax.f32 %v1421_v0, 0.0  ;;  %v1425_v14 = vld [vmem:[#allocation2 + $0x8] sm:$0xff]  ;;  %1491 = vst [vmem:[%s2398_s26] sm:$0xff] %v1475_v21  ;;  %v1478_v3 = vpack.c.bf16 %v1450_v62, %v1449_v61  ;;  %v1455_v16 = vmax.f32 %v1423_v2, 0.0  ;;  %v1456_v4 = vmax.f32 %v1424_v45, 0.0  ;;  %v1427_v46 = vld [vmem:[#allocation2 + $0x38] sm:$0xff]  ;;  %v1429_v24 = vld [vmem:[#allocation2 + $0x40] sm:$0xff] }
 0x217   : > { %v1428_v6 = vld [vmem:[#allocation2 + $0x58] sm:$0xff]  ;;  %1492 = vst [vmem:[%s2398_s26 + $0x8] sm:$0xff] %v1476_v1  ;;  %v1479_v47 = vpack.c.bf16 %v1452_v13, %v1451_v63  ;;  %v1457_v48 = vmax.f32 %v1425_v14, 0.0  ;;  %v1458_v7 = vmax.f32 %v1426_v5, 0.0  ;;  %v1459_v8 = vmax.f32 %v1427_v46, 0.0  ;;  %v1430_v25 = vld [vmem:[#allocation2 + $0xc8] sm:$0xff] }
 0x218   : > { %1493 = vst [vmem:[%s2398_s26 + $0x10] sm:$0xff] %v1477_v23  ;;  %v1480_v33 = vpack.c.bf16 %v1454_v15, %v1453_v26  ;;  %v1481_v57 = vpack.c.bf16 %v1456_v4, %v1455_v16  ;;  %v1460_v27 = vmax.f32 %v1428_v6, 0.0  ;;  %v1461_v28 = vmax.f32 %v1429_v24, 0.0  ;;  %v1431_v34 = vld [vmem:[#allocation2 + $0xe0] sm:$0xff]  ;;  %v1432_v29 = vld [vmem:[#allocation2 + $0x90] sm:$0xff]  ;;  %v1435_v60 = vld [vmem:[#allocation2 + $0xa8] sm:$0xff] }
 0x219   : > { %v1433_v35 = vld [vmem:[#allocation2 + $0x70] sm:$0xff]  ;;  %1494 = vst [vmem:[%s2398_s26 + $0x18] sm:$0xff] %v1478_v3  ;;  %v1482_v58 = vpack.c.bf16 %v1458_v7, %v1457_v48  ;;  %v1462_v36 = vmax.f32 %v1430_v25, 0.0  ;;  %v1463_v30 = vmax.f32 %v1431_v34, 0.0  ;;  %v1464_v9 = vmax.f32 %v1432_v29, 0.0  ;;  %v1434_v59 = vld [vmem:[#allocation2 + $0xc0] sm:$0xff] }
 0x21a   : > { %1495 = vst [vmem:[%s2398_s26 + $0x20] sm:$0xff] %v1479_v47  ;;  %v1483_v31 = vpack.c.bf16 %v1460_v27, %v1459_v8  ;;  %v1465_v10 = vmax.f32 %v1433_v35, 0.0  ;;  %v1466_v32 = vmax.f32 %v1434_v59, 0.0  ;;  %v1436_v11 = vld [vmem:[#allocation2 + $0xd0] sm:$0xff]  ;;  %v1467_v12 = vmax.f32 %v1435_v60, 0.0  ;;  %v1438_v40 = vld [vmem:[#allocation2 + $0x28] sm:$0xff] }
 0x21b   : > { %v1437_v37 = vld [vmem:[#allocation2 + $0x10] sm:$0xff]  ;;  %1496 = vst [vmem:[%s2398_s26 + $0x28] sm:$0xff] %v1480_v33  ;;  %v1484_v38 = vpack.c.bf16 %v1462_v36, %v1461_v28  ;;  %v1468_v39 = vmax.f32 %v1436_v11, 0.0  ;;  %v1439_v50 = vld [vmem:[#allocation2 + $0xa0] sm:$0xff]  ;;  %v1440_v51 = vld [vmem:[#allocation2 + $0xf8] sm:$0xff]  ;;  %v1485_v52 = vpack.c.bf16 %v1464_v9, %v1463_v30  ;;  %v1470_v18 = vmax.f32 %v1438_v40, 0.0 }
 0x21c   : > { %v1469_v49 = vmax.f32 %v1437_v37, 0.0  ;;  %1497 = vst [vmem:[%s2398_s26 + $0x30] sm:$0xff] %v1481_v57  ;;  %v1471_v53 = vmax.f32 %v1439_v50, 0.0  ;;  %v1472_v41 = vmax.f32 %v1440_v51, 0.0  ;;  %v1441_v54 = vld [vmem:[#allocation2 + $0x20] sm:$0xff]  ;;  %v1442_v55 = vld [vmem:[#allocation2 + $0x98] sm:$0xff]  ;;  %v1486_v19 = vpack.c.bf16 %v1466_v32, %v1465_v10 }
 0x21d   : > { %1498 = vst [vmem:[%s2398_s26 + $0x38] sm:$0xff] %v1482_v58  ;;  %v1473_v42 = vmax.f32 %v1441_v54, 0.0  ;;  %v1474_v56 = vmax.f32 %v1442_v55, 0.0  ;;  %v1487_v43 = vpack.c.bf16 %v1468_v39, %v1467_v12 }
 0x21e   : > { %1499 = vst [vmem:[%s2398_s26 + $0x40] sm:$0xff] %v1483_v31  ;;  %v1488_v44 = vpack.c.bf16 %v1470_v18, %v1469_v49  ;;  %v1489_v20 = vpack.c.bf16 %v1472_v41, %v1471_v53 }
 0x21f   : > { %1500 = vst [vmem:[%s2398_s26 + $0x48] sm:$0xff] %v1484_v38  ;;  %v1490_v21 = vpack.c.bf16 %v1474_v56, %v1473_v42 }
 0x220   : > { %1501 = vst [vmem:[%s2398_s26 + $0x50] sm:$0xff] %v1485_v52 }
 0x221   : > { %1502 = vst [vmem:[%s2398_s26 + $0x58] sm:$0xff] %v1486_v19 }
 0x222   : > { %1503 = vst [vmem:[%s2398_s26 + $0x60] sm:$0xff] %v1487_v43 }
 0x223   : > { %1504 = vst [vmem:[%s2398_s26 + $0x68] sm:$0xff] %v1488_v44 }
 0x224   : > { %1505 = vst [vmem:[%s2398_s26 + $0x70] sm:$0xff] %v1489_v20 }
 0x225   : > { %1506 = vst [vmem:[%s2398_s26 + $0x78] sm:$0xff] %v1490_v21 }
 0x226 PF: > { %s12_s15 = sadd.s32 1, %s2239_s15   ;;  %s2764_s9 = smov %s2219_s10 }
 0x227   : > { %p9_p0 = scmp.ge.s32.totalorder %s12_s15, 92   ;;  %s2765_s10 = smov %s2308_s22 }
 0x228   : > { %s2766_s11 = smov %s2231_s13  ;;  %s2767_s12 = smov %s2235_s14 }
 0x229   : > { %s2768_s13 = smov %s2771_s16  ;;  %s2769_s14 = smov %s2775_s17 }
 0x22a   :  { %11 = sbr.rel (!%p9_p0) target bundleno = 4 (0x4), region = 97 }

// kernel: decoder_conv_up.9
= control target key start
LH: loop header
LB: loop body
LE: loop exit
PB: predicated region body
PF: predicated region fallthrough
CT: control target
= control target key end

     0   :  { %s1739_s9 = smov 0   ;;  %s1741_s10 = smov 0   ;;  %s2003_s0 = inlined_call_operand.vmem [shape: bf16[1024,11520], index: 0, kind: input, shape index: {}]   ;;  %s2004_s1 = inlined_call_operand.vmem [shape: bf16[11520,128], index: 1, kind: input, shape index: {}]   ;;  %s2005_s2 = inlined_call_operand.vmem [shape: bf16[1024,128], index: 2, kind: output, shape index: {}]  }
   0x1   :  { %s1743_s11 = smov 0   ;;  %s1745_s12 = smov 0  }
   0x2   :  { %s1747_s13 = smov 0   ;;  %s1749_s14 = smov 0  }
   0x3   :  { %s1751_s15 = smov 0  }
   0x4 LB: > { %s24_s16 = sadd.s32 1, %s1713_s13  ;;  %s31_s17 = sadd.s32 1, %s1717_s14  ;;  %s1721_s15 = sphi %s1751_s15, %s12_s15   ;;  %s1717_s14 = sphi %s1749_s14, %s2011_s14   ;;  %s1713_s13 = sphi %s1747_s13, %s2010_s13   ;;  %s1709_s12 = sphi %s1745_s12, %s2009_s12   ;;  %s1705_s11 = sphi %s1743_s11, %s2008_s11   ;;  %s1701_s10 = sphi %s1741_s10, %s2007_s10   ;;  %s1697_s9 = sphi %s1739_s9, %s2006_s9  }
   0x5   : > { %p25_p0 = scmp.ge.s32.totalorder %s24_s16, 45  ;;  %p47_p1 = scmp.ne.s32.totalorder %s1701_s10, %s1697_s9 }
   0x6   : > { %p48_p2 = scmp.eq.s32.totalorder %s1721_s15, 0  ;;  %s40_s21 = sadd.s32 1, %s1701_s10 }
   0x7   : > { %s2013_s16 = smov (%p25_p0, %s24_s16), 0  ;;  %s2015_s17 = smov (!%p25_p0, %s31_s17), %s1717_s14 }
   0x8   : > { %p49_p3 = por %p48_p2, %p47_p1  ;;  %p33_p4 = scmp.ge.s32.totalorder %s2015_s17, 4 }
   0x9   : > { %s36_s18 = ssub.s32 %s1713_s13, %s2013_s16  ;;  %p1242_p6 = scmp.ge.s32.totalorder %s1721_s15, 180 }
   0xa   : > { %s2017_s17 = smov (%p33_p4, %s2015_s17), 0 }
   0xb   : > { %s35_s19 = ssub.s32 %s1717_s14, %s2017_s17  ;;  %129 = sbr.rel (%p1242_p6) target bundleno = 56 (0x38), region = 16 }
   0xc   : > { %s37_s20 = sor.u32 %s36_s18, %s35_s19 }
   0xd   : > { %p38_p5 = scmp.eq.s32.totalorder %s37_s20, 0 }
   0xf   : > { %s1790_s22 = scalar_select %p38_p5, %s1701_s10, %s40_s21  }
  0x10   : > { %132 = sbr.rel (!%p49_p3) target bundleno = 56 (0x38), region = 20  ;;  %s134_s23 = sand.u32 (%p49_p3), 1, %s1701_s10  }
  0x11   : > { %s1245_s24 = sshll.u32 (%p49_p3), %s1713_s13, 1  ;;  %s1243_s25 = sshll.u32 (%p49_p3), %s134_s23, 8 }
  0x12   : > { %s1609_s26 = smul.u32 (%p49_p3), 2880, %s1717_s14  ;;  %s1804_s4 = scalar_lea.vmem (%p49_p3), [#allocation3], %s1243_s25 }
  0x14   : > { %s140_s27 = sadd.s32 (%p49_p3), %s1609_s26, %s1245_s24 }
  0x15   : > { %s1247_s28 = sshll.u32 %s140_s27, 2 }
  0x16   : > { %s1799_s3 = scalar_lea.vmem %s2003_s0, %s1247_s28 }
  0x17   : > { %v233_v0 = vld [vmem:[%s1799_s3] sm:$0xff]  ;;  %v235_v1 = vld [vmem:[%s1799_s3 + $0x168] sm:$0xff]  ;;  %v237_v2 = vld [vmem:[%s1799_s3 + $0x2d0] sm:$0xff] }
  0x18   : > { %234 = vst [vmem:[%s1804_s4] sm:$0xff] %v233_v0  ;;  %v239_v3 = vld [vmem:[%s1799_s3 + $0x438] sm:$0xff]  ;;  %v241_v4 = vld [vmem:[%s1799_s3 + $0x5a0] sm:$0xff]  ;;  %v243_v5 = vld [vmem:[%s1799_s3 + $0x708] sm:$0xff] }
  0x19   : > { %236 = vst [vmem:[%s1804_s4 + $0x8] sm:$0xff] %v235_v1  ;;  %v245_v6 = vld [vmem:[%s1799_s3 + $0x870] sm:$0xff]  ;;  %v247_v7 = vld [vmem:[%s1799_s3 + $0x9d8] sm:$0xff]  ;;  %v249_v8 = vld [vmem:[%s1799_s3 + $0xb40] sm:$0xff] }
  0x1a   : > { %238 = vst [vmem:[%s1804_s4 + $0x10] sm:$0xff] %v237_v2  ;;  %v251_v9 = vld [vmem:[%s1799_s3 + $0xca8] sm:$0xff]  ;;  %v253_v10 = vld [vmem:[%s1799_s3 + $0xe10] sm:$0xff]  ;;  %v255_v11 = vld [vmem:[%s1799_s3 + $0xf78] sm:$0xff] }
  0x1b   : > { %240 = vst [vmem:[%s1804_s4 + $0x18] sm:$0xff] %v239_v3  ;;  %v257_v12 = vld [vmem:[%s1799_s3 + $0x10e0] sm:$0xff]  ;;  %v259_v13 = vld [vmem:[%s1799_s3 + $0x1248] sm:$0xff]  ;;  %v261_v14 = vld [vmem:[%s1799_s3 + $0x13b0] sm:$0xff] }
  0x1c   : > { %242 = vst [vmem:[%s1804_s4 + $0x20] sm:$0xff] %v241_v4  ;;  %v263_v15 = vld [vmem:[%s1799_s3 + $0x1518] sm:$0xff]  ;;  %v265_v16 = vld [vmem:[%s1799_s3 + $0x1680] sm:$0xff]  ;;  %v267_v17 = vld [vmem:[%s1799_s3 + $0x17e8] sm:$0xff] }
  0x1d   : > { %244 = vst [vmem:[%s1804_s4 + $0x28] sm:$0xff] %v243_v5  ;;  %v269_v18 = vld [vmem:[%s1799_s3 + $0x1950] sm:$0xff]  ;;  %v271_v19 = vld [vmem:[%s1799_s3 + $0x1ab8] sm:$0xff]  ;;  %v273_v20 = vld [vmem:[%s1799_s3 + $0x1c20] sm:$0xff] }
  0x1e   : > { %246 = vst [vmem:[%s1804_s4 + $0x30] sm:$0xff] %v245_v6  ;;  %v275_v21 = vld [vmem:[%s1799_s3 + $0x1d88] sm:$0xff]  ;;  %v277_v22 = vld [vmem:[%s1799_s3 + $0x1ef0] sm:$0xff]  ;;  %v279_v23 = vld [vmem:[%s1799_s3 + $0x2058] sm:$0xff] }
  0x1f   : > { %248 = vst [vmem:[%s1804_s4 + $0x38] sm:$0xff] %v247_v7  ;;  %v281_v24 = vld [vmem:[%s1799_s3 + $0x21c0] sm:$0xff]  ;;  %v283_v25 = vld [vmem:[%s1799_s3 + $0x2328] sm:$0xff]  ;;  %v285_v26 = vld [vmem:[%s1799_s3 + $0x2490] sm:$0xff] }
  0x20   : > { %250 = vst [vmem:[%s1804_s4 + $0x40] sm:$0xff] %v249_v8  ;;  %v287_v27 = vld [vmem:[%s1799_s3 + $0x25f8] sm:$0xff]  ;;  %v289_v28 = vld [vmem:[%s1799_s3 + $0x2760] sm:$0xff]  ;;  %v291_v29 = vld [vmem:[%s1799_s3 + $0x28c8] sm:$0xff] }
  0x21   : > { %252 = vst [vmem:[%s1804_s4 + $0x48] sm:$0xff] %v251_v9  ;;  %v293_v30 = vld [vmem:[%s1799_s3 + $0x2a30] sm:$0xff]  ;;  %v295_v31 = vld [vmem:[%s1799_s3 + $0x2b98] sm:$0xff] }
  0x22   : > { %254 = vst [vmem:[%s1804_s4 + $0x50] sm:$0xff] %v253_v10 }
  0x23   : > { %256 = vst [vmem:[%s1804_s4 + $0x58] sm:$0xff] %v255_v11 }
  0x24   : > { %258 = vst [vmem:[%s1804_s4 + $0x60] sm:$0xff] %v257_v12 }
  0x25   : > { %260 = vst [vmem:[%s1804_s4 + $0x68] sm:$0xff] %v259_v13 }
  0x26   : > { %262 = vst [vmem:[%s1804_s4 + $0x70] sm:$0xff] %v261_v14 }
  0x27   : > { %264 = vst [vmem:[%s1804_s4 + $0x78] sm:$0xff] %v263_v15 }
  0x28   : > { %266 = vst [vmem:[%s1804_s4 + $0x80] sm:$0xff] %v265_v16 }
  0x29   : > { %268 = vst [vmem:[%s1804_s4 + $0x88] sm:$0xff] %v267_v17 }
  0x2a   : > { %270 = vst [vmem:[%s1804_s4 + $0x90] sm:$0xff] %v269_v18 }
  0x2b   : > { %272 = vst [vmem:[%s1804_s4 + $0x98] sm:$0xff] %v271_v19 }
  0x2c   : > { %274 = vst [vmem:[%s1804_s4 + $0xa0] sm:$0xff] %v273_v20 }
  0x2d   : > { %276 = vst [vmem:[%s1804_s4 + $0xa8] sm:$0xff] %v275_v21 }
  0x2e   : > { %278 = vst [vmem:[%s1804_s4 + $0xb0] sm:$0xff] %v277_v22 }
  0x2f   : > { %280 = vst [vmem:[%s1804_s4 + $0xb8] sm:$0xff] %v279_v23 }
  0x30   : > { %282 = vst [vmem:[%s1804_s4 + $0xc0] sm:$0xff] %v281_v24 }
  0x31   : > { %284 = vst [vmem:[%s1804_s4 + $0xc8] sm:$0xff] %v283_v25 }
  0x32   : > { %286 = vst [vmem:[%s1804_s4 + $0xd0] sm:$0xff] %v285_v26 }
  0x33   : > { %288 = vst [vmem:[%s1804_s4 + $0xd8] sm:$0xff] %v287_v27 }
  0x34   : > { %290 = vst [vmem:[%s1804_s4 + $0xe0] sm:$0xff] %v289_v28 }
  0x35   : > { %292 = vst [vmem:[%s1804_s4 + $0xe8] sm:$0xff] %v291_v29 }
  0x36   : > { %294 = vst [vmem:[%s1804_s4 + $0xf0] sm:$0xff] %v293_v30 }
  0x37   : > { %296 = vst [vmem:[%s1804_s4 + $0xf8] sm:$0xff] %v295_v31 }
  0x38 PF: > { %p1248_p7 = scmp.ge.s32.totalorder %s1721_s15, 1  ;;  %p313_p8 = scmp.lt.s32.totalorder %s1721_s15, 181 }
  0x3a   : > { %p314_p9 = pnand %p1248_p7, %p313_p8 }
  0x3b   : > { %s320_s5 = sand.u32 (!%p314_p9), 1, %s1697_s9   ;;  %s1250_s6 = sshll.u32 (!%p314_p9), %s1705_s11, 5 }
  0x3c   : > { %317 = sbr.rel (%p314_p9) target bundleno = 417 (0x1a1), region = 62  ;;  %s1249_s7 = sshll.u32 (!%p314_p9), %s320_s5, 8 }
  0x3d   : > { %p355_p10 = scmp.lt.s32.totalorder (!%p314_p9), %s1250_s6, 1439  ;;  %s1252_s8 = sshll.u32 (!%p314_p9), %s1709_s12, 5 }
  0x3e   : > { %p364_p11 = scmp.lt.s32.totalorder (!%p314_p9), %s1252_s8, 127  ;;  %s1882_s9 = scalar_lea.vmem (!%p314_p9), [#allocation3], %s1249_s7 }
  0x3f   : > { %p1254_p12 = scmp.ne.s32.totalorder (!%p314_p9), %s1705_s11, 0 }
  0x41   : > { %s2019_s6 = smov (!%p355_p10, %s1250_s6), 1439  ;;  %s2021_s8 = smov (!%p364_p11, %s1252_s8), 127 }
  0x42   : > { %s1251_s18 = sshll.u32 %s2019_s6, 2  ;;  %s1253_s23 = sshll.u32 %s2021_s8, 2 }
  0x43   : > { %s1875_s21 = scalar_lea.vmem %s2004_s1, %s1251_s18  ;;  %s1880_s26 = scalar_lea.vmem %s2005_s2, %s1253_s23 }
  0x44   : > { %375 = sbr.rel (%p1254_p12) target bundleno = 106 (0x6a), region = 70 }
  0x49   : > { %v1723_v32 = vmov 0.0  }
  0x4a   : > { %376 = vst [vmem:[#allocation2 + $0xb0] sm:$0xff] %v1723_v32 }
  0x4b   : > { %377 = vst [vmem:[#allocation2] sm:$0xff] %v1723_v32 }
  0x4c   : > { %378 = vst [vmem:[#allocation2 + $0xd8] sm:$0xff] %v1723_v32 }
  0x4d   : > { %379 = vst [vmem:[#allocation2 + $0x18] sm:$0xff] %v1723_v32 }
  0x4e   : > { %380 = vst [vmem:[#allocation2 + $0x50] sm:$0xff] %v1723_v32 }
  0x4f   : > { %381 = vst [vmem:[#allocation2 + $0x68] sm:$0xff] %v1723_v32 }
  0x50   : > { %382 = vst [vmem:[#allocation2 + $0x30] sm:$0xff] %v1723_v32 }
  0x51   : > { %383 = vst [vmem:[#allocation2 + $0x48] sm:$0xff] %v1723_v32 }
  0x52   : > { %384 = vst [vmem:[#allocation2 + $0x80] sm:$0xff] %v1723_v32 }
  0x53   : > { %385 = vst [vmem:[#allocation2 + $0x88] sm:$0xff] %v1723_v32 }
  0x54   : > { %386 = vst [vmem:[#allocation2 + $0xe8] sm:$0xff] %v1723_v32 }
  0x55   : > { %387 = vst [vmem:[#allocation2 + $0xb8] sm:$0xff] %v1723_v32 }
  0x56   : > { %388 = vst [vmem:[#allocation2 + $0x60] sm:$0xff] %v1723_v32 }
  0x57   : > { %389 = vst [vmem:[#allocation2 + $0xf0] sm:$0xff] %v1723_v32 }
  0x58   : > { %390 = vst [vmem:[#allocation2 + $0x8] sm:$0xff] %v1723_v32 }
  0x59   : > { %391 = vst [vmem:[#allocation2 + $0x78] sm:$0xff] %v1723_v32 }
  0x5a   : > { %392 = vst [vmem:[#allocation2 + $0x38] sm:$0xff] %v1723_v32 }
  0x5b   : > { %393 = vst [vmem:[#allocation2 + $0x58] sm:$0xff] %v1723_v32 }
  0x5c   : > { %394 = vst [vmem:[#allocation2 + $0x40] sm:$0xff] %v1723_v32 }
  0x5d   : > { %395 = vst [vmem:[#allocation2 + $0xc8] sm:$0xff] %v1723_v32 }
  0x5e   : > { %396 = vst [vmem:[#allocation2 + $0xe0] sm:$0xff] %v1723_v32 }
  0x5f   : > { %397 = vst [vmem:[#allocation2 + $0x90] sm:$0xff] %v1723_v32 }
  0x60   : > { %398 = vst [vmem:[#allocation2 + $0x70] sm:$0xff] %v1723_v32 }
  0x61   : > { %399 = vst [vmem:[#allocation2 + $0xc0] sm:$0xff] %v1723_v32 }
  0x62   : > { %400 = vst [vmem:[#allocation2 + $0xa8] sm:$0xff] %v1723_v32 }
  0x63   : > { %401 = vst [vmem:[#allocation2 + $0xd0] sm:$0xff] %v1723_v32 }
  0x64   : > { %402 = vst [vmem:[#allocation2 + $0x10] sm:$0xff] %v1723_v32 }
  0x65   : > { %403 = vst [vmem:[#allocation2 + $0x28] sm:$0xff] %v1723_v32 }
  0x66   : > { %404 = vst [vmem:[#allocation2 + $0xa0] sm:$0xff] %v1723_v32 }
  0x67   : > { %405 = vst [vmem:[#allocation2 + $0xf8] sm:$0xff] %v1723_v32 }
  0x68   : > { %406 = vst [vmem:[#allocation2 + $0x20] sm:$0xff] %v1723_v32 }
  0x69   : > { %407 = vst [vmem:[#allocation2 + $0x98] sm:$0xff] %v1723_v32 }
  0x6a PF: > { %v1489_v33 = vld [vmem:[%s1875_s21 + $0x38] sm:$0xff]  ;;  %v1488_v35 = vld [vmem:[%s1875_s21 + $0x30] sm:$0xff]  ;;  %v1487_v37 = vld [vmem:[%s1875_s21 + $0x28] sm:$0xff]  ;;  %p1447_p13 = scmp.ne.s32.totalorder %s1705_s11, 44 }
  0x6b   : > { %v1497_v34 = vld [vmem:[%s1875_s21 + $0x78] sm:$0xff]  ;;  %760 = vmatpush.bf16.msra.mxu0 %v1489_v33  ;;  %1593 = vmatpush.bf16.msra.mxu2 %v1489_v33  ;;  %v1496_v36 = vld [vmem:[%s1875_s21 + $0x70] sm:$0xff]  ;;  %v1495_v38 = vld [vmem:[%s1875_s21 + $0x68] sm:$0xff] }
  0x6c   : > { %849 = vmatpush.bf16.msra.mxu1 %v1497_v34  ;;  %1601 = vmatpush.bf16.msra.mxu3 %v1497_v34  ;;  %v1486_v39 = vld [vmem:[%s1875_s21 + $0x20] sm:$0xff]  ;;  %v1485_v41 = vld [vmem:[%s1875_s21 + $0x18] sm:$0xff]  ;;  %v1484_v43 = vld [vmem:[%s1875_s21 + $0x10] sm:$0xff] }
  0x6d   : > { %v1494_v40 = vld [vmem:[%s1875_s21 + $0x60] sm:$0xff]  ;;  %v1493_v42 = vld [vmem:[%s1875_s21 + $0x58] sm:$0xff]  ;;  %v1492_v44 = vld [vmem:[%s1875_s21 + $0x50] sm:$0xff] }
  0x6e   : > { %v1483_v45 = vld [vmem:[%s1875_s21 + $0x8] sm:$0xff]  ;;  %v1482_v47 = vld [vmem:[%s1875_s21] sm:$0xff]  ;;  %v1265_v61 = vld [vmem:[%s1882_s9 + $0x10] sm:$0xf] }
  0x6f   : > { %761 = vmatpush.bf16.msra.mxu0 %v1488_v35  ;;  %1594 = vmatpush.bf16.msra.mxu2 %v1488_v35  ;;  %v1491_v46 = vld [vmem:[%s1875_s21 + $0x48] sm:$0xff]  ;;  %v1490_v48 = vld [vmem:[%s1875_s21 + $0x40] sm:$0xff]  ;;  %v1453_v62 = vld [vmem:[%s1882_s9 + $0x14] sm:$0xf0] }
  0x70   : > { %850 = vmatpush.bf16.msra.mxu1 %v1496_v36  ;;  %1602 = vmatpush.bf16.msra.mxu3 %v1496_v36  ;;  %v1257_v49 = vld [vmem:[%s1882_s9] sm:$0xf]  ;;  %v1451_v50 = vld [vmem:[%s1882_s9 + $0x4] sm:$0xf0]  ;;  %v1450_v53 = vld [vmem:[%s1882_s9 + $0x4] sm:$0xf]  ;;  %v1266_v5 = vor.u32 %v1453_v62, %v1265_v61 }
  0x71   : > { %v1321_v51 = vld [vmem:[%s1882_s9 + $0x80] sm:$0xf]  ;;  %v1467_v52 = vld [vmem:[%s1882_s9 + $0x84] sm:$0xf0]  ;;  %v1259_v54 = vld [vmem:[%s1882_s9 + $0x8] sm:$0xf0]  ;;  %v1258_v57 = vor.u32 %v1451_v50, %v1257_v49 }
  0x72   : > { %v1466_v55 = vld [vmem:[%s1882_s9 + $0x84] sm:$0xf]  ;;  %v1323_v56 = vld [vmem:[%s1882_s9 + $0x88] sm:$0xf0]  ;;  %v1322_v58 = vor.u32 %v1467_v52, %v1321_v51  ;;  %v1262_v59 = vor.u32 %v1450_v53, %v1259_v54  ;;  %v1329_v63 = vld [vmem:[%s1882_s9 + $0x90] sm:$0xf] }
  0x73   : > { %762 = vmatpush.bf16.msra.mxu0 %v1487_v37  ;;  %1595 = vmatpush.bf16.msra.mxu2 %v1487_v37  ;;  %v1326_v60 = vor.u32 %v1466_v55, %v1323_v56  ;;  %v1469_v0 = vld [vmem:[%s1882_s9 + $0x94] sm:$0xf0]  ;;  %v1452_v1 = vld [vmem:[%s1882_s9 + $0x14] sm:$0xf]  ;;  %v1267_v2 = vld [vmem:[%s1882_s9 + $0x18] sm:$0xf0] }
  0x74   : > { %851 = vmatpush.bf16.msra.mxu1 %v1495_v38  ;;  %1603 = vmatpush.bf16.msra.mxu3 %v1495_v38  ;;  %v1468_v3 = vld [vmem:[%s1882_s9 + $0x94] sm:$0xf]  ;;  %v1331_v4 = vld [vmem:[%s1882_s9 + $0x98] sm:$0xf0]  ;;  %v1330_v6 = vor.u32 %v1469_v0, %v1329_v63  ;;  %v1270_v7 = vor.u32 %v1452_v1, %v1267_v2  ;;  %v1273_v9 = vld [vmem:[%s1882_s9 + $0x20] sm:$0xf] }
  0x75   : > { %v1334_v8 = vor.u32 %v1468_v3, %v1331_v4  ;;  %v1455_v10 = vld [vmem:[%s1882_s9 + $0x24] sm:$0xf0]  ;;  %v1337_v11 = vld [vmem:[%s1882_s9 + $0xa0] sm:$0xf]  ;;  %v1454_v13 = vld [vmem:[%s1882_s9 + $0x24] sm:$0xf] }
  0x76   : > { %v1471_v12 = vld [vmem:[%s1882_s9 + $0xa4] sm:$0xf0]  ;;  %v1275_v14 = vld [vmem:[%s1882_s9 + $0x28] sm:$0xf0]  ;;  %v1470_v15 = vld [vmem:[%s1882_s9 + $0xa4] sm:$0xf]  ;;  %v1274_v17 = vor.u32 %v1455_v10, %v1273_v9 }
  0x77   : > { %763 = vmatpush.bf16.msra.mxu0 %v1486_v39  ;;  %1596 = vmatpush.bf16.msra.mxu2 %v1486_v39  ;;  %v1339_v16 = vld [vmem:[%s1882_s9 + $0xa8] sm:$0xf0]  ;;  %v1338_v18 = vor.u32 %v1471_v12, %v1337_v11  ;;  %v1278_v19 = vor.u32 %v1454_v13, %v1275_v14  ;;  %v1281_v21 = vld [vmem:[%s1882_s9 + $0x30] sm:$0xf]  ;;  %v1457_v22 = vld [vmem:[%s1882_s9 + $0x34] sm:$0xf0] }
  0x78   : > { %852 = vmatpush.bf16.msra.mxu1 %v1494_v40  ;;  %1604 = vmatpush.bf16.msra.mxu3 %v1494_v40  ;;  %v1342_v20 = vor.u32 %v1470_v15, %v1339_v16  ;;  %v1345_v23 = vld [vmem:[%s1882_s9 + $0xb0] sm:$0xf]  ;;  %v1473_v24 = vld [vmem:[%s1882_s9 + $0xb4] sm:$0xf0]  ;;  %v1456_v25 = vld [vmem:[%s1882_s9 + $0x34] sm:$0xf]  ;;  %v1282_v29 = vor.u32 %v1457_v22, %v1281_v21 }
  0x79   : > { %v1283_v26 = vld [vmem:[%s1882_s9 + $0x38] sm:$0xf0]  ;;  %v1472_v27 = vld [vmem:[%s1882_s9 + $0xb4] sm:$0xf]  ;;  %v1346_v30 = vor.u32 %v1473_v24, %v1345_v23  ;;  %v1289_v33 = vld [vmem:[%s1882_s9 + $0x40] sm:$0xf] }
  0x7a   : > { %v1347_v28 = vld [vmem:[%s1882_s9 + $0xb8] sm:$0xf0]  ;;  %v1286_v31 = vor.u32 %v1456_v25, %v1283_v26  ;;  %v1459_v34 = vld [vmem:[%s1882_s9 + $0x44] sm:$0xf0]  ;;  %v1353_v35 = vld [vmem:[%s1882_s9 + $0xc0] sm:$0xf] }
  0x7b   : > { %764 = vmatpush.bf16.msra.mxu0 %v1485_v41  ;;  %1597 = vmatpush.bf16.msra.mxu2 %v1485_v41  ;;  %v1350_v32 = vor.u32 %v1472_v27, %v1347_v28  ;;  %v1475_v36 = vld [vmem:[%s1882_s9 + $0xc4] sm:$0xf0]  ;;  %v1458_v37 = vld [vmem:[%s1882_s9 + $0x44] sm:$0xf]  ;;  %v1291_v38 = vld [vmem:[%s1882_s9 + $0x48] sm:$0xf0]  ;;  %v1290_v41 = vor.u32 %v1459_v34, %v1289_v33 }
  0x7c   : > { %853 = vmatpush.bf16.msra.mxu1 %v1493_v42  ;;  %1605 = vmatpush.bf16.msra.mxu3 %v1493_v42  ;;  %v1474_v39 = vld [vmem:[%s1882_s9 + $0xc4] sm:$0xf]  ;;  %v1355_v40 = vld [vmem:[%s1882_s9 + $0xc8] sm:$0xf0]  ;;  %v1354_v42 = vor.u32 %v1475_v36, %v1353_v35  ;;  %v1460_v49 = vld [vmem:[%s1882_s9 + $0x54] sm:$0xf] }
  0x7d   : > { %v1299_v50 = vld [vmem:[%s1882_s9 + $0x58] sm:$0xf0]  ;;  %v1476_v51 = vld [vmem:[%s1882_s9 + $0xd4] sm:$0xf]  ;;  %v1462_v61 = vld [vmem:[%s1882_s9 + $0x64] sm:$0xf] }
  0x7e   : > { %v1363_v52 = vld [vmem:[%s1882_s9 + $0xd8] sm:$0xf0]  ;;  %v1302_v55 = vor.u32 %v1460_v49, %v1299_v50  ;;  %v1307_v62 = vld [vmem:[%s1882_s9 + $0x68] sm:$0xf0]  ;;  %v1478_v63 = vld [vmem:[%s1882_s9 + $0xe4] sm:$0xf] }
  0x7f   : > { %765 = vmatpush.bf16.msra.mxu0 %v1484_v43  ;;  %1598 = vmatpush.bf16.msra.mxu2 %v1484_v43  ;;  %v1294_v43 = vor.u32 %v1458_v37, %v1291_v38  ;;  %v1366_v56 = vor.u32 %v1476_v51, %v1363_v52  ;;  %v1371_v0 = vld [vmem:[%s1882_s9 + $0xe8] sm:$0xf0]  ;;  %v1310_v3 = vor.u32 %v1462_v61, %v1307_v62  ;;  %v1464_v9 = vld [vmem:[%s1882_s9 + $0x74] sm:$0xf]  ;;  %v1315_v10 = vld [vmem:[%s1882_s9 + $0x78] sm:$0xf0] }
  0x80   : > { %854 = vmatpush.bf16.msra.mxu1 %v1492_v44  ;;  %1606 = vmatpush.bf16.msra.mxu3 %v1492_v44  ;;  %v1358_v44 = vor.u32 %v1474_v39, %v1355_v40  ;;  %v1374_v4 = vor.u32 %v1478_v63, %v1371_v0  ;;  %v1480_v11 = vld [vmem:[%s1882_s9 + $0xf4] sm:$0xf]  ;;  %v1379_v12 = vld [vmem:[%s1882_s9 + $0xf8] sm:$0xf0]  ;;  %v1318_v15 = vor.u32 %v1464_v9, %v1315_v10  ;;  %v409_v27 = vld [vmem:[#allocation2] sm:$0xff] }
  0x81   : > { %v1382_v16 = vor.u32 %v1480_v11, %v1379_v12  ;;  %v424_v23 = vld [vmem:[#allocation2 + $0x38] sm:$0xff]  ;;  %v428_v63 = vld [vmem:[#allocation2 + $0xe0] sm:$0xff]  ;;  %v429_v9 = vld [vmem:[#allocation2 + $0x90] sm:$0xff] }
  0x82   : > { %v425_v33 = vld [vmem:[#allocation2 + $0x58] sm:$0xff] }
  0x83   : > { %766 = vmatpush.bf16.msra.mxu0 %v1483_v45  ;;  %1599 = vmatpush.bf16.msra.mxu2 %v1483_v45  ;;  %v1297_v45 = vld [vmem:[%s1882_s9 + $0x50] sm:$0xf]  ;;  %v410_v37 = vld [vmem:[#allocation2 + $0xd8] sm:$0xff] }
  0x84   : > { %855 = vmatpush.bf16.msra.mxu1 %v1491_v46  ;;  %1607 = vmatpush.bf16.msra.mxu3 %v1491_v46  ;;  %v1461_v46 = vld [vmem:[%s1882_s9 + $0x54] sm:$0xf0] }
  0x85   : > { %v1298_v53 = vor.u32 %v1461_v46, %v1297_v45 }
  0x87   : > { %767 = vmatpush.bf16.msra.mxu0 %v1482_v47  ;;  %1600 = vmatpush.bf16.msra.mxu2 %v1482_v47  ;;  %v1361_v47 = vld [vmem:[%s1882_s9 + $0xd0] sm:$0xf] }
  0x88   : > { %856 = vmatpush.bf16.msra.mxu1 %v1490_v48  ;;  %1608 = vmatpush.bf16.msra.mxu3 %v1490_v48  ;;  %v1477_v48 = vld [vmem:[%s1882_s9 + $0xd4] sm:$0xf0] }
  0x89   : > { %v1362_v54 = vor.u32 %v1477_v48, %v1361_v47  ;;  %v411_v47 = vld [vmem:[#allocation2 + $0x18] sm:$0xff] }
  0x8a   : > { %768 = vmatmul.bf16.vlgmr.msra.gmra.mxu0 %v1258_v57  ;;  %808 = vmatmul.bf16.vlgmr.msra.gmra.mxu2 %v1322_v58  ;;  %v1305_v57 = vld [vmem:[%s1882_s9 + $0x60] sm:$0xf]  ;;  %v1463_v58 = vld [vmem:[%s1882_s9 + $0x64] sm:$0xf0] }
  0x8b   : > { %857 = vmatmul.bf16.vlgmr.msra.gmra.mxu1 %v1262_v59  ;;  %897 = vmatmul.bf16.vlgmr.msra.gmra.mxu3 %v1326_v60  ;;  %v1369_v59 = vld [vmem:[%s1882_s9 + $0xe0] sm:$0xf]  ;;  %v1479_v60 = vld [vmem:[%s1882_s9 + $0xe4] sm:$0xf0]  ;;  %v1306_v1 = vor.u32 %v1463_v58, %v1305_v57  ;;  %v412_v57 = vld [vmem:[#allocation2 + $0x50] sm:$0xff] }
  0x8c   : > { %v1370_v2 = vor.u32 %v1479_v60, %v1369_v59 }
  0x9a   : > { %773 = vmatmul.bf16.gmra.mxu0 %v1266_v5  ;;  %813 = vmatmul.bf16.gmra.mxu2 %v1330_v6  ;;  %v1313_v5 = vld [vmem:[%s1882_s9 + $0x70] sm:$0xf]  ;;  %v1465_v6 = vld [vmem:[%s1882_s9 + $0x74] sm:$0xf0] }
  0x9b   : > { %862 = vmatmul.bf16.gmra.mxu1 %v1270_v7  ;;  %902 = vmatmul.bf16.gmra.mxu3 %v1334_v8  ;;  %v1377_v7 = vld [vmem:[%s1882_s9 + $0xf0] sm:$0xf]  ;;  %v1481_v8 = vld [vmem:[%s1882_s9 + $0xf4] sm:$0xf0]  ;;  %v1314_v13 = vor.u32 %v1465_v6, %v1313_v5 }
  0x9c   : > { %v1378_v14 = vor.u32 %v1481_v8, %v1377_v7 }
  0xaa   : > { %778 = vmatmul.bf16.gmra.mxu0 %v1274_v17  ;;  %818 = vmatmul.bf16.gmra.mxu2 %v1338_v18  ;;  %v408_v18 = vld [vmem:[#allocation2 + $0xb0] sm:$0xff] }
  0xab   : > { %867 = vmatmul.bf16.gmra.mxu1 %v1278_v19  ;;  %907 = vmatmul.bf16.gmra.mxu3 %v1342_v20 }
  0xba   : > { %783 = vmatmul.bf16.gmra.mxu0 %v1282_v29  ;;  %823 = vmatmul.bf16.gmra.mxu2 %v1346_v30 }
  0xbb   : > { %872 = vmatmul.bf16.gmra.mxu1 %v1286_v31  ;;  %912 = vmatmul.bf16.gmra.mxu3 %v1350_v32 }
  0xca   : > { %788 = vmatmul.bf16.gmra.mxu0 %v1290_v41  ;;  %828 = vmatmul.bf16.gmra.mxu2 %v1354_v42 }
  0xcb   : > { %877 = vmatmul.bf16.gmra.mxu1 %v1294_v43  ;;  %917 = vmatmul.bf16.gmra.mxu3 %v1358_v44  ;;  %v426_v43 = vld [vmem:[#allocation2 + $0x40] sm:$0xff] }
  0xda   : > { %793 = vmatmul.bf16.gmra.mxu0 %v1298_v53  ;;  %833 = vmatmul.bf16.gmra.mxu2 %v1362_v54  ;;  %v427_v53 = vld [vmem:[#allocation2 + $0xc8] sm:$0xff] }
  0xdb   : > { %882 = vmatmul.bf16.gmra.mxu1 %v1302_v55  ;;  %922 = vmatmul.bf16.gmra.mxu3 %v1366_v56 }
  0xea   : > { %798 = vmatmul.bf16.gmra.mxu0 %v1306_v1  ;;  %838 = vmatmul.bf16.gmra.mxu2 %v1370_v2 }
  0xeb   : > { %887 = vmatmul.bf16.gmra.mxu1 %v1310_v3  ;;  %927 = vmatmul.bf16.gmra.mxu3 %v1374_v4  ;;  %v413_v3 = vld [vmem:[#allocation2 + $0x68] sm:$0xff] }
  0xfa   : > { %803 = vmatmul.bf16.gmra.mxu0 %v1314_v13  ;;  %843 = vmatmul.bf16.gmra.mxu2 %v1378_v14  ;;  %v414_v13 = vld [vmem:[#allocation2 + $0x30] sm:$0xff] }
  0xfb   : > { %892 = vmatmul.bf16.gmra.mxu1 %v1318_v15  ;;  %932 = vmatmul.bf16.gmra.mxu3 %v1382_v16 }
 0x107   : > { %v769_v17 = vpop.f32.mrf.mxu0 }
 0x108   : > { %v858_v19 = vpop.f32.mrf.mxu1 }
 0x109   : > { %v859_v20 = vadd.f32 %v858_v19, %v769_v17  ;;  %v430_v19 = vld [vmem:[#allocation2 + $0x70] sm:$0xff] }
 0x10b   : > { %v938_v21 = vadd.f32 %v859_v20, %v408_v18 }
 0x10d   : > { %970 = vst [vmem:[#allocation2 + $0xb0] sm:$0xff] %v938_v21  ;;  %v809_v22 = vpop.f32.mrf.mxu2 }
 0x10e   : > { %v898_v24 = vpop.f32.mrf.mxu3 }
 0x10f   : > { %v899_v25 = vadd.f32 %v898_v24, %v809_v22  ;;  %v771_v26 = vpop.f32.mrf.mxu0 }
 0x110   : > { %v860_v28 = vpop.f32.mrf.mxu1 }
 0x111   : > { %v954_v29 = vadd.f32 %v899_v25, %v424_v23  ;;  %v861_v30 = vadd.f32 %v860_v28, %v771_v26  ;;  %v415_v23 = vld [vmem:[#allocation2 + $0x48] sm:$0xff] }
 0x113   : > { %986 = vst [vmem:[#allocation2 + $0x38] sm:$0xff] %v954_v29  ;;  %v939_v31 = vadd.f32 %v861_v30, %v409_v27  ;;  %v431_v29 = vld [vmem:[#allocation2 + $0xc0] sm:$0xff] }
 0x115   : > { %971 = vst [vmem:[#allocation2] sm:$0xff] %v939_v31  ;;  %v811_v32 = vpop.f32.mrf.mxu2 }
 0x116   : > { %v900_v34 = vpop.f32.mrf.mxu3 }
 0x117   : > { %v901_v35 = vadd.f32 %v900_v34, %v811_v32  ;;  %v774_v36 = vpop.f32.mrf.mxu0 }
 0x118   : > { %v863_v38 = vpop.f32.mrf.mxu1 }
 0x119   : > { %v955_v39 = vadd.f32 %v901_v35, %v425_v33  ;;  %v864_v40 = vadd.f32 %v863_v38, %v774_v36  ;;  %v416_v33 = vld [vmem:[#allocation2 + $0x80] sm:$0xff] }
 0x11b   : > { %987 = vst [vmem:[#allocation2 + $0x58] sm:$0xff] %v955_v39  ;;  %v940_v41 = vadd.f32 %v864_v40, %v410_v37  ;;  %v432_v39 = vld [vmem:[#allocation2 + $0xa8] sm:$0xff] }
 0x11d   : > { %972 = vst [vmem:[#allocation2 + $0xd8] sm:$0xff] %v940_v41  ;;  %v814_v42 = vpop.f32.mrf.mxu2 }
 0x11e   : > { %v903_v44 = vpop.f32.mrf.mxu3 }
 0x11f   : > { %v904_v45 = vadd.f32 %v903_v44, %v814_v42  ;;  %v776_v46 = vpop.f32.mrf.mxu0 }
 0x120   : > { %v865_v48 = vpop.f32.mrf.mxu1 }
 0x121   : > { %v956_v49 = vadd.f32 %v904_v45, %v426_v43  ;;  %v866_v50 = vadd.f32 %v865_v48, %v776_v46  ;;  %v417_v43 = vld [vmem:[#allocation2 + $0x88] sm:$0xff] }
 0x123   : > { %988 = vst [vmem:[#allocation2 + $0x40] sm:$0xff] %v956_v49  ;;  %v941_v51 = vadd.f32 %v866_v50, %v411_v47  ;;  %v433_v49 = vld [vmem:[#allocation2 + $0xd0] sm:$0xff] }
 0x125   : > { %973 = vst [vmem:[#allocation2 + $0x18] sm:$0xff] %v941_v51  ;;  %v816_v52 = vpop.f32.mrf.mxu2 }
 0x126   : > { %v905_v54 = vpop.f32.mrf.mxu3 }
 0x127   : > { %v906_v55 = vadd.f32 %v905_v54, %v816_v52  ;;  %v779_v56 = vpop.f32.mrf.mxu0 }
 0x128   : > { %v868_v58 = vpop.f32.mrf.mxu1 }
 0x129   : > { %v957_v59 = vadd.f32 %v906_v55, %v427_v53  ;;  %v869_v60 = vadd.f32 %v868_v58, %v779_v56  ;;  %v418_v53 = vld [vmem:[#allocation2 + $0xe8] sm:$0xff] }
 0x12b   : > { %989 = vst [vmem:[#allocation2 + $0xc8] sm:$0xff] %v957_v59  ;;  %v942_v61 = vadd.f32 %v869_v60, %v412_v57  ;;  %v434_v59 = vld [vmem:[#allocation2 + $0x10] sm:$0xff] }
 0x12d   : > { %974 = vst [vmem:[#allocation2 + $0x50] sm:$0xff] %v942_v61  ;;  %v819_v62 = vpop.f32.mrf.mxu2 }
 0x12e   : > { %v908_v0 = vpop.f32.mrf.mxu3 }
 0x12f   : > { %v909_v1 = vadd.f32 %v908_v0, %v819_v62  ;;  %v781_v2 = vpop.f32.mrf.mxu0 }
 0x130   : > { %v870_v4 = vpop.f32.mrf.mxu1 }
 0x131   : > { %v958_v5 = vadd.f32 %v909_v1, %v428_v63  ;;  %v871_v6 = vadd.f32 %v870_v4, %v781_v2  ;;  %v419_v63 = vld [vmem:[#allocation2 + $0xb8] sm:$0xff] }
 0x133   : > { %990 = vst [vmem:[#allocation2 + $0xe0] sm:$0xff] %v958_v5  ;;  %v943_v7 = vadd.f32 %v871_v6, %v413_v3  ;;  %v435_v5 = vld [vmem:[#allocation2 + $0x28] sm:$0xff] }
 0x135   : > { %975 = vst [vmem:[#allocation2 + $0x68] sm:$0xff] %v943_v7  ;;  %v821_v8 = vpop.f32.mrf.mxu2 }
 0x136   : > { %v910_v10 = vpop.f32.mrf.mxu3 }
 0x137   : > { %v911_v11 = vadd.f32 %v910_v10, %v821_v8  ;;  %v784_v12 = vpop.f32.mrf.mxu0 }
 0x138   : > { %v873_v14 = vpop.f32.mrf.mxu1 }
 0x139   : > { %v959_v15 = vadd.f32 %v911_v11, %v429_v9  ;;  %v874_v16 = vadd.f32 %v873_v14, %v784_v12  ;;  %v420_v9 = vld [vmem:[#allocation2 + $0x60] sm:$0xff] }
 0x13b   : > { %991 = vst [vmem:[#allocation2 + $0x90] sm:$0xff] %v959_v15  ;;  %v944_v17 = vadd.f32 %v874_v16, %v414_v13  ;;  %v436_v15 = vld [vmem:[#allocation2 + $0xa0] sm:$0xff] }
 0x13d   : > { %976 = vst [vmem:[#allocation2 + $0x30] sm:$0xff] %v944_v17  ;;  %v824_v18 = vpop.f32.mrf.mxu2 }
 0x13e   : > { %v913_v20 = vpop.f32.mrf.mxu3 }
 0x13f   : > { %v914_v21 = vadd.f32 %v913_v20, %v824_v18  ;;  %v786_v22 = vpop.f32.mrf.mxu0 }
 0x140   : > { %v875_v24 = vpop.f32.mrf.mxu1 }
 0x141   : > { %v960_v25 = vadd.f32 %v914_v21, %v430_v19  ;;  %v876_v26 = vadd.f32 %v875_v24, %v786_v22  ;;  %v421_v19 = vld [vmem:[#allocation2 + $0xf0] sm:$0xff] }
 0x143   : > { %992 = vst [vmem:[#allocation2 + $0x70] sm:$0xff] %v960_v25  ;;  %v945_v27 = vadd.f32 %v876_v26, %v415_v23  ;;  %v437_v25 = vld [vmem:[#allocation2 + $0xf8] sm:$0xff] }
 0x145   : > { %977 = vst [vmem:[#allocation2 + $0x48] sm:$0xff] %v945_v27  ;;  %v826_v28 = vpop.f32.mrf.mxu2 }
 0x146   : > { %v915_v30 = vpop.f32.mrf.mxu3 }
 0x147   : > { %v916_v31 = vadd.f32 %v915_v30, %v826_v28  ;;  %v789_v32 = vpop.f32.mrf.mxu0 }
 0x148   : > { %v878_v34 = vpop.f32.mrf.mxu1 }
 0x149   : > { %v961_v35 = vadd.f32 %v916_v31, %v431_v29  ;;  %v879_v36 = vadd.f32 %v878_v34, %v789_v32  ;;  %v422_v29 = vld [vmem:[#allocation2 + $0x8] sm:$0xff] }
 0x14b   : > { %993 = vst [vmem:[#allocation2 + $0xc0] sm:$0xff] %v961_v35  ;;  %v946_v37 = vadd.f32 %v879_v36, %v416_v33  ;;  %v438_v35 = vld [vmem:[#allocation2 + $0x20] sm:$0xff] }
 0x14d   : > { %978 = vst [vmem:[#allocation2 + $0x80] sm:$0xff] %v946_v37  ;;  %v829_v38 = vpop.f32.mrf.mxu2 }
 0x14e   : > { %v918_v40 = vpop.f32.mrf.mxu3 }
 0x14f   : > { %v919_v41 = vadd.f32 %v918_v40, %v829_v38  ;;  %v791_v42 = vpop.f32.mrf.mxu0 }
 0x150   : > { %v880_v44 = vpop.f32.mrf.mxu1 }
 0x151   : > { %v962_v45 = vadd.f32 %v919_v41, %v432_v39  ;;  %v881_v46 = vadd.f32 %v880_v44, %v791_v42  ;;  %v423_v39 = vld [vmem:[#allocation2 + $0x78] sm:$0xff] }
 0x153   : > { %994 = vst [vmem:[#allocation2 + $0xa8] sm:$0xff] %v962_v45  ;;  %v947_v47 = vadd.f32 %v881_v46, %v417_v43  ;;  %v439_v45 = vld [vmem:[#allocation2 + $0x98] sm:$0xff] }
 0x155   : > { %979 = vst [vmem:[#allocation2 + $0x88] sm:$0xff] %v947_v47  ;;  %v831_v48 = vpop.f32.mrf.mxu2 }
 0x156   : > { %v920_v50 = vpop.f32.mrf.mxu3 }
 0x157   : > { %v921_v51 = vadd.f32 %v920_v50, %v831_v48  ;;  %v794_v52 = vpop.f32.mrf.mxu0 }
 0x158   : > { %v883_v54 = vpop.f32.mrf.mxu1 }
 0x159   : > { %v963_v55 = vadd.f32 %v921_v51, %v433_v49  ;;  %v884_v56 = vadd.f32 %v883_v54, %v794_v52 }
 0x15b   : > { %995 = vst [vmem:[#allocation2 + $0xd0] sm:$0xff] %v963_v55  ;;  %v948_v57 = vadd.f32 %v884_v56, %v418_v53 }
 0x15d   : > { %980 = vst [vmem:[#allocation2 + $0xe8] sm:$0xff] %v948_v57  ;;  %v834_v58 = vpop.f32.mrf.mxu2 }
 0x15e   : > { %v923_v60 = vpop.f32.mrf.mxu3 }
 0x15f   : > { %v924_v61 = vadd.f32 %v923_v60, %v834_v58  ;;  %v796_v62 = vpop.f32.mrf.mxu0 }
 0x160   : > { %v885_v0 = vpop.f32.mrf.mxu1 }
 0x161   : > { %v964_v1 = vadd.f32 %v924_v61, %v434_v59  ;;  %v886_v2 = vadd.f32 %v885_v0, %v796_v62 }
 0x163   : > { %996 = vst [vmem:[#allocation2 + $0x10] sm:$0xff] %v964_v1  ;;  %v949_v3 = vadd.f32 %v886_v2, %v419_v63 }
 0x165   : > { %981 = vst [vmem:[#allocation2 + $0xb8] sm:$0xff] %v949_v3  ;;  %v836_v4 = vpop.f32.mrf.mxu2 }
 0x166   : > { %v925_v6 = vpop.f32.mrf.mxu3 }
 0x167   : > { %v926_v7 = vadd.f32 %v925_v6, %v836_v4  ;;  %v799_v8 = vpop.f32.mrf.mxu0 }
 0x168   : > { %v888_v10 = vpop.f32.mrf.mxu1 }
 0x169   : > { %v965_v11 = vadd.f32 %v926_v7, %v435_v5  ;;  %v889_v12 = vadd.f32 %v888_v10, %v799_v8 }
 0x16b   : > { %997 = vst [vmem:[#allocation2 + $0x28] sm:$0xff] %v965_v11  ;;  %v950_v13 = vadd.f32 %v889_v12, %v420_v9 }
 0x16d   : > { %982 = vst [vmem:[#allocation2 + $0x60] sm:$0xff] %v950_v13  ;;  %v839_v14 = vpop.f32.mrf.mxu2 }
 0x16e   : > { %v928_v16 = vpop.f32.mrf.mxu3 }
 0x16f   : > { %v929_v17 = vadd.f32 %v928_v16, %v839_v14  ;;  %v801_v18 = vpop.f32.mrf.mxu0 }
 0x170   : > { %v890_v20 = vpop.f32.mrf.mxu1 }
 0x171   : > { %v966_v21 = vadd.f32 %v929_v17, %v436_v15  ;;  %v891_v22 = vadd.f32 %v890_v20, %v801_v18 }
 0x173   : > { %998 = vst [vmem:[#allocation2 + $0xa0] sm:$0xff] %v966_v21  ;;  %v951_v23 = vadd.f32 %v891_v22, %v421_v19 }
 0x175   : > { %983 = vst [vmem:[#allocation2 + $0xf0] sm:$0xff] %v951_v23  ;;  %v841_v24 = vpop.f32.mrf.mxu2 }
 0x176   : > { %v930_v26 = vpop.f32.mrf.mxu3 }
 0x177   : > { %v931_v27 = vadd.f32 %v930_v26, %v841_v24  ;;  %v804_v28 = vpop.f32.mrf.mxu0 }
 0x178   : > { %v893_v30 = vpop.f32.mrf.mxu1 }
 0x179   : > { %v967_v31 = vadd.f32 %v931_v27, %v437_v25  ;;  %v894_v32 = vadd.f32 %v893_v30, %v804_v28 }
 0x17b   : > { %999 = vst [vmem:[#allocation2 + $0xf8] sm:$0xff] %v967_v31  ;;  %v952_v33 = vadd.f32 %v894_v32, %v422_v29 }
 0x17d   : > { %984 = vst [vmem:[#allocation2 + $0x8] sm:$0xff] %v952_v33  ;;  %v844_v34 = vpop.f32.mrf.mxu2 }
 0x17e   : > { %v933_v36 = vpop.f32.mrf.mxu3 }
 0x17f   : > { %v934_v37 = vadd.f32 %v933_v36, %v844_v34  ;;  %v806_v38 = vpop.f32.mrf.mxu0 }
 0x180   : > { %v895_v40 = vpop.f32.mrf.mxu1 }
 0x181   : > { %v968_v41 = vadd.f32 %v934_v37, %v438_v35  ;;  %v896_v42 = vadd.f32 %v895_v40, %v806_v38 }
 0x183   : > { %1000 = vst [vmem:[#allocation2 + $0x20] sm:$0xff] %v968_v41  ;;  %v953_v43 = vadd.f32 %v896_v42, %v423_v39 }
 0x185   : > { %985 = vst [vmem:[#allocation2 + $0x78] sm:$0xff] %v953_v43  ;;  %v846_v44 = vpop.f32.mrf.mxu2 }
 0x186   : > { %v935_v46 = vpop.f32.mrf.mxu3 }
 0x187   : > { %v936_v47 = vadd.f32 %v935_v46, %v846_v44  ;;  %1005 = sbr.rel (%p1447_p13) target bundleno = 417 (0x1a1), region = 74 }
 0x189   : > { %v969_v48 = vadd.f32 %v936_v47, %v439_v45 }
 0x18b   : > { %1001 = vst [vmem:[#allocation2 + $0x98] sm:$0xff] %v969_v48 }
 0x18c   : > { %v1006_v49 = vld [vmem:[#allocation2 + $0xb0] sm:$0xff]  ;;  %v1007_v50 = vld [vmem:[#allocation2] sm:$0xff]  ;;  %v1008_v51 = vld [vmem:[#allocation2 + $0xd8] sm:$0xff] }
 0x18d   : > { %v1038_v52 = vmax.f32 %v1006_v49, 0.0  ;;  %v1039_v53 = vmax.f32 %v1007_v50, 0.0  ;;  %v1009_v54 = vld [vmem:[#allocation2 + $0x18] sm:$0xff]  ;;  %v1040_v55 = vmax.f32 %v1008_v51, 0.0  ;;  %v1010_v56 = vld [vmem:[#allocation2 + $0x50] sm:$0xff]  ;;  %v1011_v57 = vld [vmem:[#allocation2 + $0x68] sm:$0xff] }
 0x18e   : > { %v1041_v58 = vmax.f32 %v1009_v54, 0.0  ;;  %v1042_v59 = vmax.f32 %v1010_v56, 0.0  ;;  %v1043_v60 = vmax.f32 %v1011_v57, 0.0  ;;  %v1012_v61 = vld [vmem:[#allocation2 + $0x30] sm:$0xff]  ;;  %v1013_v62 = vld [vmem:[#allocation2 + $0x48] sm:$0xff]  ;;  %v1014_v63 = vld [vmem:[#allocation2 + $0x80] sm:$0xff] }
 0x18f   : > { %v1501_v0 = vpack.c.bf16 %v1039_v53, %v1038_v52  ;;  %v1044_v1 = vmax.f32 %v1012_v61, 0.0  ;;  %v1045_v2 = vmax.f32 %v1013_v62, 0.0  ;;  %v1015_v3 = vld [vmem:[#allocation2 + $0x88] sm:$0xff]  ;;  %v1046_v4 = vmax.f32 %v1014_v63, 0.0  ;;  %v1017_v6 = vld [vmem:[#allocation2 + $0xb8] sm:$0xff]  ;;  %v1018_v11 = vld [vmem:[#allocation2 + $0x60] sm:$0xff] }
 0x190   : > { %v1016_v5 = vld [vmem:[#allocation2 + $0xe8] sm:$0xff]  ;;  %v1506_v7 = vpack.c.bf16 %v1041_v58, %v1040_v55  ;;  %v1511_v8 = vpack.c.bf16 %v1043_v60, %v1042_v59  ;;  %v1047_v9 = vmax.f32 %v1015_v3, 0.0  ;;  %v1019_v12 = vld [vmem:[#allocation2 + $0xf0] sm:$0xff]  ;;  %v1049_v15 = vmax.f32 %v1017_v6, 0.0  ;;  %v1021_v18 = vld [vmem:[#allocation2 + $0x78] sm:$0xff] }
 0x191   : > { %v1048_v10 = vmax.f32 %v1016_v5, 0.0  ;;  %v1020_v13 = vld [vmem:[#allocation2 + $0x8] sm:$0xff]  ;;  %1502 = vst [vmem:[%s1880_s26] sm:$0xff] %v1501_v0   ;;  %v1516_v14 = vpack.c.bf16 %v1045_v2, %v1044_v1  ;;  %v1050_v16 = vmax.f32 %v1018_v11, 0.0  ;;  %v1051_v17 = vmax.f32 %v1019_v12, 0.0  ;;  %v1022_v19 = vld [vmem:[#allocation2 + $0x38] sm:$0xff]  ;;  %v1024_v25 = vld [vmem:[#allocation2 + $0x40] sm:$0xff] }
 0x192   : > { %v1023_v20 = vld [vmem:[#allocation2 + $0x58] sm:$0xff]  ;;  %1578 = vst [vmem:[%s1880_s26 + $0x8] sm:$0xff] %v1506_v7   ;;  %v1521_v21 = vpack.c.bf16 %v1047_v9, %v1046_v4  ;;  %v1052_v22 = vmax.f32 %v1020_v13, 0.0  ;;  %v1053_v23 = vmax.f32 %v1021_v18, 0.0  ;;  %v1054_v24 = vmax.f32 %v1022_v19, 0.0  ;;  %v1025_v26 = vld [vmem:[#allocation2 + $0xc8] sm:$0xff] }
 0x193   : > { %1579 = vst [vmem:[%s1880_s26 + $0x10] sm:$0xff] %v1511_v8   ;;  %v1526_v27 = vpack.c.bf16 %v1049_v15, %v1048_v10  ;;  %v1531_v28 = vpack.c.bf16 %v1051_v17, %v1050_v16  ;;  %v1055_v29 = vmax.f32 %v1023_v20, 0.0  ;;  %v1056_v30 = vmax.f32 %v1024_v25, 0.0  ;;  %v1026_v31 = vld [vmem:[#allocation2 + $0xe0] sm:$0xff]  ;;  %v1027_v32 = vld [vmem:[#allocation2 + $0x90] sm:$0xff]  ;;  %v1030_v39 = vld [vmem:[#allocation2 + $0xa8] sm:$0xff] }
 0x194   : > { %v1028_v33 = vld [vmem:[#allocation2 + $0x70] sm:$0xff]  ;;  %1580 = vst [vmem:[%s1880_s26 + $0x18] sm:$0xff] %v1516_v14   ;;  %v1536_v34 = vpack.c.bf16 %v1053_v23, %v1052_v22  ;;  %v1057_v35 = vmax.f32 %v1025_v26, 0.0  ;;  %v1058_v36 = vmax.f32 %v1026_v31, 0.0  ;;  %v1059_v37 = vmax.f32 %v1027_v32, 0.0  ;;  %v1029_v38 = vld [vmem:[#allocation2 + $0xc0] sm:$0xff] }
 0x195   : > { %1581 = vst [vmem:[%s1880_s26 + $0x20] sm:$0xff] %v1521_v21   ;;  %v1541_v40 = vpack.c.bf16 %v1055_v29, %v1054_v24  ;;  %v1060_v41 = vmax.f32 %v1028_v33, 0.0  ;;  %v1061_v42 = vmax.f32 %v1029_v38, 0.0  ;;  %v1031_v43 = vld [vmem:[#allocation2 + $0xd0] sm:$0xff]  ;;  %v1062_v44 = vmax.f32 %v1030_v39, 0.0  ;;  %v1033_v48 = vld [vmem:[#allocation2 + $0x28] sm:$0xff] }
 0x196   : > { %v1032_v45 = vld [vmem:[#allocation2 + $0x10] sm:$0xff]  ;;  %1582 = vst [vmem:[%s1880_s26 + $0x28] sm:$0xff] %v1526_v27   ;;  %v1546_v46 = vpack.c.bf16 %v1057_v35, %v1056_v30  ;;  %v1063_v47 = vmax.f32 %v1031_v43, 0.0  ;;  %v1034_v50 = vld [vmem:[#allocation2 + $0xa0] sm:$0xff]  ;;  %v1035_v51 = vld [vmem:[#allocation2 + $0xf8] sm:$0xff]  ;;  %v1551_v52 = vpack.c.bf16 %v1059_v37, %v1058_v36  ;;  %v1065_v53 = vmax.f32 %v1033_v48, 0.0 }
 0x197   : > { %v1064_v49 = vmax.f32 %v1032_v45, 0.0  ;;  %1583 = vst [vmem:[%s1880_s26 + $0x30] sm:$0xff] %v1531_v28   ;;  %v1066_v54 = vmax.f32 %v1034_v50, 0.0  ;;  %v1067_v55 = vmax.f32 %v1035_v51, 0.0  ;;  %v1036_v56 = vld [vmem:[#allocation2 + $0x20] sm:$0xff]  ;;  %v1037_v57 = vld [vmem:[#allocation2 + $0x98] sm:$0xff]  ;;  %v1556_v58 = vpack.c.bf16 %v1061_v42, %v1060_v41 }
 0x198   : > { %1584 = vst [vmem:[%s1880_s26 + $0x38] sm:$0xff] %v1536_v34   ;;  %v1068_v59 = vmax.f32 %v1036_v56, 0.0  ;;  %v1069_v60 = vmax.f32 %v1037_v57, 0.0  ;;  %v1561_v61 = vpack.c.bf16 %v1063_v47, %v1062_v44 }
 0x199   : > { %1585 = vst [vmem:[%s1880_s26 + $0x40] sm:$0xff] %v1541_v40   ;;  %v1566_v62 = vpack.c.bf16 %v1065_v53, %v1064_v49  ;;  %v1571_v63 = vpack.c.bf16 %v1067_v55, %v1066_v54 }
 0x19a   : > { %1586 = vst [vmem:[%s1880_s26 + $0x48] sm:$0xff] %v1546_v46   ;;  %v1576_v0 = vpack.c.bf16 %v1069_v60, %v1068_v59 }
 0x19b   : > { %1587 = vst [vmem:[%s1880_s26 + $0x50] sm:$0xff] %v1551_v52  }
 0x19c   : > { %1588 = vst [vmem:[%s1880_s26 + $0x58] sm:$0xff] %v1556_v58  }
 0x19d   : > { %1589 = vst [vmem:[%s1880_s26 + $0x60] sm:$0xff] %v1561_v61  }
 0x19e   : > { %1590 = vst [vmem:[%s1880_s26 + $0x68] sm:$0xff] %v1566_v62  }
 0x19f   : > { %1591 = vst [vmem:[%s1880_s26 + $0x70] sm:$0xff] %v1571_v63  }
 0x1a0   : > { %1592 = vst [vmem:[%s1880_s26 + $0x78] sm:$0xff] %v1576_v0  }
 0x1a1 PF: > { %s12_s15 = sadd.s32 1, %s1721_s15   ;;  %s2006_s9 = smov %s1701_s10 }
 0x1a2   : > { %p9_p0 = scmp.ge.s32.totalorder %s12_s15, 182   ;;  %s2007_s10 = smov %s1790_s22 }
 0x1a3   : > { %s2008_s11 = smov %s1713_s13  ;;  %s2009_s12 = smov %s1717_s14 }
 0x1a4   : > { %s2010_s13 = smov %s2013_s16  ;;  %s2011_s14 = smov %s2017_s17 }
 0x1a5   :  { %11 = sbr.rel (!%p9_p0) target bundleno = 4 (0x4), region = 112 }

// kernel: decoder_conv_up.10
= control target key start
LH: loop header
LB: loop body
LE: loop exit
PB: predicated region body
PF: predicated region fallthrough
CT: control target
= control target key end

     0   :  { %s1739_s9 = smov 0   ;;  %s1741_s10 = smov 0   ;;  %s2003_s0 = inlined_call_operand.vmem [shape: bf16[2048,2304], index: 0, kind: input, shape index: {}]   ;;  %s2004_s1 = inlined_call_operand.vmem [shape: bf16[2304,128], index: 1, kind: input, shape index: {}]   ;;  %s2005_s2 = inlined_call_operand.vmem [shape: bf16[2048,128], index: 2, kind: output, shape index: {}]  }
   0x1   :  { %s1743_s11 = smov 0   ;;  %s1745_s12 = smov 0  }
   0x2   :  { %s1747_s13 = smov 0   ;;  %s1749_s14 = smov 0  }
   0x3   :  { %s1751_s15 = smov 0  }
   0x4 LB: > { %s24_s16 = sadd.s32 1, %s1713_s13  ;;  %s31_s17 = sadd.s32 1, %s1717_s14  ;;  %s1721_s15 = sphi %s1751_s15, %s12_s15   ;;  %s1717_s14 = sphi %s1749_s14, %s2011_s14   ;;  %s1713_s13 = sphi %s1747_s13, %s2010_s13   ;;  %s1709_s12 = sphi %s1745_s12, %s2009_s12   ;;  %s1705_s11 = sphi %s1743_s11, %s2008_s11   ;;  %s1701_s10 = sphi %s1741_s10, %s2007_s10   ;;  %s1697_s9 = sphi %s1739_s9, %s2006_s9  }
   0x5   : > { %p25_p0 = scmp.ge.s32.totalorder %s24_s16, 9  ;;  %p47_p1 = scmp.ne.s32.totalorder %s1701_s10, %s1697_s9 }
   0x6   : > { %p48_p2 = scmp.eq.s32.totalorder %s1721_s15, 0  ;;  %s40_s21 = sadd.s32 1, %s1701_s10 }
   0x7   : > { %s2013_s16 = smov (%p25_p0, %s24_s16), 0  ;;  %s2015_s17 = smov (!%p25_p0, %s31_s17), %s1717_s14 }
   0x8   : > { %p49_p3 = por %p48_p2, %p47_p1  ;;  %p33_p4 = scmp.ge.s32.totalorder %s2015_s17, 8 }
   0x9   : > { %s36_s18 = ssub.s32 %s1713_s13, %s2013_s16  ;;  %p1242_p6 = scmp.ge.s32.totalorder %s1721_s15, 72 }
   0xa   : > { %s2017_s17 = smov (%p33_p4, %s2015_s17), 0 }
   0xb   : > { %s35_s19 = ssub.s32 %s1717_s14, %s2017_s17  ;;  %129 = sbr.rel (%p1242_p6) target bundleno = 56 (0x38), region = 16 }
   0xc   : > { %s37_s20 = sor.u32 %s36_s18, %s35_s19 }
   0xd   : > { %p38_p5 = scmp.eq.s32.totalorder %s37_s20, 0 }
   0xf   : > { %s1790_s22 = scalar_select %p38_p5, %s1701_s10, %s40_s21  }
  0x10   : > { %132 = sbr.rel (!%p49_p3) target bundleno = 56 (0x38), region = 20  ;;  %s134_s23 = sand.u32 (%p49_p3), 1, %s1701_s10  }
  0x11   : > { %s1245_s24 = sshll.u32 (%p49_p3), %s1713_s13, 1  ;;  %s1243_s25 = sshll.u32 (%p49_p3), %s134_s23, 8 }
  0x12   : > { %s1609_s26 = smul.u32 (%p49_p3), 576, %s1717_s14  ;;  %s1804_s4 = scalar_lea.vmem (%p49_p3), [#allocation3], %s1243_s25 }
  0x14   : > { %s140_s27 = sadd.s32 (%p49_p3), %s1609_s26, %s1245_s24 }
  0x15   : > { %s1247_s28 = sshll.u32 %s140_s27, 2 }
  0x16   : > { %s1799_s3 = scalar_lea.vmem %s2003_s0, %s1247_s28 }
  0x17   : > { %v233_v0 = vld [vmem:[%s1799_s3] sm:$0xff]  ;;  %v235_v1 = vld [vmem:[%s1799_s3 + $0x48] sm:$0xff]  ;;  %v237_v2 = vld [vmem:[%s1799_s3 + $0x90] sm:$0xff] }
  0x18   : > { %234 = vst [vmem:[%s1804_s4] sm:$0xff] %v233_v0  ;;  %v239_v3 = vld [vmem:[%s1799_s3 + $0xd8] sm:$0xff]  ;;  %v241_v4 = vld [vmem:[%s1799_s3 + $0x120] sm:$0xff]  ;;  %v243_v5 = vld [vmem:[%s1799_s3 + $0x168] sm:$0xff] }
  0x19   : > { %236 = vst [vmem:[%s1804_s4 + $0x8] sm:$0xff] %v235_v1  ;;  %v245_v6 = vld [vmem:[%s1799_s3 + $0x1b0] sm:$0xff]  ;;  %v247_v7 = vld [vmem:[%s1799_s3 + $0x1f8] sm:$0xff]  ;;  %v249_v8 = vld [vmem:[%s1799_s3 + $0x240] sm:$0xff] }
  0x1a   : > { %238 = vst [vmem:[%s1804_s4 + $0x10] sm:$0xff] %v237_v2  ;;  %v251_v9 = vld [vmem:[%s1799_s3 + $0x288] sm:$0xff]  ;;  %v253_v10 = vld [vmem:[%s1799_s3 + $0x2d0] sm:$0xff]  ;;  %v255_v11 = vld [vmem:[%s1799_s3 + $0x318] sm:$0xff] }
  0x1b   : > { %240 = vst [vmem:[%s1804_s4 + $0x18] sm:$0xff] %v239_v3  ;;  %v257_v12 = vld [vmem:[%s1799_s3 + $0x360] sm:$0xff]  ;;  %v259_v13 = vld [vmem:[%s1799_s3 + $0x3a8] sm:$0xff]  ;;  %v261_v14 = vld [vmem:[%s1799_s3 + $0x3f0] sm:$0xff] }
  0x1c   : > { %242 = vst [vmem:[%s1804_s4 + $0x20] sm:$0xff] %v241_v4  ;;  %v263_v15 = vld [vmem:[%s1799_s3 + $0x438] sm:$0xff]  ;;  %v265_v16 = vld [vmem:[%s1799_s3 + $0x480] sm:$0xff]  ;;  %v267_v17 = vld [vmem:[%s1799_s3 + $0x4c8] sm:$0xff] }
  0x1d   : > { %244 = vst [vmem:[%s1804_s4 + $0x28] sm:$0xff] %v243_v5  ;;  %v269_v18 = vld [vmem:[%s1799_s3 + $0x510] sm:$0xff]  ;;  %v271_v19 = vld [vmem:[%s1799_s3 + $0x558] sm:$0xff]  ;;  %v273_v20 = vld [vmem:[%s1799_s3 + $0x5a0] sm:$0xff] }
  0x1e   : > { %246 = vst [vmem:[%s1804_s4 + $0x30] sm:$0xff] %v245_v6  ;;  %v275_v21 = vld [vmem:[%s1799_s3 + $0x5e8] sm:$0xff]  ;;  %v277_v22 = vld [vmem:[%s1799_s3 + $0x630] sm:$0xff]  ;;  %v279_v23 = vld [vmem:[%s1799_s3 + $0x678] sm:$0xff] }
  0x1f   : > { %248 = vst [vmem:[%s1804_s4 + $0x38] sm:$0xff] %v247_v7  ;;  %v281_v24 = vld [vmem:[%s1799_s3 + $0x6c0] sm:$0xff]  ;;  %v283_v25 = vld [vmem:[%s1799_s3 + $0x708] sm:$0xff]  ;;  %v285_v26 = vld [vmem:[%s1799_s3 + $0x750] sm:$0xff] }
  0x20   : > { %250 = vst [vmem:[%s1804_s4 + $0x40] sm:$0xff] %v249_v8  ;;  %v287_v27 = vld [vmem:[%s1799_s3 + $0x798] sm:$0xff]  ;;  %v289_v28 = vld [vmem:[%s1799_s3 + $0x7e0] sm:$0xff]  ;;  %v291_v29 = vld [vmem:[%s1799_s3 + $0x828] sm:$0xff] }
  0x21   : > { %252 = vst [vmem:[%s1804_s4 + $0x48] sm:$0xff] %v251_v9  ;;  %v293_v30 = vld [vmem:[%s1799_s3 + $0x870] sm:$0xff]  ;;  %v295_v31 = vld [vmem:[%s1799_s3 + $0x8b8] sm:$0xff] }
  0x22   : > { %254 = vst [vmem:[%s1804_s4 + $0x50] sm:$0xff] %v253_v10 }
  0x23   : > { %256 = vst [vmem:[%s1804_s4 + $0x58] sm:$0xff] %v255_v11 }
  0x24   : > { %258 = vst [vmem:[%s1804_s4 + $0x60] sm:$0xff] %v257_v12 }
  0x25   : > { %260 = vst [vmem:[%s1804_s4 + $0x68] sm:$0xff] %v259_v13 }
  0x26   : > { %262 = vst [vmem:[%s1804_s4 + $0x70] sm:$0xff] %v261_v14 }
  0x27   : > { %264 = vst [vmem:[%s1804_s4 + $0x78] sm:$0xff] %v263_v15 }
  0x28   : > { %266 = vst [vmem:[%s1804_s4 + $0x80] sm:$0xff] %v265_v16 }
  0x29   : > { %268 = vst [vmem:[%s1804_s4 + $0x88] sm:$0xff] %v267_v17 }
  0x2a   : > { %270 = vst [vmem:[%s1804_s4 + $0x90] sm:$0xff] %v269_v18 }
  0x2b   : > { %272 = vst [vmem:[%s1804_s4 + $0x98] sm:$0xff] %v271_v19 }
  0x2c   : > { %274 = vst [vmem:[%s1804_s4 + $0xa0] sm:$0xff] %v273_v20 }
  0x2d   : > { %276 = vst [vmem:[%s1804_s4 + $0xa8] sm:$0xff] %v275_v21 }
  0x2e   : > { %278 = vst [vmem:[%s1804_s4 + $0xb0] sm:$0xff] %v277_v22 }
  0x2f   : > { %280 = vst [vmem:[%s1804_s4 + $0xb8] sm:$0xff] %v279_v23 }
  0x30   : > { %282 = vst [vmem:[%s1804_s4 + $0xc0] sm:$0xff] %v281_v24 }
  0x31   : > { %284 = vst [vmem:[%s1804_s4 + $0xc8] sm:$0xff] %v283_v25 }
  0x32   : > { %286 = vst [vmem:[%s1804_s4 + $0xd0] sm:$0xff] %v285_v26 }
  0x33   : > { %288 = vst [vmem:[%s1804_s4 + $0xd8] sm:$0xff] %v287_v27 }
  0x34   : > { %290 = vst [vmem:[%s1804_s4 + $0xe0] sm:$0xff] %v289_v28 }
  0x35   : > { %292 = vst [vmem:[%s1804_s4 + $0xe8] sm:$0xff] %v291_v29 }
  0x36   : > { %294 = vst [vmem:[%s1804_s4 + $0xf0] sm:$0xff] %v293_v30 }
  0x37   : > { %296 = vst [vmem:[%s1804_s4 + $0xf8] sm:$0xff] %v295_v31 }
  0x38 PF: > { %p1248_p7 = scmp.ge.s32.totalorder %s1721_s15, 1  ;;  %p313_p8 = scmp.lt.s32.totalorder %s1721_s15, 73 }
  0x3a   : > { %p314_p9 = pnand %p1248_p7, %p313_p8 }
  0x3b   : > { %s320_s5 = sand.u32 (!%p314_p9), 1, %s1697_s9   ;;  %s1250_s6 = sshll.u32 (!%p314_p9), %s1705_s11, 5 }
  0x3c   : > { %317 = sbr.rel (%p314_p9) target bundleno = 417 (0x1a1), region = 62  ;;  %s1249_s7 = sshll.u32 (!%p314_p9), %s320_s5, 8 }
  0x3d   : > { %p355_p10 = scmp.lt.s32.totalorder (!%p314_p9), %s1250_s6, 287  ;;  %s1252_s8 = sshll.u32 (!%p314_p9), %s1709_s12, 5 }
  0x3e   : > { %p364_p11 = scmp.lt.s32.totalorder (!%p314_p9), %s1252_s8, 255  ;;  %s1882_s9 = scalar_lea.vmem (!%p314_p9), [#allocation3], %s1249_s7 }
  0x3f   : > { %p1254_p12 = scmp.ne.s32.totalorder (!%p314_p9), %s1705_s11, 0 }
  0x41   : > { %s2019_s6 = smov (!%p355_p10, %s1250_s6), 287  ;;  %s2021_s8 = smov (!%p364_p11, %s1252_s8), 255 }
  0x42   : > { %s1251_s18 = sshll.u32 %s2019_s6, 2  ;;  %s1253_s23 = sshll.u32 %s2021_s8, 2 }
  0x43   : > { %s1875_s21 = scalar_lea.vmem %s2004_s1, %s1251_s18  ;;  %s1880_s26 = scalar_lea.vmem %s2005_s2, %s1253_s23 }
  0x44   : > { %375 = sbr.rel (%p1254_p12) target bundleno = 106 (0x6a), region = 70 }
  0x49   : > { %v1723_v32 = vmov 0.0  }
  0x4a   : > { %376 = vst [vmem:[#allocation2 + $0xb0] sm:$0xff] %v1723_v32 }
  0x4b   : > { %377 = vst [vmem:[#allocation2] sm:$0xff] %v1723_v32 }
  0x4c   : > { %378 = vst [vmem:[#allocation2 + $0xd8] sm:$0xff] %v1723_v32 }
  0x4d   : > { %379 = vst [vmem:[#allocation2 + $0x18] sm:$0xff] %v1723_v32 }
  0x4e   : > { %380 = vst [vmem:[#allocation2 + $0x50] sm:$0xff] %v1723_v32 }
  0x4f   : > { %381 = vst [vmem:[#allocation2 + $0x68] sm:$0xff] %v1723_v32 }
  0x50   : > { %382 = vst [vmem:[#allocation2 + $0x30] sm:$0xff] %v1723_v32 }
  0x51   : > { %383 = vst [vmem:[#allocation2 + $0x48] sm:$0xff] %v1723_v32 }
  0x52   : > { %384 = vst [vmem:[#allocation2 + $0x80] sm:$0xff] %v1723_v32 }
  0x53   : > { %385 = vst [vmem:[#allocation2 + $0x88] sm:$0xff] %v1723_v32 }
  0x54   : > { %386 = vst [vmem:[#allocation2 + $0xe8] sm:$0xff] %v1723_v32 }
  0x55   : > { %387 = vst [vmem:[#allocation2 + $0xb8] sm:$0xff] %v1723_v32 }
  0x56   : > { %388 = vst [vmem:[#allocation2 + $0x60] sm:$0xff] %v1723_v32 }
  0x57   : > { %389 = vst [vmem:[#allocation2 + $0xf0] sm:$0xff] %v1723_v32 }
  0x58   : > { %390 = vst [vmem:[#allocation2 + $0x8] sm:$0xff] %v1723_v32 }
  0x59   : > { %391 = vst [vmem:[#allocation2 + $0x78] sm:$0xff] %v1723_v32 }
  0x5a   : > { %392 = vst [vmem:[#allocation2 + $0x38] sm:$0xff] %v1723_v32 }
  0x5b   : > { %393 = vst [vmem:[#allocation2 + $0x58] sm:$0xff] %v1723_v32 }
  0x5c   : > { %394 = vst [vmem:[#allocation2 + $0x40] sm:$0xff] %v1723_v32 }
  0x5d   : > { %395 = vst [vmem:[#allocation2 + $0xc8] sm:$0xff] %v1723_v32 }
  0x5e   : > { %396 = vst [vmem:[#allocation2 + $0xe0] sm:$0xff] %v1723_v32 }
  0x5f   : > { %397 = vst [vmem:[#allocation2 + $0x90] sm:$0xff] %v1723_v32 }
  0x60   : > { %398 = vst [vmem:[#allocation2 + $0x70] sm:$0xff] %v1723_v32 }
  0x61   : > { %399 = vst [vmem:[#allocation2 + $0xc0] sm:$0xff] %v1723_v32 }
  0x62   : > { %400 = vst [vmem:[#allocation2 + $0xa8] sm:$0xff] %v1723_v32 }
  0x63   : > { %401 = vst [vmem:[#allocation2 + $0xd0] sm:$0xff] %v1723_v32 }
  0x64   : > { %402 = vst [vmem:[#allocation2 + $0x10] sm:$0xff] %v1723_v32 }
  0x65   : > { %403 = vst [vmem:[#allocation2 + $0x28] sm:$0xff] %v1723_v32 }
  0x66   : > { %404 = vst [vmem:[#allocation2 + $0xa0] sm:$0xff] %v1723_v32 }
  0x67   : > { %405 = vst [vmem:[#allocation2 + $0xf8] sm:$0xff] %v1723_v32 }
  0x68   : > { %406 = vst [vmem:[#allocation2 + $0x20] sm:$0xff] %v1723_v32 }
  0x69   : > { %407 = vst [vmem:[#allocation2 + $0x98] sm:$0xff] %v1723_v32 }
  0x6a PF: > { %v1489_v33 = vld [vmem:[%s1875_s21 + $0x38] sm:$0xff]  ;;  %v1488_v35 = vld [vmem:[%s1875_s21 + $0x30] sm:$0xff]  ;;  %v1487_v37 = vld [vmem:[%s1875_s21 + $0x28] sm:$0xff]  ;;  %p1447_p13 = scmp.ne.s32.totalorder %s1705_s11, 8 }
  0x6b   : > { %v1497_v34 = vld [vmem:[%s1875_s21 + $0x78] sm:$0xff]  ;;  %760 = vmatpush.bf16.msra.mxu0 %v1489_v33  ;;  %1593 = vmatpush.bf16.msra.mxu2 %v1489_v33  ;;  %v1496_v36 = vld [vmem:[%s1875_s21 + $0x70] sm:$0xff]  ;;  %v1495_v38 = vld [vmem:[%s1875_s21 + $0x68] sm:$0xff] }
  0x6c   : > { %849 = vmatpush.bf16.msra.mxu1 %v1497_v34  ;;  %1601 = vmatpush.bf16.msra.mxu3 %v1497_v34  ;;  %v1486_v39 = vld [vmem:[%s1875_s21 + $0x20] sm:$0xff]  ;;  %v1485_v41 = vld [vmem:[%s1875_s21 + $0x18] sm:$0xff]  ;;  %v1484_v43 = vld [vmem:[%s1875_s21 + $0x10] sm:$0xff] }
  0x6d   : > { %v1494_v40 = vld [vmem:[%s1875_s21 + $0x60] sm:$0xff]  ;;  %v1493_v42 = vld [vmem:[%s1875_s21 + $0x58] sm:$0xff]  ;;  %v1492_v44 = vld [vmem:[%s1875_s21 + $0x50] sm:$0xff] }
  0x6e   : > { %v1483_v45 = vld [vmem:[%s1875_s21 + $0x8] sm:$0xff]  ;;  %v1482_v47 = vld [vmem:[%s1875_s21] sm:$0xff]  ;;  %v1265_v61 = vld [vmem:[%s1882_s9 + $0x10] sm:$0xf] }
  0x6f   : > { %761 = vmatpush.bf16.msra.mxu0 %v1488_v35  ;;  %1594 = vmatpush.bf16.msra.mxu2 %v1488_v35  ;;  %v1491_v46 = vld [vmem:[%s1875_s21 + $0x48] sm:$0xff]  ;;  %v1490_v48 = vld [vmem:[%s1875_s21 + $0x40] sm:$0xff]  ;;  %v1453_v62 = vld [vmem:[%s1882_s9 + $0x14] sm:$0xf0] }
  0x70   : > { %850 = vmatpush.bf16.msra.mxu1 %v1496_v36  ;;  %1602 = vmatpush.bf16.msra.mxu3 %v1496_v36  ;;  %v1257_v49 = vld [vmem:[%s1882_s9] sm:$0xf]  ;;  %v1451_v50 = vld [vmem:[%s1882_s9 + $0x4] sm:$0xf0]  ;;  %v1450_v53 = vld [vmem:[%s1882_s9 + $0x4] sm:$0xf]  ;;  %v1266_v5 = vor.u32 %v1453_v62, %v1265_v61 }
  0x71   : > { %v1321_v51 = vld [vmem:[%s1882_s9 + $0x80] sm:$0xf]  ;;  %v1467_v52 = vld [vmem:[%s1882_s9 + $0x84] sm:$0xf0]  ;;  %v1259_v54 = vld [vmem:[%s1882_s9 + $0x8] sm:$0xf0]  ;;  %v1258_v57 = vor.u32 %v1451_v50, %v1257_v49 }
  0x72   : > { %v1466_v55 = vld [vmem:[%s1882_s9 + $0x84] sm:$0xf]  ;;  %v1323_v56 = vld [vmem:[%s1882_s9 + $0x88] sm:$0xf0]  ;;  %v1322_v58 = vor.u32 %v1467_v52, %v1321_v51  ;;  %v1262_v59 = vor.u32 %v1450_v53, %v1259_v54  ;;  %v1329_v63 = vld [vmem:[%s1882_s9 + $0x90] sm:$0xf] }
  0x73   : > { %762 = vmatpush.bf16.msra.mxu0 %v1487_v37  ;;  %1595 = vmatpush.bf16.msra.mxu2 %v1487_v37  ;;  %v1326_v60 = vor.u32 %v1466_v55, %v1323_v56  ;;  %v1469_v0 = vld [vmem:[%s1882_s9 + $0x94] sm:$0xf0]  ;;  %v1452_v1 = vld [vmem:[%s1882_s9 + $0x14] sm:$0xf]  ;;  %v1267_v2 = vld [vmem:[%s1882_s9 + $0x18] sm:$0xf0] }
  0x74   : > { %851 = vmatpush.bf16.msra.mxu1 %v1495_v38  ;;  %1603 = vmatpush.bf16.msra.mxu3 %v1495_v38  ;;  %v1468_v3 = vld [vmem:[%s1882_s9 + $0x94] sm:$0xf]  ;;  %v1331_v4 = vld [vmem:[%s1882_s9 + $0x98] sm:$0xf0]  ;;  %v1330_v6 = vor.u32 %v1469_v0, %v1329_v63  ;;  %v1270_v7 = vor.u32 %v1452_v1, %v1267_v2  ;;  %v1273_v9 = vld [vmem:[%s1882_s9 + $0x20] sm:$0xf] }
  0x75   : > { %v1334_v8 = vor.u32 %v1468_v3, %v1331_v4  ;;  %v1455_v10 = vld [vmem:[%s1882_s9 + $0x24] sm:$0xf0]  ;;  %v1337_v11 = vld [vmem:[%s1882_s9 + $0xa0] sm:$0xf]  ;;  %v1454_v13 = vld [vmem:[%s1882_s9 + $0x24] sm:$0xf] }
  0x76   : > { %v1471_v12 = vld [vmem:[%s1882_s9 + $0xa4] sm:$0xf0]  ;;  %v1275_v14 = vld [vmem:[%s1882_s9 + $0x28] sm:$0xf0]  ;;  %v1470_v15 = vld [vmem:[%s1882_s9 + $0xa4] sm:$0xf]  ;;  %v1274_v17 = vor.u32 %v1455_v10, %v1273_v9 }
  0x77   : > { %763 = vmatpush.bf16.msra.mxu0 %v1486_v39  ;;  %1596 = vmatpush.bf16.msra.mxu2 %v1486_v39  ;;  %v1339_v16 = vld [vmem:[%s1882_s9 + $0xa8] sm:$0xf0]  ;;  %v1338_v18 = vor.u32 %v1471_v12, %v1337_v11  ;;  %v1278_v19 = vor.u32 %v1454_v13, %v1275_v14  ;;  %v1281_v21 = vld [vmem:[%s1882_s9 + $0x30] sm:$0xf]  ;;  %v1457_v22 = vld [vmem:[%s1882_s9 + $0x34] sm:$0xf0] }
  0x78   : > { %852 = vmatpush.bf16.msra.mxu1 %v1494_v40  ;;  %1604 = vmatpush.bf16.msra.mxu3 %v1494_v40  ;;  %v1342_v20 = vor.u32 %v1470_v15, %v1339_v16  ;;  %v1345_v23 = vld [vmem:[%s1882_s9 + $0xb0] sm:$0xf]  ;;  %v1473_v24 = vld [vmem:[%s1882_s9 + $0xb4] sm:$0xf0]  ;;  %v1456_v25 = vld [vmem:[%s1882_s9 + $0x34] sm:$0xf]  ;;  %v1282_v29 = vor.u32 %v1457_v22, %v1281_v21 }
  0x79   : > { %v1283_v26 = vld [vmem:[%s1882_s9 + $0x38] sm:$0xf0]  ;;  %v1472_v27 = vld [vmem:[%s1882_s9 + $0xb4] sm:$0xf]  ;;  %v1346_v30 = vor.u32 %v1473_v24, %v1345_v23  ;;  %v1289_v33 = vld [vmem:[%s1882_s9 + $0x40] sm:$0xf] }
  0x7a   : > { %v1347_v28 = vld [vmem:[%s1882_s9 + $0xb8] sm:$0xf0]  ;;  %v1286_v31 = vor.u32 %v1456_v25, %v1283_v26  ;;  %v1459_v34 = vld [vmem:[%s1882_s9 + $0x44] sm:$0xf0]  ;;  %v1353_v35 = vld [vmem:[%s1882_s9 + $0xc0] sm:$0xf] }
  0x7b   : > { %764 = vmatpush.bf16.msra.mxu0 %v1485_v41  ;;  %1597 = vmatpush.bf16.msra.mxu2 %v1485_v41  ;;  %v1350_v32 = vor.u32 %v1472_v27, %v1347_v28  ;;  %v1475_v36 = vld [vmem:[%s1882_s9 + $0xc4] sm:$0xf0]  ;;  %v1458_v37 = vld [vmem:[%s1882_s9 + $0x44] sm:$0xf]  ;;  %v1291_v38 = vld [vmem:[%s1882_s9 + $0x48] sm:$0xf0]  ;;  %v1290_v41 = vor.u32 %v1459_v34, %v1289_v33 }
  0x7c   : > { %853 = vmatpush.bf16.msra.mxu1 %v1493_v42  ;;  %1605 = vmatpush.bf16.msra.mxu3 %v1493_v42  ;;  %v1474_v39 = vld [vmem:[%s1882_s9 + $0xc4] sm:$0xf]  ;;  %v1355_v40 = vld [vmem:[%s1882_s9 + $0xc8] sm:$0xf0]  ;;  %v1354_v42 = vor.u32 %v1475_v36, %v1353_v35  ;;  %v1460_v49 = vld [vmem:[%s1882_s9 + $0x54] sm:$0xf] }
  0x7d   : > { %v1299_v50 = vld [vmem:[%s1882_s9 + $0x58] sm:$0xf0]  ;;  %v1476_v51 = vld [vmem:[%s1882_s9 + $0xd4] sm:$0xf]  ;;  %v1462_v61 = vld [vmem:[%s1882_s9 + $0x64] sm:$0xf] }
  0x7e   : > { %v1363_v52 = vld [vmem:[%s1882_s9 + $0xd8] sm:$0xf0]  ;;  %v1302_v55 = vor.u32 %v1460_v49, %v1299_v50  ;;  %v1307_v62 = vld [vmem:[%s1882_s9 + $0x68] sm:$0xf0]  ;;  %v1478_v63 = vld [vmem:[%s1882_s9 + $0xe4] sm:$0xf] }
  0x7f   : > { %765 = vmatpush.bf16.msra.mxu0 %v1484_v43  ;;  %1598 = vmatpush.bf16.msra.mxu2 %v1484_v43  ;;  %v1294_v43 = vor.u32 %v1458_v37, %v1291_v38  ;;  %v1366_v56 = vor.u32 %v1476_v51, %v1363_v52  ;;  %v1371_v0 = vld [vmem:[%s1882_s9 + $0xe8] sm:$0xf0]  ;;  %v1310_v3 = vor.u32 %v1462_v61, %v1307_v62  ;;  %v1464_v9 = vld [vmem:[%s1882_s9 + $0x74] sm:$0xf]  ;;  %v1315_v10 = vld [vmem:[%s1882_s9 + $0x78] sm:$0xf0] }
  0x80   : > { %854 = vmatpush.bf16.msra.mxu1 %v1492_v44  ;;  %1606 = vmatpush.bf16.msra.mxu3 %v1492_v44  ;;  %v1358_v44 = vor.u32 %v1474_v39, %v1355_v40  ;;  %v1374_v4 = vor.u32 %v1478_v63, %v1371_v0  ;;  %v1480_v11 = vld [vmem:[%s1882_s9 + $0xf4] sm:$0xf]  ;;  %v1379_v12 = vld [vmem:[%s1882_s9 + $0xf8] sm:$0xf0]  ;;  %v1318_v15 = vor.u32 %v1464_v9, %v1315_v10  ;;  %v409_v27 = vld [vmem:[#allocation2] sm:$0xff] }
  0x81   : > { %v1382_v16 = vor.u32 %v1480_v11, %v1379_v12  ;;  %v424_v23 = vld [vmem:[#allocation2 + $0x38] sm:$0xff]  ;;  %v428_v63 = vld [vmem:[#allocation2 + $0xe0] sm:$0xff]  ;;  %v429_v9 = vld [vmem:[#allocation2 + $0x90] sm:$0xff] }
  0x82   : > { %v425_v33 = vld [vmem:[#allocation2 + $0x58] sm:$0xff] }
  0x83   : > { %766 = vmatpush.bf16.msra.mxu0 %v1483_v45  ;;  %1599 = vmatpush.bf16.msra.mxu2 %v1483_v45  ;;  %v1297_v45 = vld [vmem:[%s1882_s9 + $0x50] sm:$0xf]  ;;  %v410_v37 = vld [vmem:[#allocation2 + $0xd8] sm:$0xff] }
  0x84   : > { %855 = vmatpush.bf16.msra.mxu1 %v1491_v46  ;;  %1607 = vmatpush.bf16.msra.mxu3 %v1491_v46  ;;  %v1461_v46 = vld [vmem:[%s1882_s9 + $0x54] sm:$0xf0] }
  0x85   : > { %v1298_v53 = vor.u32 %v1461_v46, %v1297_v45 }
  0x87   : > { %767 = vmatpush.bf16.msra.mxu0 %v1482_v47  ;;  %1600 = vmatpush.bf16.msra.mxu2 %v1482_v47  ;;  %v1361_v47 = vld [vmem:[%s1882_s9 + $0xd0] sm:$0xf] }
  0x88   : > { %856 = vmatpush.bf16.msra.mxu1 %v1490_v48  ;;  %1608 = vmatpush.bf16.msra.mxu3 %v1490_v48  ;;  %v1477_v48 = vld [vmem:[%s1882_s9 + $0xd4] sm:$0xf0] }
  0x89   : > { %v1362_v54 = vor.u32 %v1477_v48, %v1361_v47  ;;  %v411_v47 = vld [vmem:[#allocation2 + $0x18] sm:$0xff] }
  0x8a   : > { %768 = vmatmul.bf16.vlgmr.msra.gmra.mxu0 %v1258_v57  ;;  %808 = vmatmul.bf16.vlgmr.msra.gmra.mxu2 %v1322_v58  ;;  %v1305_v57 = vld [vmem:[%s1882_s9 + $0x60] sm:$0xf]  ;;  %v1463_v58 = vld [vmem:[%s1882_s9 + $0x64] sm:$0xf0] }
  0x8b   : > { %857 = vmatmul.bf16.vlgmr.msra.gmra.mxu1 %v1262_v59  ;;  %897 = vmatmul.bf16.vlgmr.msra.gmra.mxu3 %v1326_v60  ;;  %v1369_v59 = vld [vmem:[%s1882_s9 + $0xe0] sm:$0xf]  ;;  %v1479_v60 = vld [vmem:[%s1882_s9 + $0xe4] sm:$0xf0]  ;;  %v1306_v1 = vor.u32 %v1463_v58, %v1305_v57  ;;  %v412_v57 = vld [vmem:[#allocation2 + $0x50] sm:$0xff] }
  0x8c   : > { %v1370_v2 = vor.u32 %v1479_v60, %v1369_v59 }
  0x9a   : > { %773 = vmatmul.bf16.gmra.mxu0 %v1266_v5  ;;  %813 = vmatmul.bf16.gmra.mxu2 %v1330_v6  ;;  %v1313_v5 = vld [vmem:[%s1882_s9 + $0x70] sm:$0xf]  ;;  %v1465_v6 = vld [vmem:[%s1882_s9 + $0x74] sm:$0xf0] }
  0x9b   : > { %862 = vmatmul.bf16.gmra.mxu1 %v1270_v7  ;;  %902 = vmatmul.bf16.gmra.mxu3 %v1334_v8  ;;  %v1377_v7 = vld [vmem:[%s1882_s9 + $0xf0] sm:$0xf]  ;;  %v1481_v8 = vld [vmem:[%s1882_s9 + $0xf4] sm:$0xf0]  ;;  %v1314_v13 = vor.u32 %v1465_v6, %v1313_v5 }
  0x9c   : > { %v1378_v14 = vor.u32 %v1481_v8, %v1377_v7 }
  0xaa   : > { %778 = vmatmul.bf16.gmra.mxu0 %v1274_v17  ;;  %818 = vmatmul.bf16.gmra.mxu2 %v1338_v18  ;;  %v408_v18 = vld [vmem:[#allocation2 + $0xb0] sm:$0xff] }
  0xab   : > { %867 = vmatmul.bf16.gmra.mxu1 %v1278_v19  ;;  %907 = vmatmul.bf16.gmra.mxu3 %v1342_v20 }
  0xba   : > { %783 = vmatmul.bf16.gmra.mxu0 %v1282_v29  ;;  %823 = vmatmul.bf16.gmra.mxu2 %v1346_v30 }
  0xbb   : > { %872 = vmatmul.bf16.gmra.mxu1 %v1286_v31  ;;  %912 = vmatmul.bf16.gmra.mxu3 %v1350_v32 }
  0xca   : > { %788 = vmatmul.bf16.gmra.mxu0 %v1290_v41  ;;  %828 = vmatmul.bf16.gmra.mxu2 %v1354_v42 }
  0xcb   : > { %877 = vmatmul.bf16.gmra.mxu1 %v1294_v43  ;;  %917 = vmatmul.bf16.gmra.mxu3 %v1358_v44  ;;  %v426_v43 = vld [vmem:[#allocation2 + $0x40] sm:$0xff] }
  0xda   : > { %793 = vmatmul.bf16.gmra.mxu0 %v1298_v53  ;;  %833 = vmatmul.bf16.gmra.mxu2 %v1362_v54  ;;  %v427_v53 = vld [vmem:[#allocation2 + $0xc8] sm:$0xff] }
  0xdb   : > { %882 = vmatmul.bf16.gmra.mxu1 %v1302_v55  ;;  %922 = vmatmul.bf16.gmra.mxu3 %v1366_v56 }
  0xea   : > { %798 = vmatmul.bf16.gmra.mxu0 %v1306_v1  ;;  %838 = vmatmul.bf16.gmra.mxu2 %v1370_v2 }
  0xeb   : > { %887 = vmatmul.bf16.gmra.mxu1 %v1310_v3  ;;  %927 = vmatmul.bf16.gmra.mxu3 %v1374_v4  ;;  %v413_v3 = vld [vmem:[#allocation2 + $0x68] sm:$0xff] }
  0xfa   : > { %803 = vmatmul.bf16.gmra.mxu0 %v1314_v13  ;;  %843 = vmatmul.bf16.gmra.mxu2 %v1378_v14  ;;  %v414_v13 = vld [vmem:[#allocation2 + $0x30] sm:$0xff] }
  0xfb   : > { %892 = vmatmul.bf16.gmra.mxu1 %v1318_v15  ;;  %932 = vmatmul.bf16.gmra.mxu3 %v1382_v16 }
 0x107   : > { %v769_v17 = vpop.f32.mrf.mxu0 }
 0x108   : > { %v858_v19 = vpop.f32.mrf.mxu1 }
 0x109   : > { %v859_v20 = vadd.f32 %v858_v19, %v769_v17  ;;  %v430_v19 = vld [vmem:[#allocation2 + $0x70] sm:$0xff] }
 0x10b   : > { %v938_v21 = vadd.f32 %v859_v20, %v408_v18 }
 0x10d   : > { %970 = vst [vmem:[#allocation2 + $0xb0] sm:$0xff] %v938_v21  ;;  %v809_v22 = vpop.f32.mrf.mxu2 }
 0x10e   : > { %v898_v24 = vpop.f32.mrf.mxu3 }
 0x10f   : > { %v899_v25 = vadd.f32 %v898_v24, %v809_v22  ;;  %v771_v26 = vpop.f32.mrf.mxu0 }
 0x110   : > { %v860_v28 = vpop.f32.mrf.mxu1 }
 0x111   : > { %v954_v29 = vadd.f32 %v899_v25, %v424_v23  ;;  %v861_v30 = vadd.f32 %v860_v28, %v771_v26  ;;  %v415_v23 = vld [vmem:[#allocation2 + $0x48] sm:$0xff] }
 0x113   : > { %986 = vst [vmem:[#allocation2 + $0x38] sm:$0xff] %v954_v29  ;;  %v939_v31 = vadd.f32 %v861_v30, %v409_v27  ;;  %v431_v29 = vld [vmem:[#allocation2 + $0xc0] sm:$0xff] }
 0x115   : > { %971 = vst [vmem:[#allocation2] sm:$0xff] %v939_v31  ;;  %v811_v32 = vpop.f32.mrf.mxu2 }
 0x116   : > { %v900_v34 = vpop.f32.mrf.mxu3 }
 0x117   : > { %v901_v35 = vadd.f32 %v900_v34, %v811_v32  ;;  %v774_v36 = vpop.f32.mrf.mxu0 }
 0x118   : > { %v863_v38 = vpop.f32.mrf.mxu1 }
 0x119   : > { %v955_v39 = vadd.f32 %v901_v35, %v425_v33  ;;  %v864_v40 = vadd.f32 %v863_v38, %v774_v36  ;;  %v416_v33 = vld [vmem:[#allocation2 + $0x80] sm:$0xff] }
 0x11b   : > { %987 = vst [vmem:[#allocation2 + $0x58] sm:$0xff] %v955_v39  ;;  %v940_v41 = vadd.f32 %v864_v40, %v410_v37  ;;  %v432_v39 = vld [vmem:[#allocation2 + $0xa8] sm:$0xff] }
 0x11d   : > { %972 = vst [vmem:[#allocation2 + $0xd8] sm:$0xff] %v940_v41  ;;  %v814_v42 = vpop.f32.mrf.mxu2 }
 0x11e   : > { %v903_v44 = vpop.f32.mrf.mxu3 }
 0x11f   : > { %v904_v45 = vadd.f32 %v903_v44, %v814_v42  ;;  %v776_v46 = vpop.f32.mrf.mxu0 }
 0x120   : > { %v865_v48 = vpop.f32.mrf.mxu1 }
 0x121   : > { %v956_v49 = vadd.f32 %v904_v45, %v426_v43  ;;  %v866_v50 = vadd.f32 %v865_v48, %v776_v46  ;;  %v417_v43 = vld [vmem:[#allocation2 + $0x88] sm:$0xff] }
 0x123   : > { %988 = vst [vmem:[#allocation2 + $0x40] sm:$0xff] %v956_v49  ;;  %v941_v51 = vadd.f32 %v866_v50, %v411_v47  ;;  %v433_v49 = vld [vmem:[#allocation2 + $0xd0] sm:$0xff] }
 0x125   : > { %973 = vst [vmem:[#allocation2 + $0x18] sm:$0xff] %v941_v51  ;;  %v816_v52 = vpop.f32.mrf.mxu2 }
 0x126   : > { %v905_v54 = vpop.f32.mrf.mxu3 }
 0x127   : > { %v906_v55 = vadd.f32 %v905_v54, %v816_v52  ;;  %v779_v56 = vpop.f32.mrf.mxu0 }
 0x128   : > { %v868_v58 = vpop.f32.mrf.mxu1 }
 0x129   : > { %v957_v59 = vadd.f32 %v906_v55, %v427_v53  ;;  %v869_v60 = vadd.f32 %v868_v58, %v779_v56  ;;  %v418_v53 = vld [vmem:[#allocation2 + $0xe8] sm:$0xff] }
 0x12b   : > { %989 = vst [vmem:[#allocation2 + $0xc8] sm:$0xff] %v957_v59  ;;  %v942_v61 = vadd.f32 %v869_v60, %v412_v57  ;;  %v434_v59 = vld [vmem:[#allocation2 + $0x10] sm:$0xff] }
 0x12d   : > { %974 = vst [vmem:[#allocation2 + $0x50] sm:$0xff] %v942_v61  ;;  %v819_v62 = vpop.f32.mrf.mxu2 }
 0x12e   : > { %v908_v0 = vpop.f32.mrf.mxu3 }
 0x12f   : > { %v909_v1 = vadd.f32 %v908_v0, %v819_v62  ;;  %v781_v2 = vpop.f32.mrf.mxu0 }
 0x130   : > { %v870_v4 = vpop.f32.mrf.mxu1 }
 0x131   : > { %v958_v5 = vadd.f32 %v909_v1, %v428_v63  ;;  %v871_v6 = vadd.f32 %v870_v4, %v781_v2  ;;  %v419_v63 = vld [vmem:[#allocation2 + $0xb8] sm:$0xff] }
 0x133   : > { %990 = vst [vmem:[#allocation2 + $0xe0] sm:$0xff] %v958_v5  ;;  %v943_v7 = vadd.f32 %v871_v6, %v413_v3  ;;  %v435_v5 = vld [vmem:[#allocation2 + $0x28] sm:$0xff] }
 0x135   : > { %975 = vst [vmem:[#allocation2 + $0x68] sm:$0xff] %v943_v7  ;;  %v821_v8 = vpop.f32.mrf.mxu2 }
 0x136   : > { %v910_v10 = vpop.f32.mrf.mxu3 }
 0x137   : > { %v911_v11 = vadd.f32 %v910_v10, %v821_v8  ;;  %v784_v12 = vpop.f32.mrf.mxu0 }
 0x138   : > { %v873_v14 = vpop.f32.mrf.mxu1 }
 0x139   : > { %v959_v15 = vadd.f32 %v911_v11, %v429_v9  ;;  %v874_v16 = vadd.f32 %v873_v14, %v784_v12  ;;  %v420_v9 = vld [vmem:[#allocation2 + $0x60] sm:$0xff] }
 0x13b   : > { %991 = vst [vmem:[#allocation2 + $0x90] sm:$0xff] %v959_v15  ;;  %v944_v17 = vadd.f32 %v874_v16, %v414_v13  ;;  %v436_v15 = vld [vmem:[#allocation2 + $0xa0] sm:$0xff] }
 0x13d   : > { %976 = vst [vmem:[#allocation2 + $0x30] sm:$0xff] %v944_v17  ;;  %v824_v18 = vpop.f32.mrf.mxu2 }
 0x13e   : > { %v913_v20 = vpop.f32.mrf.mxu3 }
 0x13f   : > { %v914_v21 = vadd.f32 %v913_v20, %v824_v18  ;;  %v786_v22 = vpop.f32.mrf.mxu0 }
 0x140   : > { %v875_v24 = vpop.f32.mrf.mxu1 }
 0x141   : > { %v960_v25 = vadd.f32 %v914_v21, %v430_v19  ;;  %v876_v26 = vadd.f32 %v875_v24, %v786_v22  ;;  %v421_v19 = vld [vmem:[#allocation2 + $0xf0] sm:$0xff] }
 0x143   : > { %992 = vst [vmem:[#allocation2 + $0x70] sm:$0xff] %v960_v25  ;;  %v945_v27 = vadd.f32 %v876_v26, %v415_v23  ;;  %v437_v25 = vld [vmem:[#allocation2 + $0xf8] sm:$0xff] }
 0x145   : > { %977 = vst [vmem:[#allocation2 + $0x48] sm:$0xff] %v945_v27  ;;  %v826_v28 = vpop.f32.mrf.mxu2 }
 0x146   : > { %v915_v30 = vpop.f32.mrf.mxu3 }
 0x147   : > { %v916_v31 = vadd.f32 %v915_v30, %v826_v28  ;;  %v789_v32 = vpop.f32.mrf.mxu0 }
 0x148   : > { %v878_v34 = vpop.f32.mrf.mxu1 }
 0x149   : > { %v961_v35 = vadd.f32 %v916_v31, %v431_v29  ;;  %v879_v36 = vadd.f32 %v878_v34, %v789_v32  ;;  %v422_v29 = vld [vmem:[#allocation2 + $0x8] sm:$0xff] }
 0x14b   : > { %993 = vst [vmem:[#allocation2 + $0xc0] sm:$0xff] %v961_v35  ;;  %v946_v37 = vadd.f32 %v879_v36, %v416_v33  ;;  %v438_v35 = vld [vmem:[#allocation2 + $0x20] sm:$0xff] }
 0x14d   : > { %978 = vst [vmem:[#allocation2 + $0x80] sm:$0xff] %v946_v37  ;;  %v829_v38 = vpop.f32.mrf.mxu2 }
 0x14e   : > { %v918_v40 = vpop.f32.mrf.mxu3 }
 0x14f   : > { %v919_v41 = vadd.f32 %v918_v40, %v829_v38  ;;  %v791_v42 = vpop.f32.mrf.mxu0 }
 0x150   : > { %v880_v44 = vpop.f32.mrf.mxu1 }
 0x151   : > { %v962_v45 = vadd.f32 %v919_v41, %v432_v39  ;;  %v881_v46 = vadd.f32 %v880_v44, %v791_v42  ;;  %v423_v39 = vld [vmem:[#allocation2 + $0x78] sm:$0xff] }
 0x153   : > { %994 = vst [vmem:[#allocation2 + $0xa8] sm:$0xff] %v962_v45  ;;  %v947_v47 = vadd.f32 %v881_v46, %v417_v43  ;;  %v439_v45 = vld [vmem:[#allocation2 + $0x98] sm:$0xff] }
 0x155   : > { %979 = vst [vmem:[#allocation2 + $0x88] sm:$0xff] %v947_v47  ;;  %v831_v48 = vpop.f32.mrf.mxu2 }
 0x156   : > { %v920_v50 = vpop.f32.mrf.mxu3 }
 0x157   : > { %v921_v51 = vadd.f32 %v920_v50, %v831_v48  ;;  %v794_v52 = vpop.f32.mrf.mxu0 }
 0x158   : > { %v883_v54 = vpop.f32.mrf.mxu1 }
 0x159   : > { %v963_v55 = vadd.f32 %v921_v51, %v433_v49  ;;  %v884_v56 = vadd.f32 %v883_v54, %v794_v52 }
 0x15b   : > { %995 = vst [vmem:[#allocation2 + $0xd0] sm:$0xff] %v963_v55  ;;  %v948_v57 = vadd.f32 %v884_v56, %v418_v53 }
 0x15d   : > { %980 = vst [vmem:[#allocation2 + $0xe8] sm:$0xff] %v948_v57  ;;  %v834_v58 = vpop.f32.mrf.mxu2 }
 0x15e   : > { %v923_v60 = vpop.f32.mrf.mxu3 }
 0x15f   : > { %v924_v61 = vadd.f32 %v923_v60, %v834_v58  ;;  %v796_v62 = vpop.f32.mrf.mxu0 }
 0x160   : > { %v885_v0 = vpop.f32.mrf.mxu1 }
 0x161   : > { %v964_v1 = vadd.f32 %v924_v61, %v434_v59  ;;  %v886_v2 = vadd.f32 %v885_v0, %v796_v62 }
 0x163   : > { %996 = vst [vmem:[#allocation2 + $0x10] sm:$0xff] %v964_v1  ;;  %v949_v3 = vadd.f32 %v886_v2, %v419_v63 }
 0x165   : > { %981 = vst [vmem:[#allocation2 + $0xb8] sm:$0xff] %v949_v3  ;;  %v836_v4 = vpop.f32.mrf.mxu2 }
 0x166   : > { %v925_v6 = vpop.f32.mrf.mxu3 }
 0x167   : > { %v926_v7 = vadd.f32 %v925_v6, %v836_v4  ;;  %v799_v8 = vpop.f32.mrf.mxu0 }
 0x168   : > { %v888_v10 = vpop.f32.mrf.mxu1 }
 0x169   : > { %v965_v11 = vadd.f32 %v926_v7, %v435_v5  ;;  %v889_v12 = vadd.f32 %v888_v10, %v799_v8 }
 0x16b   : > { %997 = vst [vmem:[#allocation2 + $0x28] sm:$0xff] %v965_v11  ;;  %v950_v13 = vadd.f32 %v889_v12, %v420_v9 }
 0x16d   : > { %982 = vst [vmem:[#allocation2 + $0x60] sm:$0xff] %v950_v13  ;;  %v839_v14 = vpop.f32.mrf.mxu2 }
 0x16e   : > { %v928_v16 = vpop.f32.mrf.mxu3 }
 0x16f   : > { %v929_v17 = vadd.f32 %v928_v16, %v839_v14  ;;  %v801_v18 = vpop.f32.mrf.mxu0 }
 0x170   : > { %v890_v20 = vpop.f32.mrf.mxu1 }
 0x171   : > { %v966_v21 = vadd.f32 %v929_v17, %v436_v15  ;;  %v891_v22 = vadd.f32 %v890_v20, %v801_v18 }
 0x173   : > { %998 = vst [vmem:[#allocation2 + $0xa0] sm:$0xff] %v966_v21  ;;  %v951_v23 = vadd.f32 %v891_v22, %v421_v19 }
 0x175   : > { %983 = vst [vmem:[#allocation2 + $0xf0] sm:$0xff] %v951_v23  ;;  %v841_v24 = vpop.f32.mrf.mxu2 }
 0x176   : > { %v930_v26 = vpop.f32.mrf.mxu3 }
 0x177   : > { %v931_v27 = vadd.f32 %v930_v26, %v841_v24  ;;  %v804_v28 = vpop.f32.mrf.mxu0 }
 0x178   : > { %v893_v30 = vpop.f32.mrf.mxu1 }
 0x179   : > { %v967_v31 = vadd.f32 %v931_v27, %v437_v25  ;;  %v894_v32 = vadd.f32 %v893_v30, %v804_v28 }
 0x17b   : > { %999 = vst [vmem:[#allocation2 + $0xf8] sm:$0xff] %v967_v31  ;;  %v952_v33 = vadd.f32 %v894_v32, %v422_v29 }
 0x17d   : > { %984 = vst [vmem:[#allocation2 + $0x8] sm:$0xff] %v952_v33  ;;  %v844_v34 = vpop.f32.mrf.mxu2 }
 0x17e   : > { %v933_v36 = vpop.f32.mrf.mxu3 }
 0x17f   : > { %v934_v37 = vadd.f32 %v933_v36, %v844_v34  ;;  %v806_v38 = vpop.f32.mrf.mxu0 }
 0x180   : > { %v895_v40 = vpop.f32.mrf.mxu1 }
 0x181   : > { %v968_v41 = vadd.f32 %v934_v37, %v438_v35  ;;  %v896_v42 = vadd.f32 %v895_v40, %v806_v38 }
 0x183   : > { %1000 = vst [vmem:[#allocation2 + $0x20] sm:$0xff] %v968_v41  ;;  %v953_v43 = vadd.f32 %v896_v42, %v423_v39 }
 0x185   : > { %985 = vst [vmem:[#allocation2 + $0x78] sm:$0xff] %v953_v43  ;;  %v846_v44 = vpop.f32.mrf.mxu2 }
 0x186   : > { %v935_v46 = vpop.f32.mrf.mxu3 }
 0x187   : > { %v936_v47 = vadd.f32 %v935_v46, %v846_v44  ;;  %1005 = sbr.rel (%p1447_p13) target bundleno = 417 (0x1a1), region = 74 }
 0x189   : > { %v969_v48 = vadd.f32 %v936_v47, %v439_v45 }
 0x18b   : > { %1001 = vst [vmem:[#allocation2 + $0x98] sm:$0xff] %v969_v48 }
 0x18c   : > { %v1006_v49 = vld [vmem:[#allocation2 + $0xb0] sm:$0xff]  ;;  %v1007_v50 = vld [vmem:[#allocation2] sm:$0xff]  ;;  %v1008_v51 = vld [vmem:[#allocation2 + $0xd8] sm:$0xff] }
 0x18d   : > { %v1038_v52 = vmax.f32 %v1006_v49, 0.0  ;;  %v1039_v53 = vmax.f32 %v1007_v50, 0.0  ;;  %v1009_v54 = vld [vmem:[#allocation2 + $0x18] sm:$0xff]  ;;  %v1040_v55 = vmax.f32 %v1008_v51, 0.0  ;;  %v1010_v56 = vld [vmem:[#allocation2 + $0x50] sm:$0xff]  ;;  %v1011_v57 = vld [vmem:[#allocation2 + $0x68] sm:$0xff] }
 0x18e   : > { %v1041_v58 = vmax.f32 %v1009_v54, 0.0  ;;  %v1042_v59 = vmax.f32 %v1010_v56, 0.0  ;;  %v1043_v60 = vmax.f32 %v1011_v57, 0.0  ;;  %v1012_v61 = vld [vmem:[#allocation2 + $0x30] sm:$0xff]  ;;  %v1013_v62 = vld [vmem:[#allocation2 + $0x48] sm:$0xff]  ;;  %v1014_v63 = vld [vmem:[#allocation2 + $0x80] sm:$0xff] }
 0x18f   : > { %v1501_v0 = vpack.c.bf16 %v1039_v53, %v1038_v52  ;;  %v1044_v1 = vmax.f32 %v1012_v61, 0.0  ;;  %v1045_v2 = vmax.f32 %v1013_v62, 0.0  ;;  %v1015_v3 = vld [vmem:[#allocation2 + $0x88] sm:$0xff]  ;;  %v1046_v4 = vmax.f32 %v1014_v63, 0.0  ;;  %v1017_v6 = vld [vmem:[#allocation2 + $0xb8] sm:$0xff]  ;;  %v1018_v11 = vld [vmem:[#allocation2 + $0x60] sm:$0xff] }
 0x190   : > { %v1016_v5 = vld [vmem:[#allocation2 + $0xe8] sm:$0xff]  ;;  %v1506_v7 = vpack.c.bf16 %v1041_v58, %v1040_v55  ;;  %v1511_v8 = vpack.c.bf16 %v1043_v60, %v1042_v59  ;;  %v1047_v9 = vmax.f32 %v1015_v3, 0.0  ;;  %v1019_v12 = vld [vmem:[#allocation2 + $0xf0] sm:$0xff]  ;;  %v1049_v15 = vmax.f32 %v1017_v6, 0.0  ;;  %v1021_v18 = vld [vmem:[#allocation2 + $0x78] sm:$0xff] }
 0x191   : > { %v1048_v10 = vmax.f32 %v1016_v5, 0.0  ;;  %v1020_v13 = vld [vmem:[#allocation2 + $0x8] sm:$0xff]  ;;  %1502 = vst [vmem:[%s1880_s26] sm:$0xff] %v1501_v0   ;;  %v1516_v14 = vpack.c.bf16 %v1045_v2, %v1044_v1  ;;  %v1050_v16 = vmax.f32 %v1018_v11, 0.0  ;;  %v1051_v17 = vmax.f32 %v1019_v12, 0.0  ;;  %v1022_v19 = vld [vmem:[#allocation2 + $0x38] sm:$0xff]  ;;  %v1024_v25 = vld [vmem:[#allocation2 + $0x40] sm:$0xff] }
 0x192   : > { %v1023_v20 = vld [vmem:[#allocation2 + $0x58] sm:$0xff]  ;;  %1578 = vst [vmem:[%s1880_s26 + $0x8] sm:$0xff] %v1506_v7   ;;  %v1521_v21 = vpack.c.bf16 %v1047_v9, %v1046_v4  ;;  %v1052_v22 = vmax.f32 %v1020_v13, 0.0  ;;  %v1053_v23 = vmax.f32 %v1021_v18, 0.0  ;;  %v1054_v24 = vmax.f32 %v1022_v19, 0.0  ;;  %v1025_v26 = vld [vmem:[#allocation2 + $0xc8] sm:$0xff] }
 0x193   : > { %1579 = vst [vmem:[%s1880_s26 + $0x10] sm:$0xff] %v1511_v8   ;;  %v1526_v27 = vpack.c.bf16 %v1049_v15, %v1048_v10  ;;  %v1531_v28 = vpack.c.bf16 %v1051_v17, %v1050_v16  ;;  %v1055_v29 = vmax.f32 %v1023_v20, 0.0  ;;  %v1056_v30 = vmax.f32 %v1024_v25, 0.0  ;;  %v1026_v31 = vld [vmem:[#allocation2 + $0xe0] sm:$0xff]  ;;  %v1027_v32 = vld [vmem:[#allocation2 + $0x90] sm:$0xff]  ;;  %v1030_v39 = vld [vmem:[#allocation2 + $0xa8] sm:$0xff] }
 0x194   : > { %v1028_v33 = vld [vmem:[#allocation2 + $0x70] sm:$0xff]  ;;  %1580 = vst [vmem:[%s1880_s26 + $0x18] sm:$0xff] %v1516_v14   ;;  %v1536_v34 = vpack.c.bf16 %v1053_v23, %v1052_v22  ;;  %v1057_v35 = vmax.f32 %v1025_v26, 0.0  ;;  %v1058_v36 = vmax.f32 %v1026_v31, 0.0  ;;  %v1059_v37 = vmax.f32 %v1027_v32, 0.0  ;;  %v1029_v38 = vld [vmem:[#allocation2 + $0xc0] sm:$0xff] }
 0x195   : > { %1581 = vst [vmem:[%s1880_s26 + $0x20] sm:$0xff] %v1521_v21   ;;  %v1541_v40 = vpack.c.bf16 %v1055_v29, %v1054_v24  ;;  %v1060_v41 = vmax.f32 %v1028_v33, 0.0  ;;  %v1061_v42 = vmax.f32 %v1029_v38, 0.0  ;;  %v1031_v43 = vld [vmem:[#allocation2 + $0xd0] sm:$0xff]  ;;  %v1062_v44 = vmax.f32 %v1030_v39, 0.0  ;;  %v1033_v48 = vld [vmem:[#allocation2 + $0x28] sm:$0xff] }
 0x196   : > { %v1032_v45 = vld [vmem:[#allocation2 + $0x10] sm:$0xff]  ;;  %1582 = vst [vmem:[%s1880_s26 + $0x28] sm:$0xff] %v1526_v27   ;;  %v1546_v46 = vpack.c.bf16 %v1057_v35, %v1056_v30  ;;  %v1063_v47 = vmax.f32 %v1031_v43, 0.0  ;;  %v1034_v50 = vld [vmem:[#allocation2 + $0xa0] sm:$0xff]  ;;  %v1035_v51 = vld [vmem:[#allocation2 + $0xf8] sm:$0xff]  ;;  %v1551_v52 = vpack.c.bf16 %v1059_v37, %v1058_v36  ;;  %v1065_v53 = vmax.f32 %v1033_v48, 0.0 }
 0x197   : > { %v1064_v49 = vmax.f32 %v1032_v45, 0.0  ;;  %1583 = vst [vmem:[%s1880_s26 + $0x30] sm:$0xff] %v1531_v28   ;;  %v1066_v54 = vmax.f32 %v1034_v50, 0.0  ;;  %v1067_v55 = vmax.f32 %v1035_v51, 0.0  ;;  %v1036_v56 = vld [vmem:[#allocation2 + $0x20] sm:$0xff]  ;;  %v1037_v57 = vld [vmem:[#allocation2 + $0x98] sm:$0xff]  ;;  %v1556_v58 = vpack.c.bf16 %v1061_v42, %v1060_v41 }
 0x198   : > { %1584 = vst [vmem:[%s1880_s26 + $0x38] sm:$0xff] %v1536_v34   ;;  %v1068_v59 = vmax.f32 %v1036_v56, 0.0  ;;  %v1069_v60 = vmax.f32 %v1037_v57, 0.0  ;;  %v1561_v61 = vpack.c.bf16 %v1063_v47, %v1062_v44 }
 0x199   : > { %1585 = vst [vmem:[%s1880_s26 + $0x40] sm:$0xff] %v1541_v40   ;;  %v1566_v62 = vpack.c.bf16 %v1065_v53, %v1064_v49  ;;  %v1571_v63 = vpack.c.bf16 %v1067_v55, %v1066_v54 }
 0x19a   : > { %1586 = vst [vmem:[%s1880_s26 + $0x48] sm:$0xff] %v1546_v46   ;;  %v1576_v0 = vpack.c.bf16 %v1069_v60, %v1068_v59 }
 0x19b   : > { %1587 = vst [vmem:[%s1880_s26 + $0x50] sm:$0xff] %v1551_v52  }
 0x19c   : > { %1588 = vst [vmem:[%s1880_s26 + $0x58] sm:$0xff] %v1556_v58  }
 0x19d   : > { %1589 = vst [vmem:[%s1880_s26 + $0x60] sm:$0xff] %v1561_v61  }
 0x19e   : > { %1590 = vst [vmem:[%s1880_s26 + $0x68] sm:$0xff] %v1566_v62  }
 0x19f   : > { %1591 = vst [vmem:[%s1880_s26 + $0x70] sm:$0xff] %v1571_v63  }
 0x1a0   : > { %1592 = vst [vmem:[%s1880_s26 + $0x78] sm:$0xff] %v1576_v0  }
 0x1a1 PF: > { %s12_s15 = sadd.s32 1, %s1721_s15   ;;  %s2006_s9 = smov %s1701_s10 }
 0x1a2   : > { %p9_p0 = scmp.ge.s32.totalorder %s12_s15, 74   ;;  %s2007_s10 = smov %s1790_s22 }
 0x1a3   : > { %s2008_s11 = smov %s1713_s13  ;;  %s2009_s12 = smov %s1717_s14 }
 0x1a4   : > { %s2010_s13 = smov %s2013_s16  ;;  %s2011_s14 = smov %s2017_s17 }
 0x1a5   :  { %11 = sbr.rel (!%p9_p0) target bundleno = 4 (0x4), region = 112 }

// kernel: squeeze.1
= control target key start
LH: loop header
LB: loop body
LE: loop exit
PB: predicated region body
PF: predicated region fallthrough
CT: control target
= control target key end

     0   :  { %s94_s10 = smov 64   ;;  %s129_s0 = inlined_call_operand.vmem [shape: f32[4096], index: 0, kind: input, shape index: {}]   ;;  %s130_s1 = inlined_call_operand.hbm [shape: f32[1,64,64], index: 1, kind: output, shape index: {}]  }
   0x1   :  { %v64_v0 = vld [vmem:[%s129_s0 + $0x8] sm:$0xff]   ;;  %v21_v1 = vld [vmem:[%s129_s0] sm:$0xff]  }
   0x2   :  { %36 = vrot.lane.b32.xlu1 %v64_v0, %s94_s10  ;;  %22 = vrot.lane.b32.xlu0 %v21_v1, %s94_s10 }
   0x3   :  { %2 = vsyncpa [#allocation1], 0  ;;  %v65_v2 = vld [vmem:[%s129_s0 + $0x18] sm:$0xff]   ;;  %v63_v3 = vld [vmem:[%s129_s0 + $0x10] sm:$0xff]   ;;  %vm4_vm0 = vcmask 523264   ;;  %s95_s0 = smov [#allocation0]  }
   0x4   :  { %5 = vst.msk [vmem:[#allocation0] ss:$2 sm:$0xff] %vm4_vm0, %v21_v1   ;;  %s51_s15 = sshll.u32 %s95_s0, 4  ;;  %s53_s1 = sshll.u32 %s130_s1, 4  ;;  %s52_s15 = int_to_ptr.vmem [resolvable:$true] %s51_s15  ;;  %s54_s1 = int_to_ptr.hbm [resolvable:$true] %s53_s1 }
   0x5   :  { %10 = vst.msk [vmem:[#allocation0 + $0x10] ss:$2 sm:$0xff] %vm4_vm0, %v64_v0  }
   0x6   :  { %15 = vst.msk [vmem:[#allocation0 + $0x20] ss:$2 sm:$0xff] %vm4_vm0, %v63_v3  }
   0x7   :  { %20 = vst.msk [vmem:[#allocation0 + $0x30] ss:$2 sm:$0xff] %vm4_vm0, %v65_v2  }
   0xa   :  { %43 = vrot.lane.b32.xlu1 %v65_v2, %s94_s10  ;;  %29 = vrot.lane.b32.xlu0 %v63_v3, %s94_s10 }
  0x74   :  { %v37_v4 = vpop.permute.xlu1 %36   ;;  %v23_v5 = vpop.permute.xlu0 %22  }
  0x75   :  { %40 = vst.msk [vmem:[#allocation0 + $0x11] ss:$2 sm:$0xff] %vm4_vm0, %v37_v4  }
  0x76   :  { %26 = vst.msk [vmem:[#allocation0 + $0x1] ss:$2 sm:$0xff] %vm4_vm0, %v23_v5  }
  0x7c   :  { %v44_v6 = vpop.permute.xlu1 %43   ;;  %v30_v7 = vpop.permute.xlu0 %29  }
  0x7d   :  { %47 = vst.msk [vmem:[#allocation0 + $0x31] ss:$2 sm:$0xff] %vm4_vm0, %v44_v6  }
  0x7e   :  { %33 = vst.msk [vmem:[#allocation0 + $0x21] ss:$2 sm:$0xff] %vm4_vm0, %v30_v7  }
  0x7f   :  { %56 = dma.vmem_to_hbm [thread:$0]  %s52_s15, 1024, %s54_s1, [#allocation1]  }
  0x80   :  { %92 = dma.done.wait [#allocation1], 1024  }
  0x81   :  { %93 = vsyncadd [#allocation1], 4294966272 }
  0x82   :  { %59 = vsyncpa [#allocation1], 1 }

// kernel: decoder_conv_up.11
= control target key start
LH: loop header
LB: loop body
LE: loop exit
PB: predicated region body
PF: predicated region fallthrough
CT: control target
= control target key end

     0   :  { %s2123_s15 = smov 0   ;;  %s2550_s0 = inlined_call_operand.vmem [shape: bf16[4096,256], index: 0, kind: input, shape index: {}]   ;;  %s2551_s1 = inlined_call_operand.vmem [shape: bf16[256,128], index: 1, kind: input, shape index: {}]   ;;  %s2552_s2 = inlined_call_operand.vmem [shape: bf16[128,128], index: 2, kind: input, shape index: {}]   ;;  %s2553_s3 = inlined_call_operand.vmem [shape: f32[1,128], index: 3, kind: input, shape index: {}]   ;;  %s2554_s4 = inlined_call_operand.vmem [shape: f32[4096,128], index: 4, kind: output, shape index: {}]  }
   0x1 LB: > { %s1603_s16 = sadd.s32 4294967295, %s2096_s15   ;;  %p1607_p0 = scmp.ge.s32.totalorder %s2096_s15, 1  ;;  %s2096_s15 = sphi %s2123_s15, %s14_s15  }
   0x2   : > { %p164_p1 = scmp.lt.s32.totalorder %s2096_s15, 17 }
   0x4   : > { %p165_p2 = pnand %p1607_p0, %p164_p1 }
   0x5   : > { %s1608_s29 = sshll.u32 (!%p165_p2), %s1603_s16, 5 }
   0x6   : > { %168 = sbr.rel (%p165_p2) target bundleno = 531 (0x213), region = 36  ;;  %p192_p3 = scmp.lt.s32.totalorder (!%p165_p2), %s1608_s29, 511 }
   0xb   : > { %v1911_v0 = vld [vmem:[%s2551_s1 + $0x38] sm:$0xff]  ;;  %v1910_v2 = vld [vmem:[%s2551_s1 + $0x30] sm:$0xff]  ;;  %v1909_v4 = vld [vmem:[%s2551_s1 + $0x28] sm:$0xff]  ;;  %s2570_s29 = smov (!%p192_p3, %s1608_s29), 511 }
   0xc   : > { %v1919_v1 = vld [vmem:[%s2551_s1 + $0x78] sm:$0xff]  ;;  %524 = vmatpush.bf16.msra.mxu0 %v1911_v0  ;;  %1928 = vmatpush.bf16.msra.mxu3 %v1911_v0  ;;  %v1918_v3 = vld [vmem:[%s2551_s1 + $0x70] sm:$0xff]  ;;  %v1917_v5 = vld [vmem:[%s2551_s1 + $0x68] sm:$0xff]  ;;  %s1871_s17 = sshll.u32 %s2570_s29, 3 }
   0xd   : > { %613 = vmatpush.bf16.msra.mxu1 %v1919_v1  ;;  %v1908_v6 = vld [vmem:[%s2551_s1 + $0x20] sm:$0xff]  ;;  %v1907_v8 = vld [vmem:[%s2551_s1 + $0x18] sm:$0xff]  ;;  %v1906_v10 = vld [vmem:[%s2551_s1 + $0x10] sm:$0xff]  ;;  %s2178_s22 = scalar_lea.vmem %s2550_s0, %s1871_s17  ;;  %s2315_s26 = scalar_lea.vmem %s2554_s4, %s1871_s17 }
   0xe   : > { %v1916_v7 = vld [vmem:[%s2551_s1 + $0x60] sm:$0xff]  ;;  %v1915_v9 = vld [vmem:[%s2551_s1 + $0x58] sm:$0xff]  ;;  %v1914_v11 = vld [vmem:[%s2551_s1 + $0x50] sm:$0xff] }
   0xf   : > { %v1905_v12 = vld [vmem:[%s2551_s1 + $0x8] sm:$0xff]  ;;  %v1904_v14 = vld [vmem:[%s2551_s1] sm:$0xff]  ;;  %v1623_v25 = vld [vmem:[%s2178_s22 + $0x10] sm:$0xf] }
  0x10   : > { %525 = vmatpush.bf16.msra.mxu0 %v1910_v2  ;;  %1929 = vmatpush.bf16.msra.mxu3 %v1910_v2  ;;  %v1913_v13 = vld [vmem:[%s2551_s1 + $0x48] sm:$0xff]  ;;  %v1615_v15 = vld [vmem:[%s2178_s22] sm:$0xf]  ;;  %v1872_v20 = vld [vmem:[%s2178_s22 + $0x4] sm:$0xf] }
  0x11   : > { %614 = vmatpush.bf16.msra.mxu1 %v1918_v3  ;;  %v1873_v16 = vld [vmem:[%s2178_s22 + $0x4] sm:$0xf0]  ;;  %v1711_v17 = vld [vmem:[%s2178_s22 + $0xc0] sm:$0xf]  ;;  %v1617_v21 = vld [vmem:[%s2178_s22 + $0x8] sm:$0xf0] }
  0x12   : > { %v1897_v18 = vld [vmem:[%s2178_s22 + $0xc4] sm:$0xf0]  ;;  %v1912_v19 = vld [vmem:[%s2551_s1 + $0x40] sm:$0xff]  ;;  %v1616_v22 = vor.u32 %v1873_v16, %v1615_v15  ;;  %v1620_v24 = vor.u32 %v1872_v20, %v1617_v21  ;;  %v1875_v26 = vld [vmem:[%s2178_s22 + $0x14] sm:$0xf0] }
  0x13   : > { %v1712_v23 = vor.u32 %v1897_v18, %v1711_v17  ;;  %v1719_v27 = vld [vmem:[%s2178_s22 + $0xd0] sm:$0xf]  ;;  %v1899_v28 = vld [vmem:[%s2178_s22 + $0xd4] sm:$0xf0]  ;;  %v1874_v29 = vld [vmem:[%s2178_s22 + $0x14] sm:$0xf]  ;;  %v1624_v31 = vor.u32 %v1875_v26, %v1623_v25 }
  0x14   : > { %526 = vmatpush.bf16.msra.mxu0 %v1909_v4  ;;  %1930 = vmatpush.bf16.msra.mxu3 %v1909_v4  ;;  %v1625_v30 = vld [vmem:[%s2178_s22 + $0x18] sm:$0xf0]  ;;  %v1720_v32 = vor.u32 %v1899_v28, %v1719_v27  ;;  %v1631_v34 = vld [vmem:[%s2178_s22 + $0x20] sm:$0xf]  ;;  %v1877_v35 = vld [vmem:[%s2178_s22 + $0x24] sm:$0xf0] }
  0x15   : > { %615 = vmatpush.bf16.msra.mxu1 %v1917_v5  ;;  %v1628_v33 = vor.u32 %v1874_v29, %v1625_v30  ;;  %v1727_v36 = vld [vmem:[%s2178_s22 + $0xe0] sm:$0xf]  ;;  %v1901_v37 = vld [vmem:[%s2178_s22 + $0xe4] sm:$0xf0]  ;;  %v1876_v38 = vld [vmem:[%s2178_s22 + $0x24] sm:$0xf]  ;;  %v1632_v40 = vor.u32 %v1877_v35, %v1631_v34 }
  0x16   : > { %v1633_v39 = vld [vmem:[%s2178_s22 + $0x28] sm:$0xf0]  ;;  %v1728_v41 = vor.u32 %v1901_v37, %v1727_v36  ;;  %v1639_v43 = vld [vmem:[%s2178_s22 + $0x30] sm:$0xf]  ;;  %v1879_v44 = vld [vmem:[%s2178_s22 + $0x34] sm:$0xf0] }
  0x17   : > { %v1636_v42 = vor.u32 %v1876_v38, %v1633_v39  ;;  %v1735_v45 = vld [vmem:[%s2178_s22 + $0xf0] sm:$0xf]  ;;  %v1903_v46 = vld [vmem:[%s2178_s22 + $0xf4] sm:$0xf0]  ;;  %v1878_v47 = vld [vmem:[%s2178_s22 + $0x34] sm:$0xf]  ;;  %v1640_v49 = vor.u32 %v1879_v44, %v1639_v43 }
  0x18   : > { %527 = vmatpush.bf16.msra.mxu0 %v1908_v6  ;;  %1931 = vmatpush.bf16.msra.mxu3 %v1908_v6  ;;  %v1641_v48 = vld [vmem:[%s2178_s22 + $0x38] sm:$0xf0]  ;;  %v1736_v50 = vor.u32 %v1903_v46, %v1735_v45  ;;  %v1647_v52 = vld [vmem:[%s2178_s22 + $0x40] sm:$0xf]  ;;  %v1881_v53 = vld [vmem:[%s2178_s22 + $0x44] sm:$0xf0] }
  0x19   : > { %616 = vmatpush.bf16.msra.mxu1 %v1916_v7  ;;  %v1644_v51 = vor.u32 %v1878_v47, %v1641_v48  ;;  %v1896_v54 = vld [vmem:[%s2178_s22 + $0xc4] sm:$0xf]  ;;  %v1713_v55 = vld [vmem:[%s2178_s22 + $0xc8] sm:$0xf0]  ;;  %v1648_v58 = vor.u32 %v1881_v53, %v1647_v52  ;;  %v1927_v61 = vld [vmem:[%s2552_s2 + $0x38] sm:$0xff] }
  0x1a   : > { %v1880_v56 = vld [vmem:[%s2178_s22 + $0x44] sm:$0xf]  ;;  %v1649_v57 = vld [vmem:[%s2178_s22 + $0x48] sm:$0xf0]  ;;  %v1716_v59 = vor.u32 %v1896_v54, %v1713_v55  ;;  %818 = vmatpush.bf16.msra.mxu2 %v1927_v61  ;;  %v1655_v62 = vld [vmem:[%s2178_s22 + $0x50] sm:$0xf] }
  0x1b   : > { %v1652_v60 = vor.u32 %v1880_v56, %v1649_v57  ;;  %v1883_v63 = vld [vmem:[%s2178_s22 + $0x54] sm:$0xf0]  ;;  %v1898_v0 = vld [vmem:[%s2178_s22 + $0xd4] sm:$0xf]  ;;  %v1665_v15 = vld [vmem:[%s2178_s22 + $0x68] sm:$0xf0] }
  0x1c   : > { %528 = vmatpush.bf16.msra.mxu0 %v1907_v8  ;;  %1932 = vmatpush.bf16.msra.mxu3 %v1907_v8  ;;  %v1882_v2 = vld [vmem:[%s2178_s22 + $0x54] sm:$0xf]  ;;  %v1656_v4 = vor.u32 %v1883_v63, %v1655_v62  ;;  %v1925_v8 = vld [vmem:[%s2552_s2 + $0x28] sm:$0xff]  ;;  %v1923_v18 = vld [vmem:[%s2552_s2 + $0x18] sm:$0xff] }
  0x1d   : > { %617 = vmatpush.bf16.msra.mxu1 %v1915_v9  ;;  %v1922_v20 = vld [vmem:[%s2552_s2 + $0x10] sm:$0xff]  ;;  %v1921_v21 = vld [vmem:[%s2552_s2 + $0x8] sm:$0xff]  ;;  %v1737_v26 = vld [vmem:[%s2178_s22 + $0xf8] sm:$0xf0] }
  0x1e   : > { %v1902_v25 = vld [vmem:[%s2178_s22 + $0xf4] sm:$0xf]  ;;  %v1673_v28 = vld [vmem:[%s2178_s22 + $0x78] sm:$0xf0]  ;;  %v1888_v34 = vld [vmem:[%s2178_s22 + $0x84] sm:$0xf] }
  0x1f   : > { %v1886_v27 = vld [vmem:[%s2178_s22 + $0x74] sm:$0xf]  ;;  %v1740_v30 = vor.u32 %v1902_v25, %v1737_v26  ;;  %v1681_v35 = vld [vmem:[%s2178_s22 + $0x88] sm:$0xf0]  ;;  %v1687_v47 = vld [vmem:[%s2178_s22 + $0x90] sm:$0xf] }
  0x20   : > { %529 = vmatpush.bf16.msra.mxu0 %v1906_v10  ;;  %1933 = vmatpush.bf16.msra.mxu3 %v1906_v10  ;;  %v1663_v10 = vld [vmem:[%s2178_s22 + $0x60] sm:$0xf]  ;;  %v1684_v38 = vor.u32 %v1888_v34, %v1681_v35  ;;  %v1891_v48 = vld [vmem:[%s2178_s22 + $0x94] sm:$0xf0] }
  0x21   : > { %618 = vmatpush.bf16.msra.mxu1 %v1914_v11  ;;  %v1688_v53 = vor.u32 %v1891_v48, %v1687_v47 }
  0x24   : > { %530 = vmatpush.bf16.msra.mxu0 %v1905_v12  ;;  %1934 = vmatpush.bf16.msra.mxu3 %v1905_v12  ;;  %v1900_v12 = vld [vmem:[%s2178_s22 + $0xe4] sm:$0xf] }
  0x25   : > { %619 = vmatpush.bf16.msra.mxu1 %v1913_v13 }
  0x28   : > { %531 = vmatpush.bf16.msra.mxu0 %v1904_v14  ;;  %1935 = vmatpush.bf16.msra.mxu3 %v1904_v14  ;;  %v1884_v14 = vld [vmem:[%s2178_s22 + $0x64] sm:$0xf] }
  0x29   : > { %620 = vmatpush.bf16.msra.mxu1 %v1912_v19 }
  0x2b   : > { %532 = vmatmul.bf16.vlgmr.msra.gmra.mxu0 %v1616_v22  ;;  %592 = vmatmul.bf16.vlgmr.msra.gmra.mxu3 %v1712_v23  ;;  %v1671_v22 = vld [vmem:[%s2178_s22 + $0x70] sm:$0xf]  ;;  %v1920_v23 = vld [vmem:[%s2552_s2] sm:$0xff] }
  0x2c   : > { %1936 = vmatpush.bf16.msrb.mxu3 %v1919_v1  ;;  %621 = vmatmul.bf16.vlgmr.msra.gmra.mxu1 %v1620_v24  ;;  %v1721_v1 = vld [vmem:[%s2178_s22 + $0xd8] sm:$0xf0]  ;;  %v1887_v24 = vld [vmem:[%s2178_s22 + $0x74] sm:$0xf0] }
  0x2d   : > { %v1672_v29 = vor.u32 %v1887_v24, %v1671_v22 }
  0x30   : > { %1937 = vmatpush.bf16.msrb.mxu3 %v1918_v3  ;;  %v1657_v3 = vld [vmem:[%s2178_s22 + $0x58] sm:$0xf0] }
  0x31   : > { %v1660_v6 = vor.u32 %v1882_v2, %v1657_v3  ;;  %v1892_v2 = vld [vmem:[%s2178_s22 + $0xa4] sm:$0xf]  ;;  %v1697_v3 = vld [vmem:[%s2178_s22 + $0xa8] sm:$0xf0] }
  0x34   : > { %1938 = vmatpush.bf16.msrb.mxu3 %v1917_v5  ;;  %v1724_v5 = vor.u32 %v1898_v0, %v1721_v1  ;;  %v1695_v0 = vld [vmem:[%s2178_s22 + $0xa0] sm:$0xf]  ;;  %v1893_v1 = vld [vmem:[%s2178_s22 + $0xa4] sm:$0xf0] }
  0x38   : > { %1939 = vmatpush.bf16.msrb.mxu3 %v1916_v7  ;;  %v1926_v7 = vld [vmem:[%s2552_s2 + $0x30] sm:$0xff] }
  0x39   : > { %819 = vmatpush.bf16.msra.mxu2 %v1926_v7 }
  0x3b   : > { %537 = vmatmul.bf16.gmra.mxu0 %v1624_v31  ;;  %597 = vmatmul.bf16.gmra.mxu3 %v1720_v32  ;;  %v1676_v31 = vor.u32 %v1886_v27, %v1673_v28  ;;  %v1679_v32 = vld [vmem:[%s2178_s22 + $0x80] sm:$0xf] }
  0x3c   : > { %1940 = vmatpush.bf16.msrb.mxu3 %v1915_v9  ;;  %626 = vmatmul.bf16.gmra.mxu1 %v1628_v33  ;;  %v1924_v9 = vld [vmem:[%s2552_s2 + $0x20] sm:$0xff]  ;;  %v1889_v33 = vld [vmem:[%s2178_s22 + $0x84] sm:$0xf0] }
  0x3d   : > { %820 = vmatpush.bf16.msra.mxu2 %v1925_v8  ;;  %v1680_v36 = vor.u32 %v1889_v33, %v1679_v32 }
  0x40   : > { %1941 = vmatpush.bf16.msrb.mxu3 %v1914_v11  ;;  %v1885_v11 = vld [vmem:[%s2178_s22 + $0x64] sm:$0xf0] }
  0x41   : > { %821 = vmatpush.bf16.msra.mxu2 %v1924_v9  ;;  %v1664_v16 = vor.u32 %v1885_v11, %v1663_v10 }
  0x44   : > { %1942 = vmatpush.bf16.msrb.mxu3 %v1913_v13  ;;  %v1729_v13 = vld [vmem:[%s2178_s22 + $0xe8] sm:$0xf0] }
  0x45   : > { %v1732_v17 = vor.u32 %v1900_v12, %v1729_v13  ;;  %822 = vmatpush.bf16.msra.mxu2 %v1923_v18 }
  0x48   : > { %1943 = vmatpush.bf16.msrb.mxu3 %v1912_v19  ;;  %v1668_v19 = vor.u32 %v1884_v14, %v1665_v15 }
  0x49   : > { %823 = vmatpush.bf16.msra.mxu2 %v1922_v20 }
  0x4b   : > { %542 = vmatmul.bf16.gmra.mxu0 %v1632_v40  ;;  %602 = vmatmul.bf16.gmra.mxu3 %v1728_v41 }
  0x4c   : > { %631 = vmatmul.bf16.gmra.mxu1 %v1636_v42  ;;  %1944 = vmatpush.bf16.msra.mxu3 %v1927_v61 }
  0x4d   : > { %824 = vmatpush.bf16.msra.mxu2 %v1921_v21 }
  0x50   : > { %1945 = vmatpush.bf16.msra.mxu3 %v1926_v7 }
  0x51   : > { %825 = vmatpush.bf16.msra.mxu2 %v1920_v23 }
  0x54   : > { %1946 = vmatpush.bf16.msra.mxu3 %v1925_v8  ;;  %v1700_v8 = vor.u32 %v1892_v2, %v1697_v3 }
  0x58   : > { %1947 = vmatpush.bf16.msra.mxu3 %v1924_v9 }
  0x5b   : > { %547 = vmatmul.bf16.gmra.mxu0 %v1640_v49  ;;  %607 = vmatmul.bf16.gmra.mxu3 %v1736_v50  ;;  %v1890_v49 = vld [vmem:[%s2178_s22 + $0x94] sm:$0xf]  ;;  %v1689_v50 = vld [vmem:[%s2178_s22 + $0x98] sm:$0xf0] }
  0x5c   : > { %636 = vmatmul.bf16.gmra.mxu1 %v1644_v51  ;;  %1948 = vmatpush.bf16.msra.mxu3 %v1923_v18  ;;  %v1692_v55 = vor.u32 %v1890_v49, %v1689_v50  ;;  %v1895_v18 = vld [vmem:[%s2178_s22 + $0xb4] sm:$0xf0] }
  0x60   : > { %1949 = vmatpush.bf16.msra.mxu3 %v1922_v20  ;;  %v1705_v20 = vld [vmem:[%s2178_s22 + $0xb8] sm:$0xf0] }
  0x64   : > { %1950 = vmatpush.bf16.msra.mxu3 %v1921_v21 }
  0x68   : > { %1951 = vmatpush.bf16.msra.mxu3 %v1920_v23 }
  0x6b   : > { %552 = vmatmul.bf16.gmra.mxu0 %v1648_v58  ;;  %681 = vmatmul.bf16.vlgmr.msrb.gmra.mxu3 %v1716_v59 }
  0x6c   : > { %641 = vmatmul.bf16.gmra.mxu1 %v1652_v60 }
  0x7b   : > { %557 = vmatmul.bf16.gmra.mxu0 %v1656_v4  ;;  %686 = vmatmul.bf16.gmra.mxu3 %v1724_v5 }
  0x7c   : > { %646 = vmatmul.bf16.gmra.mxu1 %v1660_v6  ;;  %v1696_v6 = vor.u32 %v1893_v1, %v1695_v0 }
  0x8b   : > { %562 = vmatmul.bf16.gmra.mxu0 %v1664_v16  ;;  %691 = vmatmul.bf16.gmra.mxu3 %v1732_v17  ;;  %v1703_v17 = vld [vmem:[%s2178_s22 + $0xb0] sm:$0xf] }
  0x8c   : > { %651 = vmatmul.bf16.gmra.mxu1 %v1668_v19  ;;  %v1894_v19 = vld [vmem:[%s2178_s22 + $0xb4] sm:$0xf]  ;;  %v1704_v23 = vor.u32 %v1895_v18, %v1703_v17 }
  0x8d   : > { %v1708_v25 = vor.u32 %v1894_v19, %v1705_v20 }
  0x9b   : > { %567 = vmatmul.bf16.gmra.mxu0 %v1672_v29  ;;  %696 = vmatmul.bf16.gmra.mxu3 %v1740_v30 }
  0x9c   : > { %656 = vmatmul.bf16.gmra.mxu1 %v1676_v31 }
  0xa8   : > { %v533_v37 = vpop.f32.mrf.mxu0 }
  0xa9   : > { %v622_v39 = vpop.f32.mrf.mxu1 }
  0xaa   : > { %v623_v41 = vadd.f32 %v622_v39, %v533_v37 }
  0xab   : > { %572 = vmatmul.bf16.gmra.mxu0 %v1680_v36 }
  0xac   : > { %661 = vmatmul.bf16.gmra.mxu1 %v1684_v38  ;;  %v702_v45 = vmax.f32 %v623_v41, 0.0 }
  0xae   : > { %v2265_v40 = vpop.f32.mrf.mxu3 }
  0xb0   : > { %v535_v42 = vpop.f32.mrf.mxu0 }
  0xb1   : > { %v624_v43 = vpop.f32.mrf.mxu1 }
  0xb2   : > { %v625_v44 = vadd.f32 %v624_v43, %v535_v42 }
  0xb4   : > { %v703_v46 = vmax.f32 %v625_v44, 0.0 }
  0xb6   : > { %v2271_v51 = vpop.f32.mrf.mxu3  ;;  %v734_v52 = vpack.c.bf16 %v703_v46, %v702_v45 }
  0xb8   : > { %826 = vmatmul.bf16.vlgmr.msra.gmra.mxu2 %v734_v52  ;;  %v538_v54 = vpop.f32.mrf.mxu0 }
  0xb9   : > { %v627_v56 = vpop.f32.mrf.mxu1 }
  0xba   : > { %v628_v58 = vadd.f32 %v627_v56, %v538_v54 }
  0xbb   : > { %577 = vmatmul.bf16.gmra.mxu0 %v1688_v53 }
  0xbc   : > { %666 = vmatmul.bf16.gmra.mxu1 %v1692_v55  ;;  %v704_v62 = vmax.f32 %v628_v58, 0.0 }
  0xbe   : > { %v2273_v57 = vpop.f32.mrf.mxu3 }
  0xc0   : > { %v540_v59 = vpop.f32.mrf.mxu0 }
  0xc1   : > { %v629_v60 = vpop.f32.mrf.mxu1 }
  0xc2   : > { %v630_v61 = vadd.f32 %v629_v60, %v540_v59 }
  0xc4   : > { %v705_v63 = vmax.f32 %v630_v61, 0.0 }
  0xc6   : > { %v2279_v4 = vpop.f32.mrf.mxu3  ;;  %v735_v5 = vpack.c.bf16 %v705_v63, %v704_v62 }
  0xc8   : > { %831 = vmatmul.bf16.gmra.mxu2 %v735_v5  ;;  %v543_v7 = vpop.f32.mrf.mxu0 }
  0xc9   : > { %v632_v9 = vpop.f32.mrf.mxu1 }
  0xca   : > { %v633_v11 = vadd.f32 %v632_v9, %v543_v7 }
  0xcb   : > { %582 = vmatmul.bf16.gmra.mxu0 %v1696_v6 }
  0xcc   : > { %671 = vmatmul.bf16.gmra.mxu1 %v1700_v8  ;;  %v706_v15 = vmax.f32 %v633_v11, 0.0 }
  0xce   : > { %v2281_v10 = vpop.f32.mrf.mxu3 }
  0xd0   : > { %v545_v12 = vpop.f32.mrf.mxu0 }
  0xd1   : > { %v634_v13 = vpop.f32.mrf.mxu1 }
  0xd2   : > { %v635_v14 = vadd.f32 %v634_v13, %v545_v12 }
  0xd4   : > { %v707_v16 = vmax.f32 %v635_v14, 0.0 }
  0xd6   : > { %v2287_v21 = vpop.f32.mrf.mxu3  ;;  %v736_v22 = vpack.c.bf16 %v707_v16, %v706_v15 }
  0xd8   : > { %836 = vmatmul.bf16.gmra.mxu2 %v736_v22  ;;  %v548_v24 = vpop.f32.mrf.mxu0 }
  0xd9   : > { %v637_v26 = vpop.f32.mrf.mxu1 }
  0xda   : > { %v638_v28 = vadd.f32 %v637_v26, %v548_v24 }
  0xdb   : > { %587 = vmatmul.bf16.gmra.mxu0 %v1704_v23 }
  0xdc   : > { %676 = vmatmul.bf16.gmra.mxu1 %v1708_v25  ;;  %v708_v32 = vmax.f32 %v638_v28, 0.0 }
  0xde   : > { %v2289_v27 = vpop.f32.mrf.mxu3 }
  0xe0   : > { %v550_v29 = vpop.f32.mrf.mxu0 }
  0xe1   : > { %v639_v30 = vpop.f32.mrf.mxu1 }
  0xe2   : > { %v640_v31 = vadd.f32 %v639_v30, %v550_v29 }
  0xe4   : > { %v709_v33 = vmax.f32 %v640_v31, 0.0 }
  0xe6   : > { %v2291_v34 = vpop.f32.mrf.mxu3  ;;  %v737_v35 = vpack.c.bf16 %v709_v33, %v708_v32 }
  0xe8   : > { %841 = vmatmul.bf16.gmra.mxu2 %v737_v35  ;;  %v553_v36 = vpop.f32.mrf.mxu0 }
  0xe9   : > { %v642_v37 = vpop.f32.mrf.mxu1 }
  0xea   : > { %v643_v39 = vadd.f32 %v642_v37, %v553_v36 }
  0xec   : > { %v710_v44 = vmax.f32 %v643_v39, 0.0 }
  0xee   : > { %v682_v38 = vpop.f32.mrf.mxu3 }
  0xef   : > { %v683_v46 = vadd.f32 %v682_v38, %v2265_v40 }
  0xf0   : > { %v555_v41 = vpop.f32.mrf.mxu0 }
  0xf1   : > { %v644_v42 = vpop.f32.mrf.mxu1  ;;  %v726_v52 = vmax.f32 %v683_v46, 0.0 }
  0xf2   : > { %v645_v43 = vadd.f32 %v644_v42, %v555_v41 }
  0xf4   : > { %v711_v45 = vmax.f32 %v645_v43, 0.0 }
  0xf6   : > { %v684_v47 = vpop.f32.mrf.mxu3  ;;  %v738_v48 = vpack.c.bf16 %v711_v45, %v710_v44 }
  0xf7   : > { %v685_v49 = vadd.f32 %v684_v47, %v2271_v51 }
  0xf8   : > { %846 = vmatmul.bf16.gmra.mxu2 %v738_v48  ;;  %v558_v50 = vpop.f32.mrf.mxu0 }
  0xf9   : > { %v727_v53 = vmax.f32 %v685_v49, 0.0  ;;  %v647_v54 = vpop.f32.mrf.mxu1 }
  0xfa   : > { %v648_v58 = vadd.f32 %v647_v54, %v558_v50 }
  0xfb   : > { %v746_v55 = vpack.c.bf16 %v727_v53, %v726_v52 }
  0xfc   : > { %v712_v62 = vmax.f32 %v648_v58, 0.0 }
  0xfd   : > { %886 = vmatmul.bf16.vlgmr.msra.gmra.mxu3 %v746_v55 }
  0xfe   : > { %v687_v56 = vpop.f32.mrf.mxu3 }
  0xff   : > { %v688_v40 = vadd.f32 %v687_v56, %v2273_v57 }
 0x100   : > { %v560_v59 = vpop.f32.mrf.mxu0 }
 0x101   : > { %v649_v60 = vpop.f32.mrf.mxu1  ;;  %v728_v3 = vmax.f32 %v688_v40, 0.0 }
 0x102   : > { %v650_v61 = vadd.f32 %v649_v60, %v560_v59 }
 0x104   : > { %v713_v63 = vmax.f32 %v650_v61, 0.0 }
 0x106   : > { %v689_v0 = vpop.f32.mrf.mxu3  ;;  %v739_v1 = vpack.c.bf16 %v713_v63, %v712_v62 }
 0x107   : > { %v690_v51 = vadd.f32 %v689_v0, %v2279_v4 }
 0x108   : > { %851 = vmatmul.bf16.gmra.mxu2 %v739_v1  ;;  %v563_v2 = vpop.f32.mrf.mxu0 }
 0x109   : > { %v729_v5 = vmax.f32 %v690_v51, 0.0  ;;  %v652_v6 = vpop.f32.mrf.mxu1 }
 0x10a   : > { %v653_v9 = vadd.f32 %v652_v6, %v563_v2 }
 0x10b   : > { %v747_v7 = vpack.c.bf16 %v729_v5, %v728_v3 }
 0x10c   : > { %v714_v14 = vmax.f32 %v653_v9, 0.0 }
 0x10d   : > { %891 = vmatmul.bf16.gmra.mxu3 %v747_v7 }
 0x10e   : > { %v692_v8 = vpop.f32.mrf.mxu3 }
 0x10f   : > { %v693_v57 = vadd.f32 %v692_v8, %v2281_v10 }
 0x110   : > { %v565_v11 = vpop.f32.mrf.mxu0 }
 0x111   : > { %v654_v12 = vpop.f32.mrf.mxu1  ;;  %v730_v19 = vmax.f32 %v693_v57, 0.0 }
 0x112   : > { %v655_v13 = vadd.f32 %v654_v12, %v565_v11 }
 0x114   : > { %v715_v15 = vmax.f32 %v655_v13, 0.0 }
 0x116   : > { %v694_v16 = vpop.f32.mrf.mxu3  ;;  %v740_v17 = vpack.c.bf16 %v715_v15, %v714_v14 }
 0x117   : > { %v695_v4 = vadd.f32 %v694_v16, %v2287_v21 }
 0x118   : > { %856 = vmatmul.bf16.gmra.mxu2 %v740_v17  ;;  %v568_v18 = vpop.f32.mrf.mxu0 }
 0x119   : > { %v731_v20 = vmax.f32 %v695_v4, 0.0  ;;  %v657_v22 = vpop.f32.mrf.mxu1 }
 0x11a   : > { %v658_v25 = vadd.f32 %v657_v22, %v568_v18 }
 0x11b   : > { %v748_v23 = vpack.c.bf16 %v731_v20, %v730_v19 }
 0x11c   : > { %v716_v30 = vmax.f32 %v658_v25, 0.0 }
 0x11d   : > { %896 = vmatmul.bf16.gmra.mxu3 %v748_v23 }
 0x11e   : > { %v697_v24 = vpop.f32.mrf.mxu3 }
 0x11f   : > { %v698_v10 = vadd.f32 %v697_v24, %v2289_v27 }
 0x120   : > { %v570_v26 = vpop.f32.mrf.mxu0 }
 0x121   : > { %v659_v28 = vpop.f32.mrf.mxu1  ;;  %v732_v36 = vmax.f32 %v698_v10, 0.0 }
 0x122   : > { %v660_v29 = vadd.f32 %v659_v28, %v570_v26 }
 0x124   : > { %v717_v31 = vmax.f32 %v660_v29, 0.0 }
 0x126   : > { %v699_v32 = vpop.f32.mrf.mxu3  ;;  %v741_v33 = vpack.c.bf16 %v717_v31, %v716_v30 }
 0x127   : > { %v700_v21 = vadd.f32 %v699_v32, %v2291_v34  ;;  %v2304_v34 = vld [vmem:[%s2553_s3] ss:$0 sm:$0xff] }
 0x128   : > { %861 = vmatmul.bf16.gmra.mxu2 %v741_v33  ;;  %v573_v35 = vpop.f32.mrf.mxu0 }
 0x129   : > { %v733_v37 = vmax.f32 %v700_v21, 0.0  ;;  %v662_v38 = vpop.f32.mrf.mxu1 }
 0x12a   : > { %v663_v41 = vadd.f32 %v662_v38, %v573_v35 }
 0x12b   : > { %v749_v39 = vpack.c.bf16 %v733_v37, %v732_v36 }
 0x12c   : > { %v718_v45 = vmax.f32 %v663_v41, 0.0 }
 0x12d   : > { %901 = vmatmul.bf16.gmra.mxu3 %v749_v39 }
 0x130   : > { %v575_v42 = vpop.f32.mrf.mxu0 }
 0x131   : > { %v664_v43 = vpop.f32.mrf.mxu1 }
 0x132   : > { %v665_v44 = vadd.f32 %v664_v43, %v575_v42 }
 0x134   : > { %v719_v46 = vmax.f32 %v665_v44, 0.0 }
 0x136   : > { %v742_v47 = vpack.c.bf16 %v719_v46, %v718_v45 }
 0x138   : > { %866 = vmatmul.bf16.gmra.mxu2 %v742_v47  ;;  %v578_v27 = vpop.f32.mrf.mxu0 }
 0x139   : > { %v667_v48 = vpop.f32.mrf.mxu1 }
 0x13a   : > { %v668_v53 = vadd.f32 %v667_v48, %v578_v27 }
 0x13b   : > { %v827_v49 = vpop.f32.mrf.mxu2 }
 0x13c   : > { %v828_v50 = vadd.f32 %v2304_v34, %v827_v49  ;;  %v720_v59 = vmax.f32 %v668_v53, 0.0 }
 0x13e   : > { %v1837_v52 = vmul.f32 -1.442695, %v828_v50 }
 0x140   : > { %1961 = vpow2.f32 %v1837_v52  ;;  %v580_v54 = vpop.f32.mrf.mxu0 }
 0x141   : > { %v669_v55 = vpop.f32.mrf.mxu1 }
 0x142   : > { %v670_v56 = vadd.f32 %v669_v55, %v580_v54 }
 0x143   : > { %v829_v58 = vpop.f32.mrf.mxu2 }
 0x144   : > { %v721_v60 = vmax.f32 %v670_v56, 0.0  ;;  %v830_v61 = vadd.f32 %v2304_v34, %v829_v58 }
 0x146   : > { %v1962_v62 = vpop.eup %1961  ;;  %v1838_v63 = vmul.f32 -1.442695, %v830_v61  ;;  %v743_v40 = vpack.c.bf16 %v721_v60, %v720_v59 }
 0x147   : > { %v1003_v0 = vadd.f32 1.0, %v1962_v62 }
 0x148   : > { %1963 = vpow2.f32 %v1838_v63  ;;  %871 = vmatmul.bf16.gmra.mxu2 %v743_v40  ;;  %v583_v1 = vpop.f32.mrf.mxu0 }
 0x149   : > { %1965 = vrcp.f32 %v1003_v0  ;;  %v672_v51 = vpop.f32.mrf.mxu1  ;;  %v1044_v57 = vand.u32 2147483647, %v1003_v0  ;;  %v1046_v16 = vand.u32 2147483648, %v1003_v0  ;;  %vm1040_vm1 = vweird.f32 %v1003_v0 }
 0x14a   : > { %v673_v9 = vadd.f32 %v672_v51, %v583_v1 }
 0x14b   : > { %v832_v2 = vpop.f32.mrf.mxu2  ;;  %v1047_v28 = vor.u32 1.1754944e-38, %v1046_v16  ;;  %vm1045_vm3 = vcmp.eq.f32.partialorder %v1044_v57, 8.507059e+37 }
 0x14c   : > { %v833_v3 = vadd.f32 %v2304_v34, %v832_v2  ;;  %v722_v17 = vmax.f32 %v673_v9, 0.0 }
 0x14e   : > { %v1964_v5 = vpop.eup %1963  ;;  %v1839_v6 = vmul.f32 -1.442695, %v833_v3 }
 0x14f   : > { %v1966_v7 = vpop.eup %1965  ;;  %v1004_v8 = vadd.f32 1.0, %v1964_v5 }
 0x150   : > { %v1036_v11 = vmul.f32 %v1966_v7, %v1003_v0  ;;  %1967 = vpow2.f32 %v1839_v6  ;;  %v585_v12 = vpop.f32.mrf.mxu0  ;;  %vm1041_vm0 = vweird.f32 %v1966_v7 }
 0x151   : > { %1969 = vrcp.f32 %v1004_v8  ;;  %v674_v13 = vpop.f32.mrf.mxu1  ;;  %vm1042_vm2 = vmor %vm1040_vm1, %vm1041_vm0  ;;  %v1061_v35 = vand.u32 2147483648, %v1004_v8  ;;  %v1059_v38 = vand.u32 2147483647, %v1004_v8  ;;  %vm1055_vm5 = vweird.f32 %v1004_v8 }
 0x152   : > { %v1037_v14 = vsub.f32 1.0, %v1036_v11  ;;  %v675_v15 = vadd.f32 %v674_v13, %v585_v12 }
 0x153   : > { %v834_v4 = vpop.f32.mrf.mxu2  ;;  %v1062_v45 = vor.u32 1.1754944e-38, %v1061_v35  ;;  %vm1060_vm7 = vcmp.eq.f32.partialorder %v1059_v38, 8.507059e+37 }
 0x154   : > { %v1038_v18 = vmul.f32 %v1966_v7, %v1037_v14  ;;  %v723_v19 = vmax.f32 %v675_v15, 0.0  ;;  %v835_v20 = vadd.f32 %v2304_v34, %v834_v4 }
 0x156   : > { %v1968_v22 = vpop.eup %1967  ;;  %v1039_v23 = vadd.f32 %v1966_v7, %v1038_v18  ;;  %v1840_v24 = vmul.f32 -1.442695, %v835_v20  ;;  %v744_v25 = vpack.c.bf16 %v723_v19, %v722_v17 }
 0x157   : > { %v1970_v26 = vpop.eup %1969  ;;  %v1005_v29 = vadd.f32 1.0, %v1968_v22 }
 0x158   : > { %v1043_v30 = vsel %vm1042_vm2, %v1966_v7, %v1039_v23  ;;  %v1051_v31 = vmul.f32 %v1970_v26, %v1004_v8  ;;  %1971 = vpow2.f32 %v1840_v24  ;;  %876 = vmatmul.bf16.gmra.mxu2 %v744_v25  ;;  %v588_v10 = vpop.f32.mrf.mxu0  ;;  %vm1056_vm4 = vweird.f32 %v1970_v26 }
 0x159   : > { %v1048_v32 = vsel %vm1045_vm3, %v1047_v28, %v1043_v30  ;;  %1973 = vrcp.f32 %v1005_v29  ;;  %v677_v33 = vpop.f32.mrf.mxu1  ;;  %vm1057_vm6 = vmor %vm1055_vm5, %vm1056_vm4  ;;  %v1074_v55 = vand.u32 2147483647, %v1005_v29  ;;  %v1076_v56 = vand.u32 2147483648, %v1005_v29 }
 0x15a   : > { %1515 = vst [vmem:[%s2315_s26] sm:$0xff] %v1048_v32  ;;  %v1052_v21 = vsub.f32 1.0, %v1051_v31  ;;  %v678_v47 = vadd.f32 %v677_v33, %v588_v10  ;;  %vm1070_vm9 = vweird.f32 %v1005_v29 }
 0x15b   : > { %v837_v36 = vpop.f32.mrf.mxu2  ;;  %v1077_v2 = vor.u32 1.1754944e-38, %v1076_v56  ;;  %vm1075_vm11 = vcmp.eq.f32.partialorder %v1074_v55, 8.507059e+37 }
 0x15c   : > { %v1053_v37 = vmul.f32 %v1970_v26, %v1052_v21  ;;  %v838_v39 = vadd.f32 %v2304_v34, %v837_v36  ;;  %v724_v58 = vmax.f32 %v678_v47, 0.0 }
 0x15e   : > { %v1972_v41 = vpop.eup %1971  ;;  %v1054_v42 = vadd.f32 %v1970_v26, %v1053_v37  ;;  %v1841_v43 = vmul.f32 -1.442695, %v838_v39 }
 0x15f   : > { %v1974_v44 = vpop.eup %1973  ;;  %v1006_v46 = vadd.f32 1.0, %v1972_v41 }
 0x160   : > { %v1058_v27 = vsel %vm1057_vm6, %v1970_v26, %v1054_v42  ;;  %v1066_v48 = vmul.f32 %v1974_v44, %v1005_v29  ;;  %1975 = vpow2.f32 %v1841_v43  ;;  %v590_v49 = vpop.f32.mrf.mxu0  ;;  %vm1071_vm8 = vweird.f32 %v1974_v44 }
 0x161   : > { %v1063_v50 = vsel %vm1060_vm7, %v1062_v45, %v1058_v27  ;;  %1977 = vrcp.f32 %v1006_v46  ;;  %v679_v52 = vpop.f32.mrf.mxu1  ;;  %vm1072_vm10 = vmor %vm1070_vm9, %vm1071_vm8  ;;  %v1091_v9 = vand.u32 2147483648, %v1006_v46  ;;  %v1089_v13 = vand.u32 2147483647, %v1006_v46 }
 0x162   : > { %1516 = vst [vmem:[%s2315_s26 + $0x8] sm:$0xff] %v1063_v50  ;;  %v1067_v53 = vsub.f32 1.0, %v1066_v48  ;;  %v680_v54 = vadd.f32 %v679_v52, %v590_v49  ;;  %vm1085_vm13 = vweird.f32 %v1006_v46 }
 0x163   : > { %v839_v59 = vpop.f32.mrf.mxu2  ;;  %v1092_v4 = vor.u32 1.1754944e-38, %v1091_v9  ;;  %vm1090_vm15 = vcmp.eq.f32.partialorder %v1089_v13, 8.507059e+37 }
 0x164   : > { %v1068_v60 = vmul.f32 %v1974_v44, %v1067_v53  ;;  %v725_v61 = vmax.f32 %v680_v54, 0.0  ;;  %v840_v62 = vadd.f32 %v2304_v34, %v839_v59 }
 0x166   : > { %v1976_v63 = vpop.eup %1975  ;;  %v1069_v40 = vadd.f32 %v1974_v44, %v1068_v60  ;;  %v1842_v0 = vmul.f32 -1.442695, %v840_v62  ;;  %v745_v1 = vpack.c.bf16 %v725_v61, %v724_v58 }
 0x167   : > { %v1978_v51 = vpop.eup %1977  ;;  %v1007_v3 = vadd.f32 1.0, %v1976_v63 }
 0x168   : > { %v1073_v5 = vsel %vm1072_vm10, %v1974_v44, %v1069_v40  ;;  %v1081_v6 = vmul.f32 %v1978_v51, %v1006_v46  ;;  %1979 = vpow2.f32 %v1842_v0  ;;  %881 = vmatmul.bf16.gmra.mxu2 %v745_v1  ;;  %vm1086_vm12 = vweird.f32 %v1978_v51 }
 0x169   : > { %v1078_v7 = vsel %vm1075_vm11, %v1077_v2, %v1073_v5  ;;  %1981 = vrcp.f32 %v1007_v3  ;;  %vm1087_vm14 = vmor %vm1085_vm13, %vm1086_vm12  ;;  %v1106_v24 = vand.u32 2147483648, %v1007_v3  ;;  %v1104_v28 = vand.u32 2147483647, %v1007_v3 }
 0x16a   : > { %1517 = vst [vmem:[%s2315_s26 + $0x10] sm:$0xff] %v1078_v7  ;;  %v1082_v8 = vsub.f32 1.0, %v1081_v6  ;;  %vm1100_vm1 = vweird.f32 %v1007_v3 }
 0x16b   : > { %v842_v11 = vpop.f32.mrf.mxu2  ;;  %v1107_v33 = vor.u32 1.1754944e-38, %v1106_v24  ;;  %vm1105_vm3 = vcmp.eq.f32.partialorder %v1104_v28, 8.507059e+37 }
 0x16c   : > { %v1083_v12 = vmul.f32 %v1978_v51, %v1082_v8  ;;  %v843_v14 = vadd.f32 %v2304_v34, %v842_v11 }
 0x16e   : > { %v1980_v15 = vpop.eup %1979  ;;  %v1084_v57 = vadd.f32 %v1978_v51, %v1083_v12  ;;  %v1843_v16 = vmul.f32 -1.442695, %v843_v14 }
 0x16f   : > { %v1982_v17 = vpop.eup %1981  ;;  %v1008_v18 = vadd.f32 1.0, %v1980_v15 }
 0x170   : > { %v1088_v19 = vsel %vm1087_vm14, %v1978_v51, %v1084_v57  ;;  %v1096_v20 = vmul.f32 %v1982_v17, %v1007_v3  ;;  %1983 = vpow2.f32 %v1843_v16  ;;  %vm1101_vm0 = vweird.f32 %v1982_v17 }
 0x171   : > { %v1093_v22 = vsel %vm1090_vm15, %v1092_v4, %v1088_v19  ;;  %1985 = vrcp.f32 %v1008_v18  ;;  %vm1102_vm2 = vmor %vm1100_vm1, %vm1101_vm0  ;;  %v1121_v39 = vand.u32 2147483648, %v1008_v18  ;;  %v1119_v43 = vand.u32 2147483647, %v1008_v18 }
 0x172   : > { %1518 = vst [vmem:[%s2315_s26 + $0x18] sm:$0xff] %v1093_v22  ;;  %v1097_v23 = vsub.f32 1.0, %v1096_v20  ;;  %vm1115_vm5 = vweird.f32 %v1008_v18 }
 0x173   : > { %v844_v25 = vpop.f32.mrf.mxu2  ;;  %v1122_v48 = vor.u32 1.1754944e-38, %v1121_v39  ;;  %vm1120_vm7 = vcmp.eq.f32.partialorder %v1119_v43, 8.507059e+37 }
 0x174   : > { %v1098_v26 = vmul.f32 %v1982_v17, %v1097_v23  ;;  %v845_v29 = vadd.f32 %v2304_v34, %v844_v25 }
 0x176   : > { %v1984_v30 = vpop.eup %1983  ;;  %v1099_v31 = vadd.f32 %v1982_v17, %v1098_v26  ;;  %v1844_v10 = vmul.f32 -1.442695, %v845_v29 }
 0x177   : > { %v1986_v32 = vpop.eup %1985  ;;  %v1009_v21 = vadd.f32 1.0, %v1984_v30 }
 0x178   : > { %v1103_v35 = vsel %vm1102_vm2, %v1982_v17, %v1099_v31  ;;  %v1111_v36 = vmul.f32 %v1986_v32, %v1008_v18  ;;  %1987 = vpow2.f32 %v1844_v10  ;;  %vm1116_vm4 = vweird.f32 %v1986_v32 }
 0x179   : > { %v1108_v37 = vsel %vm1105_vm3, %v1107_v33, %v1103_v35  ;;  %1989 = vrcp.f32 %v1009_v21  ;;  %vm1117_vm6 = vmor %vm1115_vm5, %vm1116_vm4  ;;  %v1134_v58 = vand.u32 2147483647, %v1009_v21  ;;  %v1136_v59 = vand.u32 2147483648, %v1009_v21 }
 0x17a   : > { %1519 = vst [vmem:[%s2315_s26 + $0x20] sm:$0xff] %v1108_v37  ;;  %v1112_v38 = vsub.f32 1.0, %v1111_v36  ;;  %vm1130_vm9 = vweird.f32 %v1009_v21 }
 0x17b   : > { %v847_v41 = vpop.f32.mrf.mxu2  ;;  %v1137_v2 = vor.u32 1.1754944e-38, %v1136_v59  ;;  %vm1135_vm11 = vcmp.eq.f32.partialorder %v1134_v58, 8.507059e+37 }
 0x17c   : > { %v1113_v42 = vmul.f32 %v1986_v32, %v1112_v38  ;;  %v848_v44 = vadd.f32 %v2304_v34, %v847_v41 }
 0x17e   : > { %v1988_v45 = vpop.eup %1987  ;;  %v1114_v46 = vadd.f32 %v1986_v32, %v1113_v42  ;;  %v1845_v47 = vmul.f32 -1.442695, %v848_v44 }
 0x17f   : > { %v1990_v27 = vpop.eup %1989  ;;  %v1010_v49 = vadd.f32 1.0, %v1988_v45 }
 0x180   : > { %v1118_v50 = vsel %vm1117_vm6, %v1986_v32, %v1114_v46  ;;  %v1126_v52 = vmul.f32 %v1990_v27, %v1009_v21  ;;  %1991 = vpow2.f32 %v1845_v47  ;;  %v887_v53 = vpop.f32.mrf.mxu3  ;;  %vm1131_vm8 = vweird.f32 %v1990_v27 }
 0x181   : > { %v1123_v54 = vsel %vm1120_vm7, %v1122_v48, %v1118_v50  ;;  %1993 = vrcp.f32 %v1010_v49  ;;  %v888_v56 = vadd.f32 %v2304_v34, %v887_v53  ;;  %vm1132_vm10 = vmor %vm1130_vm9, %vm1131_vm8  ;;  %v1149_v12 = vand.u32 2147483647, %v1010_v49 }
 0x182   : > { %1520 = vst [vmem:[%s2315_s26 + $0x28] sm:$0xff] %v1123_v54  ;;  %v1127_v55 = vsub.f32 1.0, %v1126_v52  ;;  %v1151_v13 = vand.u32 2147483648, %v1010_v49  ;;  %vm1145_vm13 = vweird.f32 %v1010_v49 }
 0x183   : > { %v849_v60 = vpop.f32.mrf.mxu2  ;;  %v1861_v62 = vmul.f32 -1.442695, %v888_v56  ;;  %vm1150_vm15 = vcmp.eq.f32.partialorder %v1149_v12, 8.507059e+37 }
 0x184   : > { %v1128_v61 = vmul.f32 %v1990_v27, %v1127_v55  ;;  %v850_v63 = vadd.f32 %v2304_v34, %v849_v60  ;;  %v1152_v23 = vor.u32 1.1754944e-38, %v1151_v13 }
 0x185   : > { %1995 = vpow2.f32 %v1861_v62 }
 0x186   : > { %v1992_v40 = vpop.eup %1991  ;;  %v1129_v0 = vadd.f32 %v1990_v27, %v1128_v61  ;;  %v1846_v1 = vmul.f32 -1.442695, %v850_v63 }
 0x187   : > { %v1994_v51 = vpop.eup %1993  ;;  %v1011_v3 = vadd.f32 1.0, %v1992_v40 }
 0x188   : > { %v1133_v5 = vsel %vm1132_vm10, %v1990_v27, %v1129_v0  ;;  %v1141_v6 = vmul.f32 %v1994_v51, %v1010_v49  ;;  %1997 = vpow2.f32 %v1846_v1  ;;  %v889_v7 = vpop.f32.mrf.mxu3  ;;  %vm1146_vm12 = vweird.f32 %v1994_v51 }
 0x189   : > { %v1138_v8 = vsel %vm1135_vm11, %v1137_v2, %v1133_v5  ;;  %1999 = vrcp.f32 %v1011_v3  ;;  %v890_v11 = vadd.f32 %v2304_v34, %v889_v7  ;;  %vm1147_vm14 = vmor %vm1145_vm13, %vm1146_vm12  ;;  %v1164_v31 = vand.u32 2147483647, %v1011_v3 }
 0x18a   : > { %1521 = vst [vmem:[%s2315_s26 + $0x30] sm:$0xff] %v1138_v8  ;;  %v1142_v9 = vsub.f32 1.0, %v1141_v6  ;;  %v1166_v10 = vand.u32 2147483648, %v1011_v3  ;;  %vm1160_vm1 = vweird.f32 %v1011_v3 }
 0x18b   : > { %v852_v14 = vpop.f32.mrf.mxu2  ;;  %v1996_v15 = vpop.eup %1995  ;;  %v1862_v16 = vmul.f32 -1.442695, %v890_v11  ;;  %vm1165_vm3 = vcmp.eq.f32.partialorder %v1164_v31, 8.507059e+37 }
 0x18c   : > { %v1143_v57 = vmul.f32 %v1994_v51, %v1142_v9  ;;  %v853_v17 = vadd.f32 %v2304_v34, %v852_v14  ;;  %v2333_v4 = vadd.f32 1.0, %v1996_v15  ;;  %v1167_v44 = vor.u32 1.1754944e-38, %v1166_v10 }
 0x18d   : > { %2001 = vpow2.f32 %v1862_v16 }
 0x18e   : > { %v1998_v18 = vpop.eup %1997  ;;  %v1144_v19 = vadd.f32 %v1994_v51, %v1143_v57  ;;  %v1847_v20 = vmul.f32 -1.442695, %v853_v17  ;;  %2003 = vrcp.f32 %v2333_v4  ;;  %v1404_v52 = vand.u32 2147483647, %v2333_v4 }
 0x18f   : > { %v2000_v22 = vpop.eup %1999  ;;  %v2336_v26 = vadd.f32 1.0, %v1998_v18  ;;  %v1406_v53 = vand.u32 2147483648, %v2333_v4  ;;  %vm1400_vm5 = vweird.f32 %v2333_v4 }
 0x190   : > { %v1148_v24 = vsel %vm1147_vm14, %v1994_v51, %v1144_v19  ;;  %v1156_v25 = vmul.f32 %v2000_v22, %v1011_v3  ;;  %v892_v28 = vpop.f32.mrf.mxu3  ;;  %2005 = vpow2.f32 %v1847_v20  ;;  %vm1161_vm0 = vweird.f32 %v2000_v22 }
 0x191   : > { %v1153_v29 = vsel %vm1150_vm15, %v1152_v23, %v1148_v24  ;;  %2007 = vrcp.f32 %v2336_v26  ;;  %v893_v32 = vadd.f32 %v2304_v34, %v892_v28  ;;  %vm1162_vm2 = vmor %vm1160_vm1, %vm1161_vm0  ;;  %v1179_v58 = vand.u32 2147483647, %v2336_v26 }
 0x192   : > { %1522 = vst [vmem:[%s2315_s26 + $0x38] sm:$0xff] %v1153_v29  ;;  %v1157_v30 = vsub.f32 1.0, %v1156_v25  ;;  %v1181_v61 = vand.u32 2147483648, %v2336_v26  ;;  %vm1405_vm7 = vcmp.eq.f32.partialorder %v1404_v52, 8.507059e+37  ;;  %v1407_v0 = vor.u32 1.1754944e-38, %v1406_v53 }
 0x193   : > { %v854_v33 = vpop.f32.mrf.mxu2  ;;  %v2002_v21 = vpop.eup %2001  ;;  %v1863_v39 = vmul.f32 -1.442695, %v893_v32  ;;  %vm1175_vm9 = vweird.f32 %v2336_v26  ;;  %vm1180_vm11 = vcmp.eq.f32.partialorder %v1179_v58, 8.507059e+37 }
 0x194   : > { %v1158_v35 = vmul.f32 %v2000_v22, %v1157_v30  ;;  %v855_v36 = vadd.f32 %v2304_v34, %v854_v33  ;;  %v2004_v37 = vpop.eup %2003  ;;  %v2342_v38 = vadd.f32 1.0, %v2002_v21  ;;  %v1182_v12 = vor.u32 1.1754944e-38, %v1181_v61 }
 0x195   : > { %v1396_v42 = vmul.f32 %v2004_v37, %v2333_v4  ;;  %vm1401_vm4 = vweird.f32 %v2004_v37 }
 0x196   : > { %v1159_v41 = vadd.f32 %v2000_v22, %v1158_v35  ;;  %v2006_v43 = vpop.eup %2005  ;;  %2009 = vrcp.f32 %v2342_v38  ;;  %v1848_v45 = vmul.f32 -1.442695, %v855_v36  ;;  %vm1402_vm6 = vmor %vm1400_vm5, %vm1401_vm4  ;;  %v1421_v16 = vand.u32 2147483648, %v2342_v38 }
 0x197   : > { %v2008_v46 = vpop.eup %2007  ;;  %v1397_v27 = vsub.f32 1.0, %v1396_v42  ;;  %v2346_v48 = vadd.f32 1.0, %v2006_v43  ;;  %2011 = vpow2.f32 %v1863_v39  ;;  %v1419_v19 = vand.u32 2147483647, %v2342_v38 }
 0x198   : > { %v1163_v47 = vsel %vm1162_vm2, %v2000_v22, %v1159_v41  ;;  %v894_v49 = vpop.f32.mrf.mxu3  ;;  %v1171_v54 = vmul.f32 %v2008_v46, %v2336_v26  ;;  %vm1176_vm8 = vweird.f32 %v2008_v46  ;;  %vm1415_vm13 = vweird.f32 %v2342_v38 }
 0x199   : > { %v1168_v50 = vsel %vm1165_vm3, %v1167_v44, %v1163_v47  ;;  %v1398_v55 = vmul.f32 %v2004_v37, %v1397_v27  ;;  %2013 = vrcp.f32 %v2346_v48  ;;  %v895_v62 = vadd.f32 %v2304_v34, %v894_v49  ;;  %vm1177_vm10 = vmor %vm1175_vm9, %vm1176_vm8 }
 0x19a   : > { %1523 = vst [vmem:[%s2315_s26 + $0x40] sm:$0xff] %v1168_v50  ;;  %v1172_v56 = vsub.f32 1.0, %v1171_v54  ;;  %2015 = vpow2.f32 %v1848_v45  ;;  %v1194_v25 = vand.u32 2147483647, %v2346_v48  ;;  %v1196_v26 = vand.u32 2147483648, %v2346_v48 }
 0x19b   : > { %v857_v59 = vpop.f32.mrf.mxu2  ;;  %v1399_v60 = vadd.f32 %v2004_v37, %v1398_v55  ;;  %v1864_v5 = vmul.f32 -1.442695, %v895_v62  ;;  %v1422_v29 = vor.u32 1.1754944e-38, %v1421_v16  ;;  %vm1420_vm0 = vcmp.eq.f32.partialorder %v1419_v19, 8.507059e+37 }
 0x19c   : > { %v858_v63 = vadd.f32 %v2304_v34, %v857_v59  ;;  %v2010_v40 = vpop.eup %2009  ;;  %v1173_v1 = vmul.f32 %v2008_v46, %v1172_v56  ;;  %vm1190_vm1 = vweird.f32 %v2346_v48  ;;  %vm1195_vm3 = vcmp.eq.f32.partialorder %v1194_v25, 8.507059e+37 }
 0x19d   : > { %v2012_v51 = vpop.eup %2011  ;;  %v1403_v2 = vsel %vm1402_vm6, %v2004_v37, %v1399_v60  ;;  %v1411_v3 = vmul.f32 %v2010_v40, %v2342_v38  ;;  %2017 = vpow2.f32 %v1864_v5  ;;  %vm1416_vm12 = vweird.f32 %v2010_v40 }
 0x19e   : > { %v1408_v6 = vsel %vm1405_vm7, %v1407_v0, %v1403_v2  ;;  %v1174_v7 = vadd.f32 %v2008_v46, %v1173_v1  ;;  %v2360_v8 = vadd.f32 1.0, %v2012_v51  ;;  %v1849_v9 = vmul.f32 -1.442695, %v858_v63  ;;  %vm1417_vm14 = vmor %vm1415_vm13, %vm1416_vm12 }
 0x19f   : > { %v2014_v11 = vpop.eup %2013  ;;  %1539 = vst [vmem:[%s2315_s26 + $0xc0] sm:$0xff] %v1408_v6  ;;  %v1412_v13 = vsub.f32 1.0, %v1411_v3  ;;  %v1197_v38 = vor.u32 1.1754944e-38, %v1196_v26 }
 0x1a0   : > { %v897_v14 = vpop.f32.mrf.mxu3  ;;  %v2016_v15 = vpop.eup %2015  ;;  %v1178_v57 = vsel %vm1177_vm10, %v2008_v46, %v1174_v7  ;;  %v1186_v17 = vmul.f32 %v2014_v11, %v2346_v48  ;;  %2019 = vrcp.f32 %v2360_v8  ;;  %vm1191_vm15 = vweird.f32 %v2014_v11 }
 0x1a1   : > { %v1183_v4 = vsel %vm1180_vm11, %v1182_v12, %v1178_v57  ;;  %v1413_v18 = vmul.f32 %v2010_v40, %v1412_v13  ;;  %v2369_v22 = vadd.f32 1.0, %v2016_v15  ;;  %2021 = vpow2.f32 %v1849_v9  ;;  %vm1192_vm2 = vmor %vm1190_vm1, %vm1191_vm15 }
 0x1a2   : > { %1524 = vst [vmem:[%s2315_s26 + $0x48] sm:$0xff] %v1183_v4  ;;  %v1187_v20 = vsub.f32 1.0, %v1186_v17  ;;  %v898_v28 = vadd.f32 %v2304_v34, %v897_v14  ;;  %v1434_v44 = vand.u32 2147483647, %v2360_v8  ;;  %v1436_v45 = vand.u32 2147483648, %v2360_v8 }
 0x1a3   : > { %v859_v23 = vpop.f32.mrf.mxu2  ;;  %v1414_v24 = vadd.f32 %v2010_v40, %v1413_v18  ;;  %2023 = vrcp.f32 %v2369_v22  ;;  %v2018_v31 = vpop.eup %2017  ;;  %v1209_v50 = vand.u32 2147483647, %v2369_v22  ;;  %vm1430_vm5 = vweird.f32 %v2360_v8 }
 0x1a4   : > { %v1188_v30 = vmul.f32 %v2014_v11, %v1187_v20  ;;  %v860_v32 = vadd.f32 %v2304_v34, %v859_v23  ;;  %v2377_v36 = vadd.f32 1.0, %v2018_v31  ;;  %v1865_v37 = vmul.f32 -1.442695, %v898_v28 }
 0x1a5   : > { %v1418_v10 = vsel %vm1417_vm14, %v2010_v40, %v1414_v24  ;;  %vm2391_vm6 = vcmp.eq.f32.partialorder %v1434_v44, 8.507059e+37  ;;  %v1437_v58 = vor.u32 1.1754944e-38, %v1436_v45  ;;  %vm1205_vm8 = vweird.f32 %v2369_v22 }
 0x1a6   : > { %v2020_v33 = vpop.eup %2019  ;;  %v1423_v21 = vsel %vm1420_vm0, %v1422_v29, %v1418_v10  ;;  %v1189_v35 = vadd.f32 %v2014_v11, %v1188_v30  ;;  %2025 = vrcp.f32 %v2377_v36  ;;  %v1850_v48 = vmul.f32 -1.442695, %v860_v32 }
 0x1a7   : > { %1540 = vst [vmem:[%s2315_s26 + $0xc8] sm:$0xff] %v1423_v21  ;;  %v1426_v39 = vmul.f32 %v2020_v33, %v2360_v8  ;;  %v2022_v42 = vpop.eup %2021  ;;  %2027 = vpow2.f32 %v1865_v37  ;;  %vm1431_vm4 = vweird.f32 %v2020_v33  ;;  %vm2397_vm9 = vcmp.eq.f32.partialorder %v1209_v50, 8.507059e+37 }
 0x1a8   : > { %v899_v41 = vpop.f32.mrf.mxu3  ;;  %v1193_v43 = vsel %vm1192_vm2, %v2014_v11, %v1189_v35  ;;  %v2384_v27 = vadd.f32 1.0, %v2022_v42  ;;  %vm1432_vm7 = vmor %vm1430_vm5, %vm1431_vm4  ;;  %v1211_v40 = vand.u32 2147483648, %v2369_v22  ;;  %v1449_v12 = vand.u32 2147483647, %v2377_v36 }
 0x1a9   : > { %v1198_v46 = vsel %vm1195_vm3, %v1197_v38, %v1193_v43  ;;  %v1427_v47 = vsub.f32 1.0, %v1426_v39  ;;  %v2024_v49 = vpop.eup %2023  ;;  %v900_v52 = vadd.f32 %v2304_v34, %v899_v41  ;;  %v1451_v57 = vand.u32 2147483648, %v2377_v36 }
 0x1aa   : > { %1525 = vst [vmem:[%s2315_s26 + $0x50] sm:$0xff] %v1198_v46  ;;  %v1201_v55 = vmul.f32 %v2024_v49, %v2369_v22  ;;  %2029 = vrcp.f32 %v2384_v27  ;;  %vm1206_vm10 = vweird.f32 %v2024_v49  ;;  %v1212_v15 = vor.u32 1.1754944e-38, %v1211_v40 }
 0x1ab   : > { %v862_v53 = vpop.f32.mrf.mxu2  ;;  %v1428_v54 = vmul.f32 %v2020_v33, %v1427_v47  ;;  %2031 = vpow2.f32 %v1850_v48  ;;  %v1866_v61 = vmul.f32 -1.442695, %v900_v52  ;;  %vm1207_vm11 = vmor %vm1205_vm8, %vm1206_vm10  ;;  %vm1445_vm13 = vweird.f32 %v2377_v36 }
 0x1ac   : > { %v1202_v60 = vsub.f32 1.0, %v1201_v55  ;;  %v2026_v62 = vpop.eup %2025  ;;  %v863_v0 = vadd.f32 %v2304_v34, %v862_v53  ;;  %vm1450_vm14 = vcmp.eq.f32.partialorder %v1449_v12, 8.507059e+37  ;;  %v1452_v28 = vor.u32 1.1754944e-38, %v1451_v57 }
 0x1ad   : > { %v1429_v59 = vadd.f32 %v2020_v33, %v1428_v54  ;;  %v1441_v2 = vmul.f32 %v2026_v62, %v2377_v36  ;;  %v2028_v5 = vpop.eup %2027  ;;  %2033 = vpow2.f32 %v1866_v61  ;;  %vm1446_vm12 = vweird.f32 %v2026_v62 }
 0x1ae   : > { %v1203_v51 = vmul.f32 %v2024_v49, %v1202_v60  ;;  %v1851_v7 = vmul.f32 -1.442695, %v863_v0  ;;  %v2409_v13 = vadd.f32 1.0, %v2028_v5  ;;  %vm1447_vm15 = vmor %vm1445_vm13, %vm1446_vm12  ;;  %v1224_v29 = vand.u32 2147483647, %v2384_v27 }
 0x1af   : > { %v1433_v1 = vsel %vm1432_vm7, %v2020_v33, %v1429_v59  ;;  %v1442_v11 = vsub.f32 1.0, %v1441_v2  ;;  %v1226_v30 = vand.u32 2147483648, %v2384_v27  ;;  %vm1220_vm1 = vweird.f32 %v2384_v27 }
 0x1b0   : > { %v902_v3 = vpop.f32.mrf.mxu3  ;;  %v1438_v6 = vsel %vm2391_vm6, %v1437_v58, %v1433_v1  ;;  %v1204_v9 = vadd.f32 %v2024_v49, %v1203_v51  ;;  %v2030_v14 = vpop.eup %2029  ;;  %2035 = vpow2.f32 %v1851_v7  ;;  %vm1225_vm3 = vcmp.eq.f32.partialorder %v1224_v29, 8.507059e+37 }
 0x1b1   : > { %v903_v8 = vadd.f32 %v2304_v34, %v902_v3  ;;  %1541 = vst [vmem:[%s2315_s26 + $0xd0] sm:$0xff] %v1438_v6  ;;  %v2032_v4 = vpop.eup %2031  ;;  %v1443_v19 = vmul.f32 %v2026_v62, %v1442_v11  ;;  %v1216_v20 = vmul.f32 %v2030_v14, %v2384_v27  ;;  %2037 = vrcp.f32 %v2409_v13 }
 0x1b2   : > { %v1208_v18 = vsel %vm1207_vm11, %v2024_v49, %v1204_v9  ;;  %v2420_v25 = vadd.f32 1.0, %v2032_v4  ;;  %vm1221_vm0 = vweird.f32 %v2030_v14  ;;  %v1227_v41 = vor.u32 1.1754944e-38, %v1226_v30 }
 0x1b3   : > { %v1867_v16 = vmul.f32 -1.442695, %v903_v8  ;;  %v864_v17 = vpop.f32.mrf.mxu2  ;;  %v1213_v23 = vsel %vm2397_vm9, %v1212_v15, %v1208_v18  ;;  %v1444_v22 = vadd.f32 %v2026_v62, %v1443_v19  ;;  %v1217_v24 = vsub.f32 1.0, %v1216_v20  ;;  %v2034_v26 = vpop.eup %2033  ;;  %vm1222_vm2 = vmor %vm1220_vm1, %vm1221_vm0 }
 0x1b4   : > { %1526 = vst [vmem:[%s2315_s26 + $0x58] sm:$0xff] %v1213_v23  ;;  %v865_v21 = vadd.f32 %v2304_v34, %v864_v17  ;;  %v2428_v36 = vadd.f32 1.0, %v2034_v26  ;;  %v1464_v42 = vand.u32 2147483647, %v2409_v13  ;;  %v1466_v43 = vand.u32 2147483648, %v2409_v13 }
 0x1b5   : > { %2039 = vpow2.f32 %v1867_v16  ;;  %v1448_v31 = vsel %vm1447_vm15, %v2026_v62, %v1444_v22  ;;  %v1218_v10 = vmul.f32 %v2030_v14, %v1217_v24  ;;  %v1239_v47 = vand.u32 2147483647, %v2420_v25 }
 0x1b6   : > { %2041 = vrcp.f32 %v2420_v25  ;;  %v2036_v32 = vpop.eup %2035  ;;  %v1453_v33 = vsel %vm1450_vm14, %v1452_v28, %v1448_v31  ;;  %v1852_v49 = vmul.f32 -1.442695, %v865_v21  ;;  %vm1460_vm4 = vweird.f32 %v2409_v13 }
 0x1b7   : > { %1542 = vst [vmem:[%s2315_s26 + $0xd8] sm:$0xff] %v1453_v33  ;;  %v1219_v35 = vadd.f32 %v2030_v14, %v1218_v10  ;;  %v2430_v37 = vadd.f32 1.0, %v2036_v32  ;;  %v2038_v39 = vpop.eup %2037  ;;  %2043 = vrcp.f32 %v2428_v36  ;;  %v1241_v54 = vand.u32 2147483648, %v2420_v25 }
 0x1b8   : > { %v904_v38 = vpop.f32.mrf.mxu3  ;;  %v1456_v46 = vmul.f32 %v2038_v39, %v2409_v13  ;;  %vm2442_vm5 = vcmp.eq.f32.partialorder %v1464_v42, 8.507059e+37  ;;  %v1467_v56 = vor.u32 1.1754944e-38, %v1466_v43  ;;  %vm1235_vm6 = vweird.f32 %v2420_v25 }
 0x1b9   : > { %v1223_v45 = vsel %vm1222_vm2, %v2030_v14, %v1219_v35  ;;  %v905_v50 = vadd.f32 %v2304_v34, %v904_v38  ;;  %2045 = vrcp.f32 %v2430_v37  ;;  %vm1461_vm7 = vweird.f32 %v2038_v39 }
 0x1ba   : > { %v1228_v48 = vsel %vm1225_vm3, %v1227_v41, %v1223_v45  ;;  %v1457_v53 = vsub.f32 1.0, %v1456_v46  ;;  %vm2448_vm8 = vcmp.eq.f32.partialorder %v1239_v47, 8.507059e+37  ;;  %2047 = vpow2.f32 %v1852_v49  ;;  %vm1462_vm10 = vmor %vm1460_vm4, %vm1461_vm7 }
 0x1bb   : > { %v867_v44 = vpop.f32.mrf.mxu2  ;;  %v2040_v27 = vpop.eup %2039  ;;  %1527 = vst [vmem:[%s2315_s26 + $0x60] sm:$0xff] %v1228_v48  ;;  %v1868_v63 = vmul.f32 -1.442695, %v905_v50  ;;  %v1242_v51 = vor.u32 1.1754944e-38, %v1241_v54  ;;  %vm1475_vm9 = vweird.f32 %v2428_v36  ;;  %v1479_v5 = vand.u32 2147483647, %v2428_v36 }
 0x1bc   : > { %v2042_v52 = vpop.eup %2041  ;;  %v1458_v59 = vmul.f32 %v2038_v39, %v1457_v53  ;;  %v2452_v61 = vadd.f32 1.0, %v2040_v27  ;;  %v868_v40 = vadd.f32 %v2304_v34, %v867_v44  ;;  %v1481_v9 = vand.u32 2147483648, %v2428_v36 }
 0x1bd   : > { %v1231_v58 = vmul.f32 %v2042_v52, %v2420_v25  ;;  %v2044_v0 = vpop.eup %2043  ;;  %vm1236_vm11 = vweird.f32 %v2042_v52  ;;  %vm1250_vm13 = vweird.f32 %v2430_v37  ;;  %v1254_v57 = vand.u32 2147483647, %v2430_v37 }
 0x1be   : > { %v1459_v1 = vadd.f32 %v2038_v39, %v1458_v59  ;;  %2049 = vrcp.f32 %v2452_v61  ;;  %v1471_v3 = vmul.f32 %v2044_v0, %v2428_v36  ;;  %v1853_v11 = vmul.f32 -1.442695, %v868_v40  ;;  %vm1237_vm12 = vmor %vm1235_vm6, %vm1236_vm11 }
 0x1bf   : > { %v1232_v62 = vsub.f32 1.0, %v1231_v58  ;;  %v2046_v7 = vpop.eup %2045  ;;  %2051 = vpow2.f32 %v1868_v63  ;;  %v1256_v16 = vand.u32 2147483648, %v2430_v37  ;;  %vm1476_vm14 = vweird.f32 %v2044_v0 }
 0x1c0   : > { %v1463_v8 = vsel %vm1462_vm10, %v2038_v39, %v1459_v1  ;;  %v1472_v13 = vsub.f32 1.0, %v1471_v3  ;;  %v1246_v15 = vmul.f32 %v2046_v7, %v2430_v37  ;;  %2053 = vpow2.f32 %v1853_v11  ;;  %v2048_v17 = vpop.eup %2047  ;;  %vm1477_vm1 = vmor %vm1475_vm9, %vm1476_vm14  ;;  %v2509_v37 = vld [vmem:[%s2553_s3] ss:$0 sm:$0xff] }
 0x1c1   : > { %v1233_v2 = vmul.f32 %v2042_v52, %v1232_v62  ;;  %v1468_v12 = vsel %vm2442_vm5, %v1467_v56, %v1463_v8  ;;  %vm2473_vm15 = vcmp.eq.f32.partialorder %v1479_v5, 8.507059e+37  ;;  %v2477_v24 = vadd.f32 1.0, %v2048_v17 }
 0x1c2   : > { %1543 = vst [vmem:[%s2315_s26 + $0xe0] sm:$0xff] %v1468_v12  ;;  %v1473_v18 = vmul.f32 %v2044_v0, %v1472_v13  ;;  %v1247_v19 = vsub.f32 1.0, %v1246_v15  ;;  %vm1251_vm0 = vweird.f32 %v2046_v7  ;;  %v1482_v31 = vor.u32 1.1754944e-38, %v1481_v9 }
 0x1c3   : > { %v869_v6 = vpop.f32.mrf.mxu2  ;;  %v1234_v14 = vadd.f32 %v2042_v52, %v1233_v2  ;;  %vm2484_vm2 = vcmp.eq.f32.partialorder %v1254_v57, 8.507059e+37  ;;  %v1257_v32 = vor.u32 1.1754944e-38, %v1256_v16  ;;  %2055 = vrcp.f32 %v2477_v24  ;;  %vm1252_vm3 = vmor %vm1250_vm13, %vm1251_vm0 }
 0x1c4   : > { %v2050_v20 = vpop.eup %2049  ;;  %v870_v25 = vadd.f32 %v2304_v34, %v869_v6  ;;  %v1474_v26 = vadd.f32 %v2044_v0, %v1473_v18  ;;  %v1248_v28 = vmul.f32 %v2046_v7, %v1247_v19  ;;  %v1494_v41 = vand.u32 2147483647, %v2452_v61 }
 0x1c5   : > { %v1238_v4 = vsel %vm1237_vm12, %v2042_v52, %v1234_v14  ;;  %v1486_v29 = vmul.f32 %v2050_v20, %v2452_v61  ;;  %v2052_v30 = vpop.eup %2051  ;;  %v1496_v42 = vand.u32 2147483648, %v2452_v61  ;;  %vm1491_vm4 = vweird.f32 %v2050_v20 }
 0x1c6   : > { %v1243_v23 = vsel %vm2448_vm8, %v1242_v51, %v1238_v4  ;;  %v1478_v34 = vsel %vm1477_vm1, %v2044_v0, %v1474_v26  ;;  %v1249_v33 = vadd.f32 %v2046_v7, %v1248_v28  ;;  %v2489_v35 = vadd.f32 1.0, %v2052_v30  ;;  %v2054_v39 = vpop.eup %2053 }
 0x1c7   : > { %1528 = vst [vmem:[%s2315_s26 + $0x68] sm:$0xff] %v1243_v23  ;;  %v1487_v21 = vsub.f32 1.0, %v1486_v29  ;;  %v1483_v36 = vsel %vm2473_vm15, %v1482_v31, %v1478_v34  ;;  %v1854_v43 = vmul.f32 -1.442695, %v870_v25  ;;  %v2502_v47 = vadd.f32 1.0, %v2054_v39 }
 0x1c8   : > { %1544 = vst [vmem:[%s2315_s26 + $0xe8] sm:$0xff] %v1483_v36  ;;  %v1253_v44 = vsel %vm1252_vm3, %v2046_v7, %v1249_v33  ;;  %2057 = vrcp.f32 %v2489_v35  ;;  %vm1490_vm5 = vweird.f32 %v2452_v61  ;;  %v1497_v50 = vor.u32 1.1754944e-38, %v1496_v42 }
 0x1c9   : > { %v1488_v45 = vmul.f32 %v2050_v20, %v1487_v21  ;;  %v1258_v46 = vsel %vm2484_vm2, %v1257_v32, %v1253_v44  ;;  %2059 = vpow2.f32 %v1854_v43  ;;  %v2056_v49 = vpop.eup %2055  ;;  %vm1492_vm6 = vmor %vm1490_vm5, %vm1491_vm4  ;;  %vm1495_vm7 = vcmp.eq.f32.partialorder %v1494_v41, 8.507059e+37 }
 0x1ca   : > { %1529 = vst [vmem:[%s2315_s26 + $0x70] sm:$0xff] %v1258_v46  ;;  %2061 = vrcp.f32 %v2502_v47  ;;  %v1261_v53 = vmul.f32 %v2056_v49, %v2477_v24  ;;  %v1269_v55 = vand.u32 2147483647, %v2477_v24  ;;  %v1271_v60 = vand.u32 2147483648, %v2477_v24 }
 0x1cb   : > { %v872_v38 = vpop.f32.mrf.mxu2  ;;  %v1489_v27 = vadd.f32 %v2050_v20, %v1488_v45  ;;  %vm1265_vm8 = vweird.f32 %v2477_v24  ;;  %vm1266_vm9 = vweird.f32 %v2056_v49  ;;  %v1511_v3 = vand.u32 2147483648, %v2489_v35 }
 0x1cc   : > { %v873_v48 = vadd.f32 %v2509_v37, %v872_v38  ;;  %v1262_v59 = vsub.f32 1.0, %v1261_v53  ;;  %vm2520_vm10 = vcmp.eq.f32.partialorder %v1269_v55, 8.507059e+37  ;;  %v1272_v7 = vor.u32 1.1754944e-38, %v1271_v60  ;;  %vm1267_vm11 = vmor %vm1265_vm8, %vm1266_vm9 }
 0x1cd   : > { %v1493_v52 = vsel %vm1492_vm6, %v2050_v20, %v1489_v27  ;;  %v1509_v12 = vand.u32 2147483647, %v2489_v35  ;;  %vm1505_vm13 = vweird.f32 %v2489_v35  ;;  %v1512_v17 = vor.u32 1.1754944e-38, %v1511_v3 }
 0x1ce   : > { %v1498_v54 = vsel %vm1495_vm7, %v1497_v50, %v1493_v52  ;;  %v1855_v56 = vmul.f32 -1.442695, %v873_v48  ;;  %v2058_v58 = vpop.eup %2057  ;;  %v1263_v40 = vmul.f32 %v2056_v49, %v1262_v59  ;;  %v1286_v4 = vand.u32 2147483648, %v2502_v47 }
 0x1cf   : > { %1545 = vst [vmem:[%s2315_s26 + $0xf0] sm:$0xff] %v1498_v54  ;;  %v1501_v62 = vmul.f32 %v2058_v58, %v2489_v35  ;;  %v2060_v63 = vpop.eup %2059  ;;  %vm1506_vm12 = vweird.f32 %v2058_v58  ;;  %v1284_v19 = vand.u32 2147483647, %v2502_v47  ;;  %vm1510_vm0 = vcmp.eq.f32.partialorder %v1509_v12, 8.507059e+37 }
 0x1d0   : > { %2063 = vpow2.f32 %v1855_v56  ;;  %v2062_v1 = vpop.eup %2061  ;;  %v1020_v5 = vadd.f32 1.0, %v2060_v63  ;;  %v1264_v6 = vadd.f32 %v2056_v49, %v1263_v40  ;;  %vm1507_vm14 = vmor %vm1505_vm13, %vm1506_vm12  ;;  %vm1280_vm1 = vweird.f32 %v2502_v47 }
 0x1d1   : > { %v1502_v2 = vsub.f32 1.0, %v1501_v62  ;;  %v1276_v8 = vmul.f32 %v2062_v1, %v2502_v47  ;;  %vm1281_vm15 = vweird.f32 %v2062_v1  ;;  %v1287_v29 = vor.u32 1.1754944e-38, %v1286_v4 }
 0x1d2   : > { %2065 = vrcp.f32 %v1020_v5  ;;  %v1268_v14 = vsel %vm1267_vm11, %v2056_v49, %v1264_v6  ;;  %vm1282_vm2 = vmor %vm1280_vm1, %vm1281_vm15  ;;  %vm1285_vm3 = vcmp.eq.f32.partialorder %v1284_v19, 8.507059e+37  ;;  %v1299_v35 = vand.u32 2147483647, %v1020_v5 }
 0x1d3   : > { %v874_v61 = vpop.f32.mrf.mxu2  ;;  %v1503_v11 = vmul.f32 %v2058_v58, %v1502_v2  ;;  %v1277_v13 = vsub.f32 1.0, %v1276_v8  ;;  %v1273_v57 = vsel %vm2520_vm10, %v1272_v7, %v1268_v14  ;;  %v1301_v38 = vand.u32 2147483648, %v1020_v5 }
 0x1d4   : > { %v875_v0 = vadd.f32 %v2509_v37, %v874_v61  ;;  %1530 = vst [vmem:[%s2315_s26 + $0x78] sm:$0xff] %v1273_v57  ;;  %vm1295_vm5 = vweird.f32 %v1020_v5  ;;  %vm1300_vm7 = vcmp.eq.f32.partialorder %v1299_v35, 8.507059e+37 }
 0x1d5   : > { %v1504_v16 = vadd.f32 %v2058_v58, %v1503_v11  ;;  %v1278_v18 = vmul.f32 %v2062_v1, %v1277_v13  ;;  %v1302_v45 = vor.u32 1.1754944e-38, %v1301_v38 }
 0x1d6   : > { %v1856_v9 = vmul.f32 -1.442695, %v875_v0  ;;  %v2064_v15 = vpop.eup %2063 }
 0x1d7   : > { %v1021_v20 = vadd.f32 1.0, %v2064_v15  ;;  %v1508_v22 = vsel %vm1507_vm14, %v2058_v58, %v1504_v16  ;;  %v1279_v26 = vadd.f32 %v2062_v1, %v1278_v18 }
 0x1d8   : > { %2067 = vpow2.f32 %v1856_v9  ;;  %v1513_v25 = vsel %vm1510_vm0, %v1512_v17, %v1508_v22  ;;  %v2066_v28 = vpop.eup %2065 }
 0x1d9   : > { %2069 = vrcp.f32 %v1021_v20  ;;  %1546 = vst [vmem:[%s2315_s26 + $0xf8] sm:$0xff] %v1513_v25  ;;  %v1283_v10 = vsel %vm1282_vm2, %v2062_v1, %v1279_v26  ;;  %v1291_v32 = vmul.f32 %v2066_v28, %v1020_v5  ;;  %vm1296_vm4 = vweird.f32 %v2066_v28 }
 0x1da   : > { %v1288_v34 = vsel %vm1285_vm3, %v1287_v29, %v1283_v10  ;;  %vm1297_vm6 = vmor %vm1295_vm5, %vm1296_vm4  ;;  %v1314_v48 = vand.u32 2147483647, %v1021_v20  ;;  %v1316_v49 = vand.u32 2147483648, %v1021_v20  ;;  %vm1310_vm9 = vweird.f32 %v1021_v20 }
 0x1db   : > { %v877_v23 = vpop.f32.mrf.mxu2  ;;  %1531 = vst [vmem:[%s2315_s26 + $0x80] sm:$0xff] %v1288_v34  ;;  %v1292_v21 = vsub.f32 1.0, %v1291_v32 }
 0x1dc   : > { %v878_v24 = vadd.f32 %v2509_v37, %v877_v23  ;;  %v1317_v59 = vor.u32 1.1754944e-38, %v1316_v49  ;;  %vm1315_vm11 = vcmp.eq.f32.partialorder %v1314_v48, 8.507059e+37 }
 0x1dd   : > { %v1293_v36 = vmul.f32 %v2066_v28, %v1292_v21 }
 0x1de   : > { %v1857_v30 = vmul.f32 -1.442695, %v878_v24  ;;  %v2068_v31 = vpop.eup %2067 }
 0x1df   : > { %v1022_v33 = vadd.f32 1.0, %v2068_v31  ;;  %v2070_v39 = vpop.eup %2069  ;;  %v1294_v43 = vadd.f32 %v2066_v28, %v1293_v36 }
 0x1e0   : > { %2071 = vpow2.f32 %v1857_v30  ;;  %v1306_v42 = vmul.f32 %v2070_v39, %v1021_v20  ;;  %vm1311_vm8 = vweird.f32 %v2070_v39 }
 0x1e1   : > { %2073 = vrcp.f32 %v1022_v33  ;;  %v1298_v27 = vsel %vm1297_vm6, %v2066_v28, %v1294_v43  ;;  %vm1312_vm10 = vmor %vm1310_vm9, %vm1311_vm8  ;;  %v1331_v63 = vand.u32 2147483648, %v1022_v33  ;;  %v1329_v51 = vand.u32 2147483647, %v1022_v33 }
 0x1e2   : > { %v1307_v46 = vsub.f32 1.0, %v1306_v42  ;;  %v1303_v53 = vsel %vm1300_vm7, %v1302_v45, %v1298_v27  ;;  %vm1325_vm13 = vweird.f32 %v1022_v33 }
 0x1e3   : > { %v879_v41 = vpop.f32.mrf.mxu2  ;;  %1532 = vst [vmem:[%s2315_s26 + $0x88] sm:$0xff] %v1303_v53  ;;  %v1332_v7 = vor.u32 1.1754944e-38, %v1331_v63  ;;  %vm1330_vm15 = vcmp.eq.f32.partialorder %v1329_v51, 8.507059e+37 }
 0x1e4   : > { %v880_v44 = vadd.f32 %v2509_v37, %v879_v41  ;;  %v1308_v54 = vmul.f32 %v2070_v39, %v1307_v46 }
 0x1e6   : > { %v2072_v47 = vpop.eup %2071  ;;  %v1858_v50 = vmul.f32 -1.442695, %v880_v44  ;;  %v1309_v58 = vadd.f32 %v2070_v39, %v1308_v54 }
 0x1e7   : > { %v2074_v52 = vpop.eup %2073  ;;  %v1023_v55 = vadd.f32 1.0, %v2072_v47 }
 0x1e8   : > { %v1321_v56 = vmul.f32 %v2074_v52, %v1022_v33  ;;  %2075 = vpow2.f32 %v1858_v50  ;;  %v1313_v62 = vsel %vm1312_vm10, %v2070_v39, %v1309_v58  ;;  %vm1326_vm12 = vweird.f32 %v2074_v52 }
 0x1e9   : > { %2077 = vrcp.f32 %v1023_v55  ;;  %v1318_v0 = vsel %vm1315_vm11, %v1317_v59, %v1313_v62  ;;  %vm1327_vm14 = vmor %vm1325_vm13, %vm1326_vm12  ;;  %v1346_v15 = vand.u32 2147483648, %v1023_v55  ;;  %v1344_v17 = vand.u32 2147483647, %v1023_v55 }
 0x1ea   : > { %v1322_v60 = vsub.f32 1.0, %v1321_v56  ;;  %1533 = vst [vmem:[%s2315_s26 + $0x90] sm:$0xff] %v1318_v0  ;;  %vm1340_vm1 = vweird.f32 %v1023_v55 }
 0x1eb   : > { %v882_v61 = vpop.f32.mrf.mxu2  ;;  %v1347_v22 = vor.u32 1.1754944e-38, %v1346_v15  ;;  %vm1345_vm3 = vcmp.eq.f32.partialorder %v1344_v17, 8.507059e+37 }
 0x1ec   : > { %v883_v40 = vadd.f32 %v2509_v37, %v882_v61  ;;  %v1323_v1 = vmul.f32 %v2074_v52, %v1322_v60 }
 0x1ee   : > { %v1859_v2 = vmul.f32 -1.442695, %v883_v40  ;;  %v2076_v3 = vpop.eup %2075  ;;  %v1324_v5 = vadd.f32 %v2074_v52, %v1323_v1 }
 0x1ef   : > { %v2078_v6 = vpop.eup %2077  ;;  %v1024_v8 = vadd.f32 1.0, %v2076_v3 }
 0x1f0   : > { %2079 = vpow2.f32 %v1859_v2  ;;  %v1328_v9 = vsel %vm1327_vm14, %v2074_v52, %v1324_v5  ;;  %v1336_v11 = vmul.f32 %v2078_v6, %v1023_v55  ;;  %vm1341_vm0 = vweird.f32 %v2078_v6 }
 0x1f1   : > { %v1333_v12 = vsel %vm1330_vm15, %v1332_v7, %v1328_v9  ;;  %2081 = vrcp.f32 %v1024_v8  ;;  %vm1342_vm2 = vmor %vm1340_vm1, %vm1341_vm0  ;;  %v1361_v28 = vand.u32 2147483648, %v1024_v8  ;;  %v1359_v30 = vand.u32 2147483647, %v1024_v8 }
 0x1f2   : > { %1534 = vst [vmem:[%s2315_s26 + $0x98] sm:$0xff] %v1333_v12  ;;  %v1337_v14 = vsub.f32 1.0, %v1336_v11  ;;  %vm1355_vm5 = vweird.f32 %v1024_v8 }
 0x1f3   : > { %v884_v13 = vpop.f32.mrf.mxu2  ;;  %v1362_v33 = vor.u32 1.1754944e-38, %v1361_v28  ;;  %vm1360_vm7 = vcmp.eq.f32.partialorder %v1359_v30, 8.507059e+37 }
 0x1f4   : > { %v885_v57 = vadd.f32 %v2509_v37, %v884_v13  ;;  %v1338_v16 = vmul.f32 %v2078_v6, %v1337_v14 }
 0x1f6   : > { %v2080_v4 = vpop.eup %2079  ;;  %v1860_v18 = vmul.f32 -1.442695, %v885_v57  ;;  %v1339_v19 = vadd.f32 %v2078_v6, %v1338_v16 }
 0x1f7   : > { %v1025_v20 = vadd.f32 1.0, %v2080_v4  ;;  %v2082_v23 = vpop.eup %2081 }
 0x1f8   : > { %2083 = vpow2.f32 %v1860_v18  ;;  %v1343_v24 = vsel %vm1342_vm2, %v2078_v6, %v1339_v19  ;;  %v1351_v25 = vmul.f32 %v2082_v23, %v1024_v8  ;;  %vm1356_vm4 = vweird.f32 %v2082_v23 }
 0x1f9   : > { %2085 = vrcp.f32 %v1025_v20  ;;  %v1348_v26 = vsel %vm1345_vm3, %v1347_v22, %v1343_v24  ;;  %vm1357_vm6 = vmor %vm1355_vm5, %vm1356_vm4  ;;  %v1376_v36 = vand.u32 2147483648, %v1025_v20  ;;  %v1374_v42 = vand.u32 2147483647, %v1025_v20 }
 0x1fa   : > { %1535 = vst [vmem:[%s2315_s26 + $0xa0] sm:$0xff] %v1348_v26  ;;  %v1352_v37 = vsub.f32 1.0, %v1351_v25  ;;  %vm1370_vm9 = vweird.f32 %v1025_v20 }
 0x1fb   : > { %v1377_v45 = vor.u32 1.1754944e-38, %v1376_v36  ;;  %vm1375_vm11 = vcmp.eq.f32.partialorder %v1374_v42, 8.507059e+37 }
 0x1fc   : > { %v1353_v29 = vmul.f32 %v2082_v23, %v1352_v37 }
 0x1fe   : > { %v2084_v31 = vpop.eup %2083  ;;  %v1354_v32 = vadd.f32 %v2082_v23, %v1353_v29 }
 0x1ff   : > { %v2086_v10 = vpop.eup %2085  ;;  %v1026_v34 = vadd.f32 1.0, %v2084_v31 }
 0x200   : > { %v1366_v21 = vmul.f32 %v2086_v10, %v1025_v20  ;;  %v1358_v35 = vsel %vm1357_vm6, %v2082_v23, %v1354_v32  ;;  %vm1371_vm8 = vweird.f32 %v2086_v10 }
 0x201   : > { %2087 = vrcp.f32 %v1026_v34  ;;  %v1363_v38 = vsel %vm1360_vm7, %v1362_v33, %v1358_v35  ;;  %vm1372_vm10 = vmor %vm1370_vm9, %vm1371_vm8  ;;  %v1391_v49 = vand.u32 2147483648, %v1026_v34  ;;  %v1389_v52 = vand.u32 2147483647, %v1026_v34 }
 0x202   : > { %v1367_v39 = vsub.f32 1.0, %v1366_v21  ;;  %1536 = vst [vmem:[%s2315_s26 + $0xa8] sm:$0xff] %v1363_v38  ;;  %vm1385_vm13 = vweird.f32 %v1026_v34 }
 0x203   : > { %v1392_v54 = vor.u32 1.1754944e-38, %v1391_v49  ;;  %vm1390_vm15 = vcmp.eq.f32.partialorder %v1389_v52, 8.507059e+37 }
 0x204   : > { %v1368_v41 = vmul.f32 %v2086_v10, %v1367_v39 }
 0x206   : > { %v1369_v43 = vadd.f32 %v2086_v10, %v1368_v41 }
 0x207   : > { %v2088_v44 = vpop.eup %2087 }
 0x208   : > { %v1373_v46 = vsel %vm1372_vm10, %v2086_v10, %v1369_v43  ;;  %v1381_v47 = vmul.f32 %v2088_v44, %v1026_v34  ;;  %vm1386_vm12 = vweird.f32 %v2088_v44 }
 0x209   : > { %v1378_v27 = vsel %vm1375_vm11, %v1377_v45, %v1373_v46  ;;  %vm1387_vm14 = vmor %vm1385_vm13, %vm1386_vm12 }
 0x20a   : > { %1537 = vst [vmem:[%s2315_s26 + $0xb0] sm:$0xff] %v1378_v27  ;;  %v1382_v48 = vsub.f32 1.0, %v1381_v47 }
 0x20c   : > { %v1383_v50 = vmul.f32 %v2088_v44, %v1382_v48 }
 0x20e   : > { %v1384_v53 = vadd.f32 %v2088_v44, %v1383_v50 }
 0x210   : > { %v1388_v55 = vsel %vm1387_vm14, %v2088_v44, %v1384_v53 }
 0x211   : > { %v1393_v56 = vsel %vm1390_vm15, %v1392_v54, %v1388_v55 }
 0x212   : > { %1538 = vst [vmem:[%s2315_s26 + $0xb8] sm:$0xff] %v1393_v56 }
 0x213 PF: > { %s14_s15 = sadd.s32 1, %s2096_s15  }
 0x214   : > { %p11_p4 = scmp.ge.s32.totalorder %s14_s15, 18  }
 0x216   :  { %13 = sbr.rel (!%p11_p4) target bundleno = 1 (0x1), region = 66 }

</bundles_post_ra>
